<compile_context>
chip_gen: v5e
topology: v5e:2x2
jax: 0.10.0
libtpu: 0.0.40
codegen_flags: <defaults>
</compile_context>

<pallas_src>
import jax
import jax.numpy as jnp
from jax import lax
from jax.experimental import pallas as pl
from jax.experimental.pallas import tpu as pltpu

C1_OUT = 40      # shallownet channels
EMB = 40         # emb_size
KH = 22          # conv2 kernel height (== input H)
KW = 25          # conv1 kernel width
K = KH * KW      # fused conv taps = 550
POOL_W = 75      # AvgPool2d window (width)
POOL_S = 15      # AvgPool2d stride (width)
BN_EPS = 1e-5

_VMEM_BUDGET = 20 * 1024 * 1024   # per-step working-set target (fits all gens)
_VMEM_LIMIT = 32 * 1024 * 1024    # explicit scoped-VMEM limit (<= v7x physical)


def _elu(y):
    # ELU(alpha=1); clamp the exp argument so the unselected branch stays finite.
    return jnp.where(y > 0, y, jnp.exp(jnp.minimum(y, 0.0)) - 1.0)


def _make_kernel(BB, W1):
    def kernel(x_ref, w_ref, b_ref, wpool_ref, wproj_ref, bproj_ref,
               out_ref, pt_ref):
        # In-kernel im2col into the transposed patch layout:
        #   pt[b, k*22 + h, w1] = x[b, h, w1 + k]
        # 25 static shifted slices of the raw signal block; replaces the 25x
        # HBM read amplification of a host-side im2col.
        for k in range(KW):
            pt_ref[:, k * KH:(k + 1) * KH, :] = x_ref[:, :, k:k + W1]

        # Fused conv1 o conv2 (+BatchNorm) as a batched bf16 MXU matmul with the
        # long W1 axis on lanes / MXU-N (full column & lane utilization).
        w_b = jnp.broadcast_to(w_ref[...][None], (BB, C1_OUT, K))
        y = jnp.einsum('bck,bkw->bcw', w_b, pt_ref[...],
                       preferred_element_type=jnp.float32)        # (BB, 40, W1) f32
        y = _elu(y + b_ref[...])

        # AvgPool2d((1,75),(1,15)) + Dropout(identity, eval) + AdaptiveAvgPool2d(1)
        # == per-position weighted sum over W1: VPU mul + lane reduce.
        pooled = jnp.sum(y * wpool_ref[...], axis=2)              # (BB, 40) f32

        # 1x1 projection conv + bias.
        out_ref[...] = jnp.dot(pooled, wproj_ref[...],
                               preferred_element_type=jnp.float32) + bproj_ref[...]
    return kernel


def patch_embedding_forward(x, params):
    """x: (B, 1, 22, W) float32 NCHW (PyTorch convention). Returns (B, EMB)."""
    B, C, H, W = x.shape
    assert C == 1 and H == KH, "module hard-codes 1 input channel and H == 22"
    W1 = W - KW + 1
    assert W1 >= POOL_W, "width too small for AvgPool2d((1,75))"
    T = (W1 - POOL_W) // POOL_S + 1

    B_pad = -(-B // 8) * 8

    # ---- per-generation-safe batch-block sizing (review items #4 / #6) -------
    def vmem_bytes(bb):
        w_r = -(-W // 128) * 128
        w1_r = -(-W1 // 128) * 128
        x_blk = 2 * bb * 32 * w_r * 2          # double-buffered raw input (bf16)
        pt = bb * 560 * w1_r * 2               # patch scratch (bf16)
        w_bc = bb * 48 * 640 * 2               # broadcast fused weight (bf16)
        y32 = 2 * bb * C1_OUT * w1_r * 4       # y and y*w_pool temporaries (f32)
        return x_blk + pt + w_bc + y32 + (1 << 20)

    cands = [bb for bb in (32, 16, 8)
             if B_pad % bb == 0 and vmem_bytes(bb) <= _VMEM_BUDGET]
    if not cands:
        cands = [8]            # TODO(synk): chunk W1 (2nd grid axis) if this overflows
    multi = [bb for bb in cands if B_pad // bb >= 2]
    BB = max(multi) if multi else max(cands)   # prefer >=2 steps (v7x has 2 TCs)
    n_steps = B_pad // BB

    # ---------------- glue: raw signal + fused weights (plain JAX) ------------
    xs = x[:, 0].astype(jnp.bfloat16)                           # (B, 22, W) bf16
    xs = jnp.pad(xs, ((0, B_pad - B), (0, 0), (0, 0)))          # (B_pad, 22, W)

    # Fuse the two convs into one (40, 550) weight (tap index k*22+h); fold BN.
    w2s = params['w2'][:, :, :, 0]                              # (o, i, h)
    w1s = params['w1'][:, 0, 0, :]                              # (i, k)
    w_t = jnp.einsum('oih,ik->okh', w2s, w1s).reshape(C1_OUT, K)
    b_eff = jnp.einsum('oih,i->o', w2s, params['b1']) + params['b2']
    bn_scale = params['gamma'] / jnp.sqrt(params['var'] + BN_EPS)
    bn_shift = params['beta'] - params['mean'] * bn_scale
    w_t = (w_t * bn_scale[:, None]).astype(jnp.bfloat16)        # (40, 550) bf16
    b_eff = (b_eff * bn_scale + bn_shift)[None, :, None]        # (1, 40, 1) f32
    b_eff = b_eff.astype(jnp.float32)

    # AvgPool((1,75),(1,15)) + global mean over its T outputs == weighted sum
    # over conv positions: weight[w1] = (#pool windows covering w1) / (T*75).
    r = jnp.arange(W1)
    t = jnp.arange(T)
    cover = ((r[None, :] >= t[:, None] * POOL_S) &
             (r[None, :] < t[:, None] * POOL_S + POOL_W))
    w_pool = (jnp.sum(cover, axis=0).astype(jnp.float32)
              / (T * POOL_W))[None, None, :]                    # (1, 1, W1) f32

    w_proj = params['wp'][:, :, 0, 0].T.astype(jnp.float32)     # (40, EMB)
    b_proj = params['bp'][None, :].astype(jnp.float32)          # (1, EMB)

    # ---------------------------- Pallas hot path -----------------------------
    flops = (2 * B_pad * W1 * K * C1_OUT          # fused conv matmul
             + 3 * B_pad * C1_OUT * W1            # bias/ELU-ish + pooling mul/add
             + 2 * B_pad * C1_OUT * EMB)          # 1x1 projection matmul
    cost = pl.CostEstimate(
        flops=int(flops),
        transcendentals=int(B_pad * C1_OUT * W1),
        bytes_accessed=int(xs.size * 2 + B_pad * EMB * 4
                           + K * C1_OUT * 2
                           + (C1_OUT * EMB + 3 * C1_OUT + W1) * 4))

    out = pl.pallas_call(
        _make_kernel(BB, W1),
        out_shape=jax.ShapeDtypeStruct((B_pad, EMB), jnp.float32),
        grid_spec=pltpu.PrefetchScalarGridSpec(
            num_scalar_prefetch=0,
            grid=(n_steps,),
            in_specs=[
                pl.BlockSpec((BB, KH, W), lambda b: (b, 0, 0)),     # raw signal (bf16)
                pl.BlockSpec((C1_OUT, K), lambda b: (0, 0)),        # fused conv+BN W^T
                pl.BlockSpec((1, C1_OUT, 1), lambda b: (0, 0, 0)),  # fused conv+BN b
                pl.BlockSpec((1, 1, W1), lambda b: (0, 0, 0)),      # pooling weights
                pl.BlockSpec((C1_OUT, EMB), lambda b: (0, 0)),      # 1x1 conv W
                pl.BlockSpec((1, EMB), lambda b: (0, 0)),           # 1x1 conv b
            ],
            out_specs=pl.BlockSpec((BB, EMB), lambda b: (b, 0)),
            scratch_shapes=[pltpu.VMEM((BB, K, W1), jnp.bfloat16)], # patch tile
        ),
        compiler_params=pltpu.CompilerParams(
            dimension_semantics=("parallel",),
            vmem_limit_bytes=_VMEM_LIMIT),
        cost_estimate=cost,
    )(xs, w_t, b_eff, w_pool, w_proj, b_proj)
    return out[:B]


def reference_forward(x, p):
    """Pure-JAX (lax.conv) reference of the PyTorch forward, eval mode."""
    dn = ('NCHW', 'OIHW', 'NCHW')
    y = lax.conv_general_dilated(x, p['w1'], (1, 1), 'VALID',
                                 dimension_numbers=dn) + p['b1'][None, :, None, None]
    y = lax.conv_general_dilated(y, p['w2'], (1, 1), 'VALID',
                                 dimension_numbers=dn) + p['b2'][None, :, None, None]
    scale = p['gamma'] / jnp.sqrt(p['var'] + BN_EPS)
    shift = p['beta'] - p['mean'] * scale
    y = y * scale[None, :, None, None] + shift[None, :, None, None]
    y = _elu(y)
    y = lax.reduce_window(y, 0.0, lax.add,
                          (1, 1, 1, POOL_W), (1, 1, 1, POOL_S), 'VALID') / POOL_W
    y = lax.conv_general_dilated(y, p['wp'], (1, 1), 'VALID',
                                 dimension_numbers=dn) + p['bp'][None, :, None, None]
    return jnp.mean(y, axis=(2, 3))                             # (B, EMB)


if __name__ == "__main__":
    key = jax.random.PRNGKey(0)
    kx, *ks = jax.random.split(key, 11)

    # Small but consistent shapes: the module requires C=1, H=22, W >= 99.
    B, W = 2, 114
    x = jax.random.normal(kx, (B, 1, KH, W), jnp.float32)

    params = dict(
        w1=0.05 * jax.random.normal(ks[0], (C1_OUT, 1, 1, KW), jnp.float32),
        b1=0.05 * jax.random.normal(ks[1], (C1_OUT,), jnp.float32),
        w2=0.05 * jax.random.normal(ks[2], (C1_OUT, C1_OUT, KH, 1), jnp.float32),
        b2=0.05 * jax.random.normal(ks[3], (C1_OUT,), jnp.float32),
        gamma=1.0 + 0.1 * jax.random.normal(ks[4], (C1_OUT,), jnp.float32),
        beta=0.1 * jax.random.normal(ks[5], (C1_OUT,), jnp.float32),
        mean=0.1 * jax.random.normal(ks[6], (C1_OUT,), jnp.float32),
        var=jax.random.uniform(ks[7], (C1_OUT,), jnp.float32, 0.5, 1.5),
        wp=0.1 * jax.random.normal(ks[8], (EMB, C1_OUT, 1, 1), jnp.float32),
        bp=0.1 * jax.random.normal(ks[9], (EMB,), jnp.float32),
    )

    out = patch_embedding_forward(x, params)
    out = jax.block_until_ready(out)
    assert out.shape == (B, EMB), out.shape

    ref = jax.block_until_ready(reference_forward(x, params))
    # Signal/weights are fed to the MXU in bf16 (f32 accumulate), so allow a
    # bf16-level tolerance against the all-f32 reference.
    assert jnp.allclose(out, ref, rtol=5e-3, atol=5e-3), (
        float(jnp.max(jnp.abs(out - ref))))

    print("KERNEL_OK")
</pallas_src>

<mosaic_0001>
module attributes {stable_mosaic.version = 11 : i64} {
  func.func @kernel(%arg0: i32, %arg1: memref<8x22x114xbf16, #tpu.memory_space<vmem>>, %arg2: memref<40x550xbf16, #tpu.memory_space<vmem>>, %arg3: memref<1x40x1xf32, #tpu.memory_space<vmem>>, %arg4: memref<1x1x90xf32, #tpu.memory_space<vmem>>, %arg5: memref<40x40xf32, #tpu.memory_space<vmem>>, %arg6: memref<1x40xf32, #tpu.memory_space<vmem>>, %arg7: memref<8x40xf32, #tpu.memory_space<vmem>>, %arg8: memref<8x550x90xbf16, #tpu.memory_space<vmem>>) attributes {dimension_semantics = [#tpu.dimension_semantics<parallel>], iteration_bounds = array<i64: 1>, scalar_prefetch = 0 : i64, scratch_operands = 1 : i64, tpu.core_type = #tpu.core_type<tc>, window_params = [{transform_indices = @transform_0, window_bounds = array<i64: 8, 22, 114>}, {pipeline_mode = #tpu.pipeline_mode<synchronous>, transform_indices = @transform_1, window_bounds = array<i64: 40, 550>}, {pipeline_mode = #tpu.pipeline_mode<synchronous>, transform_indices = @transform_2, window_bounds = array<i64: 1, 40, 1>}, {pipeline_mode = #tpu.pipeline_mode<synchronous>, transform_indices = @transform_3, window_bounds = array<i64: 1, 1, 90>}, {pipeline_mode = #tpu.pipeline_mode<synchronous>, transform_indices = @transform_4, window_bounds = array<i64: 40, 40>}, {pipeline_mode = #tpu.pipeline_mode<synchronous>, transform_indices = @transform_5, window_bounds = array<i64: 1, 40>}, {transform_indices = @transform_6, window_bounds = array<i64: 8, 40>}]} {
    %c0 = arith.constant 0 : index
    %c0_0 = arith.constant 0 : index
    %c0_1 = arith.constant 0 : index
    %0 = vector.load %arg1[%c0, %c0_0, %c0_1] : memref<8x22x114xbf16, #tpu.memory_space<vmem>>, vector<8x22x90xbf16>
    %c0_2 = arith.constant 0 : index
    %c0_3 = arith.constant 0 : index
    %c0_4 = arith.constant 0 : index
    %1 = vector.load %arg8[%c0_2, %c0_3, %c0_4] : memref<8x550x90xbf16, #tpu.memory_space<vmem>>, vector<8x22x90xbf16>
    tpu.vector_store %arg8[%c0_2, %c0_3, %c0_4], %0 {strides = array<i32>} : memref<8x550x90xbf16, #tpu.memory_space<vmem>>, vector<8x22x90xbf16>,
    %c0_5 = arith.constant 0 : index
    %c0_6 = arith.constant 0 : index
    %c1 = arith.constant 1 : index
    %2 = vector.load %arg1[%c0_5, %c0_6, %c1] : memref<8x22x114xbf16, #tpu.memory_space<vmem>>, vector<8x22x90xbf16>
    %c0_7 = arith.constant 0 : index
    %c22 = arith.constant 22 : index
    %c0_8 = arith.constant 0 : index
    %3 = vector.load %arg8[%c0_7, %c22, %c0_8] : memref<8x550x90xbf16, #tpu.memory_space<vmem>>, vector<8x22x90xbf16>
    tpu.vector_store %arg8[%c0_7, %c22, %c0_8], %2 {strides = array<i32>} : memref<8x550x90xbf16, #tpu.memory_space<vmem>>, vector<8x22x90xbf16>,
    %c0_9 = arith.constant 0 : index
    %c0_10 = arith.constant 0 : index
    %c2 = arith.constant 2 : index
    %4 = vector.load %arg1[%c0_9, %c0_10, %c2] : memref<8x22x114xbf16, #tpu.memory_space<vmem>>, vector<8x22x90xbf16>
    %c0_11 = arith.constant 0 : index
    %c44 = arith.constant 44 : index
    %c0_12 = arith.constant 0 : index
    %5 = vector.load %arg8[%c0_11, %c44, %c0_12] : memref<8x550x90xbf16, #tpu.memory_space<vmem>>, vector<8x22x90xbf16>
    tpu.vector_store %arg8[%c0_11, %c44, %c0_12], %4 {strides = array<i32>} : memref<8x550x90xbf16, #tpu.memory_space<vmem>>, vector<8x22x90xbf16>,
    %c0_13 = arith.constant 0 : index
    %c0_14 = arith.constant 0 : index
    %c3 = arith.constant 3 : index
    %6 = vector.load %arg1[%c0_13, %c0_14, %c3] : memref<8x22x114xbf16, #tpu.memory_space<vmem>>, vector<8x22x90xbf16>
    %c0_15 = arith.constant 0 : index
    %c66 = arith.constant 66 : index
    %c0_16 = arith.constant 0 : index
    %7 = vector.load %arg8[%c0_15, %c66, %c0_16] : memref<8x550x90xbf16, #tpu.memory_space<vmem>>, vector<8x22x90xbf16>
    tpu.vector_store %arg8[%c0_15, %c66, %c0_16], %6 {strides = array<i32>} : memref<8x550x90xbf16, #tpu.memory_space<vmem>>, vector<8x22x90xbf16>,
    %c0_17 = arith.constant 0 : index
    %c0_18 = arith.constant 0 : index
    %c4 = arith.constant 4 : index
    %8 = vector.load %arg1[%c0_17, %c0_18, %c4] : memref<8x22x114xbf16, #tpu.memory_space<vmem>>, vector<8x22x90xbf16>
    %c0_19 = arith.constant 0 : index
    %c88 = arith.constant 88 : index
    %c0_20 = arith.constant 0 : index
    %9 = vector.load %arg8[%c0_19, %c88, %c0_20] : memref<8x550x90xbf16, #tpu.memory_space<vmem>>, vector<8x22x90xbf16>
    tpu.vector_store %arg8[%c0_19, %c88, %c0_20], %8 {strides = array<i32>} : memref<8x550x90xbf16, #tpu.memory_space<vmem>>, vector<8x22x90xbf16>,
    %c0_21 = arith.constant 0 : index
    %c0_22 = arith.constant 0 : index
    %c5 = arith.constant 5 : index
    %10 = vector.load %arg1[%c0_21, %c0_22, %c5] : memref<8x22x114xbf16, #tpu.memory_space<vmem>>, vector<8x22x90xbf16>
    %c0_23 = arith.constant 0 : index
    %c110 = arith.constant 110 : index
    %c0_24 = arith.constant 0 : index
    %11 = vector.load %arg8[%c0_23, %c110, %c0_24] : memref<8x550x90xbf16, #tpu.memory_space<vmem>>, vector<8x22x90xbf16>
    tpu.vector_store %arg8[%c0_23, %c110, %c0_24], %10 {strides = array<i32>} : memref<8x550x90xbf16, #tpu.memory_space<vmem>>, vector<8x22x90xbf16>,
    %c0_25 = arith.constant 0 : index
    %c0_26 = arith.constant 0 : index
    %c6 = arith.constant 6 : index
    %12 = vector.load %arg1[%c0_25, %c0_26, %c6] : memref<8x22x114xbf16, #tpu.memory_space<vmem>>, vector<8x22x90xbf16>
    %c0_27 = arith.constant 0 : index
    %c132 = arith.constant 132 : index
    %c0_28 = arith.constant 0 : index
    %13 = vector.load %arg8[%c0_27, %c132, %c0_28] : memref<8x550x90xbf16, #tpu.memory_space<vmem>>, vector<8x22x90xbf16>
    tpu.vector_store %arg8[%c0_27, %c132, %c0_28], %12 {strides = array<i32>} : memref<8x550x90xbf16, #tpu.memory_space<vmem>>, vector<8x22x90xbf16>,
    %c0_29 = arith.constant 0 : index
    %c0_30 = arith.constant 0 : index
    %c7 = arith.constant 7 : index
    %14 = vector.load %arg1[%c0_29, %c0_30, %c7] : memref<8x22x114xbf16, #tpu.memory_space<vmem>>, vector<8x22x90xbf16>
    %c0_31 = arith.constant 0 : index
    %c154 = arith.constant 154 : index
    %c0_32 = arith.constant 0 : index
    %15 = vector.load %arg8[%c0_31, %c154, %c0_32] : memref<8x550x90xbf16, #tpu.memory_space<vmem>>, vector<8x22x90xbf16>
    tpu.vector_store %arg8[%c0_31, %c154, %c0_32], %14 {strides = array<i32>} : memref<8x550x90xbf16, #tpu.memory_space<vmem>>, vector<8x22x90xbf16>,
    %c0_33 = arith.constant 0 : index
    %c0_34 = arith.constant 0 : index
    %c8 = arith.constant 8 : index
    %16 = vector.load %arg1[%c0_33, %c0_34, %c8] : memref<8x22x114xbf16, #tpu.memory_space<vmem>>, vector<8x22x90xbf16>
    %c0_35 = arith.constant 0 : index
    %c176 = arith.constant 176 : index
    %c0_36 = arith.constant 0 : index
    %17 = vector.load %arg8[%c0_35, %c176, %c0_36] : memref<8x550x90xbf16, #tpu.memory_space<vmem>>, vector<8x22x90xbf16>
    tpu.vector_store %arg8[%c0_35, %c176, %c0_36], %16 {strides = array<i32>} : memref<8x550x90xbf16, #tpu.memory_space<vmem>>, vector<8x22x90xbf16>,
    %c0_37 = arith.constant 0 : index
    %c0_38 = arith.constant 0 : index
    %c9 = arith.constant 9 : index
    %18 = vector.load %arg1[%c0_37, %c0_38, %c9] : memref<8x22x114xbf16, #tpu.memory_space<vmem>>, vector<8x22x90xbf16>
    %c0_39 = arith.constant 0 : index
    %c198 = arith.constant 198 : index
    %c0_40 = arith.constant 0 : index
    %19 = vector.load %arg8[%c0_39, %c198, %c0_40] : memref<8x550x90xbf16, #tpu.memory_space<vmem>>, vector<8x22x90xbf16>
    tpu.vector_store %arg8[%c0_39, %c198, %c0_40], %18 {strides = array<i32>} : memref<8x550x90xbf16, #tpu.memory_space<vmem>>, vector<8x22x90xbf16>,
    %c0_41 = arith.constant 0 : index
    %c0_42 = arith.constant 0 : index
    %c10 = arith.constant 10 : index
    %20 = vector.load %arg1[%c0_41, %c0_42, %c10] : memref<8x22x114xbf16, #tpu.memory_space<vmem>>, vector<8x22x90xbf16>
    %c0_43 = arith.constant 0 : index
    %c220 = arith.constant 220 : index
    %c0_44 = arith.constant 0 : index
    %21 = vector.load %arg8[%c0_43, %c220, %c0_44] : memref<8x550x90xbf16, #tpu.memory_space<vmem>>, vector<8x22x90xbf16>
    tpu.vector_store %arg8[%c0_43, %c220, %c0_44], %20 {strides = array<i32>} : memref<8x550x90xbf16, #tpu.memory_space<vmem>>, vector<8x22x90xbf16>,
    %c0_45 = arith.constant 0 : index
    %c0_46 = arith.constant 0 : index
    %c11 = arith.constant 11 : index
    %22 = vector.load %arg1[%c0_45, %c0_46, %c11] : memref<8x22x114xbf16, #tpu.memory_space<vmem>>, vector<8x22x90xbf16>
    %c0_47 = arith.constant 0 : index
    %c242 = arith.constant 242 : index
    %c0_48 = arith.constant 0 : index
    %23 = vector.load %arg8[%c0_47, %c242, %c0_48] : memref<8x550x90xbf16, #tpu.memory_space<vmem>>, vector<8x22x90xbf16>
    tpu.vector_store %arg8[%c0_47, %c242, %c0_48], %22 {strides = array<i32>} : memref<8x550x90xbf16, #tpu.memory_space<vmem>>, vector<8x22x90xbf16>,
    %c0_49 = arith.constant 0 : index
    %c0_50 = arith.constant 0 : index
    %c12 = arith.constant 12 : index
    %24 = vector.load %arg1[%c0_49, %c0_50, %c12] : memref<8x22x114xbf16, #tpu.memory_space<vmem>>, vector<8x22x90xbf16>
    %c0_51 = arith.constant 0 : index
    %c264 = arith.constant 264 : index
    %c0_52 = arith.constant 0 : index
    %25 = vector.load %arg8[%c0_51, %c264, %c0_52] : memref<8x550x90xbf16, #tpu.memory_space<vmem>>, vector<8x22x90xbf16>
    tpu.vector_store %arg8[%c0_51, %c264, %c0_52], %24 {strides = array<i32>} : memref<8x550x90xbf16, #tpu.memory_space<vmem>>, vector<8x22x90xbf16>,
    %c0_53 = arith.constant 0 : index
    %c0_54 = arith.constant 0 : index
    %c13 = arith.constant 13 : index
    %26 = vector.load %arg1[%c0_53, %c0_54, %c13] : memref<8x22x114xbf16, #tpu.memory_space<vmem>>, vector<8x22x90xbf16>
    %c0_55 = arith.constant 0 : index
    %c286 = arith.constant 286 : index
    %c0_56 = arith.constant 0 : index
    %27 = vector.load %arg8[%c0_55, %c286, %c0_56] : memref<8x550x90xbf16, #tpu.memory_space<vmem>>, vector<8x22x90xbf16>
    tpu.vector_store %arg8[%c0_55, %c286, %c0_56], %26 {strides = array<i32>} : memref<8x550x90xbf16, #tpu.memory_space<vmem>>, vector<8x22x90xbf16>,
    %c0_57 = arith.constant 0 : index
    %c0_58 = arith.constant 0 : index
    %c14 = arith.constant 14 : index
    %28 = vector.load %arg1[%c0_57, %c0_58, %c14] : memref<8x22x114xbf16, #tpu.memory_space<vmem>>, vector<8x22x90xbf16>
    %c0_59 = arith.constant 0 : index
    %c308 = arith.constant 308 : index
    %c0_60 = arith.constant 0 : index
    %29 = vector.load %arg8[%c0_59, %c308, %c0_60] : memref<8x550x90xbf16, #tpu.memory_space<vmem>>, vector<8x22x90xbf16>
    tpu.vector_store %arg8[%c0_59, %c308, %c0_60], %28 {strides = array<i32>} : memref<8x550x90xbf16, #tpu.memory_space<vmem>>, vector<8x22x90xbf16>,
    %c0_61 = arith.constant 0 : index
    %c0_62 = arith.constant 0 : index
    %c15 = arith.constant 15 : index
    %30 = vector.load %arg1[%c0_61, %c0_62, %c15] : memref<8x22x114xbf16, #tpu.memory_space<vmem>>, vector<8x22x90xbf16>
    %c0_63 = arith.constant 0 : index
    %c330 = arith.constant 330 : index
    %c0_64 = arith.constant 0 : index
    %31 = vector.load %arg8[%c0_63, %c330, %c0_64] : memref<8x550x90xbf16, #tpu.memory_space<vmem>>, vector<8x22x90xbf16>
    tpu.vector_store %arg8[%c0_63, %c330, %c0_64], %30 {strides = array<i32>} : memref<8x550x90xbf16, #tpu.memory_space<vmem>>, vector<8x22x90xbf16>,
    %c0_65 = arith.constant 0 : index
    %c0_66 = arith.constant 0 : index
    %c16 = arith.constant 16 : index
    %32 = vector.load %arg1[%c0_65, %c0_66, %c16] : memref<8x22x114xbf16, #tpu.memory_space<vmem>>, vector<8x22x90xbf16>
    %c0_67 = arith.constant 0 : index
    %c352 = arith.constant 352 : index
    %c0_68 = arith.constant 0 : index
    %33 = vector.load %arg8[%c0_67, %c352, %c0_68] : memref<8x550x90xbf16, #tpu.memory_space<vmem>>, vector<8x22x90xbf16>
    tpu.vector_store %arg8[%c0_67, %c352, %c0_68], %32 {strides = array<i32>} : memref<8x550x90xbf16, #tpu.memory_space<vmem>>, vector<8x22x90xbf16>,
    %c0_69 = arith.constant 0 : index
    %c0_70 = arith.constant 0 : index
    %c17 = arith.constant 17 : index
    %34 = vector.load %arg1[%c0_69, %c0_70, %c17] : memref<8x22x114xbf16, #tpu.memory_space<vmem>>, vector<8x22x90xbf16>
    %c0_71 = arith.constant 0 : index
    %c374 = arith.constant 374 : index
    %c0_72 = arith.constant 0 : index
    %35 = vector.load %arg8[%c0_71, %c374, %c0_72] : memref<8x550x90xbf16, #tpu.memory_space<vmem>>, vector<8x22x90xbf16>
    tpu.vector_store %arg8[%c0_71, %c374, %c0_72], %34 {strides = array<i32>} : memref<8x550x90xbf16, #tpu.memory_space<vmem>>, vector<8x22x90xbf16>,
    %c0_73 = arith.constant 0 : index
    %c0_74 = arith.constant 0 : index
    %c18 = arith.constant 18 : index
    %36 = vector.load %arg1[%c0_73, %c0_74, %c18] : memref<8x22x114xbf16, #tpu.memory_space<vmem>>, vector<8x22x90xbf16>
    %c0_75 = arith.constant 0 : index
    %c396 = arith.constant 396 : index
    %c0_76 = arith.constant 0 : index
    %37 = vector.load %arg8[%c0_75, %c396, %c0_76] : memref<8x550x90xbf16, #tpu.memory_space<vmem>>, vector<8x22x90xbf16>
    tpu.vector_store %arg8[%c0_75, %c396, %c0_76], %36 {strides = array<i32>} : memref<8x550x90xbf16, #tpu.memory_space<vmem>>, vector<8x22x90xbf16>,
    %c0_77 = arith.constant 0 : index
    %c0_78 = arith.constant 0 : index
    %c19 = arith.constant 19 : index
    %38 = vector.load %arg1[%c0_77, %c0_78, %c19] : memref<8x22x114xbf16, #tpu.memory_space<vmem>>, vector<8x22x90xbf16>
    %c0_79 = arith.constant 0 : index
    %c418 = arith.constant 418 : index
    %c0_80 = arith.constant 0 : index
    %39 = vector.load %arg8[%c0_79, %c418, %c0_80] : memref<8x550x90xbf16, #tpu.memory_space<vmem>>, vector<8x22x90xbf16>
    tpu.vector_store %arg8[%c0_79, %c418, %c0_80], %38 {strides = array<i32>} : memref<8x550x90xbf16, #tpu.memory_space<vmem>>, vector<8x22x90xbf16>,
    %c0_81 = arith.constant 0 : index
    %c0_82 = arith.constant 0 : index
    %c20 = arith.constant 20 : index
    %40 = vector.load %arg1[%c0_81, %c0_82, %c20] : memref<8x22x114xbf16, #tpu.memory_space<vmem>>, vector<8x22x90xbf16>
    %c0_83 = arith.constant 0 : index
    %c440 = arith.constant 440 : index
    %c0_84 = arith.constant 0 : index
    %41 = vector.load %arg8[%c0_83, %c440, %c0_84] : memref<8x550x90xbf16, #tpu.memory_space<vmem>>, vector<8x22x90xbf16>
    tpu.vector_store %arg8[%c0_83, %c440, %c0_84], %40 {strides = array<i32>} : memref<8x550x90xbf16, #tpu.memory_space<vmem>>, vector<8x22x90xbf16>,
    %c0_85 = arith.constant 0 : index
    %c0_86 = arith.constant 0 : index
    %c21 = arith.constant 21 : index
    %42 = vector.load %arg1[%c0_85, %c0_86, %c21] : memref<8x22x114xbf16, #tpu.memory_space<vmem>>, vector<8x22x90xbf16>
    %c0_87 = arith.constant 0 : index
    %c462 = arith.constant 462 : index
    %c0_88 = arith.constant 0 : index
    %43 = vector.load %arg8[%c0_87, %c462, %c0_88] : memref<8x550x90xbf16, #tpu.memory_space<vmem>>, vector<8x22x90xbf16>
    tpu.vector_store %arg8[%c0_87, %c462, %c0_88], %42 {strides = array<i32>} : memref<8x550x90xbf16, #tpu.memory_space<vmem>>, vector<8x22x90xbf16>,
    %c0_89 = arith.constant 0 : index
    %c0_90 = arith.constant 0 : index
    %c22_91 = arith.constant 22 : index
    %44 = vector.load %arg1[%c0_89, %c0_90, %c22_91] : memref<8x22x114xbf16, #tpu.memory_space<vmem>>, vector<8x22x90xbf16>
    %c0_92 = arith.constant 0 : index
    %c484 = arith.constant 484 : index
    %c0_93 = arith.constant 0 : index
    %45 = vector.load %arg8[%c0_92, %c484, %c0_93] : memref<8x550x90xbf16, #tpu.memory_space<vmem>>, vector<8x22x90xbf16>
    tpu.vector_store %arg8[%c0_92, %c484, %c0_93], %44 {strides = array<i32>} : memref<8x550x90xbf16, #tpu.memory_space<vmem>>, vector<8x22x90xbf16>,
    %c0_94 = arith.constant 0 : index
    %c0_95 = arith.constant 0 : index
    %c23 = arith.constant 23 : index
    %46 = vector.load %arg1[%c0_94, %c0_95, %c23] : memref<8x22x114xbf16, #tpu.memory_space<vmem>>, vector<8x22x90xbf16>
    %c0_96 = arith.constant 0 : index
    %c506 = arith.constant 506 : index
    %c0_97 = arith.constant 0 : index
    %47 = vector.load %arg8[%c0_96, %c506, %c0_97] : memref<8x550x90xbf16, #tpu.memory_space<vmem>>, vector<8x22x90xbf16>
    tpu.vector_store %arg8[%c0_96, %c506, %c0_97], %46 {strides = array<i32>} : memref<8x550x90xbf16, #tpu.memory_space<vmem>>, vector<8x22x90xbf16>,
    %c0_98 = arith.constant 0 : index
    %c0_99 = arith.constant 0 : index
    %c24 = arith.constant 24 : index
    %48 = vector.load %arg1[%c0_98, %c0_99, %c24] : memref<8x22x114xbf16, #tpu.memory_space<vmem>>, vector<8x22x90xbf16>
    %c0_100 = arith.constant 0 : index
    %c528 = arith.constant 528 : index
    %c0_101 = arith.constant 0 : index
    %49 = vector.load %arg8[%c0_100, %c528, %c0_101] : memref<8x550x90xbf16, #tpu.memory_space<vmem>>, vector<8x22x90xbf16>
    tpu.vector_store %arg8[%c0_100, %c528, %c0_101], %48 {strides = array<i32>} : memref<8x550x90xbf16, #tpu.memory_space<vmem>>, vector<8x22x90xbf16>,
    %c0_102 = arith.constant 0 : index
    %c0_103 = arith.constant 0 : index
    %50 = vector.load %arg2[%c0_102, %c0_103] : memref<40x550xbf16, #tpu.memory_space<vmem>>, vector<40x550xbf16>
    %51 = vector.shape_cast %50 : vector<40x550xbf16> to vector<1x40x550xbf16>
    %52 = vector.shape_cast %51 : vector<1x40x550xbf16> to vector<1x40x550xbf16>
    %53 = vector.broadcast %52 : vector<1x40x550xbf16> to vector<8x40x550xbf16>
    %c0_104 = arith.constant 0 : index
    %c0_105 = arith.constant 0 : index
    %c0_106 = arith.constant 0 : index
    %54 = vector.load %arg8[%c0_104, %c0_105, %c0_106] : memref<8x550x90xbf16, #tpu.memory_space<vmem>>, vector<8x550x90xbf16>
    "tpu.trace_start"() <{level = 10 : i32, message = "bck,bkw->bcw"}> : () -> ()
    %cst = arith.constant dense<0.000000e+00> : vector<8x40x90xf32>
    %55 = tpu.matmul %53, %54, %cst {dimension_numbers = #tpu.dot_dimension_numbers<[2], [1], [1], [2], [0, 0, 0, 1, 1, 2], [0], [0]>} : vector<8x40x550xbf16>, vector<8x550x90xbf16>, vector<8x40x90xf32> -> vector<8x40x90xf32>
    "tpu.trace_stop"() : () -> ()
    %c0_107 = arith.constant 0 : index
    %c0_108 = arith.constant 0 : index
    %c0_109 = arith.constant 0 : index
    %56 = vector.load %arg3[%c0_107, %c0_108, %c0_109] : memref<1x40x1xf32, #tpu.memory_space<vmem>>, vector<1x40x1xf32>
    %57 = vector.broadcast %56 : vector<1x40x1xf32> to vector<8x40x90xf32>
    %58 = arith.addf %55, %57 : vector<8x40x90xf32>
    %cst_110 = arith.constant 0.000000e+00 : f32
    %59 = vector.broadcast %cst_110 : f32 to vector<8x40x90xf32>
    %60 = arith.cmpf ogt, %58, %59 : vector<8x40x90xf32>
    %cst_111 = arith.constant 0.000000e+00 : f32
    %61 = vector.broadcast %cst_111 : f32 to vector<8x40x90xf32>
    %62 = arith.minimumf %58, %61 : vector<8x40x90xf32>
    %63 = math.exp %62 : vector<8x40x90xf32>
    %cst_112 = arith.constant 1.000000e+00 : f32
    %64 = vector.broadcast %cst_112 : f32 to vector<8x40x90xf32>
    %65 = arith.subf %63, %64 : vector<8x40x90xf32>
    %66 = arith.select %60, %58, %65 : vector<8x40x90xi1>, vector<8x40x90xf32>
    %c0_113 = arith.constant 0 : index
    %c0_114 = arith.constant 0 : index
    %c0_115 = arith.constant 0 : index
    %67 = vector.load %arg4[%c0_113, %c0_114, %c0_115] : memref<1x1x90xf32, #tpu.memory_space<vmem>>, vector<1x1x90xf32>
    %68 = vector.broadcast %67 : vector<1x1x90xf32> to vector<8x40x90xf32>
    %69 = arith.mulf %66, %68 : vector<8x40x90xf32>
    %cst_116 = arith.constant dense<0.000000e+00> : vector<8x40xf32>
    %70 = vector.multi_reduction <add>, %69, %cst_116 [2] : vector<8x40x90xf32> to vector<8x40xf32>
    %c0_117 = arith.constant 0 : index
    %c0_118 = arith.constant 0 : index
    %71 = vector.load %arg5[%c0_117, %c0_118] : memref<40x40xf32, #tpu.memory_space<vmem>>, vector<40x40xf32>
    %cst_119 = arith.constant dense<0.000000e+00> : vector<8x40xf32>
    %72 = tpu.matmul %70, %71, %cst_119 {dimension_numbers = #tpu.dot_dimension_numbers<[1], [0], [0], [1], [0, 0, 1, 1], [], []>} : vector<8x40xf32>, vector<40x40xf32>, vector<8x40xf32> -> vector<8x40xf32>
    %c0_120 = arith.constant 0 : index
    %c0_121 = arith.constant 0 : index
    %73 = vector.load %arg6[%c0_120, %c0_121] : memref<1x40xf32, #tpu.memory_space<vmem>>, vector<1x40xf32>
    %74 = vector.broadcast %73 : vector<1x40xf32> to vector<8x40xf32>
    %75 = arith.addf %72, %74 : vector<8x40xf32>
    %c0_122 = arith.constant 0 : index
    %c0_123 = arith.constant 0 : index
    %76 = vector.load %arg7[%c0_122, %c0_123] : memref<8x40xf32, #tpu.memory_space<vmem>>, vector<8x40xf32>
    tpu.vector_store %arg7[%c0_122, %c0_123], %75 {strides = array<i32>} : memref<8x40xf32, #tpu.memory_space<vmem>>, vector<8x40xf32>,
    return
  }
  func.func @transform_0(%arg0: i32) -> (i32, i32, i32) {
    %c0_i32 = arith.constant 0 : i32
    %c0_i32_0 = arith.constant 0 : i32
    %c0_i32_1 = arith.constant 0 : i32
    return %arg0, %c0_i32, %c0_i32_0 : i32, i32, i32
  }
  func.func @transform_1(%arg0: i32) -> (i32, i32) {
    %c0_i32 = arith.constant 0 : i32
    %c0_i32_0 = arith.constant 0 : i32
    %c0_i32_1 = arith.constant 0 : i32
    return %c0_i32, %c0_i32_0 : i32, i32
  }
  func.func @transform_2(%arg0: i32) -> (i32, i32, i32) {
    %c0_i32 = arith.constant 0 : i32
    %c0_i32_0 = arith.constant 0 : i32
    %c0_i32_1 = arith.constant 0 : i32
    %c0_i32_2 = arith.constant 0 : i32
    return %c0_i32, %c0_i32_0, %c0_i32_1 : i32, i32, i32
  }
  func.func @transform_3(%arg0: i32) -> (i32, i32, i32) {
    %c0_i32 = arith.constant 0 : i32
    %c0_i32_0 = arith.constant 0 : i32
    %c0_i32_1 = arith.constant 0 : i32
    %c0_i32_2 = arith.constant 0 : i32
    return %c0_i32, %c0_i32_0, %c0_i32_1 : i32, i32, i32
  }
  func.func @transform_4(%arg0: i32) -> (i32, i32) {
    %c0_i32 = arith.constant 0 : i32
    %c0_i32_0 = arith.constant 0 : i32
    %c0_i32_1 = arith.constant 0 : i32
    return %c0_i32, %c0_i32_0 : i32, i32
  }
  func.func @transform_5(%arg0: i32) -> (i32, i32) {
    %c0_i32 = arith.constant 0 : i32
    %c0_i32_0 = arith.constant 0 : i32
    %c0_i32_1 = arith.constant 0 : i32
    return %c0_i32, %c0_i32_0 : i32, i32
  }
  func.func @transform_6(%arg0: i32) -> (i32, i32) {
    %c0_i32 = arith.constant 0 : i32
    %c0_i32_0 = arith.constant 0 : i32
    return %arg0, %c0_i32 : i32, i32
  }
}

</mosaic_0001>

<bundles_post_ra>
// kernel: tpu_custom_call.1
= control target key start
LH: loop header
LB: loop body
LE: loop exit
PB: predicated region body
PF: predicated region fallthrough
CT: control target
= control target key end

     0   :  { %vm123_vm0 = vcmask 1042432   ;;  %vm124_vm1 = vcmask 1046532   ;;  %s10511_s7 = smov 127   ;;  %s15901_s0 = inlined_call_operand.vmem [shape: bf16[8,22,114], index: 0, kind: input, shape index: {}]   ;;  %s15902_s1 = inlined_call_operand.vmem [shape: bf16[40,550], index: 1, kind: input, shape index: {}]   ;;  %s15903_s2 = inlined_call_operand.vmem [shape: f32[1,40,1], index: 2, kind: input, shape index: {}]   ;;  %s15904_s3 = inlined_call_operand.vmem [shape: f32[1,1,90], index: 3, kind: input, shape index: {}]   ;;  %s15905_s4 = inlined_call_operand.vmem [shape: f32[40,40], index: 4, kind: input, shape index: {}]   ;;  %s15906_s5 = inlined_call_operand.vmem [shape: f32[1,40], index: 5, kind: input, shape index: {}]   ;;  %s15907_s6 = inlined_call_operand.hbm [shape: f32[8,40], index: 6, kind: output, shape index: {}]  }
   0x1   :  { %v78_v0 = vld [vmem:[%s15901_s0 + $0xc] sm:$0xf]  ;;  %v75_v1 = vld [vmem:[%s15901_s0] sm:$0xf]  ;;  %v76_v4 = vld [vmem:[%s15901_s0 + $0x4] sm:$0xf] }
   0x2   :  { %v134_v2 = vrot.slane %v78_v0, 5  ;;  %v126_v3 = vrot.slane %v75_v1, 5  ;;  %v77_v5 = vld [vmem:[%s15901_s0 + $0x8] sm:$0x7]  ;;  %v128_v6 = vrot.slane %v76_v4, 5  ;;  %vm10590_vm2 = vmor %vm123_vm0, %vm124_vm1 }
   0x3   :  { %v131_v7 = vrot.slane %v77_v5, 5  ;;  %v79_v8 = vld [vmem:[%s15901_s0 + $0x10] sm:$0xf]  ;;  %v80_v17 = vld [vmem:[%s15901_s0 + $0x14] sm:$0x7] }
   0x4   :  { %198 = vrot.lane.b32.xlu2 %v134_v2, %s10511_s7  ;;  %190 = vrot.lane.b32.xlu0 %v126_v3, %s10511_s7  ;;  %v135_v10 = vrot.slane %v134_v2, 4  ;;  %v127_v11 = vrot.slane %v126_v3, 4  ;;  %v130_v12 = vrot.slane %v128_v6, 4  ;;  %v136_v13 = vrot.slane %v79_v8, 5 }
   0x5   :  { %v133_v18 = vrot.slane %v131_v7, 4 }
   0x6   :  { %v132_v14 = vsel %vm10590_vm2, %v130_v12, %v131_v7  ;;  %v137_v15 = vsel %vm10590_vm2, %v135_v10, %v136_v13  ;;  %v129_v16 = vsel %vm10590_vm2, %v127_v11, %v128_v6 }
   0x7   :  { %194 = vrot.lane.b32.xlu1 %v132_v14, %s10511_s7 }
   0xc   :  { %200 = vrot.lane.b32.xlu2 %v137_v15, %s10511_s7  ;;  %192 = vrot.lane.b32.xlu0 %v129_v16, %s10511_s7 }
   0xd   :  { %11 = vsyncpa [#allocation4], 0  ;;  %v81_v19 = vld [vmem:[%s15901_s0 + $0x18] sm:$0xf]  ;;  %v138_v20 = vrot.slane %v136_v13, 4  ;;  %v139_v21 = vrot.slane %v80_v17, 5 }
   0xe   :  { %v142_v22 = vrot.slane %v81_v19, 5  ;;  %v83_v24 = vld [vmem:[%s15901_s0 + $0x20] sm:$0x7]  ;;  %v82_v25 = vld [vmem:[%s15901_s0 + $0x1c] sm:$0xf]  ;;  %vm368_vm3 = vcmask 1041408  }
   0xf   :  { %196 = vrot.lane.b32.xlu1 %v133_v18, %s10511_s7  ;;  %v140_v23 = vsel %vm10590_vm2, %v138_v20, %v139_v21  ;;  %v141_v26 = vrot.slane %v139_v21, 4  ;;  %v147_v27 = vrot.slane %v83_v24, 5  ;;  %v144_v29 = vrot.slane %v82_v25, 5  ;;  %v85_v30 = vld [vmem:[%s15901_s0 + $0x28] sm:$0xf]  ;;  %s10512_s29 = smov 126  }
  0x10   :  { %v143_v28 = vrot.slane %v142_v22, 4  ;;  %v152_v34 = vrot.slane %v85_v30, 5  ;;  %v86_v35 = vld [vmem:[%s15901_s0 + $0x2c] sm:$0x7]  ;;  %v84_v36 = vld [vmem:[%s15901_s0 + $0x24] sm:$0xf] }
  0x11   :  { %v149_v31 = vrot.slane %v147_v27, 4  ;;  %v146_v33 = vrot.slane %v144_v29, 4  ;;  %v155_v39 = vrot.slane %v86_v35, 5  ;;  %v150_v40 = vrot.slane %v84_v36, 5  ;;  %v87_v41 = vld [vmem:[%s15901_s0 + $0x30] sm:$0xf] }
  0x12   :  { %v145_v32 = vsel %vm10590_vm2, %v143_v28, %v144_v29  ;;  %v154_v38 = vrot.slane %v152_v34, 4  ;;  %v158_v44 = vrot.slane %v87_v41, 5  ;;  %v88_v45 = vld [vmem:[%s15901_s0 + $0x34] sm:$0xf]  ;;  %v89_v51 = vld [vmem:[%s15901_s0 + $0x38] sm:$0x7] }
  0x13   :  { %v148_v37 = vsel %vm10590_vm2, %v146_v33, %v147_v27  ;;  %v151_v43 = vrot.slane %v150_v40, 4  ;;  %v160_v48 = vrot.slane %v88_v45, 5  ;;  %v157_v49 = vrot.slane %v155_v39, 4  ;;  %v90_v52 = vld [vmem:[%s15901_s0 + $0x3c] sm:$0xf]  ;;  %s10513_s28 = smov 125  }
  0x14   :  { %206 = vrot.lane.b32.xlu2 %v142_v22, %s10511_s7  ;;  %202 = vrot.lane.b32.xlu0 %v140_v23, %s10511_s7  ;;  %v156_v42 = vsel %vm10590_vm2, %v154_v38, %v155_v39  ;;  %v159_v47 = vrot.slane %v158_v44, 4  ;;  %v163_v54 = vrot.slane %v89_v51, 5  ;;  %v166_v55 = vrot.slane %v90_v52, 5  ;;  %v92_v57 = vld [vmem:[%s15901_s0 + $0x44] sm:$0x7]  ;;  %s10514_s22 = smov 124  }
  0x15   :  { %v153_v46 = vsel %vm10590_vm2, %v151_v43, %v152_v34  ;;  %v162_v53 = vrot.slane %v160_v48, 4  ;;  %v91_v58 = vld [vmem:[%s15901_s0 + $0x40] sm:$0xf]  ;;  %v171_v60 = vrot.slane %v92_v57, 5  ;;  %v94_v63 = vld [vmem:[%s15901_s0 + $0x4c] sm:$0xf] }
  0x16   :  { %v161_v50 = vsel %vm10590_vm2, %v159_v47, %v160_v48  ;;  %v165_v59 = vrot.slane %v163_v54, 4  ;;  %v167_v61 = vrot.slane %v166_v55, 4  ;;  %v168_v62 = vrot.slane %v91_v58, 5  ;;  %v95_v4 = vld [vmem:[%s15901_s0 + $0x50] sm:$0x7]  ;;  %s10516_s12 = smov 122  }
  0x17   :  { %204 = vrot.lane.b32.xlu1 %v141_v26, %s10511_s7  ;;  %v164_v56 = vsel %vm10590_vm2, %v162_v53, %v163_v54  ;;  %v173_v0 = vrot.slane %v171_v60, 4  ;;  %v176_v3 = vrot.slane %v94_v63, 5  ;;  %v93_v5 = vld [vmem:[%s15901_s0 + $0x48] sm:$0xf]  ;;  %v179_v8 = vrot.slane %v95_v4, 5  ;;  %s10517_s9 = smov 121  }
  0x18   :  { %v169_v1 = vsel %vm10590_vm2, %v167_v61, %v168_v62  ;;  %v170_v2 = vrot.slane %v168_v62, 4  ;;  %v174_v10 = vrot.slane %v93_v5, 5  ;;  %v96_v11 = vld [vmem:[%s15901_s0 + $0x54] sm:$0xf]  ;;  %v97_v15 = vld [vmem:[%s15901_s0 + $0x58] sm:$0xf] }
  0x19   :  { %v178_v7 = vrot.slane %v176_v3, 4  ;;  %v182_v14 = vrot.slane %v96_v11, 5  ;;  %v184_v18 = vrot.slane %v97_v15, 5  ;;  %v181_v19 = vrot.slane %v179_v8, 4  ;;  %v98_v21 = vld [vmem:[%s15901_s0 + $0x5c] sm:$0x7] }
  0x1a   :  { %v172_v6 = vsel %vm10590_vm2, %v170_v2, %v171_v60  ;;  %v175_v13 = vrot.slane %v174_v10, 4  ;;  %v320_v22 = vld [vmem:[%s15901_s0] sm:$0xf]  ;;  %v187_v24 = vrot.slane %v98_v21, 5  ;;  %v322_v27 = vld [vmem:[%s15901_s0 + $0x8] sm:$0x7] }
  0x1b   :  { %v180_v12 = vsel %vm10590_vm2, %v178_v7, %v179_v8  ;;  %v183_v17 = vrot.slane %v182_v14, 4  ;;  %v186_v23 = vrot.slane %v184_v18, 4  ;;  %v371_v25 = vrot.slane %v320_v22, 6  ;;  %v321_v28 = vld [vmem:[%s15901_s0 + $0x4] sm:$0xf]  ;;  %s10519_s14 = smov 119  }
  0x1c   :  { %212 = vrot.lane.b32.xlu2 %v149_v31, %s10511_s7  ;;  %208 = vrot.lane.b32.xlu0 %v145_v32, %s10511_s7  ;;  %v177_v16 = vsel %vm10590_vm2, %v175_v13, %v176_v3  ;;  %vm369_vm4 = vcmask 1045508   ;;  %v189_v29 = vrot.slane %v187_v24, 4  ;;  %v376_v30 = vrot.slane %v322_v27, 6  ;;  %v324_v34 = vld [vmem:[%s15901_s0 + $0x10] sm:$0xf]  ;;  %s10520_s16 = smov 118  }
  0x1d   :  { %v185_v20 = vsel %vm10590_vm2, %v183_v17, %v184_v18  ;;  %v188_v26 = vsel %vm10590_vm2, %v186_v23, %v187_v24  ;;  %v372_v31 = vrot.slane %v371_v25, 4  ;;  %v373_v32 = vrot.slane %v321_v28, 6  ;;  %vm10722_vm5 = vmor %vm368_vm3, %vm369_vm4  ;;  %v325_v39 = vld [vmem:[%s15901_s0 + $0x14] sm:$0x7]  ;;  %v326_v47 = vld [vmem:[%s15901_s0 + $0x18] sm:$0xf] }
  0x1e   :  { %v378_v35 = vrot.slane %v376_v30, 4  ;;  %v381_v38 = vrot.slane %v324_v34, 6  ;;  %vm52_vm6 = vcmask 731136   ;;  %v30_v41 = vld [vmem:[%s15901_s0 + $0x14] sm:$0x7]  ;;  %vm286_vm7 = vcmask 732163  }
  0x1f   :  { %210 = vrot.lane.b32.xlu1 %v148_v37, %s10511_s7  ;;  %v374_v36 = vsel %vm10722_vm5, %v372_v31, %v373_v32  ;;  %v375_v37 = vrot.slane %v373_v32, 4  ;;  %56 = vst.msk [vmem:[#allocation2 + $0x11c] sm:$0x7] %vm52_vm6, %v30_v41  ;;  %v27_v48 = vld [vmem:[%s15901_s0 + $0x8] sm:$0x7]  ;;  %v387_v51 = vrot.slane %v326_v47, 6 }
  0x20   :  { %v383_v43 = vrot.slane %v381_v38, 4  ;;  %53 = vst.msk [vmem:[#allocation2 + $0x8] sm:$0x7] %vm52_vm6, %v27_v48  ;;  %v327_v52 = vld [vmem:[%s15901_s0 + $0x1c] sm:$0xf]  ;;  %vm49_vm8 = vcmask 732160  }
  0x21   :  { %v388_v54 = vrot.slane %v387_v51, 4  ;;  %v329_v60 = vld [vmem:[%s15901_s0 + $0x24] sm:$0xf]  ;;  %v331_v3 = vld [vmem:[%s15901_s0 + $0x2c] sm:$0x7]  ;;  %vm290_vm9 = vcmask 730112  }
  0x22   :  { %v330_v4 = vld [vmem:[%s15901_s0 + $0x28] sm:$0xf]  ;;  %v334_v18 = vld [vmem:[%s15901_s0 + $0x38] sm:$0x7]  ;;  %v335_v27 = vld [vmem:[%s15901_s0 + $0x3c] sm:$0xf] }
  0x23   :  { %v397_v8 = vrot.slane %v330_v4, 6  ;;  %v408_v23 = vrot.slane %v334_v18, 6  ;;  %v336_v32 = vld [vmem:[%s15901_s0 + $0x40] sm:$0xf]  ;;  %v39_v34 = vld [vmem:[%s15901_s0 + $0x38] sm:$0x7] }
  0x24   :  { %218 = vrot.lane.b32.xlu2 %v156_v42, %s10511_s7  ;;  %214 = vrot.lane.b32.xlu0 %v150_v40, %s10511_s7  ;;  %v323_v40 = vld [vmem:[%s15901_s0 + $0xc] sm:$0xf]  ;;  %v377_v42 = vsel %vm10722_vm5, %v375_v37, %v376_v30  ;;  %v411_v30 = vrot.slane %v335_v27, 6  ;;  %65 = vst.msk [vmem:[#allocation2 + $0x458] sm:$0x7] %vm52_vm6, %v39_v34  ;;  %v413_v37 = vrot.slane %v336_v32, 6 }
  0x25   :  { %v379_v45 = vrot.slane %v323_v40, 6  ;;  %v399_v15 = vrot.slane %v397_v8, 4  ;;  %v410_v40 = vrot.slane %v408_v23, 4  ;;  %v341_v4 = vld [vmem:[%s15901_s0 + $0x54] sm:$0xf]  ;;  %vm613_vm10 = vcmask 1040384  }
  0x26   :  { %v566_v18 = vld [vmem:[%s15901_s0 + $0x4] sm:$0xf]  ;;  %vm614_vm11 = vcmask 1044484   ;;  %v567_v32 = vld [vmem:[%s15901_s0 + $0x8] sm:$0x7]  ;;  %vm531_vm13 = vcmask 732162  }
  0x27   :  { %216 = vrot.lane.b32.xlu1 %v153_v46, %s10511_s7  ;;  %vm10911_vm12 = vmor %vm613_vm10, %vm614_vm11  ;;  %vm535_vm14 = vcmask 729088   ;;  %vm744_vm15 = vcmask 732161   ;;  %s10521_s24 = smov 117   ;;  %s10522_s19 = smov 116   ;;  %vm5904_vm1 = vcmask 310272   ;;  %vm8592_vm3 = vcmask 736256  }
  0x28   :  { %s10523_s26 = smov 115   ;;  %s10526_s25 = smov 112  }
  0x29   :  { %s10527_s11 = smov 111   ;;  %s10528_s15 = smov 105  }
  0x2a   :  { %s10529_s17 = smov 106   ;;  %s10530_s20 = smov 107  }
  0x2b   :  { %s10533_s23 = smov 110  }
  0x2c   :  { %224 = vrot.lane.b32.xlu2 %v161_v50, %s10511_s7  ;;  %220 = vrot.lane.b32.xlu0 %v157_v49, %s10511_s7  ;;  %v380_v50 = vrot.slane %v379_v45, 4 }
  0x2e   :  { %v382_v53 = vsel %vm10722_vm5, %v380_v50, %v381_v38  ;;  %v42_v50 = vld [vmem:[%s15901_s0 + $0x44] sm:$0x7] }
  0x2f   :  { %222 = vrot.lane.b32.xlu1 %v158_v44, %s10511_s7  ;;  %v384_v44 = vrot.slane %v325_v39, 6  ;;  %68 = vst.msk [vmem:[#allocation2 + $0x56c] sm:$0x7] %vm52_vm6, %v42_v50 }
  0x31   :  { %v385_v49 = vsel %vm10722_vm5, %v383_v43, %v384_v44  ;;  %v386_v57 = vrot.slane %v384_v44, 4  ;;  %v337_v43 = vld [vmem:[%s15901_s0 + $0x44] sm:$0x7]  ;;  %v338_v44 = vld [vmem:[%s15901_s0 + $0x48] sm:$0xf] }
  0x34   :  { %230 = vrot.lane.b32.xlu2 %v166_v55, %s10511_s7  ;;  %226 = vrot.lane.b32.xlu0 %v164_v56, %s10511_s7  ;;  %v389_v55 = vrot.slane %v327_v52, 6  ;;  %v340_v52 = vld [vmem:[%s15901_s0 + $0x50] sm:$0x7] }
  0x36   :  { %v390_v58 = vsel %vm10722_vm5, %v388_v54, %v389_v55  ;;  %v391_v61 = vrot.slane %v389_v55, 4  ;;  %v339_v54 = vld [vmem:[%s15901_s0 + $0x4c] sm:$0xf] }
  0x37   :  { %228 = vrot.lane.b32.xlu1 %v165_v59, %s10511_s7  ;;  %v328_v59 = vld [vmem:[%s15901_s0 + $0x20] sm:$0x7] }
  0x38   :  { %v392_v62 = vrot.slane %v328_v59, 6 }
  0x3a   :  { %v393_v2 = vsel %vm10722_vm5, %v391_v61, %v392_v62  ;;  %v394_v5 = vrot.slane %v392_v62, 4  ;;  %v342_v61 = vld [vmem:[%s15901_s0 + $0x58] sm:$0xf] }
  0x3c   :  { %236 = vrot.lane.b32.xlu2 %v173_v0, %s10511_s7  ;;  %232 = vrot.lane.b32.xlu0 %v169_v1, %s10511_s7  ;;  %v395_v0 = vrot.slane %v329_v60, 6  ;;  %v33_v1 = vld [vmem:[%s15901_s0 + $0x20] sm:$0x7] }
  0x3d   :  { %59 = vst.msk [vmem:[#allocation2 + $0x230] sm:$0x7] %vm52_vm6, %v33_v1  ;;  %v429_v1 = vrot.slane %v342_v61, 6 }
  0x3e   :  { %v396_v7 = vrot.slane %v395_v0, 4 }
  0x3f   :  { %234 = vrot.lane.b32.xlu1 %v172_v6, %s10511_s7  ;;  %v400_v6 = vrot.slane %v331_v3, 6  ;;  %v343_v3 = vld [vmem:[%s15901_s0 + $0x5c] sm:$0x7] }
  0x41   :  { %v402_v13 = vrot.slane %v400_v6, 4  ;;  %v401_v21 = vsel %vm10722_vm5, %v399_v15, %v400_v6 }
  0x44   :  { %242 = vrot.lane.b32.xlu2 %v180_v12, %s10511_s7  ;;  %238 = vrot.lane.b32.xlu0 %v174_v10, %s10511_s7  ;;  %v333_v12 = vld [vmem:[%s15901_s0 + $0x34] sm:$0xf] }
  0x47   :  { %240 = vrot.lane.b32.xlu1 %v177_v16, %s10511_s7  ;;  %v405_v16 = vrot.slane %v333_v12, 6 }
  0x49   :  { %v407_v22 = vrot.slane %v405_v16, 4 }
  0x4b   :  { %v409_v28 = vsel %vm10722_vm5, %v407_v22, %v408_v23  ;;  %v618_v22 = vrot.slane %v566_v18, 7 }
  0x4c   :  { %248 = vrot.lane.b32.xlu2 %v185_v20, %s10511_s7  ;;  %244 = vrot.lane.b32.xlu0 %v181_v19, %s10511_s7  ;;  %v332_v19 = vld [vmem:[%s15901_s0 + $0x30] sm:$0xf]  ;;  %v36_v20 = vld [vmem:[%s15901_s0 + $0x2c] sm:$0x7] }
  0x4d   :  { %62 = vst.msk [vmem:[#allocation2 + $0x344] sm:$0x7] %vm52_vm6, %v36_v20  ;;  %v403_v24 = vrot.slane %v332_v19, 6  ;;  %v48_v19 = vld [vmem:[%s15901_s0 + $0x5c] sm:$0x7] }
  0x4e   :  { %74 = vst.msk [vmem:[#allocation2 + $0x794] sm:$0x7] %vm52_vm6, %v48_v19 }
  0x4f   :  { %246 = vrot.lane.b32.xlu1 %v182_v14, %s10511_s7  ;;  %v398_v14 = vsel %vm10722_vm5, %v396_v7, %v397_v8  ;;  %v431_v7 = vrot.slane %v429_v1, 4  ;;  %v432_v8 = vrot.slane %v343_v3, 6 }
  0x51   :  { %v434_v27 = vrot.slane %v432_v8, 4 }
  0x54   :  { %435 = vrot.lane.b32.xlu2 %v371_v25, %s10512_s29  ;;  %250 = vrot.lane.b32.xlu0 %v188_v26, %s10511_s7 }
  0x57   :  { %252 = vrot.lane.b32.xlu1 %v189_v29, %s10511_s7  ;;  %v404_v29 = vrot.slane %v403_v24, 4  ;;  %s10534_s7 = smov 104  }
  0x5c   :  { %441 = vrot.lane.b32.xlu2 %v378_v35, %s10512_s29  ;;  %437 = vrot.lane.b32.xlu0 %v374_v36, %s10512_s29  ;;  %v406_v35 = vsel %vm10722_vm5, %v404_v29, %v405_v16  ;;  %v412_v36 = vrot.slane %v411_v30, 4 }
  0x5e   :  { %v199_v46 = vpop.permute.xlu2 %198  ;;  %v414_v41 = vsel %vm10722_vm5, %v412_v36, %v413_v37  ;;  %v620_v36 = vrot.slane %v618_v22, 4 }
  0x5f   :  { %292 = vst.msk [vmem:[#allocation2 + $0x11c] sm:$0x8] %vm286_vm7, %v199_v46  ;;  %439 = vrot.lane.b32.xlu1 %v377_v42, %s10512_s29  ;;  %v416_v46 = vrot.slane %v337_v43, 6 }
  0x61   :  { %v418_v55 = vrot.slane %v416_v46, 4 }
  0x64   :  { %447 = vrot.lane.b32.xlu2 %v385_v49, %s10512_s29  ;;  %443 = vrot.lane.b32.xlu0 %v379_v45, %s10512_s29  ;;  %v415_v45 = vrot.slane %v413_v37, 4  ;;  %v419_v49 = vrot.slane %v338_v44, 6  ;;  %v621_v37 = vrot.slane %v567_v32, 7 }
  0x66   :  { %v201_v56 = vpop.permute.xlu2 %200 }
  0x67   :  { %293 = vst.msk [vmem:[#allocation2 + $0x120] sm:$0xf] %vm49_vm8, %v201_v56  ;;  %445 = vrot.lane.b32.xlu1 %v382_v53, %s10512_s29  ;;  %v424_v56 = vrot.slane %v340_v52, 6 }
  0x69   :  { %v426_v62 = vrot.slane %v424_v56, 4 }
  0x6c   :  { %453 = vrot.lane.b32.xlu2 %v390_v58, %s10512_s29  ;;  %449 = vrot.lane.b32.xlu0 %v386_v57, %s10512_s29  ;;  %v420_v57 = vrot.slane %v419_v49, 4  ;;  %v421_v58 = vrot.slane %v339_v54, 6 }
  0x6e   :  { %v207_v63 = vpop.permute.xlu2 %206 }
  0x6f   :  { %296 = vst.msk [vmem:[#allocation2 + $0x230] sm:$0x8] %vm286_vm7, %v207_v63  ;;  %451 = vrot.lane.b32.xlu1 %v387_v51, %s10512_s29  ;;  %v417_v51 = vsel %vm10722_vm5, %v415_v45, %v416_v46  ;;  %v422_v63 = vsel %vm10722_vm5, %v420_v57, %v421_v58  ;;  %v572_v45 = vld [vmem:[%s15901_s0 + $0x1c] sm:$0xf]  ;;  %v570_v46 = vld [vmem:[%s15901_s0 + $0x14] sm:$0x7] }
  0x70   :  { %v628_v50 = vrot.slane %v570_v46, 7 }
  0x74   :  { %459 = vrot.lane.b32.xlu2 %v395_v0, %s10512_s29  ;;  %455 = vrot.lane.b32.xlu0 %v393_v2, %s10512_s29  ;;  %v423_v0 = vrot.slane %v421_v58, 4  ;;  %v575_v58 = vld [vmem:[%s15901_s0 + $0x28] sm:$0xf] }
  0x75   :  { %v639_v61 = vrot.slane %v575_v58, 7 }
  0x76   :  { %v213_v10 = vpop.permute.xlu2 %212  ;;  %v191_v11 = vpop.permute.xlu0 %190  ;;  %v425_v6 = vsel %vm10722_vm5, %v423_v0, %v424_v56 }
  0x77   :  { %299 = vst.msk [vmem:[#allocation2 + $0x23c] sm:$0x3] %vm290_vm9, %v213_v10  ;;  %457 = vrot.lane.b32.xlu1 %v394_v5, %s10512_s29  ;;  %v45_v5 = vld [vmem:[%s15901_s0 + $0x50] sm:$0x7]  ;;  %v427_v10 = vrot.slane %v341_v4, 6 }
  0x78   :  { %287 = vst.msk [vmem:[#allocation2 + $0x8] sm:$0x8] %vm286_vm7, %v191_v11 }
  0x79   :  { %v195_v17 = vpop.permute.xlu1 %194  ;;  %71 = vst.msk [vmem:[#allocation2 + $0x680] sm:$0x7] %vm52_vm6, %v45_v5  ;;  %v428_v15 = vrot.slane %v427_v10, 4 }
  0x7a   :  { %289 = vst.msk [vmem:[#allocation2 + $0x10] sm:$0xf] %vm49_vm8, %v195_v17 }
  0x7b   :  { %v430_v20 = vsel %vm10722_vm5, %v428_v15, %v429_v1 }
  0x7c   :  { %465 = vrot.lane.b32.xlu2 %v402_v13, %s10512_s29  ;;  %461 = vrot.lane.b32.xlu0 %v398_v14, %s10512_s29  ;;  %v565_v13 = vld [vmem:[%s15901_s0] sm:$0xf]  ;;  %v433_v14 = vsel %vm10722_vm5, %v431_v7, %v432_v8  ;;  %v578_v7 = vld [vmem:[%s15901_s0 + $0x34] sm:$0xf] }
  0x7d   :  { %v616_v16 = vrot.slane %v565_v13, 7  ;;  %v576_v8 = vld [vmem:[%s15901_s0 + $0x2c] sm:$0x7] }
  0x7e   :  { %v219_v25 = vpop.permute.xlu2 %218  ;;  %v193_v26 = vpop.permute.xlu0 %192  ;;  %v642_v13 = vrot.slane %v576_v8, 7  ;;  %v771_v8 = vld [vmem:[%s15901_s0 + $0x8] sm:$0x7] }
  0x7f   :  { %302 = vst.msk [vmem:[#allocation2 + $0x34c] sm:$0xf] %vm49_vm8, %v219_v25  ;;  %463 = vrot.lane.b32.xlu1 %v401_v21, %s10512_s29  ;;  %v617_v21 = vrot.slane %v616_v16, 4 }
  0x80   :  { %288 = vst.msk [vmem:[#allocation2 + $0xc] sm:$0xf] %vm49_vm8, %v193_v26  ;;  %v568_v26 = vld [vmem:[%s15901_s0 + $0xc] sm:$0xf] }
  0x81   :  { %v197_v31 = vpop.permute.xlu1 %196  ;;  %v623_v29 = vrot.slane %v568_v26, 7 }
  0x82   :  { %291 = vst.msk [vmem:[#allocation2 + $0x14] sm:$0x3] %vm290_vm9, %v197_v31  ;;  %v569_v31 = vld [vmem:[%s15901_s0 + $0x10] sm:$0xf] }
  0x83   :  { %v624_v34 = vrot.slane %v623_v29, 4 }
  0x84   :  { %471 = vrot.lane.b32.xlu2 %v409_v28, %s10512_s29  ;;  %467 = vrot.lane.b32.xlu0 %v403_v24, %s10512_s29  ;;  %v619_v28 = vsel %vm10911_vm12, %v617_v21, %v618_v22  ;;  %v581_v21 = vld [vmem:[%s15901_s0 + $0x40] sm:$0xf]  ;;  %v579_v22 = vld [vmem:[%s15901_s0 + $0x38] sm:$0x7] }
  0x86   :  { %v225_v38 = vpop.permute.xlu2 %224  ;;  %v203_v39 = vpop.permute.xlu0 %202 }
  0x87   :  { %305 = vst.msk [vmem:[#allocation2 + $0x45c] sm:$0xf] %vm49_vm8, %v225_v38  ;;  %469 = vrot.lane.b32.xlu1 %v406_v35, %s10512_s29  ;;  %v625_v35 = vrot.slane %v569_v31, 7 }
  0x88   :  { %294 = vst.msk [vmem:[#allocation2 + $0x124] sm:$0xf] %vm49_vm8, %v203_v39 }
  0x89   :  { %v205_v42 = vpop.permute.xlu1 %204 }
  0x8a   :  { %295 = vst.msk [vmem:[#allocation2 + $0x128] sm:$0x3] %vm290_vm9, %v205_v42  ;;  %v622_v42 = vsel %vm10911_vm12, %v620_v36, %v621_v37  ;;  %v584_v36 = vld [vmem:[%s15901_s0 + $0x4c] sm:$0xf]  ;;  %v582_v37 = vld [vmem:[%s15901_s0 + $0x44] sm:$0x7] }
  0x8c   :  { %477 = vrot.lane.b32.xlu2 %v414_v41, %s10512_s29  ;;  %473 = vrot.lane.b32.xlu0 %v410_v40, %s10512_s29  ;;  %v571_v40 = vld [vmem:[%s15901_s0 + $0x18] sm:$0xf]  ;;  %v626_v41 = vsel %vm10911_vm12, %v624_v34, %v625_v35 }
  0x8d   :  { %v630_v43 = vrot.slane %v571_v40, 7 }
  0x8e   :  { %v231_v47 = vpop.permute.xlu2 %230  ;;  %v209_v48 = vpop.permute.xlu0 %208 }
  0x8f   :  { %308 = vst.msk [vmem:[#allocation2 + $0x56c] sm:$0x8] %vm286_vm7, %v231_v47  ;;  %475 = vrot.lane.b32.xlu1 %v411_v30, %s10512_s29  ;;  %v631_v47 = vrot.slane %v630_v43, 4 }
  0x90   :  { %297 = vst.msk [vmem:[#allocation2 + $0x234] sm:$0xf] %vm49_vm8, %v209_v48  ;;  %v632_v48 = vrot.slane %v572_v45, 7 }
  0x91   :  { %v211_v53 = vpop.permute.xlu1 %210 }
  0x92   :  { %298 = vst.msk [vmem:[#allocation2 + $0x238] sm:$0xf] %vm49_vm8, %v211_v53  ;;  %v574_v53 = vld [vmem:[%s15901_s0 + $0x24] sm:$0xf]  ;;  %v633_v54 = vsel %vm10911_vm12, %v631_v47, %v632_v48 }
  0x93   :  { %v637_v56 = vrot.slane %v574_v53, 7 }
  0x94   :  { %483 = vrot.lane.b32.xlu2 %v419_v49, %s10512_s29  ;;  %479 = vrot.lane.b32.xlu0 %v417_v51, %s10512_s29  ;;  %v627_v49 = vrot.slane %v625_v35, 4 }
  0x96   :  { %v237_v59 = vpop.permute.xlu2 %236  ;;  %v215_v60 = vpop.permute.xlu0 %214 }
  0x97   :  { %311 = vst.msk [vmem:[#allocation2 + $0x578] sm:$0x3] %vm290_vm9, %v237_v59  ;;  %481 = vrot.lane.b32.xlu1 %v418_v55, %s10512_s29  ;;  %v629_v55 = vsel %vm10911_vm12, %v627_v49, %v628_v50  ;;  %v573_v59 = vld [vmem:[%s15901_s0 + $0x20] sm:$0x7]  ;;  %v587_v49 = vld [vmem:[%s15901_s0 + $0x58] sm:$0xf] }
  0x98   :  { %300 = vst.msk [vmem:[#allocation2 + $0x344] sm:$0x8] %vm286_vm7, %v215_v60  ;;  %v638_v60 = vrot.slane %v637_v56, 4  ;;  %v585_v50 = vld [vmem:[%s15901_s0 + $0x50] sm:$0x7] }
  0x99   :  { %v217_v2 = vpop.permute.xlu1 %216 }
  0x9a   :  { %301 = vst.msk [vmem:[#allocation2 + $0x348] sm:$0xf] %vm49_vm8, %v217_v2  ;;  %v577_v2 = vld [vmem:[%s15901_s0 + $0x30] sm:$0xf]  ;;  %v640_v3 = vsel %vm10911_vm12, %v638_v60, %v639_v61  ;;  %v588_v60 = vld [vmem:[%s15901_s0 + $0x5c] sm:$0x7] }
  0x9b   :  { %v644_v5 = vrot.slane %v577_v2, 7 }
  0x9c   :  { %489 = vrot.lane.b32.xlu2 %v426_v62, %s10512_s29  ;;  %485 = vrot.lane.b32.xlu0 %v422_v63, %s10512_s29  ;;  %v634_v62 = vrot.slane %v632_v48, 4  ;;  %v635_v63 = vrot.slane %v573_v59, 7 }
  0x9e   :  { %v243_v11 = vpop.permute.xlu2 %242  ;;  %v221_v12 = vpop.permute.xlu0 %220  ;;  %v636_v4 = vsel %vm10911_vm12, %v634_v62, %v635_v63  ;;  %v670_v62 = vrot.slane %v588_v60, 7  ;;  %v915_v60 = vld [vmem:[%s15901_s0 + $0x8] sm:$0x7] }
  0x9f   :  { %314 = vst.msk [vmem:[#allocation2 + $0x688] sm:$0xf] %vm49_vm8, %v243_v11  ;;  %487 = vrot.lane.b32.xlu1 %v425_v6, %s10512_s29  ;;  %v646_v11 = vrot.slane %v578_v7, 7  ;;  %v773_v7 = vld [vmem:[%s15901_s0 + $0x10] sm:$0xf] }
  0xa0   :  { %303 = vst.msk [vmem:[#allocation2 + $0x350] sm:$0x3] %vm290_vm9, %v221_v12  ;;  %v641_v12 = vrot.slane %v639_v61, 4 }
  0xa1   :  { %v223_v17 = vpop.permute.xlu1 %222  ;;  %v648_v26 = vrot.slane %v646_v11, 4 }
  0xa2   :  { %304 = vst.msk [vmem:[#allocation2 + $0x458] sm:$0x8] %vm286_vm7, %v223_v17  ;;  %v643_v18 = vsel %vm10911_vm12, %v641_v12, %v642_v13 }
  0xa4   :  { %495 = vrot.lane.b32.xlu2 %v433_v14, %s10512_s29  ;;  %491 = vrot.lane.b32.xlu0 %v427_v10, %s10512_s29  ;;  %v645_v10 = vrot.slane %v644_v5, 4 }
  0xa6   :  { %v249_v23 = vpop.permute.xlu2 %248  ;;  %v227_v24 = vpop.permute.xlu0 %226  ;;  %v647_v17 = vsel %vm10911_vm12, %v645_v10, %v646_v11  ;;  %v772_v11 = vld [vmem:[%s15901_s0 + $0xc] sm:$0xf] }
  0xa7   :  { %317 = vst.msk [vmem:[#allocation2 + $0x798] sm:$0xf] %vm49_vm8, %v249_v23  ;;  %493 = vrot.lane.b32.xlu1 %v430_v20, %s10512_s29 }
  0xa8   :  { %306 = vst.msk [vmem:[#allocation2 + $0x460] sm:$0xf] %vm49_vm8, %v227_v24  ;;  %v653_v24 = vrot.slane %v581_v21, 7  ;;  %v777_v21 = vld [vmem:[%s15901_s0 + $0x20] sm:$0x7] }
  0xa9   :  { %v229_v30 = vpop.permute.xlu1 %228 }
  0xaa   :  { %307 = vst.msk [vmem:[#allocation2 + $0x464] sm:$0x3] %vm290_vm9, %v229_v30  ;;  %v583_v30 = vld [vmem:[%s15901_s0 + $0x48] sm:$0xf]  ;;  %v655_v40 = vrot.slane %v653_v24, 4 }
  0xab   :  { %v658_v34 = vrot.slane %v583_v30, 7  ;;  %v781_v30 = vld [vmem:[%s15901_s0 + $0x30] sm:$0xf] }
  0xac   :  { %674 = vrot.lane.b32.xlu2 %v619_v28, %s10513_s28  ;;  %497 = vrot.lane.b32.xlu0 %v434_v27, %s10512_s29  ;;  %v649_v27 = vrot.slane %v579_v22, 7  ;;  %s10531_s29 = smov 108  }
  0xae   :  { %v436_v38 = vpop.permute.xlu2 %435  ;;  %v233_v39 = vpop.permute.xlu0 %232  ;;  %v650_v32 = vsel %vm10911_vm12, %v648_v26, %v649_v27  ;;  %v782_v27 = vld [vmem:[%s15901_s0 + $0x34] sm:$0xf] }
  0xaf   :  { %532 = vst.msk [vmem:[#allocation2 + $0x14] sm:$0xc] %vm531_vm13, %v436_v38  ;;  %672 = vrot.lane.b32.xlu1 %v616_v16, %s10513_s28  ;;  %v580_v16 = vld [vmem:[%s15901_s0 + $0x3c] sm:$0xf]  ;;  %v659_v38 = vrot.slane %v658_v34, 4 }
  0xb0   :  { %309 = vst.msk [vmem:[#allocation2 + $0x570] sm:$0xf] %vm49_vm8, %v233_v39  ;;  %v651_v19 = vrot.slane %v580_v16, 7  ;;  %v660_v39 = vrot.slane %v584_v36, 7 }
  0xb1   :  { %v235_v44 = vpop.permute.xlu1 %234 }
  0xb2   :  { %310 = vst.msk [vmem:[#allocation2 + $0x574] sm:$0xf] %vm49_vm8, %v235_v44  ;;  %v652_v23 = vrot.slane %v651_v19, 4  ;;  %v586_v44 = vld [vmem:[%s15901_s0 + $0x54] sm:$0xf]  ;;  %v661_v45 = vsel %vm10911_vm12, %v659_v38, %v660_v39  ;;  %v662_v53 = vrot.slane %v660_v39, 4 }
  0xb3   :  { %v665_v47 = vrot.slane %v586_v44, 7 }
  0xb4   :  { %680 = vrot.lane.b32.xlu2 %v626_v41, %s10513_s28  ;;  %676 = vrot.lane.b32.xlu0 %v622_v42, %s10513_s28  ;;  %v654_v31 = vsel %vm10911_vm12, %v652_v23, %v653_v24  ;;  %v656_v41 = vrot.slane %v582_v37, 7  ;;  %v778_v23 = vld [vmem:[%s15901_s0 + $0x24] sm:$0xf]  ;;  %v784_v37 = vld [vmem:[%s15901_s0 + $0x3c] sm:$0xf] }
  0xb6   :  { %v442_v51 = vpop.permute.xlu2 %441  ;;  %v239_v52 = vpop.permute.xlu0 %238  ;;  %v657_v46 = vsel %vm10911_vm12, %v655_v40, %v656_v41  ;;  %v788_v40 = vld [vmem:[%s15901_s0 + $0x4c] sm:$0xf]  ;;  %v786_v41 = vld [vmem:[%s15901_s0 + $0x44] sm:$0x7] }
  0xb7   :  { %536 = vst.msk [vmem:[#allocation2 + $0x20] sm:$0x1] %vm535_vm14, %v442_v51  ;;  %678 = vrot.lane.b32.xlu1 %v623_v29, %s10513_s28  ;;  %v666_v51 = vrot.slane %v665_v47, 4 }
  0xb8   :  { %312 = vst.msk [vmem:[#allocation2 + $0x680] sm:$0x8] %vm286_vm7, %v239_v52  ;;  %v667_v52 = vrot.slane %v587_v49, 7 }
  0xb9   :  { %v241_v57 = vpop.permute.xlu1 %240 }
  0xba   :  { %313 = vst.msk [vmem:[#allocation2 + $0x684] sm:$0xf] %vm49_vm8, %v241_v57  ;;  %v668_v57 = vsel %vm10911_vm12, %v666_v51, %v667_v52  ;;  %v669_v61 = vrot.slane %v667_v52, 4  ;;  %v914_v51 = vld [vmem:[%s15901_s0 + $0x4] sm:$0xf] }
  0xbb   :  { %v790_v52 = vld [vmem:[%s15901_s0 + $0x54] sm:$0xf] }
  0xbc   :  { %686 = vrot.lane.b32.xlu2 %v633_v54, %s10513_s28  ;;  %682 = vrot.lane.b32.xlu0 %v629_v55, %s10513_s28  ;;  %v663_v54 = vrot.slane %v585_v50, 7  ;;  %v671_v2 = vsel %vm10911_vm12, %v669_v61, %v670_v62  ;;  %v916_v61 = vld [vmem:[%s15901_s0 + $0xc] sm:$0xf] }
  0xbe   :  { %v448_v0 = vpop.permute.xlu2 %447  ;;  %v245_v1 = vpop.permute.xlu0 %244  ;;  %v664_v58 = vsel %vm10911_vm12, %v662_v53, %v663_v54  ;;  %v963_v54 = vrot.slane %v914_v51, 5 }
  0xbf   :  { %539 = vst.msk [vmem:[#allocation2 + $0x130] sm:$0xf] %vm49_vm8, %v448_v0  ;;  %684 = vrot.lane.b32.xlu1 %v630_v43, %s10513_s28 }
  0xc0   :  { %315 = vst.msk [vmem:[#allocation2 + $0x68c] sm:$0x3] %vm290_vm9, %v245_v1  ;;  %v770_v1 = vld [vmem:[%s15901_s0 + $0x4] sm:$0xf]  ;;  %v965_v62 = vrot.slane %v963_v54, 4 }
  0xc1   :  { %v247_v6 = vpop.permute.xlu1 %246 }
  0xc2   :  { %316 = vst.msk [vmem:[#allocation2 + $0x794] sm:$0x8] %vm286_vm7, %v247_v6 }
  0xc4   :  { %692 = vrot.lane.b32.xlu2 %v640_v3, %s10513_s28  ;;  %688 = vrot.lane.b32.xlu0 %v636_v4, %s10513_s28  ;;  %v769_v4 = vld [vmem:[%s15901_s0] sm:$0xf] }
  0xc6   :  { %v454_v14 = vpop.permute.xlu2 %453  ;;  %v251_v15 = vpop.permute.xlu0 %250 }
  0xc7   :  { %542 = vst.msk [vmem:[#allocation2 + $0x240] sm:$0xf] %vm49_vm8, %v454_v14  ;;  %690 = vrot.lane.b32.xlu1 %v637_v56, %s10513_s28  ;;  %v776_v14 = vld [vmem:[%s15901_s0 + $0x1c] sm:$0xf] }
  0xc8   :  { %318 = vst.msk [vmem:[#allocation2 + $0x79c] sm:$0xf] %vm49_vm8, %v251_v15  ;;  %v774_v15 = vld [vmem:[%s15901_s0 + $0x14] sm:$0x7] }
  0xc9   :  { %v253_v20 = vpop.permute.xlu1 %252 }
  0xca   :  { %319 = vst.msk [vmem:[#allocation2 + $0x7a0] sm:$0x3] %vm290_vm9, %v253_v20  ;;  %v779_v20 = vld [vmem:[%s15901_s0 + $0x28] sm:$0xf] }
  0xcc   :  { %698 = vrot.lane.b32.xlu2 %v647_v17, %s10513_s28  ;;  %694 = vrot.lane.b32.xlu0 %v643_v18, %s10513_s28  ;;  %v775_v17 = vld [vmem:[%s15901_s0 + $0x18] sm:$0xf] }
  0xce   :  { %v460_v28 = vpop.permute.xlu2 %459  ;;  %v438_v29 = vpop.permute.xlu0 %437 }
  0xcf   :  { %545 = vst.msk [vmem:[#allocation2 + $0x350] sm:$0xc] %vm531_vm13, %v460_v28  ;;  %696 = vrot.lane.b32.xlu1 %v644_v5, %s10513_s28  ;;  %v780_v28 = vld [vmem:[%s15901_s0 + $0x2c] sm:$0x7] }
  0xd0   :  { %533 = vst.msk [vmem:[#allocation2 + $0x18] sm:$0xf] %vm49_vm8, %v438_v29 }
  0xd1   :  { %v440_v35 = vpop.permute.xlu1 %439 }
  0xd2   :  { %534 = vst.msk [vmem:[#allocation2 + $0x1c] sm:$0xf] %vm49_vm8, %v440_v35  ;;  %v783_v35 = vld [vmem:[%s15901_s0 + $0x38] sm:$0x7] }
  0xd4   :  { %704 = vrot.lane.b32.xlu2 %v654_v31, %s10513_s28  ;;  %700 = vrot.lane.b32.xlu0 %v650_v32, %s10513_s28 }
  0xd6   :  { %v466_v42 = vpop.permute.xlu2 %465  ;;  %v444_v43 = vpop.permute.xlu0 %443 }
  0xd7   :  { %548 = vst.msk [vmem:[#allocation2 + $0x35c] sm:$0x1] %vm535_vm14, %v466_v42  ;;  %702 = vrot.lane.b32.xlu1 %v651_v19, %s10513_s28 }
  0xd8   :  { %537 = vst.msk [vmem:[#allocation2 + $0x128] sm:$0xc] %vm531_vm13, %v444_v43  ;;  %v787_v43 = vld [vmem:[%s15901_s0 + $0x48] sm:$0xf] }
  0xd9   :  { %v446_v48 = vpop.permute.xlu1 %445 }
  0xda   :  { %538 = vst.msk [vmem:[#allocation2 + $0x12c] sm:$0xf] %vm49_vm8, %v446_v48  ;;  %v789_v48 = vld [vmem:[%s15901_s0 + $0x50] sm:$0x7] }
  0xdc   :  { %710 = vrot.lane.b32.xlu2 %v661_v45, %s10513_s28  ;;  %706 = vrot.lane.b32.xlu0 %v657_v46, %s10513_s28  ;;  %v913_v46 = vld [vmem:[%s15901_s0] sm:$0xf] }
  0xdd   :  { %v961_v49 = vrot.slane %v913_v46, 5 }
  0xde   :  { %v472_v55 = vpop.permute.xlu2 %471  ;;  %v450_v56 = vpop.permute.xlu0 %449 }
  0xdf   :  { %551 = vst.msk [vmem:[#allocation2 + $0x46c] sm:$0xf] %vm49_vm8, %v472_v55  ;;  %708 = vrot.lane.b32.xlu1 %v658_v34, %s10513_s28  ;;  %v785_v34 = vld [vmem:[%s15901_s0 + $0x40] sm:$0xf]  ;;  %v962_v53 = vrot.slane %v961_v49, 4 }
  0xe0   :  { %540 = vst.msk [vmem:[#allocation2 + $0x134] sm:$0x1] %vm535_vm14, %v450_v56 }
  0xe1   :  { %v452_v59 = vpop.permute.xlu1 %451 }
  0xe2   :  { %541 = vst.msk [vmem:[#allocation2 + $0x23c] sm:$0xc] %vm531_vm13, %v452_v59 }
  0xe4   :  { %716 = vrot.lane.b32.xlu2 %v668_v57, %s10513_s28  ;;  %712 = vrot.lane.b32.xlu0 %v664_v58, %s10513_s28  ;;  %v964_v57 = vsel %vm10590_vm2, %v962_v53, %v963_v54  ;;  %v792_v58 = vld [vmem:[%s15901_s0 + $0x5c] sm:$0x7]  ;;  %v926_v54 = vld [vmem:[%s15901_s0 + $0x34] sm:$0xf] }
  0xe6   :  { %v478_v63 = vpop.permute.xlu2 %477  ;;  %v456_v0 = vpop.permute.xlu0 %455 }
  0xe7   :  { %554 = vst.msk [vmem:[#allocation2 + $0x57c] sm:$0xf] %vm49_vm8, %v478_v63  ;;  %714 = vrot.lane.b32.xlu1 %v665_v47, %s10513_s28  ;;  %v791_v47 = vld [vmem:[%s15901_s0 + $0x58] sm:$0xf]  ;;  %v966_v63 = vrot.slane %v915_v60, 5 }
  0xe8   :  { %543 = vst.msk [vmem:[#allocation2 + $0x244] sm:$0xf] %vm49_vm8, %v456_v0 }
  0xe9   :  { %v458_v3 = vpop.permute.xlu1 %457 }
  0xea   :  { %544 = vst.msk [vmem:[#allocation2 + $0x248] sm:$0x1] %vm535_vm14, %v458_v3  ;;  %v967_v3 = vsel %vm10590_vm2, %v965_v62, %v966_v63 }
  0xec   :  { %819 = vrot.lane.b32.xlu2 %v770_v1, %s10514_s22  ;;  %718 = vrot.lane.b32.xlu0 %v671_v2, %s10513_s28  ;;  %s10515_s28 = smov 123   ;;  %v969_v2 = vrot.slane %v916_v61, 5  ;;  %v929_v61 = vld [vmem:[%s15901_s0 + $0x40] sm:$0xf] }
  0xee   :  { %v484_v5 = vpop.permute.xlu2 %483  ;;  %v462_v6 = vpop.permute.xlu0 %461 }
  0xef   :  { %557 = vst.msk [vmem:[#allocation2 + $0x68c] sm:$0xc] %vm531_vm13, %v484_v5  ;;  %817 = vrot.lane.b32.xlu1 %v769_v4, %s10514_s22  ;;  %v918_v4 = vld [vmem:[%s15901_s0 + $0x14] sm:$0x7] }
  0xf0   :  { %546 = vst.msk [vmem:[#allocation2 + $0x354] sm:$0xf] %vm49_vm8, %v462_v6  ;;  %v917_v6 = vld [vmem:[%s15901_s0 + $0x10] sm:$0xf] }
  0xf1   :  { %v464_v10 = vpop.permute.xlu1 %463 }
  0xf2   :  { %547 = vst.msk [vmem:[#allocation2 + $0x358] sm:$0xf] %vm49_vm8, %v464_v10  ;;  %v970_v10 = vrot.slane %v969_v2, 4 }
  0xf4   :  { %825 = vrot.lane.b32.xlu2 %v773_v7, %s10514_s22  ;;  %821 = vrot.lane.b32.xlu0 %v771_v8, %s10514_s22  ;;  %v968_v7 = vrot.slane %v966_v63, 4  ;;  %v974_v8 = vrot.slane %v918_v4, 5  ;;  %v928_v4 = vld [vmem:[%s15901_s0 + $0x3c] sm:$0xf] }
  0xf6   :  { %v490_v12 = vpop.permute.xlu2 %489  ;;  %v468_v13 = vpop.permute.xlu0 %467 }
  0xf7   :  { %560 = vst.msk [vmem:[#allocation2 + $0x698] sm:$0x1] %vm535_vm14, %v490_v12  ;;  %823 = vrot.lane.b32.xlu1 %v772_v11, %s10514_s22  ;;  %v971_v11 = vrot.slane %v917_v6, 5 }
  0xf8   :  { %549 = vst.msk [vmem:[#allocation2 + $0x464] sm:$0xc] %vm531_vm13, %v468_v13 }
  0xf9   :  { %v470_v16 = vpop.permute.xlu1 %469 }
  0xfa   :  { %550 = vst.msk [vmem:[#allocation2 + $0x468] sm:$0xf] %vm49_vm8, %v470_v16  ;;  %v972_v16 = vsel %vm10590_vm2, %v970_v10, %v971_v11 }
  0xfc   :  { %831 = vrot.lane.b32.xlu2 %v776_v14, %s10514_s22  ;;  %827 = vrot.lane.b32.xlu0 %v774_v15, %s10514_s22  ;;  %v920_v14 = vld [vmem:[%s15901_s0 + $0x1c] sm:$0xf]  ;;  %v976_v15 = vrot.slane %v974_v8, 4 }
  0xfe   :  { %v496_v18 = vpop.permute.xlu2 %495  ;;  %v474_v19 = vpop.permute.xlu0 %473 }
  0xff   :  { %563 = vst.msk [vmem:[#allocation2 + $0x7a8] sm:$0xf] %vm49_vm8, %v496_v18  ;;  %829 = vrot.lane.b32.xlu1 %v775_v17, %s10514_s22  ;;  %v973_v17 = vrot.slane %v971_v11, 4  ;;  %v979_v18 = vrot.slane %v920_v14, 5 }
 0x100   :  { %552 = vst.msk [vmem:[#allocation2 + $0x470] sm:$0x1] %vm535_vm14, %v474_v19 }
 0x101   :  { %v476_v22 = vpop.permute.xlu1 %475 }
 0x102   :  { %553 = vst.msk [vmem:[#allocation2 + $0x578] sm:$0xc] %vm531_vm13, %v476_v22  ;;  %v975_v22 = vsel %vm10590_vm2, %v973_v17, %v974_v8  ;;  %v1001_v8 = vrot.slane %v928_v4, 5  ;;  %v932_v17 = vld [vmem:[%s15901_s0 + $0x4c] sm:$0xf] }
 0x104   :  { %837 = vrot.lane.b32.xlu2 %v779_v20, %s10514_s22  ;;  %833 = vrot.lane.b32.xlu0 %v777_v21, %s10514_s22  ;;  %v921_v20 = vld [vmem:[%s15901_s0 + $0x20] sm:$0x7]  ;;  %v919_v21 = vld [vmem:[%s15901_s0 + $0x18] sm:$0xf]  ;;  %v1002_v14 = vrot.slane %v1001_v8, 4 }
 0x106   :  { %v675_v24 = vpop.permute.xlu2 %674  ;;  %v480_v26 = vpop.permute.xlu0 %479 }
 0x107   :  { %746 = vst.msk [vmem:[#allocation2 + $0x24] sm:$0xf] %vm49_vm8, %v675_v24  ;;  %835 = vrot.lane.b32.xlu1 %v778_v23, %s10514_s22  ;;  %v981_v23 = vrot.slane %v979_v18, 4  ;;  %v982_v24 = vrot.slane %v921_v20, 5  ;;  %v1011_v20 = vrot.slane %v932_v17, 5 }
 0x108   :  { %555 = vst.msk [vmem:[#allocation2 + $0x580] sm:$0xf] %vm49_vm8, %v480_v26  ;;  %v977_v26 = vrot.slane %v919_v21, 5 }
 0x109   :  { %v482_v29 = vpop.permute.xlu1 %481 }
 0x10a   :  { %556 = vst.msk [vmem:[#allocation2 + $0x584] sm:$0x1] %vm535_vm14, %v482_v29  ;;  %v922_v29 = vld [vmem:[%s15901_s0 + $0x24] sm:$0xf] }
 0x10c   :  { %843 = vrot.lane.b32.xlu2 %v782_v27, %s10514_s22  ;;  %839 = vrot.lane.b32.xlu0 %v780_v28, %s10514_s22 }
 0x10e   :  { %v681_v31 = vpop.permute.xlu2 %680  ;;  %v486_v32 = vpop.permute.xlu0 %485 }
 0x10f   :  { %749 = vst.msk [vmem:[#allocation2 + $0x138] sm:$0xf] %vm49_vm8, %v681_v31  ;;  %841 = vrot.lane.b32.xlu1 %v781_v30, %s10514_s22  ;;  %v983_v30 = vsel %vm10590_vm2, %v981_v23, %v982_v24  ;;  %v978_v31 = vrot.slane %v977_v26, 4 }
 0x110   :  { %558 = vst.msk [vmem:[#allocation2 + $0x690] sm:$0xf] %vm49_vm8, %v486_v32  ;;  %v985_v32 = vrot.slane %v922_v29, 5  ;;  %v1013_v29 = vrot.slane %v1011_v20, 4 }
 0x111   :  { %v488_v36 = vpop.permute.xlu1 %487 }
 0x112   :  { %559 = vst.msk [vmem:[#allocation2 + $0x694] sm:$0xf] %vm49_vm8, %v488_v36  ;;  %v980_v36 = vsel %vm10590_vm2, %v978_v31, %v979_v18 }
 0x114   :  { %849 = vrot.lane.b32.xlu2 %v785_v34, %s10514_s22  ;;  %845 = vrot.lane.b32.xlu0 %v783_v35, %s10514_s22  ;;  %v923_v35 = vld [vmem:[%s15901_s0 + $0x28] sm:$0xf] }
 0x116   :  { %v687_v38 = vpop.permute.xlu2 %686  ;;  %v492_v39 = vpop.permute.xlu0 %491 }
 0x117   :  { %752 = vst.msk [vmem:[#allocation2 + $0x24c] sm:$0xf] %vm49_vm8, %v687_v38  ;;  %847 = vrot.lane.b32.xlu1 %v784_v37, %s10514_s22  ;;  %v986_v37 = vrot.slane %v985_v32, 4  ;;  %v987_v38 = vrot.slane %v923_v35, 5 }
 0x118   :  { %561 = vst.msk [vmem:[#allocation2 + $0x7a0] sm:$0xc] %vm531_vm13, %v492_v39 }
 0x119   :  { %v494_v42 = vpop.permute.xlu1 %493  ;;  %v989_v46 = vrot.slane %v987_v38, 4 }
 0x11a   :  { %562 = vst.msk [vmem:[#allocation2 + $0x7a4] sm:$0xf] %vm49_vm8, %v494_v42  ;;  %v988_v42 = vsel %vm10590_vm2, %v986_v37, %v987_v38  ;;  %v935_v38 = vld [vmem:[%s15901_s0 + $0x58] sm:$0xf] }
 0x11c   :  { %855 = vrot.lane.b32.xlu2 %v788_v40, %s10514_s22  ;;  %851 = vrot.lane.b32.xlu0 %v786_v41, %s10514_s22  ;;  %v984_v41 = vrot.slane %v982_v24, 4 }
 0x11e   :  { %v693_v44 = vpop.permute.xlu2 %692  ;;  %v498_v45 = vpop.permute.xlu0 %497 }
 0x11f   :  { %755 = vst.msk [vmem:[#allocation2 + $0x360] sm:$0xf] %vm49_vm8, %v693_v44  ;;  %853 = vrot.lane.b32.xlu1 %v787_v43, %s10514_s22  ;;  %v924_v44 = vld [vmem:[%s15901_s0 + $0x2c] sm:$0x7] }
 0x120   :  { %564 = vst.msk [vmem:[#allocation2 + $0x7ac] sm:$0x1] %vm535_vm14, %v498_v45  ;;  %v925_v45 = vld [vmem:[%s15901_s0 + $0x30] sm:$0xf] }
 0x121   :  { %v673_v50 = vpop.permute.xlu1 %672 }
 0x122   :  { %745 = vst.msk [vmem:[#allocation2 + $0x20] sm:$0xe] %vm744_vm15, %v673_v50  ;;  %v993_v50 = vrot.slane %v925_v45, 5  ;;  %v1154_v45 = vld [vmem:[%s15901_s0 + $0x4] sm:$0xf] }
 0x124   :  { %861 = vrot.lane.b32.xlu2 %v791_v47, %s10514_s22  ;;  %857 = vrot.lane.b32.xlu0 %v789_v48, %s10514_s22  ;;  %v990_v47 = vrot.slane %v924_v44, 5 }
 0x126   :  { %v699_v55 = vpop.permute.xlu2 %698  ;;  %v677_v56 = vpop.permute.xlu0 %676  ;;  %v991_v51 = vsel %vm10590_vm2, %v989_v46, %v990_v47 }
 0x127   :  { %758 = vst.msk [vmem:[#allocation2 + $0x474] sm:$0xf] %vm49_vm8, %v699_v55  ;;  %859 = vrot.lane.b32.xlu1 %v790_v52, %s10514_s22  ;;  %v927_v52 = vld [vmem:[%s15901_s0 + $0x38] sm:$0x7]  ;;  %v992_v55 = vrot.slane %v990_v47, 4 }
 0x128   :  { %747 = vst.msk [vmem:[#allocation2 + $0x28] sm:$0xf] %vm49_vm8, %v677_v56  ;;  %v998_v56 = vrot.slane %v927_v52, 5  ;;  %v1153_v52 = vld [vmem:[%s15901_s0] sm:$0xf] }
 0x129   :  { %v679_v59 = vpop.permute.xlu1 %678 }
 0x12a   :  { %748 = vst.msk [vmem:[#allocation2 + $0x134] sm:$0xe] %vm744_vm15, %v679_v59  ;;  %v1000_v62 = vrot.slane %v998_v56, 4 }
 0x12c   :  { %1027 = vrot.lane.b32.xlu2 %v964_v57, %s10515_s28  ;;  %863 = vrot.lane.b32.xlu0 %v792_v58, %s10514_s22  ;;  %v994_v57 = vrot.slane %v993_v50, 4  ;;  %v995_v58 = vrot.slane %v926_v54, 5  ;;  %s10518_s22 = smov 120  }
 0x12e   :  { %v705_v0 = vpop.permute.xlu2 %704  ;;  %v683_v1 = vpop.permute.xlu0 %682  ;;  %v996_v63 = vsel %vm10590_vm2, %v994_v57, %v995_v58 }
 0x12f   :  { %761 = vst.msk [vmem:[#allocation2 + $0x588] sm:$0xf] %vm49_vm8, %v705_v0  ;;  %1025 = vrot.lane.b32.xlu1 %v961_v49, %s10515_s28  ;;  %v997_v0 = vrot.slane %v995_v58, 4 }
 0x130   :  { %750 = vst.msk [vmem:[#allocation2 + $0x13c] sm:$0xf] %vm49_vm8, %v683_v1  ;;  %v1003_v1 = vrot.slane %v929_v61, 5 }
 0x131   :  { %v685_v5 = vpop.permute.xlu1 %684 }
 0x132   :  { %751 = vst.msk [vmem:[#allocation2 + $0x248] sm:$0xe] %vm744_vm15, %v685_v5  ;;  %v999_v5 = vsel %vm10590_vm2, %v997_v0, %v998_v56  ;;  %v1005_v6 = vrot.slane %v1003_v1, 4  ;;  %v1004_v18 = vsel %vm10590_vm2, %v1002_v14, %v1003_v1  ;;  %v1201_v56 = vrot.slane %v1153_v52, 6  ;;  %v1157_v0 = vld [vmem:[%s15901_s0 + $0x10] sm:$0xf] }
 0x134   :  { %1033 = vrot.lane.b32.xlu2 %v969_v2, %s10515_s28  ;;  %1029 = vrot.lane.b32.xlu0 %v967_v3, %s10515_s28  ;;  %v930_v3 = vld [vmem:[%s15901_s0 + $0x44] sm:$0x7]  ;;  %v1202_v61 = vrot.slane %v1201_v56, 4 }
 0x136   :  { %v711_v12 = vpop.permute.xlu2 %710  ;;  %v689_v13 = vpop.permute.xlu0 %688 }
 0x137   :  { %764 = vst.msk [vmem:[#allocation2 + $0x69c] sm:$0xf] %vm49_vm8, %v711_v12  ;;  %1031 = vrot.lane.b32.xlu1 %v968_v7, %s10515_s28  ;;  %v1006_v7 = vrot.slane %v930_v3, 5  ;;  %v931_v12 = vld [vmem:[%s15901_s0 + $0x48] sm:$0xf]  ;;  %v1211_v3 = vrot.slane %v1157_v0, 6 }
 0x138   :  { %753 = vst.msk [vmem:[#allocation2 + $0x250] sm:$0xf] %vm49_vm8, %v689_v13 }
 0x139   :  { %v691_v19 = vpop.permute.xlu1 %690  ;;  %v1007_v13 = vsel %vm10590_vm2, %v1005_v6, %v1006_v7  ;;  %v1008_v23 = vrot.slane %v1006_v7, 4 }
 0x13a   :  { %754 = vst.msk [vmem:[#allocation2 + $0x35c] sm:$0xe] %vm744_vm15, %v691_v19 }
 0x13c   :  { %1039 = vrot.lane.b32.xlu2 %v976_v15, %s10515_s28  ;;  %1035 = vrot.lane.b32.xlu0 %v972_v16, %s10515_s28  ;;  %v1009_v15 = vrot.slane %v931_v12, 5  ;;  %v1213_v12 = vrot.slane %v1211_v3, 4 }
 0x13e   :  { %v717_v27 = vpop.permute.xlu2 %716  ;;  %v695_v28 = vpop.permute.xlu0 %694  ;;  %v1010_v19 = vrot.slane %v1009_v15, 4 }
 0x13f   :  { %767 = vst.msk [vmem:[#allocation2 + $0x7b0] sm:$0xf] %vm49_vm8, %v717_v27  ;;  %1037 = vrot.lane.b32.xlu1 %v975_v22, %s10515_s28  ;;  %v933_v27 = vld [vmem:[%s15901_s0 + $0x50] sm:$0x7] }
 0x140   :  { %756 = vst.msk [vmem:[#allocation2 + $0x364] sm:$0xf] %vm49_vm8, %v695_v28  ;;  %v1012_v24 = vsel %vm10590_vm2, %v1010_v19, %v1011_v20  ;;  %v934_v28 = vld [vmem:[%s15901_s0 + $0x54] sm:$0xf]  ;;  %v1160_v20 = vld [vmem:[%s15901_s0 + $0x1c] sm:$0xf] }
 0x141   :  { %v697_v34 = vpop.permute.xlu1 %696 }
 0x142   :  { %757 = vst.msk [vmem:[#allocation2 + $0x470] sm:$0xe] %vm744_vm15, %v697_v34  ;;  %v1017_v34 = vrot.slane %v934_v28, 5  ;;  %v1163_v28 = vld [vmem:[%s15901_s0 + $0x28] sm:$0xf] }
 0x144   :  { %1045 = vrot.lane.b32.xlu2 %v983_v30, %s10515_s28  ;;  %1041 = vrot.lane.b32.xlu0 %v977_v26, %s10515_s28  ;;  %v1014_v30 = vrot.slane %v933_v27, 5 }
 0x146   :  { %v820_v39 = vpop.permute.xlu2 %819  ;;  %v701_v40 = vpop.permute.xlu0 %700  ;;  %v1015_v35 = vsel %vm10590_vm2, %v1013_v29, %v1014_v30 }
 0x147   :  { %890 = vst.msk [vmem:[#allocation2 + $0x30] sm:$0xf] %vm49_vm8, %v820_v39  ;;  %1043 = vrot.lane.b32.xlu1 %v980_v36, %s10515_s28  ;;  %v936_v36 = vld [vmem:[%s15901_s0 + $0x5c] sm:$0x7]  ;;  %v1016_v39 = vrot.slane %v1014_v30, 4 }
 0x148   :  { %759 = vst.msk [vmem:[#allocation2 + $0x478] sm:$0xf] %vm49_vm8, %v701_v40  ;;  %v1022_v40 = vrot.slane %v936_v36, 5  ;;  %v1162_v36 = vld [vmem:[%s15901_s0 + $0x24] sm:$0xf] }
 0x149   :  { %v703_v43 = vpop.permute.xlu1 %702 }
 0x14a   :  { %760 = vst.msk [vmem:[#allocation2 + $0x584] sm:$0xe] %vm744_vm15, %v703_v43  ;;  %v1024_v46 = vrot.slane %v1022_v40, 4 }
 0x14c   :  { %1051 = vrot.lane.b32.xlu2 %v988_v42, %s10515_s28  ;;  %1047 = vrot.lane.b32.xlu0 %v984_v41, %s10515_s28  ;;  %v1018_v41 = vrot.slane %v1017_v34, 4  ;;  %v1019_v42 = vrot.slane %v935_v38, 5 }
 0x14e   :  { %v826_v48 = vpop.permute.xlu2 %825  ;;  %v707_v49 = vpop.permute.xlu0 %706  ;;  %v1020_v47 = vsel %vm10590_vm2, %v1018_v41, %v1019_v42 }
 0x14f   :  { %893 = vst.msk [vmem:[#allocation2 + $0x144] sm:$0xf] %vm49_vm8, %v826_v48  ;;  %1049 = vrot.lane.b32.xlu1 %v985_v32, %s10515_s28  ;;  %v1021_v48 = vrot.slane %v1019_v42, 4 }
 0x150   :  { %762 = vst.msk [vmem:[#allocation2 + $0x58c] sm:$0xf] %vm49_vm8, %v707_v49  ;;  %v1203_v49 = vrot.slane %v1154_v45, 6 }
 0x151   :  { %v709_v53 = vpop.permute.xlu1 %708 }
 0x152   :  { %763 = vst.msk [vmem:[#allocation2 + $0x698] sm:$0xe] %vm744_vm15, %v709_v53  ;;  %v1023_v53 = vsel %vm10590_vm2, %v1021_v48, %v1022_v40  ;;  %v1205_v54 = vrot.slane %v1203_v49, 4  ;;  %v1204_v1 = vsel %vm10722_vm5, %v1202_v61, %v1203_v49  ;;  %v1225_v40 = vrot.slane %v1162_v36, 6  ;;  %v1166_v48 = vld [vmem:[%s15901_s0 + $0x34] sm:$0xf] }
 0x154   :  { %1057 = vrot.lane.b32.xlu2 %v993_v50, %s10515_s28  ;;  %1053 = vrot.lane.b32.xlu0 %v991_v51, %s10515_s28  ;;  %v1155_v51 = vld [vmem:[%s15901_s0 + $0x8] sm:$0x7]  ;;  %v1226_v45 = vrot.slane %v1225_v40, 4 }
 0x156   :  { %v832_v59 = vpop.permute.xlu2 %831  ;;  %v713_v60 = vpop.permute.xlu0 %712 }
 0x157   :  { %896 = vst.msk [vmem:[#allocation2 + $0x258] sm:$0xf] %vm49_vm8, %v832_v59  ;;  %1055 = vrot.lane.b32.xlu1 %v992_v55, %s10515_s28  ;;  %v1206_v55 = vrot.slane %v1155_v51, 6  ;;  %v1156_v59 = vld [vmem:[%s15901_s0 + $0xc] sm:$0xf]  ;;  %v1235_v51 = vrot.slane %v1166_v48, 6 }
 0x158   :  { %765 = vst.msk [vmem:[#allocation2 + $0x6a0] sm:$0xf] %vm49_vm8, %v713_v60  ;;  %v1176_v48 = vld [vmem:[%s15901_s0 + $0x5c] sm:$0x7] }
 0x159   :  { %v715_v2 = vpop.permute.xlu1 %714  ;;  %v1207_v60 = vsel %vm10722_vm5, %v1205_v54, %v1206_v55  ;;  %v1208_v6 = vrot.slane %v1206_v55, 4 }
 0x15a   :  { %766 = vst.msk [vmem:[#allocation2 + $0x7ac] sm:$0xe] %vm744_vm15, %v715_v2 }
 0x15c   :  { %1063 = vrot.lane.b32.xlu2 %v1000_v62, %s10515_s28  ;;  %1059 = vrot.lane.b32.xlu0 %v996_v63, %s10515_s28  ;;  %v1209_v62 = vrot.slane %v1156_v59, 6  ;;  %v1237_v59 = vrot.slane %v1235_v51, 4 }
 0x15e   :  { %v838_v10 = vpop.permute.xlu2 %837  ;;  %v719_v11 = vpop.permute.xlu0 %718  ;;  %v1210_v2 = vrot.slane %v1209_v62, 4 }
 0x15f   :  { %899 = vst.msk [vmem:[#allocation2 + $0x36c] sm:$0xf] %vm49_vm8, %v838_v10  ;;  %1061 = vrot.lane.b32.xlu1 %v999_v5, %s10515_s28  ;;  %v1158_v10 = vld [vmem:[%s15901_s0 + $0x14] sm:$0x7] }
 0x160   :  { %768 = vst.msk [vmem:[#allocation2 + $0x7b4] sm:$0xf] %vm49_vm8, %v719_v11  ;;  %v1212_v7 = vsel %vm10722_vm5, %v1210_v2, %v1211_v3  ;;  %v1159_v11 = vld [vmem:[%s15901_s0 + $0x18] sm:$0xf]  ;;  %v1170_v2 = vld [vmem:[%s15901_s0 + $0x44] sm:$0x7] }
 0x161   :  { %v818_v16 = vpop.permute.xlu1 %817 }
 0x162   :  { %889 = vst.msk [vmem:[#allocation2 + $0x2c] sm:$0xf] %vm49_vm8, %v818_v16  ;;  %v1217_v16 = vrot.slane %v1159_v11, 6 }
 0x164   :  { %1069 = vrot.lane.b32.xlu2 %v1007_v13, %s10515_s28  ;;  %1065 = vrot.lane.b32.xlu0 %v1001_v8, %s10515_s28  ;;  %v1214_v13 = vrot.slane %v1158_v10, 6 }
 0x166   :  { %v844_v21 = vpop.permute.xlu2 %843  ;;  %v822_v22 = vpop.permute.xlu0 %821  ;;  %v1215_v17 = vsel %vm10722_vm5, %v1213_v12, %v1214_v13 }
 0x167   :  { %902 = vst.msk [vmem:[#allocation2 + $0x480] sm:$0xf] %vm49_vm8, %v844_v21  ;;  %1067 = vrot.lane.b32.xlu1 %v1004_v18, %s10515_s28  ;;  %v1161_v18 = vld [vmem:[%s15901_s0 + $0x20] sm:$0x7]  ;;  %v1216_v21 = vrot.slane %v1214_v13, 4 }
 0x168   :  { %891 = vst.msk [vmem:[#allocation2 + $0x34] sm:$0x7] %vm52_vm6, %v822_v22  ;;  %v1222_v22 = vrot.slane %v1161_v18, 6  ;;  %v1172_v13 = vld [vmem:[%s15901_s0 + $0x4c] sm:$0xf] }
 0x169   :  { %v824_v26 = vpop.permute.xlu1 %823  ;;  %v1251_v18 = vrot.slane %v1172_v13, 6 }
 0x16a   :  { %892 = vst.msk [vmem:[#allocation2 + $0x140] sm:$0xf] %vm49_vm8, %v824_v26  ;;  %v1224_v29 = vrot.slane %v1222_v22, 4 }
 0x16c   :  { %1075 = vrot.lane.b32.xlu2 %v1012_v24, %s10515_s28  ;;  %1071 = vrot.lane.b32.xlu0 %v1008_v23, %s10515_s28  ;;  %v1218_v23 = vrot.slane %v1217_v16, 4  ;;  %v1219_v24 = vrot.slane %v1160_v20, 6  ;;  %v1173_v20 = vld [vmem:[%s15901_s0 + $0x50] sm:$0x7] }
 0x16e   :  { %v850_v31 = vpop.permute.xlu2 %849  ;;  %v828_v32 = vpop.permute.xlu0 %827  ;;  %v1220_v30 = vsel %vm10722_vm5, %v1218_v23, %v1219_v24 }
 0x16f   :  { %905 = vst.msk [vmem:[#allocation2 + $0x594] sm:$0xf] %vm49_vm8, %v850_v31  ;;  %1073 = vrot.lane.b32.xlu1 %v1009_v15, %s10515_s28  ;;  %v1221_v31 = vrot.slane %v1219_v24, 4  ;;  %v1253_v24 = vrot.slane %v1251_v18, 4 }
 0x170   :  { %894 = vst.msk [vmem:[#allocation2 + $0x148] sm:$0x7] %vm52_vm6, %v828_v32  ;;  %v1227_v32 = vrot.slane %v1163_v28, 6 }
 0x171   :  { %v830_v37 = vpop.permute.xlu1 %829 }
 0x172   :  { %895 = vst.msk [vmem:[#allocation2 + $0x254] sm:$0xf] %vm49_vm8, %v830_v37  ;;  %v1223_v37 = vsel %vm10722_vm5, %v1221_v31, %v1222_v22  ;;  %v1229_v38 = vrot.slane %v1227_v32, 4  ;;  %v1228_v49 = vsel %vm10722_vm5, %v1226_v45, %v1227_v32  ;;  %v10105_v22 = vld [vmem:[#allocation2 + $0x20] sm:$0xff]  ;;  %v10104_v31 = vld [vmem:[#allocation2 + $0x18] sm:$0xff] }
 0x174   :  { %1081 = vrot.lane.b32.xlu2 %v1017_v34, %s10515_s28  ;;  %1077 = vrot.lane.b32.xlu0 %v1015_v35, %s10515_s28  ;;  %v1164_v35 = vld [vmem:[%s15901_s0 + $0x2c] sm:$0x7] }
 0x176   :  { %v856_v43 = vpop.permute.xlu2 %855  ;;  %v834_v44 = vpop.permute.xlu0 %833 }
 0x177   :  { %908 = vst.msk [vmem:[#allocation2 + $0x6a8] sm:$0xf] %vm49_vm8, %v856_v43  ;;  %1079 = vrot.lane.b32.xlu1 %v1016_v39, %s10515_s28  ;;  %v1230_v39 = vrot.slane %v1164_v35, 6  ;;  %v1165_v43 = vld [vmem:[%s15901_s0 + $0x30] sm:$0xf] }
 0x178   :  { %897 = vst.msk [vmem:[#allocation2 + $0x25c] sm:$0x7] %vm52_vm6, %v834_v44 }
 0x179   :  { %v836_v50 = vpop.permute.xlu1 %835  ;;  %v1231_v44 = vsel %vm10722_vm5, %v1229_v38, %v1230_v39  ;;  %v1232_v54 = vrot.slane %v1230_v39, 4  ;;  %v10103_v38 = vld [vmem:[#allocation2 + $0x10] sm:$0xff] }
 0x17a   :  { %898 = vst.msk [vmem:[#allocation2 + $0x368] sm:$0xf] %vm49_vm8, %v836_v50 }
 0x17c   :  { %1087 = vrot.lane.b32.xlu2 %v1024_v46, %s10515_s28  ;;  %1083 = vrot.lane.b32.xlu0 %v1020_v47, %s10515_s28  ;;  %v1233_v46 = vrot.slane %v1165_v43, 6 }
 0x17e   :  { %v862_v57 = vpop.permute.xlu2 %861  ;;  %v840_v58 = vpop.permute.xlu0 %839  ;;  %v1234_v50 = vrot.slane %v1233_v46, 4 }
 0x17f   :  { %911 = vst.msk [vmem:[#allocation2 + $0x7bc] sm:$0xf] %vm49_vm8, %v862_v57  ;;  %1085 = vrot.lane.b32.xlu1 %v1023_v53, %s10515_s28  ;;  %v1167_v57 = vld [vmem:[%s15901_s0 + $0x38] sm:$0x7] }
 0x180   :  { %900 = vst.msk [vmem:[#allocation2 + $0x370] sm:$0x7] %vm52_vm6, %v840_v58  ;;  %v1236_v55 = vsel %vm10722_vm5, %v1234_v50, %v1235_v51  ;;  %v1168_v58 = vld [vmem:[%s15901_s0 + $0x3c] sm:$0xf]  ;;  %v1262_v51 = vrot.slane %v1176_v48, 6 }
 0x181   :  { %v842_v63 = vpop.permute.xlu1 %841  ;;  %v1241_v0 = vrot.slane %v1168_v58, 6  ;;  %v1406_v48 = vld [vmem:[%s15901_s0 + $0x34] sm:$0xf] }
 0x182   :  { %901 = vst.msk [vmem:[#allocation2 + $0x47c] sm:$0xf] %vm49_vm8, %v842_v63  ;;  %v1264_v58 = vrot.slane %v1262_v51, 4 }
 0x184   :  { %1269 = vrot.lane.b32.xlu2 %v1207_v60, %s10516_s12  ;;  %1265 = vrot.lane.b32.xlu0 %v1201_v56, %s10516_s12  ;;  %v1238_v60 = vrot.slane %v1167_v57, 6  ;;  %v1394_v57 = vld [vmem:[%s15901_s0 + $0x4] sm:$0xf] }
 0x186   :  { %v1028_v4 = vpop.permute.xlu2 %1027  ;;  %v846_v5 = vpop.permute.xlu0 %845 }
 0x187   :  { %1122 = vst.msk [vmem:[#allocation2 + $0x38] sm:$0xf] %vm49_vm8, %v1028_v4  ;;  %1267 = vrot.lane.b32.xlu1 %v1204_v1, %s10516_s12  ;;  %v1239_v1 = vsel %vm10722_vm5, %v1237_v59, %v1238_v60  ;;  %v1169_v4 = vld [vmem:[%s15901_s0 + $0x40] sm:$0xf]  ;;  %v1396_v59 = vld [vmem:[%s15901_s0 + $0xc] sm:$0xf] }
 0x188   :  { %903 = vst.msk [vmem:[#allocation2 + $0x484] sm:$0x7] %vm52_vm6, %v846_v5  ;;  %v1243_v10 = vrot.slane %v1169_v4, 6 }
 0x189   :  { %v848_v8 = vpop.permute.xlu1 %847 }
 0x18a   :  { %904 = vst.msk [vmem:[#allocation2 + $0x590] sm:$0xf] %vm49_vm8, %v848_v8  ;;  %v1242_v8 = vrot.slane %v1241_v0, 4 }
 0x18c   :  { %1275 = vrot.lane.b32.xlu2 %v1212_v7, %s10516_s12  ;;  %1271 = vrot.lane.b32.xlu0 %v1208_v6, %s10516_s12  ;;  %v1240_v6 = vrot.slane %v1238_v60, 4  ;;  %v1246_v7 = vrot.slane %v1170_v2, 6 }
 0x18e   :  { %v1034_v14 = vpop.permute.xlu2 %1033  ;;  %v852_v15 = vpop.permute.xlu0 %851 }
 0x18f   :  { %1125 = vst.msk [vmem:[#allocation2 + $0x148] sm:$0x8] %vm286_vm7, %v1034_v14  ;;  %1273 = vrot.lane.b32.xlu1 %v1209_v62, %s10516_s12  ;;  %v10106_v14 = vld [vmem:[#allocation2 + $0x28] sm:$0xff] }
 0x190   :  { %906 = vst.msk [vmem:[#allocation2 + $0x598] sm:$0x7] %vm52_vm6, %v852_v15  ;;  %v1248_v15 = vrot.slane %v1246_v7, 4 }
 0x191   :  { %v854_v19 = vpop.permute.xlu1 %853 }
 0x192   :  { %907 = vst.msk [vmem:[#allocation2 + $0x6a4] sm:$0xf] %vm49_vm8, %v854_v19 }
 0x194   :  { %1281 = vrot.lane.b32.xlu2 %v1217_v16, %s10516_s12  ;;  %1277 = vrot.lane.b32.xlu0 %v1215_v17, %s10516_s12  ;;  %v1244_v16 = vsel %vm10722_vm5, %v1242_v8, %v1243_v10  ;;  %v1245_v17 = vrot.slane %v1243_v10, 4  ;;  %v1399_v8 = vld [vmem:[%s15901_s0 + $0x18] sm:$0xf] }
 0x196   :  { %v1040_v26 = vpop.permute.xlu2 %1039  ;;  %v858_v27 = vpop.permute.xlu0 %857  ;;  %v1247_v23 = vsel %vm10722_vm5, %v1245_v17, %v1246_v7 }
 0x197   :  { %1128 = vst.msk [vmem:[#allocation2 + $0x154] sm:$0x3] %vm290_vm9, %v1040_v26  ;;  %1279 = vrot.lane.b32.xlu1 %v1216_v21, %s10516_s12  ;;  %v1171_v21 = vld [vmem:[%s15901_s0 + $0x48] sm:$0xf]  ;;  %v1254_v26 = vrot.slane %v1173_v20, 6 }
 0x198   :  { %909 = vst.msk [vmem:[#allocation2 + $0x6ac] sm:$0x7] %vm52_vm6, %v858_v27  ;;  %v1249_v27 = vrot.slane %v1171_v21, 6  ;;  %v1400_v20 = vld [vmem:[%s15901_s0 + $0x1c] sm:$0xf] }
 0x199   :  { %v860_v34 = vpop.permute.xlu1 %859  ;;  %v1255_v32 = vsel %vm10722_vm5, %v1253_v24, %v1254_v26  ;;  %v1256_v45 = vrot.slane %v1254_v26, 4  ;;  %v1457_v24 = vrot.slane %v1400_v20, 7 }
 0x19a   :  { %910 = vst.msk [vmem:[#allocation2 + $0x7b8] sm:$0xf] %vm49_vm8, %v860_v34  ;;  %v1250_v34 = vrot.slane %v1249_v27, 4 }
 0x19c   :  { %1287 = vrot.lane.b32.xlu2 %v1224_v29, %s10516_s12  ;;  %1283 = vrot.lane.b32.xlu0 %v1220_v30, %s10516_s12  ;;  %v1174_v30 = vld [vmem:[%s15901_s0 + $0x54] sm:$0xf]  ;;  %v1252_v39 = vsel %vm10722_vm5, %v1250_v34, %v1251_v18 }
 0x19d   :  { %v1257_v35 = vrot.slane %v1174_v30, 6 }
 0x19e   :  { %v1046_v41 = vpop.permute.xlu2 %1045  ;;  %v864_v42 = vpop.permute.xlu0 %863 }
 0x19f   :  { %1131 = vst.msk [vmem:[#allocation2 + $0x264] sm:$0xf] %vm49_vm8, %v1046_v41  ;;  %1285 = vrot.lane.b32.xlu1 %v1223_v37, %s10516_s12  ;;  %v1175_v37 = vld [vmem:[%s15901_s0 + $0x58] sm:$0xf] }
 0x1a0   :  { %912 = vst.msk [vmem:[#allocation2 + $0x7c0] sm:$0x7] %vm52_vm6, %v864_v42  ;;  %v1259_v41 = vrot.slane %v1175_v37, 6  ;;  %v1405_v37 = vld [vmem:[%s15901_s0 + $0x30] sm:$0xf] }
 0x1a1   :  { %v1026_v47 = vpop.permute.xlu1 %1025 }
 0x1a2   :  { %1121 = vst.msk [vmem:[#allocation2 + $0x34] sm:$0x8] %vm286_vm7, %v1026_v47  ;;  %v1261_v50 = vrot.slane %v1259_v41, 4 }
 0x1a4   :  { %1293 = vrot.lane.b32.xlu2 %v1231_v44, %s10516_s12  ;;  %1289 = vrot.lane.b32.xlu0 %v1225_v40, %s10516_s12  ;;  %v1258_v40 = vrot.slane %v1257_v35, 4  ;;  %v10102_v44 = vld [vmem:[#allocation2 + $0x8] sm:$0xff] }
 0x1a6   :  { %v1052_v52 = vpop.permute.xlu2 %1051  ;;  %v1030_v53 = vpop.permute.xlu0 %1029 }
 0x1a7   :  { %1134 = vst.msk [vmem:[#allocation2 + $0x374] sm:$0xf] %vm49_vm8, %v1052_v52  ;;  %1291 = vrot.lane.b32.xlu1 %v1228_v49, %s10516_s12  ;;  %v1393_v49 = vld [vmem:[%s15901_s0] sm:$0xf] }
 0x1a8   :  { %1123 = vst.msk [vmem:[#allocation2 + $0x3c] sm:$0xf] %vm49_vm8, %v1030_v53 }
 0x1a9   :  { %v1032_v56 = vpop.permute.xlu1 %1031  ;;  %v10107_v5 = vld [vmem:[#allocation2 + $0x30] sm:$0xff] }
 0x1aa   :  { %1124 = vst.msk [vmem:[#allocation2 + $0x40] sm:$0x3] %vm290_vm9, %v1032_v56 }
 0x1ac   :  { %1299 = vrot.lane.b32.xlu2 %v1236_v55, %s10516_s12  ;;  %1295 = vrot.lane.b32.xlu0 %v1232_v54, %s10516_s12  ;;  %v1441_v54 = vrot.slane %v1393_v49, 7  ;;  %v1263_v55 = vsel %vm10722_vm5, %v1261_v50, %v1262_v51  ;;  %v1408_v50 = vld [vmem:[%s15901_s0 + $0x3c] sm:$0xf] }
 0x1ae   :  { %v1058_v61 = vpop.permute.xlu2 %1057  ;;  %v1036_v62 = vpop.permute.xlu0 %1035  ;;  %v1442_v60 = vrot.slane %v1441_v54, 4 }
 0x1af   :  { %1137 = vst.msk [vmem:[#allocation2 + $0x484] sm:$0x8] %vm286_vm7, %v1058_v61  ;;  %v10108_v63 = vld [vmem:[#allocation2 + $0x38] sm:$0xff]  ;;  %1297 = vrot.lane.b32.xlu1 %v1233_v46, %s10516_s12  ;;  %v1260_v46 = vsel %vm10722_vm5, %v1258_v40, %v1259_v41  ;;  %v1443_v61 = vrot.slane %v1394_v57, 7 }
 0x1b0   :  { %1126 = vst.msk [vmem:[#allocation2 + $0x14c] sm:$0xf] %vm49_vm8, %v1036_v62  ;;  %5918 = vmatpush.bf16.msra.mxu0 %v10108_v63 }
 0x1b1   :  { %v1038_v3 = vpop.permute.xlu1 %1037  ;;  %v1444_v2 = vsel %vm10911_vm12, %v1442_v60, %v1443_v61 }
 0x1b2   :  { %1127 = vst.msk [vmem:[#allocation2 + $0x150] sm:$0xf] %vm49_vm8, %v1038_v3  ;;  %v1445_v3 = vrot.slane %v1443_v61, 4  ;;  %v1409_v61 = vld [vmem:[%s15901_s0 + $0x40] sm:$0xf] }
 0x1b4   :  { %1305 = vrot.lane.b32.xlu2 %v1241_v0, %s10516_s12  ;;  %1301 = vrot.lane.b32.xlu0 %v1239_v1, %s10516_s12  ;;  %v1395_v0 = vld [vmem:[%s15901_s0 + $0x8] sm:$0x7]  ;;  %v1448_v1 = vrot.slane %v1396_v59, 7 }
 0x1b5   :  { %5919 = vmatpush.bf16.msra.mxu0 %v10107_v5  ;;  %v1446_v4 = vrot.slane %v1395_v0, 7 }
 0x1b6   :  { %v1064_v11 = vpop.permute.xlu2 %1063  ;;  %v1042_v12 = vpop.permute.xlu0 %1041  ;;  %v1449_v10 = vrot.slane %v1448_v1, 4 }
 0x1b7   :  { %1140 = vst.msk [vmem:[#allocation2 + $0x490] sm:$0x3] %vm290_vm9, %v1064_v11  ;;  %1303 = vrot.lane.b32.xlu1 %v1240_v6, %s10516_s12  ;;  %v1397_v6 = vld [vmem:[%s15901_s0 + $0x10] sm:$0xf]  ;;  %v1447_v7 = vsel %vm10911_vm12, %v1445_v3, %v1446_v4  ;;  %v1410_v4 = vld [vmem:[%s15901_s0 + $0x44] sm:$0x7] }
 0x1b8   :  { %1129 = vst.msk [vmem:[#allocation2 + $0x25c] sm:$0x8] %vm286_vm7, %v1042_v12  ;;  %v1450_v11 = vrot.slane %v1397_v6, 7 }
 0x1b9   :  { %5920 = vmatpush.bf16.msra.mxu0 %v10106_v14  ;;  %v1044_v19 = vpop.permute.xlu1 %1043  ;;  %v1398_v14 = vld [vmem:[%s15901_s0 + $0x14] sm:$0x7] }
 0x1ba   :  { %1130 = vst.msk [vmem:[#allocation2 + $0x260] sm:$0xf] %vm49_vm8, %v1044_v19  ;;  %v1452_v17 = vrot.slane %v1450_v11, 4  ;;  %v1453_v18 = vrot.slane %v1398_v14, 7 }
 0x1bc   :  { %1311 = vrot.lane.b32.xlu2 %v1248_v15, %s10516_s12  ;;  %1307 = vrot.lane.b32.xlu0 %v1244_v16, %s10516_s12  ;;  %v1455_v15 = vrot.slane %v1399_v8, 7  ;;  %v1451_v16 = vsel %vm10911_vm12, %v1449_v10, %v1450_v11  ;;  %v1454_v21 = vsel %vm10911_vm12, %v1452_v17, %v1453_v18  ;;  %v1481_v8 = vrot.slane %v1410_v4, 7  ;;  %v1412_v11 = vld [vmem:[%s15901_s0 + $0x4c] sm:$0xf]  ;;  %v1413_v18 = vld [vmem:[%s15901_s0 + $0x50] sm:$0x7] }
 0x1bd   :  { %5921 = vmatpush.bf16.msra.mxu0 %v10105_v22  ;;  %v1402_v22 = vld [vmem:[%s15901_s0 + $0x24] sm:$0xf]  ;;  %v1607_v4 = vld [vmem:[%s15901_s0 + $0x38] sm:$0x7] }
 0x1be   :  { %v1070_v28 = vpop.permute.xlu2 %1069  ;;  %v1048_v29 = vpop.permute.xlu0 %1047 }
 0x1bf   :  { %1143 = vst.msk [vmem:[#allocation2 + $0x5a0] sm:$0xf] %vm49_vm8, %v1070_v28  ;;  %1309 = vrot.lane.b32.xlu1 %v1247_v23, %s10516_s12  ;;  %v1456_v23 = vrot.slane %v1455_v15, 4  ;;  %v1401_v28 = vld [vmem:[%s15901_s0 + $0x20] sm:$0x7] }
 0x1c0   :  { %1132 = vst.msk [vmem:[#allocation2 + $0x268] sm:$0x3] %vm290_vm9, %v1048_v29  ;;  %v1462_v29 = vrot.slane %v1402_v22, 7  ;;  %v1488_v22 = vrot.slane %v1413_v18, 7  ;;  %v1737_v18 = vld [vmem:[%s15901_s0] sm:$0xf] }
 0x1c1   :  { %5922 = vmatpush.bf16.msra.mxu0 %v10104_v31  ;;  %v1050_v36 = vpop.permute.xlu1 %1049  ;;  %v1458_v30 = vsel %vm10911_vm12, %v1456_v23, %v1457_v24  ;;  %v1459_v31 = vrot.slane %v1457_v24, 4  ;;  %v1415_v24 = vld [vmem:[%s15901_s0 + $0x58] sm:$0xf] }
 0x1c2   :  { %1133 = vst.msk [vmem:[#allocation2 + $0x370] sm:$0x8] %vm286_vm7, %v1050_v36 }
 0x1c4   :  { %1317 = vrot.lane.b32.xlu2 %v1255_v32, %s10516_s12  ;;  %1313 = vrot.lane.b32.xlu0 %v1249_v27, %s10516_s12  ;;  %v1460_v32 = vrot.slane %v1401_v28, 7  ;;  %v1492_v28 = vrot.slane %v1415_v24, 7 }
 0x1c5   :  { %5923 = vmatpush.bf16.msra.mxu0 %v10103_v38  ;;  %v1463_v38 = vrot.slane %v1462_v29, 4 }
 0x1c6   :  { %v1076_v42 = vpop.permute.xlu2 %1075  ;;  %v1054_v43 = vpop.permute.xlu0 %1053  ;;  %v1461_v36 = vsel %vm10911_vm12, %v1459_v31, %v1460_v32  ;;  %v1416_v31 = vld [vmem:[%s15901_s0 + $0x5c] sm:$0x7]  ;;  %v1593_v32 = vld [vmem:[%s15901_s0] sm:$0xf] }
 0x1c7   :  { %1146 = vst.msk [vmem:[#allocation2 + $0x6b0] sm:$0xf] %vm49_vm8, %v1076_v42  ;;  %1315 = vrot.lane.b32.xlu1 %v1252_v39, %s10516_s12  ;;  %v1404_v42 = vld [vmem:[%s15901_s0 + $0x2c] sm:$0x7] }
 0x1c8   :  { %1135 = vst.msk [vmem:[#allocation2 + $0x378] sm:$0xf] %vm49_vm8, %v1054_v43  ;;  %v1469_v43 = vrot.slane %v1405_v37, 7 }
 0x1c9   :  { %5924 = vmatpush.bf16.msra.mxu0 %v10102_v44  ;;  %v1056_v47 = vpop.permute.xlu1 %1055 }
 0x1ca   :  { %1136 = vst.msk [vmem:[#allocation2 + $0x37c] sm:$0x3] %vm290_vm9, %v1056_v47  ;;  %v1470_v51 = vrot.slane %v1469_v43, 4 }
 0x1cc   :  { %1323 = vrot.lane.b32.xlu2 %v1260_v46, %s10516_s12  ;;  %1319 = vrot.lane.b32.xlu0 %v1256_v45, %s10516_s12  ;;  %v1467_v46 = vrot.slane %v1404_v42, 7  ;;  %v1594_v42 = vld [vmem:[%s15901_s0 + $0x4] sm:$0xf] }
 0x1ce   :  { %v1082_v52 = vpop.permute.xlu2 %1081  ;;  %v1060_v53 = vpop.permute.xlu0 %1059 }
 0x1cf   :  { %1149 = vst.msk [vmem:[#allocation2 + $0x7c0] sm:$0x8] %vm286_vm7, %v1082_v52  ;;  %1321 = vrot.lane.b32.xlu1 %v1257_v35, %s10516_s12  ;;  %v1403_v35 = vld [vmem:[%s15901_s0 + $0x28] sm:$0xf]  ;;  %v1471_v52 = vrot.slane %v1406_v48, 7 }
 0x1d0   :  { %1138 = vst.msk [vmem:[#allocation2 + $0x488] sm:$0xf] %vm49_vm8, %v1060_v53  ;;  %v1464_v39 = vrot.slane %v1403_v35, 7  ;;  %v1494_v35 = vrot.slane %v1492_v28, 4  ;;  %v1597_v48 = vld [vmem:[%s15901_s0 + $0x10] sm:$0xf] }
 0x1d1   :  { %v1062_v56 = vpop.permute.xlu1 %1061  ;;  %v1472_v57 = vsel %vm10911_vm12, %v1470_v51, %v1471_v52 }
 0x1d2   :  { %1139 = vst.msk [vmem:[#allocation2 + $0x48c] sm:$0xf] %vm49_vm8, %v1062_v56  ;;  %v1465_v44 = vsel %vm10911_vm12, %v1463_v38, %v1464_v39  ;;  %v1466_v45 = vrot.slane %v1464_v39, 4  ;;  %v1476_v56 = vrot.slane %v1408_v50, 7  ;;  %v1598_v50 = vld [vmem:[%s15901_s0 + $0x14] sm:$0x7] }
 0x1d4   :  { %1497 = vrot.lane.b32.xlu2 %v1441_v54, %s10517_s9  ;;  %1325 = vrot.lane.b32.xlu0 %v1263_v55, %s10516_s12  ;;  %v1468_v49 = vsel %vm10911_vm12, %v1466_v45, %v1467_v46  ;;  %v1407_v55 = vld [vmem:[%s15901_s0 + $0x38] sm:$0x7]  ;;  %v1477_v0 = vrot.slane %v1476_v56, 4 }
 0x1d5   :  { %v1474_v59 = vrot.slane %v1407_v55, 7 }
 0x1d6   :  { %v1088_v62 = vpop.permute.xlu2 %1087  ;;  %v1066_v63 = vpop.permute.xlu0 %1065 }
 0x1d7   :  { %1152 = vst.msk [vmem:[#allocation2 + $0x7cc] sm:$0x3] %vm290_vm9, %v1088_v62  ;;  %1327 = vrot.lane.b32.xlu1 %v1264_v58, %s10516_s12  ;;  %v1473_v58 = vrot.slane %v1471_v52, 4 }
 0x1d8   :  { %1141 = vst.msk [vmem:[#allocation2 + $0x598] sm:$0x8] %vm286_vm7, %v1066_v63  ;;  %v1411_v63 = vld [vmem:[%s15901_s0 + $0x48] sm:$0xf] }
 0x1d9   :  { %v1068_v5 = vpop.permute.xlu1 %1067  ;;  %v1475_v62 = vsel %vm10911_vm12, %v1473_v58, %v1474_v59  ;;  %v1605_v59 = vld [vmem:[%s15901_s0 + $0x30] sm:$0xf] }
 0x1da   :  { %1142 = vst.msk [vmem:[#allocation2 + $0x59c] sm:$0xf] %vm49_vm8, %v1068_v5  ;;  %v1483_v5 = vrot.slane %v1411_v63, 7 }
 0x1dc   :  { %1503 = vrot.lane.b32.xlu2 %v1448_v1, %s10517_s9  ;;  %1499 = vrot.lane.b32.xlu0 %v1444_v2, %s10517_s9  ;;  %v1478_v1 = vrot.slane %v1409_v61, 7  ;;  %v1484_v14 = vrot.slane %v1483_v5, 4 }
 0x1de   :  { %v1270_v12 = vpop.permute.xlu2 %1269  ;;  %v1072_v13 = vpop.permute.xlu0 %1071  ;;  %v1479_v6 = vsel %vm10911_vm12, %v1477_v0, %v1478_v1 }
 0x1df   :  { %1363 = vst.msk [vmem:[#allocation2 + $0x48] sm:$0xf] %vm49_vm8, %v1270_v12  ;;  %1501 = vrot.lane.b32.xlu1 %v1447_v7, %s10517_s9  ;;  %v1480_v7 = vrot.slane %v1478_v1, 4  ;;  %v1608_v1 = vld [vmem:[%s15901_s0 + $0x3c] sm:$0xf] }
 0x1e0   :  { %1144 = vst.msk [vmem:[#allocation2 + $0x5a4] sm:$0x3] %vm290_vm9, %v1072_v13  ;;  %v1414_v13 = vld [vmem:[%s15901_s0 + $0x54] sm:$0xf] }
 0x1e1   :  { %v1074_v19 = vpop.permute.xlu1 %1073  ;;  %v1482_v12 = vsel %vm10911_vm12, %v1480_v7, %v1481_v8  ;;  %v1611_v7 = vld [vmem:[%s15901_s0 + $0x48] sm:$0xf]  ;;  %v1609_v8 = vld [vmem:[%s15901_s0 + $0x40] sm:$0xf] }
 0x1e2   :  { %1145 = vst.msk [vmem:[#allocation2 + $0x6ac] sm:$0x8] %vm286_vm7, %v1074_v19  ;;  %v1490_v19 = vrot.slane %v1414_v13, 7 }
 0x1e4   :  { %1509 = vrot.lane.b32.xlu2 %v1455_v15, %s10517_s9  ;;  %1505 = vrot.lane.b32.xlu0 %v1451_v16, %s10517_s9  ;;  %v1485_v15 = vrot.slane %v1412_v11, 7  ;;  %v1610_v11 = vld [vmem:[%s15901_s0 + $0x44] sm:$0x7] }
 0x1e6   :  { %v1276_v26 = vpop.permute.xlu2 %1275  ;;  %v1078_v27 = vpop.permute.xlu0 %1077  ;;  %v1486_v20 = vsel %vm10911_vm12, %v1484_v14, %v1485_v15  ;;  %v1614_v14 = vld [vmem:[%s15901_s0 + $0x54] sm:$0xf] }
 0x1e7   :  { %1366 = vst.msk [vmem:[#allocation2 + $0x158] sm:$0xf] %vm49_vm8, %v1276_v26  ;;  %1507 = vrot.lane.b32.xlu1 %v1454_v21, %s10517_s9  ;;  %v1487_v21 = vrot.slane %v1485_v15, 4  ;;  %v1612_v15 = vld [vmem:[%s15901_s0 + $0x4c] sm:$0xf] }
 0x1e8   :  { %1147 = vst.msk [vmem:[#allocation2 + $0x6b4] sm:$0xf] %vm49_vm8, %v1078_v27  ;;  %v1491_v27 = vrot.slane %v1490_v19, 4 }
 0x1e9   :  { %v1080_v34 = vpop.permute.xlu1 %1079  ;;  %v1489_v26 = vsel %vm10911_vm12, %v1487_v21, %v1488_v22  ;;  %v1785_v21 = vrot.slane %v1737_v18, 5  ;;  %v1615_v22 = vld [vmem:[%s15901_s0 + $0x58] sm:$0xf] }
 0x1ea   :  { %1148 = vst.msk [vmem:[#allocation2 + $0x6b8] sm:$0x3] %vm290_vm9, %v1080_v34  ;;  %v1493_v34 = vsel %vm10911_vm12, %v1491_v27, %v1492_v28  ;;  %v1616_v28 = vld [vmem:[%s15901_s0 + $0x5c] sm:$0x7] }
 0x1ec   :  { %1515 = vrot.lane.b32.xlu2 %v1462_v29, %s10517_s9  ;;  %1511 = vrot.lane.b32.xlu0 %v1458_v30, %s10517_s9 }
 0x1ee   :  { %v1282_v40 = vpop.permute.xlu2 %1281  ;;  %v1084_v41 = vpop.permute.xlu0 %1083 }
 0x1ef   :  { %1369 = vst.msk [vmem:[#allocation2 + $0x268] sm:$0xc] %vm531_vm13, %v1282_v40  ;;  %1513 = vrot.lane.b32.xlu1 %v1461_v36, %s10517_s9  ;;  %v1495_v36 = vrot.slane %v1416_v31, 7 }
 0x1f0   :  { %1150 = vst.msk [vmem:[#allocation2 + $0x7c4] sm:$0xf] %vm49_vm8, %v1084_v41  ;;  %v1596_v41 = vld [vmem:[%s15901_s0 + $0xc] sm:$0xf] }
 0x1f1   :  { %v1086_v47 = vpop.permute.xlu1 %1085  ;;  %v1496_v38 = vsel %vm10911_vm12, %v1494_v35, %v1495_v36 }
 0x1f2   :  { %1151 = vst.msk [vmem:[#allocation2 + $0x7c8] sm:$0xf] %vm49_vm8, %v1086_v47  ;;  %v1599_v47 = vld [vmem:[%s15901_s0 + $0x18] sm:$0xf] }
 0x1f4   :  { %1521 = vrot.lane.b32.xlu2 %v1469_v43, %s10517_s9  ;;  %1517 = vrot.lane.b32.xlu0 %v1465_v44, %s10517_s9  ;;  %v1595_v44 = vld [vmem:[%s15901_s0 + $0x8] sm:$0x7] }
 0x1f6   :  { %v1288_v53 = vpop.permute.xlu2 %1287  ;;  %v1266_v54 = vpop.permute.xlu0 %1265 }
 0x1f7   :  { %1372 = vst.msk [vmem:[#allocation2 + $0x274] sm:$0x1] %vm535_vm14, %v1288_v53  ;;  %1519 = vrot.lane.b32.xlu1 %v1468_v49, %s10517_s9  ;;  %v1602_v53 = vld [vmem:[%s15901_s0 + $0x24] sm:$0xf] }
 0x1f8   :  { %1361 = vst.msk [vmem:[#allocation2 + $0x40] sm:$0xc] %vm531_vm13, %v1266_v54  ;;  %v1600_v54 = vld [vmem:[%s15901_s0 + $0x1c] sm:$0xf] }
 0x1f9   :  { %v1268_v60 = vpop.permute.xlu1 %1267 }
 0x1fa   :  { %1362 = vst.msk [vmem:[#allocation2 + $0x44] sm:$0xf] %vm49_vm8, %v1268_v60  ;;  %v1603_v60 = vld [vmem:[%s15901_s0 + $0x28] sm:$0xf] }
 0x1fc   :  { %1527 = vrot.lane.b32.xlu2 %v1476_v56, %s10517_s9  ;;  %1523 = vrot.lane.b32.xlu0 %v1472_v57, %s10517_s9  ;;  %v1601_v56 = vld [vmem:[%s15901_s0 + $0x20] sm:$0x7] }
 0x1fe   :  { %v1294_v2 = vpop.permute.xlu2 %1293  ;;  %v1272_v3 = vpop.permute.xlu0 %1271 }
 0x1ff   :  { %1375 = vst.msk [vmem:[#allocation2 + $0x384] sm:$0xf] %vm49_vm8, %v1294_v2  ;;  %1525 = vrot.lane.b32.xlu1 %v1475_v62, %s10517_s9  ;;  %v1604_v62 = vld [vmem:[%s15901_s0 + $0x2c] sm:$0x7]  ;;  %v1606_v2 = vld [vmem:[%s15901_s0 + $0x34] sm:$0xf] }
 0x200   :  { %1364 = vst.msk [vmem:[#allocation2 + $0x4c] sm:$0x1] %vm535_vm14, %v1272_v3 }
 0x201   :  { %v1274_v10 = vpop.permute.xlu1 %1273 }
 0x202   :  { %1365 = vst.msk [vmem:[#allocation2 + $0x154] sm:$0xc] %vm531_vm13, %v1274_v10 }
 0x204   :  { %1533 = vrot.lane.b32.xlu2 %v1483_v5, %s10517_s9  ;;  %1529 = vrot.lane.b32.xlu0 %v1479_v6, %s10517_s9 }
 0x206   :  { %v1300_v16 = vpop.permute.xlu2 %1299  ;;  %v1278_v17 = vpop.permute.xlu0 %1277 }
 0x207   :  { %1378 = vst.msk [vmem:[#allocation2 + $0x494] sm:$0xf] %vm49_vm8, %v1300_v16  ;;  %1531 = vrot.lane.b32.xlu1 %v1482_v12, %s10517_s9 }
 0x208   :  { %1367 = vst.msk [vmem:[#allocation2 + $0x15c] sm:$0xf] %vm49_vm8, %v1278_v17  ;;  %v1613_v17 = vld [vmem:[%s15901_s0 + $0x50] sm:$0x7] }
 0x209   :  { %v1280_v23 = vpop.permute.xlu1 %1279 }
 0x20a   :  { %1368 = vst.msk [vmem:[#allocation2 + $0x160] sm:$0x1] %vm535_vm14, %v1280_v23  ;;  %v1739_v23 = vld [vmem:[%s15901_s0 + $0x8] sm:$0x7] }
 0x20b   :  { %v1790_v27 = vrot.slane %v1739_v23, 5  ;;  %v1749_v23 = vld [vmem:[%s15901_s0 + $0x30] sm:$0xf] }
 0x20c   :  { %1539 = vrot.lane.b32.xlu2 %v1490_v19, %s10517_s9  ;;  %1535 = vrot.lane.b32.xlu0 %v1486_v20, %s10517_s9 }
 0x20d   :  { %v1792_v35 = vrot.slane %v1790_v27, 4 }
 0x20e   :  { %v1306_v29 = vpop.permute.xlu2 %1305  ;;  %v1284_v30 = vpop.permute.xlu0 %1283 }
 0x20f   :  { %1381 = vst.msk [vmem:[#allocation2 + $0x5a4] sm:$0xc] %vm531_vm13, %v1306_v29  ;;  %1537 = vrot.lane.b32.xlu1 %v1489_v26, %s10517_s9  ;;  %v1738_v26 = vld [vmem:[%s15901_s0 + $0x4] sm:$0xf]  ;;  %v1786_v29 = vrot.slane %v1785_v21, 4 }
 0x210   :  { %1370 = vst.msk [vmem:[#allocation2 + $0x26c] sm:$0xf] %vm49_vm8, %v1284_v30  ;;  %v1787_v30 = vrot.slane %v1738_v26, 5 }
 0x211   :  { %v1286_v37 = vpop.permute.xlu1 %1285 }
 0x212   :  { %1371 = vst.msk [vmem:[#allocation2 + $0x270] sm:$0xf] %vm49_vm8, %v1286_v37  ;;  %v1788_v36 = vsel %vm10590_vm2, %v1786_v29, %v1787_v30  ;;  %v1789_v37 = vrot.slane %v1787_v30, 4 }
 0x214   :  { %1641 = vrot.lane.b32.xlu2 %v1593_v32, %s10518_s22  ;;  %1541 = vrot.lane.b32.xlu0 %v1493_v34, %s10517_s9  ;;  %v1741_v34 = vld [vmem:[%s15901_s0 + $0x10] sm:$0xf] }
 0x216   :  { %v1312_v39 = vpop.permute.xlu2 %1311  ;;  %v1290_v40 = vpop.permute.xlu0 %1289 }
 0x217   :  { %1384 = vst.msk [vmem:[#allocation2 + $0x5b0] sm:$0x1] %vm535_vm14, %v1312_v39  ;;  %1543 = vrot.lane.b32.xlu1 %v1496_v38, %s10517_s9  ;;  %v1795_v38 = vrot.slane %v1741_v34, 5 }
 0x218   :  { %1373 = vst.msk [vmem:[#allocation2 + $0x37c] sm:$0xc] %vm531_vm13, %v1290_v40  ;;  %v1742_v40 = vld [vmem:[%s15901_s0 + $0x14] sm:$0x7] }
 0x219   :  { %v1292_v43 = vpop.permute.xlu1 %1291 }
 0x21a   :  { %1374 = vst.msk [vmem:[#allocation2 + $0x380] sm:$0xf] %vm49_vm8, %v1292_v43  ;;  %v1797_v43 = vrot.slane %v1795_v38, 4 }
 0x21c   :  { %1647 = vrot.lane.b32.xlu2 %v1596_v41, %s10518_s22  ;;  %1643 = vrot.lane.b32.xlu0 %v1594_v42, %s10518_s22  ;;  %v1740_v41 = vld [vmem:[%s15901_s0 + $0xc] sm:$0xf]  ;;  %v1791_v42 = vsel %vm10590_vm2, %v1789_v37, %v1790_v27  ;;  %v1753_v37 = vld [vmem:[%s15901_s0 + $0x40] sm:$0xf] }
 0x21e   :  { %v1318_v45 = vpop.permute.xlu2 %1317  ;;  %v1296_v46 = vpop.permute.xlu0 %1295 }
 0x21f   :  { %1387 = vst.msk [vmem:[#allocation2 + $0x6c0] sm:$0xf] %vm49_vm8, %v1318_v45  ;;  %1645 = vrot.lane.b32.xlu1 %v1595_v44, %s10518_s22  ;;  %v1798_v44 = vrot.slane %v1742_v40, 5  ;;  %v1793_v45 = vrot.slane %v1740_v41, 5  ;;  %v1827_v40 = vrot.slane %v1753_v37, 5 }
 0x220   :  { %1376 = vst.msk [vmem:[#allocation2 + $0x388] sm:$0x1] %vm535_vm14, %v1296_v46 }
 0x221   :  { %v1298_v49 = vpop.permute.xlu1 %1297 }
 0x222   :  { %1377 = vst.msk [vmem:[#allocation2 + $0x490] sm:$0xc] %vm531_vm13, %v1298_v49  ;;  %v1799_v49 = vsel %vm10590_vm2, %v1797_v43, %v1798_v44 }
 0x224   :  { %1653 = vrot.lane.b32.xlu2 %v1599_v47, %s10518_s22  ;;  %1649 = vrot.lane.b32.xlu0 %v1597_v48, %s10518_s22  ;;  %v1743_v48 = vld [vmem:[%s15901_s0 + $0x18] sm:$0xf] }
 0x226   :  { %v1324_v51 = vpop.permute.xlu2 %1323  ;;  %v1302_v52 = vpop.permute.xlu0 %1301 }
 0x227   :  { %1390 = vst.msk [vmem:[#allocation2 + $0x7d0] sm:$0xf] %vm49_vm8, %v1324_v51  ;;  %1651 = vrot.lane.b32.xlu1 %v1598_v50, %s10518_s22  ;;  %v1794_v50 = vrot.slane %v1793_v45, 4  ;;  %v1801_v51 = vrot.slane %v1743_v48, 5  ;;  %v1829_v48 = vrot.slane %v1827_v40, 4 }
 0x228   :  { %1379 = vst.msk [vmem:[#allocation2 + $0x498] sm:$0xf] %vm49_vm8, %v1302_v52 }
 0x229   :  { %v1304_v55 = vpop.permute.xlu1 %1303 }
 0x22a   :  { %1380 = vst.msk [vmem:[#allocation2 + $0x49c] sm:$0x1] %vm535_vm14, %v1304_v55  ;;  %v1802_v55 = vrot.slane %v1801_v51, 4 }
 0x22c   :  { %1659 = vrot.lane.b32.xlu2 %v1602_v53, %s10518_s22  ;;  %1655 = vrot.lane.b32.xlu0 %v1600_v54, %s10518_s22  ;;  %v1744_v53 = vld [vmem:[%s15901_s0 + $0x1c] sm:$0xf]  ;;  %v1796_v54 = vsel %vm10590_vm2, %v1794_v50, %v1795_v38 }
 0x22e   :  { %v1498_v57 = vpop.permute.xlu2 %1497  ;;  %v1308_v58 = vpop.permute.xlu0 %1307 }
 0x22f   :  { %1569 = vst.msk [vmem:[#allocation2 + $0x4c] sm:$0xe] %vm744_vm15, %v1498_v57  ;;  %1657 = vrot.lane.b32.xlu1 %v1601_v56, %s10518_s22  ;;  %v1803_v56 = vrot.slane %v1744_v53, 5 }
 0x230   :  { %1382 = vst.msk [vmem:[#allocation2 + $0x5a8] sm:$0xf] %vm49_vm8, %v1308_v58 }
 0x231   :  { %v1310_v61 = vpop.permute.xlu1 %1309 }
 0x232   :  { %1383 = vst.msk [vmem:[#allocation2 + $0x5ac] sm:$0xf] %vm49_vm8, %v1310_v61 }
 0x234   :  { %1665 = vrot.lane.b32.xlu2 %v1605_v59, %s10518_s22  ;;  %1661 = vrot.lane.b32.xlu0 %v1603_v60, %s10518_s22  ;;  %v1800_v59 = vrot.slane %v1798_v44, 4  ;;  %v1804_v60 = vsel %vm10590_vm2, %v1802_v55, %v1803_v56 }
 0x236   :  { %v1504_v63 = vpop.permute.xlu2 %1503  ;;  %v1314_v0 = vpop.permute.xlu0 %1313 }
 0x237   :  { %1572 = vst.msk [vmem:[#allocation2 + $0x160] sm:$0xe] %vm744_vm15, %v1504_v63  ;;  %1663 = vrot.lane.b32.xlu1 %v1604_v62, %s10518_s22  ;;  %v1745_v62 = vld [vmem:[%s15901_s0 + $0x20] sm:$0x7]  ;;  %v1746_v63 = vld [vmem:[%s15901_s0 + $0x24] sm:$0xf] }
 0x238   :  { %1385 = vst.msk [vmem:[#allocation2 + $0x6b8] sm:$0xc] %vm531_vm13, %v1314_v0  ;;  %v1805_v0 = vrot.slane %v1803_v56, 4  ;;  %v1756_v56 = vld [vmem:[%s15901_s0 + $0x4c] sm:$0xf] }
 0x239   :  { %v1316_v3 = vpop.permute.xlu1 %1315 }
 0x23a   :  { %1386 = vst.msk [vmem:[#allocation2 + $0x6bc] sm:$0xf] %vm49_vm8, %v1316_v3 }
 0x23c   :  { %1671 = vrot.lane.b32.xlu2 %v1608_v1, %s10518_s22  ;;  %1667 = vrot.lane.b32.xlu0 %v1606_v2, %s10518_s22  ;;  %v1806_v1 = vrot.slane %v1745_v62, 5 }
 0x23e   :  { %v1510_v5 = vpop.permute.xlu2 %1509  ;;  %v1320_v6 = vpop.permute.xlu0 %1319 }
 0x23f   :  { %1575 = vst.msk [vmem:[#allocation2 + $0x274] sm:$0xe] %vm744_vm15, %v1510_v5  ;;  %1669 = vrot.lane.b32.xlu1 %v1607_v4, %s10518_s22  ;;  %v1809_v4 = vrot.slane %v1746_v63, 5  ;;  %v1807_v5 = vsel %vm10590_vm2, %v1805_v0, %v1806_v1  ;;  %v1759_v63 = vld [vmem:[%s15901_s0 + $0x58] sm:$0xf] }
 0x240   :  { %1388 = vst.msk [vmem:[#allocation2 + $0x6c4] sm:$0x1] %vm535_vm14, %v1320_v6  ;;  %v1748_v6 = vld [vmem:[%s15901_s0 + $0x2c] sm:$0x7] }
 0x241   :  { %v1322_v10 = vpop.permute.xlu1 %1321 }
 0x242   :  { %1389 = vst.msk [vmem:[#allocation2 + $0x7cc] sm:$0xc] %vm531_vm13, %v1322_v10  ;;  %v1808_v10 = vrot.slane %v1806_v1, 4 }
 0x244   :  { %1677 = vrot.lane.b32.xlu2 %v1611_v7, %s10518_s22  ;;  %1673 = vrot.lane.b32.xlu0 %v1609_v8, %s10518_s22  ;;  %v1747_v8 = vld [vmem:[%s15901_s0 + $0x28] sm:$0xf] }
 0x246   :  { %v1516_v12 = vpop.permute.xlu2 %1515  ;;  %v1326_v13 = vpop.permute.xlu0 %1325 }
 0x247   :  { %1578 = vst.msk [vmem:[#allocation2 + $0x388] sm:$0xe] %vm744_vm15, %v1516_v12  ;;  %1675 = vrot.lane.b32.xlu1 %v1610_v11, %s10518_s22  ;;  %v1814_v11 = vrot.slane %v1748_v6, 5  ;;  %v1810_v12 = vrot.slane %v1809_v4, 4  ;;  %v1758_v6 = vld [vmem:[%s15901_s0 + $0x54] sm:$0xf] }
 0x248   :  { %1391 = vst.msk [vmem:[#allocation2 + $0x7d4] sm:$0xf] %vm49_vm8, %v1326_v13  ;;  %v1811_v13 = vrot.slane %v1747_v8, 5 }
 0x249   :  { %v1328_v16 = vpop.permute.xlu1 %1327 }
 0x24a   :  { %1392 = vst.msk [vmem:[#allocation2 + $0x7d8] sm:$0x1] %vm535_vm14, %v1328_v16  ;;  %v1750_v16 = vld [vmem:[%s15901_s0 + $0x34] sm:$0xf]  ;;  %v1812_v18 = vsel %vm10590_vm2, %v1810_v12, %v1811_v13 }
 0x24c   :  { %1683 = vrot.lane.b32.xlu2 %v1614_v14, %s10518_s22  ;;  %1679 = vrot.lane.b32.xlu0 %v1612_v15, %s10518_s22 }
 0x24e   :  { %v1522_v19 = vpop.permute.xlu2 %1521  ;;  %v1500_v20 = vpop.permute.xlu0 %1499 }
 0x24f   :  { %1581 = vst.msk [vmem:[#allocation2 + $0x49c] sm:$0xe] %vm744_vm15, %v1522_v19  ;;  %1681 = vrot.lane.b32.xlu1 %v1613_v17, %s10518_s22  ;;  %v1816_v17 = vrot.slane %v1814_v11, 4  ;;  %v1813_v19 = vrot.slane %v1811_v13, 4 }
 0x250   :  { %1570 = vst.msk [vmem:[#allocation2 + $0x50] sm:$0xf] %vm49_vm8, %v1500_v20  ;;  %v1819_v20 = vrot.slane %v1750_v16, 5 }
 0x251   :  { %v1502_v24 = vpop.permute.xlu1 %1501 }
 0x252   :  { %1571 = vst.msk [vmem:[#allocation2 + $0x54] sm:$0xf] %vm49_vm8, %v1502_v24  ;;  %v1815_v24 = vsel %vm10590_vm2, %v1813_v19, %v1814_v11  ;;  %v1821_v26 = vrot.slane %v1819_v20, 4  ;;  %v1841_v11 = vrot.slane %v1758_v6, 5  ;;  %v1978_v19 = vld [vmem:[%s15901_s0 + $0x4] sm:$0xf] }
 0x254   :  { %1849 = vrot.lane.b32.xlu2 %v1785_v21, %s10519_s14  ;;  %1685 = vrot.lane.b32.xlu0 %v1615_v22, %s10518_s22  ;;  %v1751_v22 = vld [vmem:[%s15901_s0 + $0x38] sm:$0x7]  ;;  %v1842_v16 = vrot.slane %v1841_v11, 4 }
 0x255   :  { %v1822_v27 = vrot.slane %v1751_v22, 5  ;;  %v2027_v22 = vrot.slane %v1978_v19, 6 }
 0x256   :  { %v1528_v31 = vpop.permute.xlu2 %1527  ;;  %v1506_v32 = vpop.permute.xlu0 %1505 }
 0x257   :  { %1584 = vst.msk [vmem:[#allocation2 + $0x5b0] sm:$0xe] %vm744_vm15, %v1528_v31  ;;  %1687 = vrot.lane.b32.xlu1 %v1616_v28, %s10518_s22  ;;  %v1817_v28 = vrot.slane %v1749_v23, 5  ;;  %v1752_v31 = vld [vmem:[%s15901_s0 + $0x3c] sm:$0xf]  ;;  %v1824_v43 = vrot.slane %v1822_v27, 4 }
 0x258   :  { %1573 = vst.msk [vmem:[#allocation2 + $0x164] sm:$0xf] %vm49_vm8, %v1506_v32  ;;  %v1823_v32 = vsel %vm10590_vm2, %v1821_v26, %v1822_v27 }
 0x259   :  { %v1508_v39 = vpop.permute.xlu1 %1507  ;;  %v1818_v34 = vrot.slane %v1817_v28, 4 }
 0x25a   :  { %1574 = vst.msk [vmem:[#allocation2 + $0x168] sm:$0xf] %vm49_vm8, %v1508_v39 }
 0x25b   :  { %v1820_v38 = vsel %vm10590_vm2, %v1818_v34, %v1819_v20 }
 0x25c   :  { %1855 = vrot.lane.b32.xlu2 %v1792_v35, %s10519_s14  ;;  %1851 = vrot.lane.b32.xlu0 %v1788_v36, %s10519_s14  ;;  %v1825_v35 = vrot.slane %v1752_v31, 5  ;;  %v2029_v31 = vrot.slane %v2027_v22, 4 }
 0x25e   :  { %v1534_v46 = vpop.permute.xlu2 %1533  ;;  %v1512_v47 = vpop.permute.xlu0 %1511  ;;  %v1826_v39 = vrot.slane %v1825_v35, 4 }
 0x25f   :  { %1587 = vst.msk [vmem:[#allocation2 + $0x6c4] sm:$0xe] %vm744_vm15, %v1534_v46  ;;  %1853 = vrot.lane.b32.xlu1 %v1791_v42, %s10519_s14  ;;  %v1754_v46 = vld [vmem:[%s15901_s0 + $0x44] sm:$0x7] }
 0x260   :  { %1576 = vst.msk [vmem:[#allocation2 + $0x278] sm:$0xf] %vm49_vm8, %v1512_v47  ;;  %v1828_v44 = vsel %vm10590_vm2, %v1826_v39, %v1827_v40  ;;  %v1755_v47 = vld [vmem:[%s15901_s0 + $0x48] sm:$0xf]  ;;  %v1981_v40 = vld [vmem:[%s15901_s0 + $0x10] sm:$0xf] }
 0x261   :  { %v1514_v52 = vpop.permute.xlu1 %1513 }
 0x262   :  { %1577 = vst.msk [vmem:[#allocation2 + $0x27c] sm:$0xf] %vm49_vm8, %v1514_v52  ;;  %v1833_v52 = vrot.slane %v1755_v47, 5  ;;  %v1984_v47 = vld [vmem:[%s15901_s0 + $0x1c] sm:$0xf] }
 0x264   :  { %1861 = vrot.lane.b32.xlu2 %v1799_v49, %s10519_s14  ;;  %1857 = vrot.lane.b32.xlu0 %v1793_v45, %s10519_s14  ;;  %v1830_v49 = vrot.slane %v1754_v46, 5 }
 0x266   :  { %v1540_v57 = vpop.permute.xlu2 %1539  ;;  %v1518_v58 = vpop.permute.xlu0 %1517  ;;  %v1831_v53 = vsel %vm10590_vm2, %v1829_v48, %v1830_v49 }
 0x267   :  { %1590 = vst.msk [vmem:[#allocation2 + $0x7d8] sm:$0xe] %vm744_vm15, %v1540_v57  ;;  %1859 = vrot.lane.b32.xlu1 %v1796_v54, %s10519_s14  ;;  %v1757_v54 = vld [vmem:[%s15901_s0 + $0x50] sm:$0x7]  ;;  %v1832_v57 = vrot.slane %v1830_v49, 4 }
 0x268   :  { %1579 = vst.msk [vmem:[#allocation2 + $0x38c] sm:$0xf] %vm49_vm8, %v1518_v58  ;;  %v1838_v58 = vrot.slane %v1757_v54, 5  ;;  %v1983_v54 = vld [vmem:[%s15901_s0 + $0x18] sm:$0xf] }
 0x269   :  { %v1520_v61 = vpop.permute.xlu1 %1519 }
 0x26a   :  { %1580 = vst.msk [vmem:[#allocation2 + $0x390] sm:$0xf] %vm49_vm8, %v1520_v61  ;;  %v1840_v0 = vrot.slane %v1838_v58, 4 }
 0x26c   :  { %1867 = vrot.lane.b32.xlu2 %v1804_v60, %s10519_s14  ;;  %1863 = vrot.lane.b32.xlu0 %v1800_v59, %s10519_s14  ;;  %v1834_v59 = vrot.slane %v1833_v52, 4  ;;  %v1835_v60 = vrot.slane %v1756_v56, 5 }
 0x26e   :  { %v1642_v2 = vpop.permute.xlu2 %1641  ;;  %v1524_v3 = vpop.permute.xlu0 %1523  ;;  %v1836_v1 = vsel %vm10590_vm2, %v1834_v59, %v1835_v60 }
 0x26f   :  { %1713 = vst.msk [vmem:[#allocation2 + $0x58] sm:$0xf] %vm49_vm8, %v1642_v2  ;;  %1865 = vrot.lane.b32.xlu1 %v1801_v51, %s10519_s14  ;;  %v1837_v2 = vrot.slane %v1835_v60, 4 }
 0x270   :  { %1582 = vst.msk [vmem:[#allocation2 + $0x4a0] sm:$0xf] %vm49_vm8, %v1524_v3  ;;  %v1843_v3 = vrot.slane %v1759_v63, 5 }
 0x271   :  { %v1526_v7 = vpop.permute.xlu1 %1525 }
 0x272   :  { %1583 = vst.msk [vmem:[#allocation2 + $0x4a4] sm:$0xf] %vm49_vm8, %v1526_v7  ;;  %v1839_v7 = vsel %vm10590_vm2, %v1837_v2, %v1838_v58  ;;  %v1845_v8 = vrot.slane %v1843_v3, 4  ;;  %v1844_v20 = vsel %vm10590_vm2, %v1842_v16, %v1843_v3  ;;  %v2041_v58 = vrot.slane %v1983_v54, 6  ;;  %v1987_v2 = vld [vmem:[%s15901_s0 + $0x28] sm:$0xf] }
 0x274   :  { %1873 = vrot.lane.b32.xlu2 %v1809_v4, %s10519_s14  ;;  %1869 = vrot.lane.b32.xlu0 %v1807_v5, %s10519_s14  ;;  %v1760_v5 = vld [vmem:[%s15901_s0 + $0x5c] sm:$0x7]  ;;  %v2042_v63 = vrot.slane %v2041_v58, 4 }
 0x276   :  { %v1648_v14 = vpop.permute.xlu2 %1647  ;;  %v1530_v15 = vpop.permute.xlu0 %1529 }
 0x277   :  { %1716 = vst.msk [vmem:[#allocation2 + $0x16c] sm:$0xf] %vm49_vm8, %v1648_v14  ;;  %1871 = vrot.lane.b32.xlu1 %v1808_v10, %s10519_s14  ;;  %v1846_v10 = vrot.slane %v1760_v5, 5  ;;  %v1977_v14 = vld [vmem:[%s15901_s0] sm:$0xf]  ;;  %v2051_v5 = vrot.slane %v1987_v2, 6 }
 0x278   :  { %1585 = vst.msk [vmem:[#allocation2 + $0x5b4] sm:$0xf] %vm49_vm8, %v1530_v15 }
 0x279   :  { %v1532_v21 = vpop.permute.xlu1 %1531  ;;  %v1847_v15 = vsel %vm10590_vm2, %v1845_v8, %v1846_v10  ;;  %v1848_v26 = vrot.slane %v1846_v10, 4 }
 0x27a   :  { %1586 = vst.msk [vmem:[#allocation2 + $0x5b8] sm:$0xf] %vm49_vm8, %v1532_v21 }
 0x27c   :  { %1879 = vrot.lane.b32.xlu2 %v1816_v17, %s10519_s14  ;;  %1875 = vrot.lane.b32.xlu0 %v1812_v18, %s10519_s14  ;;  %v2025_v17 = vrot.slane %v1977_v14, 6  ;;  %v2053_v14 = vrot.slane %v2051_v5, 4 }
 0x27e   :  { %v1654_v29 = vpop.permute.xlu2 %1653  ;;  %v1536_v30 = vpop.permute.xlu0 %1535  ;;  %v2026_v21 = vrot.slane %v2025_v17, 4 }
 0x27f   :  { %1719 = vst.msk [vmem:[#allocation2 + $0x280] sm:$0xf] %vm49_vm8, %v1654_v29  ;;  %1877 = vrot.lane.b32.xlu1 %v1815_v24, %s10519_s14  ;;  %v1979_v29 = vld [vmem:[%s15901_s0 + $0x8] sm:$0x7] }
 0x280   :  { %1588 = vst.msk [vmem:[#allocation2 + $0x6c8] sm:$0xf] %vm49_vm8, %v1536_v30  ;;  %v2028_v27 = vsel %vm10722_vm5, %v2026_v21, %v2027_v22  ;;  %v1980_v30 = vld [vmem:[%s15901_s0 + $0xc] sm:$0xf]  ;;  %v1990_v22 = vld [vmem:[%s15901_s0 + $0x34] sm:$0xf] }
 0x281   :  { %v1538_v36 = vpop.permute.xlu1 %1537 }
 0x282   :  { %1589 = vst.msk [vmem:[#allocation2 + $0x6cc] sm:$0xf] %vm49_vm8, %v1538_v36  ;;  %v2033_v36 = vrot.slane %v1980_v30, 6  ;;  %v1993_v30 = vld [vmem:[%s15901_s0 + $0x40] sm:$0xf] }
 0x284   :  { %1885 = vrot.lane.b32.xlu2 %v1823_v32, %s10519_s14  ;;  %1881 = vrot.lane.b32.xlu0 %v1817_v28, %s10519_s14  ;;  %v2030_v32 = vrot.slane %v1979_v29, 6 }
 0x286   :  { %v1660_v41 = vpop.permute.xlu2 %1659  ;;  %v1542_v42 = vpop.permute.xlu0 %1541  ;;  %v2031_v37 = vsel %vm10722_vm5, %v2029_v31, %v2030_v32 }
 0x287   :  { %1722 = vst.msk [vmem:[#allocation2 + $0x394] sm:$0xf] %vm49_vm8, %v1660_v41  ;;  %1883 = vrot.lane.b32.xlu1 %v1820_v38, %s10519_s14  ;;  %v1982_v38 = vld [vmem:[%s15901_s0 + $0x14] sm:$0x7]  ;;  %v2032_v41 = vrot.slane %v2030_v32, 4 }
 0x288   :  { %1591 = vst.msk [vmem:[#allocation2 + $0x7dc] sm:$0xf] %vm49_vm8, %v1542_v42  ;;  %v2038_v42 = vrot.slane %v1982_v38, 6  ;;  %v1992_v38 = vld [vmem:[%s15901_s0 + $0x3c] sm:$0xf] }
 0x289   :  { %v1544_v45 = vpop.permute.xlu1 %1543 }
 0x28a   :  { %1592 = vst.msk [vmem:[#allocation2 + $0x7e0] sm:$0xf] %vm49_vm8, %v1544_v45  ;;  %v2040_v48 = vrot.slane %v2038_v42, 4 }
 0x28c   :  { %1891 = vrot.lane.b32.xlu2 %v1828_v44, %s10519_s14  ;;  %1887 = vrot.lane.b32.xlu0 %v1824_v43, %s10519_s14  ;;  %v2034_v43 = vrot.slane %v2033_v36, 4  ;;  %v2035_v44 = vrot.slane %v1981_v40, 6 }
 0x28e   :  { %v1666_v50 = vpop.permute.xlu2 %1665  ;;  %v1644_v51 = vpop.permute.xlu0 %1643  ;;  %v2036_v49 = vsel %vm10722_vm5, %v2034_v43, %v2035_v44 }
 0x28f   :  { %1725 = vst.msk [vmem:[#allocation2 + $0x4a8] sm:$0xf] %vm49_vm8, %v1666_v50  ;;  %1889 = vrot.lane.b32.xlu1 %v1825_v35, %s10519_s14  ;;  %v2037_v50 = vrot.slane %v2035_v44, 4 }
 0x290   :  { %1714 = vst.msk [vmem:[#allocation2 + $0x5c] sm:$0xf] %vm49_vm8, %v1644_v51  ;;  %v2043_v51 = vrot.slane %v1984_v47, 6 }
 0x291   :  { %v1646_v55 = vpop.permute.xlu1 %1645 }
 0x292   :  { %1715 = vst.msk [vmem:[#allocation2 + $0x60] sm:$0x7] %vm52_vm6, %v1646_v55  ;;  %v2039_v55 = vsel %vm10722_vm5, %v2037_v50, %v2038_v42  ;;  %v2045_v56 = vrot.slane %v2043_v51, 4  ;;  %v2044_v3 = vsel %vm10722_vm5, %v2042_v63, %v2043_v51  ;;  %v2065_v42 = vrot.slane %v1992_v38, 6  ;;  %v1996_v50 = vld [vmem:[%s15901_s0 + $0x4c] sm:$0xf] }
 0x294   :  { %1897 = vrot.lane.b32.xlu2 %v1833_v52, %s10519_s14  ;;  %1893 = vrot.lane.b32.xlu0 %v1831_v53, %s10519_s14  ;;  %v1985_v53 = vld [vmem:[%s15901_s0 + $0x20] sm:$0x7]  ;;  %v2066_v47 = vrot.slane %v2065_v42, 4 }
 0x296   :  { %v1672_v61 = vpop.permute.xlu2 %1671  ;;  %v1650_v62 = vpop.permute.xlu0 %1649 }
 0x297   :  { %1728 = vst.msk [vmem:[#allocation2 + $0x5bc] sm:$0xf] %vm49_vm8, %v1672_v61  ;;  %1895 = vrot.lane.b32.xlu1 %v1832_v57, %s10519_s14  ;;  %v2046_v57 = vrot.slane %v1985_v53, 6  ;;  %v1986_v61 = vld [vmem:[%s15901_s0 + $0x24] sm:$0xf]  ;;  %v2075_v53 = vrot.slane %v1996_v50, 6 }
 0x298   :  { %1717 = vst.msk [vmem:[#allocation2 + $0x170] sm:$0xf] %vm49_vm8, %v1650_v62 }
 0x299   :  { %v1652_v4 = vpop.permute.xlu1 %1651  ;;  %v2047_v62 = vsel %vm10722_vm5, %v2045_v56, %v2046_v57  ;;  %v2048_v8 = vrot.slane %v2046_v57, 4 }
 0x29a   :  { %1718 = vst.msk [vmem:[#allocation2 + $0x174] sm:$0x7] %vm52_vm6, %v1652_v4 }
 0x29c   :  { %1903 = vrot.lane.b32.xlu2 %v1840_v0, %s10519_s14  ;;  %1899 = vrot.lane.b32.xlu0 %v1836_v1, %s10519_s14  ;;  %v2049_v0 = vrot.slane %v1986_v61, 6  ;;  %v2077_v61 = vrot.slane %v2075_v53, 4 }
 0x29e   :  { %v1678_v12 = vpop.permute.xlu2 %1677  ;;  %v1656_v13 = vpop.permute.xlu0 %1655  ;;  %v2050_v4 = vrot.slane %v2049_v0, 4 }
 0x29f   :  { %1731 = vst.msk [vmem:[#allocation2 + $0x6d0] sm:$0xf] %vm49_vm8, %v1678_v12  ;;  %1901 = vrot.lane.b32.xlu1 %v1839_v7, %s10519_s14  ;;  %v1988_v12 = vld [vmem:[%s15901_s0 + $0x2c] sm:$0x7] }
 0x2a0   :  { %1720 = vst.msk [vmem:[#allocation2 + $0x284] sm:$0xf] %vm49_vm8, %v1656_v13  ;;  %v2052_v10 = vsel %vm10722_vm5, %v2050_v4, %v2051_v5  ;;  %v1989_v13 = vld [vmem:[%s15901_s0 + $0x30] sm:$0xf]  ;;  %v1999_v5 = vld [vmem:[%s15901_s0 + $0x58] sm:$0xf] }
 0x2a1   :  { %v1658_v18 = vpop.permute.xlu1 %1657 }
 0x2a2   :  { %1721 = vst.msk [vmem:[#allocation2 + $0x288] sm:$0x7] %vm52_vm6, %v1658_v18  ;;  %v2057_v18 = vrot.slane %v1989_v13, 6  ;;  %v2218_v13 = vld [vmem:[%s15901_s0 + $0x4] sm:$0xf] }
 0x2a4   :  { %1909 = vrot.lane.b32.xlu2 %v1847_v15, %s10519_s14  ;;  %1905 = vrot.lane.b32.xlu0 %v1841_v11, %s10519_s14  ;;  %v2054_v15 = vrot.slane %v1988_v12, 6 }
 0x2a6   :  { %v1684_v23 = vpop.permute.xlu2 %1683  ;;  %v1662_v24 = vpop.permute.xlu0 %1661  ;;  %v2055_v19 = vsel %vm10722_vm5, %v2053_v14, %v2054_v15 }
 0x2a7   :  { %1734 = vst.msk [vmem:[#allocation2 + $0x7e4] sm:$0xf] %vm49_vm8, %v1684_v23  ;;  %1907 = vrot.lane.b32.xlu1 %v1844_v20, %s10519_s14  ;;  %v1991_v20 = vld [vmem:[%s15901_s0 + $0x38] sm:$0x7]  ;;  %v2056_v23 = vrot.slane %v2054_v15, 4 }
 0x2a8   :  { %1723 = vst.msk [vmem:[#allocation2 + $0x398] sm:$0xf] %vm49_vm8, %v1662_v24  ;;  %v2062_v24 = vrot.slane %v1991_v20, 6  ;;  %v2217_v20 = vld [vmem:[%s15901_s0] sm:$0xf] }
 0x2a9   :  { %v1664_v28 = vpop.permute.xlu1 %1663 }
 0x2aa   :  { %1724 = vst.msk [vmem:[#allocation2 + $0x39c] sm:$0x7] %vm52_vm6, %v1664_v28  ;;  %v2064_v31 = vrot.slane %v2062_v24, 4 }
 0x2ac   :  { %2091 = vrot.lane.b32.xlu2 %v2028_v27, %s10520_s16  ;;  %1911 = vrot.lane.b32.xlu0 %v1848_v26, %s10519_s14  ;;  %v2058_v26 = vrot.slane %v2057_v18, 4  ;;  %v2059_v27 = vrot.slane %v1990_v22, 6 }
 0x2ae   :  { %v1850_v34 = vpop.permute.xlu2 %1849  ;;  %v1668_v35 = vpop.permute.xlu0 %1667  ;;  %v2060_v32 = vsel %vm10722_vm5, %v2058_v26, %v2059_v27 }
 0x2af   :  { %1945 = vst.msk [vmem:[#allocation2 + $0x60] sm:$0x8] %vm286_vm7, %v1850_v34  ;;  %2089 = vrot.lane.b32.xlu1 %v2025_v17, %s10520_s16  ;;  %v2061_v34 = vrot.slane %v2059_v27, 4 }
 0x2b0   :  { %1726 = vst.msk [vmem:[#allocation2 + $0x4ac] sm:$0xf] %vm49_vm8, %v1668_v35  ;;  %v2067_v35 = vrot.slane %v1993_v30, 6 }
 0x2b1   :  { %v1670_v39 = vpop.permute.xlu1 %1669 }
 0x2b2   :  { %1727 = vst.msk [vmem:[#allocation2 + $0x4b0] sm:$0x7] %vm52_vm6, %v1670_v39  ;;  %v2063_v39 = vsel %vm10722_vm5, %v2061_v34, %v2062_v24  ;;  %v2069_v40 = vrot.slane %v2067_v35, 4  ;;  %v2068_v51 = vsel %vm10722_vm5, %v2066_v47, %v2067_v35  ;;  %v2265_v24 = vrot.slane %v2217_v20, 7  ;;  %v2222_v34 = vld [vmem:[%s15901_s0 + $0x14] sm:$0x7] }
 0x2b3   :  { %v2220_v35 = vld [vmem:[%s15901_s0 + $0xc] sm:$0xf]  ;;  %v2277_v38 = vrot.slane %v2222_v34, 7  ;;  %v2225_v47 = vld [vmem:[%s15901_s0 + $0x20] sm:$0x7] }
 0x2b4   :  { %2097 = vrot.lane.b32.xlu2 %v2033_v36, %s10520_s16  ;;  %2093 = vrot.lane.b32.xlu0 %v2031_v37, %s10520_s16  ;;  %v1994_v37 = vld [vmem:[%s15901_s0 + $0x44] sm:$0x7]  ;;  %v2266_v30 = vrot.slane %v2265_v24, 4 }
 0x2b6   :  { %v1856_v45 = vpop.permute.xlu2 %1855  ;;  %v1674_v46 = vpop.permute.xlu0 %1673 }
 0x2b7   :  { %1948 = vst.msk [vmem:[#allocation2 + $0x6c] sm:$0x3] %vm290_vm9, %v1856_v45  ;;  %2095 = vrot.lane.b32.xlu1 %v2032_v41, %s10520_s16  ;;  %v2070_v41 = vrot.slane %v1994_v37, 6  ;;  %v1995_v45 = vld [vmem:[%s15901_s0 + $0x48] sm:$0xf] }
 0x2b8   :  { %1729 = vst.msk [vmem:[#allocation2 + $0x5c0] sm:$0xf] %vm49_vm8, %v1674_v46 }
 0x2b9   :  { %v1676_v52 = vpop.permute.xlu1 %1675  ;;  %v2071_v46 = vsel %vm10722_vm5, %v2069_v40, %v2070_v41  ;;  %v2072_v56 = vrot.slane %v2070_v41, 4 }
 0x2ba   :  { %1730 = vst.msk [vmem:[#allocation2 + $0x5c4] sm:$0x7] %vm52_vm6, %v1676_v52 }
 0x2bc   :  { %2103 = vrot.lane.b32.xlu2 %v2040_v48, %s10520_s16  ;;  %2099 = vrot.lane.b32.xlu0 %v2036_v49, %s10520_s16  ;;  %v2073_v48 = vrot.slane %v1995_v45, 6 }
 0x2be   :  { %v1862_v59 = vpop.permute.xlu2 %1861  ;;  %v1680_v60 = vpop.permute.xlu0 %1679  ;;  %v2074_v52 = vrot.slane %v2073_v48, 4 }
 0x2bf   :  { %1951 = vst.msk [vmem:[#allocation2 + $0x17c] sm:$0xf] %vm49_vm8, %v1862_v59  ;;  %2101 = vrot.lane.b32.xlu1 %v2039_v55, %s10520_s16  ;;  %v1997_v59 = vld [vmem:[%s15901_s0 + $0x50] sm:$0x7] }
 0x2c0   :  { %1732 = vst.msk [vmem:[#allocation2 + $0x6d4] sm:$0xf] %vm49_vm8, %v1680_v60  ;;  %v2076_v57 = vsel %vm10722_vm5, %v2074_v52, %v2075_v53  ;;  %v1998_v60 = vld [vmem:[%s15901_s0 + $0x54] sm:$0xf] }
 0x2c1   :  { %v1682_v1 = vpop.permute.xlu1 %1681 }
 0x2c2   :  { %1733 = vst.msk [vmem:[#allocation2 + $0x6d8] sm:$0x7] %vm52_vm6, %v1682_v1  ;;  %v2081_v1 = vrot.slane %v1998_v60, 6  ;;  %v2228_v60 = vld [vmem:[%s15901_s0 + $0x2c] sm:$0x7] }
 0x2c4   :  { %2109 = vrot.lane.b32.xlu2 %v2047_v62, %s10520_s16  ;;  %2105 = vrot.lane.b32.xlu0 %v2041_v58, %s10520_s16  ;;  %v2078_v62 = vrot.slane %v1997_v59, 6 }
 0x2c6   :  { %v1868_v6 = vpop.permute.xlu2 %1867  ;;  %v1686_v7 = vpop.permute.xlu0 %1685  ;;  %v2079_v2 = vsel %vm10722_vm5, %v2077_v61, %v2078_v62  ;;  %v2226_v61 = vld [vmem:[%s15901_s0 + $0x24] sm:$0xf] }
 0x2c7   :  { %1954 = vst.msk [vmem:[#allocation2 + $0x28c] sm:$0xf] %vm49_vm8, %v1868_v6  ;;  %2107 = vrot.lane.b32.xlu1 %v2044_v3, %s10520_s16  ;;  %v2000_v3 = vld [vmem:[%s15901_s0 + $0x5c] sm:$0x7]  ;;  %v2080_v6 = vrot.slane %v2078_v62, 4 }
 0x2c8   :  { %1735 = vst.msk [vmem:[#allocation2 + $0x7e8] sm:$0xf] %vm49_vm8, %v1686_v7  ;;  %v2086_v7 = vrot.slane %v2000_v3, 6 }
 0x2c9   :  { %v1688_v11 = vpop.permute.xlu1 %1687 }
 0x2ca   :  { %1736 = vst.msk [vmem:[#allocation2 + $0x7ec] sm:$0x7] %vm52_vm6, %v1688_v11  ;;  %v2088_v14 = vrot.slane %v2086_v7, 4 }
 0x2cc   :  { %2115 = vrot.lane.b32.xlu2 %v2052_v10, %s10520_s16  ;;  %2111 = vrot.lane.b32.xlu0 %v2048_v8, %s10520_s16  ;;  %v2082_v8 = vrot.slane %v2081_v1, 4  ;;  %v2083_v10 = vrot.slane %v1999_v5, 6 }
 0x2ce   :  { %v1874_v16 = vpop.permute.xlu2 %1873  ;;  %v1852_v17 = vpop.permute.xlu0 %1851  ;;  %v2084_v15 = vsel %vm10722_vm5, %v2082_v8, %v2083_v10 }
 0x2cf   :  { %1957 = vst.msk [vmem:[#allocation2 + $0x39c] sm:$0x8] %vm286_vm7, %v1874_v16  ;;  %2113 = vrot.lane.b32.xlu1 %v2049_v0, %s10520_s16  ;;  %v2085_v16 = vrot.slane %v2083_v10, 4  ;;  %v2231_v10 = vld [vmem:[%s15901_s0 + $0x38] sm:$0x7] }
 0x2d0   :  { %1946 = vst.msk [vmem:[#allocation2 + $0x64] sm:$0xf] %vm49_vm8, %v1852_v17  ;;  %v2267_v17 = vrot.slane %v2218_v13, 7 }
 0x2d1   :  { %v1854_v21 = vpop.permute.xlu1 %1853 }
 0x2d2   :  { %1947 = vst.msk [vmem:[#allocation2 + $0x68] sm:$0xf] %vm49_vm8, %v1854_v21  ;;  %v2087_v21 = vsel %vm10722_vm5, %v2085_v16, %v2086_v7  ;;  %v2269_v22 = vrot.slane %v2267_v17, 4 }
 0x2d4   :  { %2121 = vrot.lane.b32.xlu2 %v2057_v18, %s10520_s16  ;;  %2117 = vrot.lane.b32.xlu0 %v2055_v19, %s10520_s16  ;;  %v2219_v19 = vld [vmem:[%s15901_s0 + $0x8] sm:$0x7] }
 0x2d6   :  { %v1880_v28 = vpop.permute.xlu2 %1879  ;;  %v1858_v29 = vpop.permute.xlu0 %1857 }
 0x2d7   :  { %1960 = vst.msk [vmem:[#allocation2 + $0x3a8] sm:$0x3] %vm290_vm9, %v1880_v28  ;;  %2119 = vrot.lane.b32.xlu1 %v2056_v23, %s10520_s16  ;;  %v2270_v23 = vrot.slane %v2219_v19, 7  ;;  %v2221_v28 = vld [vmem:[%s15901_s0 + $0x10] sm:$0xf] }
 0x2d8   :  { %1949 = vst.msk [vmem:[#allocation2 + $0x174] sm:$0x8] %vm286_vm7, %v1858_v29 }
 0x2d9   :  { %v1860_v36 = vpop.permute.xlu1 %1859  ;;  %v2271_v29 = vsel %vm10911_vm12, %v2269_v22, %v2270_v23  ;;  %v2234_v23 = vld [vmem:[%s15901_s0 + $0x44] sm:$0x7] }
 0x2da   :  { %1950 = vst.msk [vmem:[#allocation2 + $0x178] sm:$0xf] %vm49_vm8, %v1860_v36  ;;  %v2268_v36 = vsel %vm10911_vm12, %v2266_v30, %v2267_v17 }
 0x2dc   :  { %2127 = vrot.lane.b32.xlu2 %v2064_v31, %s10520_s16  ;;  %2123 = vrot.lane.b32.xlu0 %v2060_v32, %s10520_s16  ;;  %v2274_v31 = vrot.slane %v2221_v28, 7  ;;  %v2305_v28 = vrot.slane %v2234_v23, 7  ;;  %v2427_v23 = vld [vmem:[%s15901_s0 + $0x28] sm:$0xf] }
 0x2de   :  { %v1886_v43 = vpop.permute.xlu2 %1885  ;;  %v1864_v44 = vpop.permute.xlu0 %1863  ;;  %v2276_v37 = vrot.slane %v2274_v31, 4 }
 0x2df   :  { %1963 = vst.msk [vmem:[#allocation2 + $0x4b8] sm:$0xf] %vm49_vm8, %v1886_v43  ;;  %2125 = vrot.lane.b32.xlu1 %v2063_v39, %s10520_s16  ;;  %v2272_v39 = vrot.slane %v2220_v35, 7 }
 0x2e0   :  { %1952 = vst.msk [vmem:[#allocation2 + $0x180] sm:$0x3] %vm290_vm9, %v1864_v44  ;;  %v2278_v43 = vsel %vm10911_vm12, %v2276_v37, %v2277_v38  ;;  %v2237_v38 = vld [vmem:[%s15901_s0 + $0x50] sm:$0x7] }
 0x2e1   :  { %v1866_v49 = vpop.permute.xlu1 %1865  ;;  %v2273_v44 = vrot.slane %v2272_v39, 4 }
 0x2e2   :  { %1953 = vst.msk [vmem:[#allocation2 + $0x288] sm:$0x8] %vm286_vm7, %v1866_v49 }
 0x2e3   :  { %v2275_v49 = vsel %vm10911_vm12, %v2273_v44, %v2274_v31 }
 0x2e4   :  { %2133 = vrot.lane.b32.xlu2 %v2071_v46, %s10520_s16  ;;  %2129 = vrot.lane.b32.xlu0 %v2065_v42, %s10520_s16  ;;  %v2224_v42 = vld [vmem:[%s15901_s0 + $0x1c] sm:$0xf] }
 0x2e5   :  { %v2281_v45 = vrot.slane %v2224_v42, 7  ;;  %v2312_v42 = vrot.slane %v2237_v38, 7 }
 0x2e6   :  { %v1892_v54 = vpop.permute.xlu2 %1891  ;;  %v1870_v55 = vpop.permute.xlu0 %1869 }
 0x2e7   :  { %1966 = vst.msk [vmem:[#allocation2 + $0x5c8] sm:$0xf] %vm49_vm8, %v1892_v54  ;;  %2131 = vrot.lane.b32.xlu1 %v2068_v51, %s10520_s16  ;;  %v2283_v50 = vrot.slane %v2281_v45, 4  ;;  %v2284_v51 = vrot.slane %v2225_v47, 7 }
 0x2e8   :  { %1955 = vst.msk [vmem:[#allocation2 + $0x290] sm:$0xf] %vm49_vm8, %v1870_v55  ;;  %v2227_v55 = vld [vmem:[%s15901_s0 + $0x28] sm:$0xf] }
 0x2e9   :  { %v1872_v58 = vpop.permute.xlu1 %1871 }
 0x2ea   :  { %1956 = vst.msk [vmem:[#allocation2 + $0x294] sm:$0x3] %vm290_vm9, %v1872_v58  ;;  %v2288_v58 = vrot.slane %v2227_v55, 7 }
 0x2ec   :  { %2139 = vrot.lane.b32.xlu2 %v2076_v57, %s10520_s16  ;;  %2135 = vrot.lane.b32.xlu0 %v2072_v56, %s10520_s16  ;;  %v2285_v56 = vsel %vm10911_vm12, %v2283_v50, %v2284_v51  ;;  %v2240_v51 = vld [vmem:[%s15901_s0 + $0x5c] sm:$0x7] }
 0x2ed   :  { %v2319_v55 = vrot.slane %v2240_v51, 7  ;;  %v2563_v51 = vld [vmem:[%s15901_s0 + $0x8] sm:$0x7] }
 0x2ee   :  { %v1898_v63 = vpop.permute.xlu2 %1897  ;;  %v1876_v0 = vpop.permute.xlu0 %1875 }
 0x2ef   :  { %1969 = vst.msk [vmem:[#allocation2 + $0x6d8] sm:$0x8] %vm286_vm7, %v1898_v63  ;;  %2137 = vrot.lane.b32.xlu1 %v2073_v48, %s10520_s16  ;;  %v2223_v48 = vld [vmem:[%s15901_s0 + $0x18] sm:$0xf]  ;;  %v2290_v63 = vrot.slane %v2288_v58, 4 }
 0x2f0   :  { %1958 = vst.msk [vmem:[#allocation2 + $0x3a0] sm:$0xf] %vm49_vm8, %v1876_v0  ;;  %v2279_v52 = vrot.slane %v2223_v48, 7  ;;  %v2291_v0 = vrot.slane %v2228_v60, 7 }
 0x2f1   :  { %v1878_v4 = vpop.permute.xlu1 %1877 }
 0x2f2   :  { %1959 = vst.msk [vmem:[#allocation2 + $0x3a4] sm:$0xf] %vm49_vm8, %v1878_v4  ;;  %v2280_v57 = vrot.slane %v2279_v52, 4  ;;  %v2230_v4 = vld [vmem:[%s15901_s0 + $0x34] sm:$0xf]  ;;  %v2292_v5 = vsel %vm10911_vm12, %v2290_v63, %v2291_v0 }
 0x2f3   :  { %v2295_v7 = vrot.slane %v2230_v4, 7  ;;  %v2418_v4 = vld [vmem:[%s15901_s0 + $0x4] sm:$0xf] }
 0x2f4   :  { %2145 = vrot.lane.b32.xlu2 %v2081_v1, %s10520_s16  ;;  %2141 = vrot.lane.b32.xlu0 %v2079_v2, %s10520_s16  ;;  %v2282_v62 = vsel %vm10911_vm12, %v2280_v57, %v2281_v45  ;;  %v2286_v1 = vrot.slane %v2226_v61, 7 }
 0x2f5   :  { %v2297_v13 = vrot.slane %v2295_v7, 4 }
 0x2f6   :  { %v1904_v11 = vpop.permute.xlu2 %1903  ;;  %v1882_v12 = vpop.permute.xlu0 %1881 }
 0x2f7   :  { %1972 = vst.msk [vmem:[#allocation2 + $0x6e4] sm:$0x3] %vm290_vm9, %v1904_v11  ;;  %2143 = vrot.lane.b32.xlu1 %v2080_v6, %s10520_s16  ;;  %v2287_v6 = vrot.slane %v2286_v1, 4  ;;  %v2229_v11 = vld [vmem:[%s15901_s0 + $0x30] sm:$0xf] }
 0x2f8   :  { %1961 = vst.msk [vmem:[#allocation2 + $0x4b0] sm:$0x8] %vm286_vm7, %v1882_v12 }
 0x2f9   :  { %v1884_v18 = vpop.permute.xlu1 %1883  ;;  %v2289_v12 = vsel %vm10911_vm12, %v2287_v6, %v2288_v58 }
 0x2fa   :  { %1962 = vst.msk [vmem:[#allocation2 + $0x4b4] sm:$0xf] %vm49_vm8, %v1884_v18  ;;  %v2233_v18 = vld [vmem:[%s15901_s0 + $0x40] sm:$0xf] }
 0x2fc   :  { %2151 = vrot.lane.b32.xlu2 %v2088_v14, %s10520_s16  ;;  %2147 = vrot.lane.b32.xlu0 %v2084_v15, %s10520_s16  ;;  %v2298_v14 = vrot.slane %v2231_v10, 7  ;;  %v2293_v15 = vrot.slane %v2229_v11, 7  ;;  %v2421_v11 = vld [vmem:[%s15901_s0 + $0x10] sm:$0xf] }
 0x2fe   :  { %v1910_v26 = vpop.permute.xlu2 %1909  ;;  %v1888_v27 = vpop.permute.xlu0 %1887  ;;  %v2299_v19 = vsel %vm10911_vm12, %v2297_v13, %v2298_v14  ;;  %v2294_v20 = vrot.slane %v2293_v15, 4  ;;  %v2425_v14 = vld [vmem:[%s15901_s0 + $0x20] sm:$0x7] }
 0x2ff   :  { %1975 = vst.msk [vmem:[#allocation2 + $0x7f4] sm:$0xf] %vm49_vm8, %v1910_v26  ;;  %2149 = vrot.lane.b32.xlu1 %v2087_v21, %s10520_s16  ;;  %v2302_v21 = vrot.slane %v2233_v18, 7  ;;  %s10524_s16 = smov 114  }
 0x300   :  { %1964 = vst.msk [vmem:[#allocation2 + $0x4bc] sm:$0x3] %vm290_vm9, %v1888_v27  ;;  %v2296_v26 = vsel %vm10911_vm12, %v2294_v20, %v2295_v7  ;;  %v2422_v7 = vld [vmem:[%s15901_s0 + $0x14] sm:$0x7]  ;;  %v2428_v20 = vld [vmem:[%s15901_s0 + $0x2c] sm:$0x7] }
 0x301   :  { %v1890_v32 = vpop.permute.xlu1 %1889  ;;  %v2304_v27 = vrot.slane %v2302_v21, 4 }
 0x302   :  { %1965 = vst.msk [vmem:[#allocation2 + $0x5c4] sm:$0x8] %vm286_vm7, %v1890_v32  ;;  %v2236_v32 = vld [vmem:[%s15901_s0 + $0x4c] sm:$0xf] }
 0x303   :  { %v2306_v34 = vsel %vm10911_vm12, %v2304_v27, %v2305_v28  ;;  %v2431_v27 = vld [vmem:[%s15901_s0 + $0x38] sm:$0x7]  ;;  %v2429_v28 = vld [vmem:[%s15901_s0 + $0x30] sm:$0xf] }
 0x304   :  { %2325 = vrot.lane.b32.xlu2 %v2271_v29, %s10521_s24  ;;  %2321 = vrot.lane.b32.xlu0 %v2265_v24, %s10521_s24  ;;  %v2232_v24 = vld [vmem:[%s15901_s0 + $0x3c] sm:$0xf] }
 0x305   :  { %v2300_v29 = vrot.slane %v2232_v24, 7 }
 0x306   :  { %v2092_v40 = vpop.permute.xlu2 %2091  ;;  %v1894_v41 = vpop.permute.xlu0 %1893 }
 0x307   :  { %2186 = vst.msk [vmem:[#allocation2 + $0x70] sm:$0xf] %vm49_vm8, %v2092_v40  ;;  %2323 = vrot.lane.b32.xlu1 %v2268_v36, %s10521_s24  ;;  %v2301_v35 = vrot.slane %v2300_v29, 4  ;;  %v2309_v36 = vrot.slane %v2236_v32, 7 }
 0x308   :  { %1967 = vst.msk [vmem:[#allocation2 + $0x5cc] sm:$0xf] %vm49_vm8, %v1894_v41 }
 0x309   :  { %v1896_v46 = vpop.permute.xlu1 %1895  ;;  %v2303_v40 = vsel %vm10911_vm12, %v2301_v35, %v2302_v21  ;;  %v2311_v41 = vrot.slane %v2309_v36, 4  ;;  %v2426_v21 = vld [vmem:[%s15901_s0 + $0x24] sm:$0xf]  ;;  %v2432_v35 = vld [vmem:[%s15901_s0 + $0x3c] sm:$0xf] }
 0x30a   :  { %1968 = vst.msk [vmem:[#allocation2 + $0x5d0] sm:$0x3] %vm290_vm9, %v1896_v46  ;;  %v2239_v46 = vld [vmem:[%s15901_s0 + $0x58] sm:$0xf] }
 0x30b   :  { %v2313_v47 = vsel %vm10911_vm12, %v2311_v41, %v2312_v42  ;;  %v2435_v41 = vld [vmem:[%s15901_s0 + $0x48] sm:$0xf] }
 0x30c   :  { %2331 = vrot.lane.b32.xlu2 %v2278_v43, %s10521_s24  ;;  %2327 = vrot.lane.b32.xlu0 %v2272_v39, %s10521_s24  ;;  %v2235_v39 = vld [vmem:[%s15901_s0 + $0x48] sm:$0xf] }
 0x30d   :  { %v2307_v43 = vrot.slane %v2235_v39, 7 }
 0x30e   :  { %v2098_v53 = vpop.permute.xlu2 %2097  ;;  %v1900_v54 = vpop.permute.xlu0 %1899 }
 0x30f   :  { %2189 = vst.msk [vmem:[#allocation2 + $0x180] sm:$0xc] %vm531_vm13, %v2098_v53  ;;  %2329 = vrot.lane.b32.xlu1 %v2275_v49, %s10521_s24  ;;  %v2308_v48 = vrot.slane %v2307_v43, 4  ;;  %v2316_v49 = vrot.slane %v2239_v46, 7  ;;  %v2562_v46 = vld [vmem:[%s15901_s0 + $0x4] sm:$0xf] }
 0x310   :  { %1970 = vst.msk [vmem:[#allocation2 + $0x6dc] sm:$0xf] %vm49_vm8, %v1900_v54 }
 0x311   :  { %v1902_v59 = vpop.permute.xlu1 %1901  ;;  %v2310_v53 = vsel %vm10911_vm12, %v2308_v48, %v2309_v36  ;;  %v2318_v54 = vrot.slane %v2316_v49, 4  ;;  %v2438_v48 = vld [vmem:[%s15901_s0 + $0x54] sm:$0xf] }
 0x312   :  { %1971 = vst.msk [vmem:[#allocation2 + $0x6e0] sm:$0xf] %vm49_vm8, %v1902_v59 }
 0x313   :  { %v2320_v59 = vsel %vm10911_vm12, %v2318_v54, %v2319_v55  ;;  %v2614_v55 = vrot.slane %v2563_v51, 5  ;;  %v10109_v51 = vld [vmem:[#allocation2 + $0x40] sm:$0xff] }
 0x314   :  { %2337 = vrot.lane.b32.xlu2 %v2285_v56, %s10521_s24  ;;  %2333 = vrot.lane.b32.xlu0 %v2279_v52, %s10521_s24  ;;  %v2238_v52 = vld [vmem:[%s15901_s0 + $0x54] sm:$0xf] }
 0x315   :  { %v2314_v56 = vrot.slane %v2238_v52, 7  ;;  %v2561_v52 = vld [vmem:[%s15901_s0] sm:$0xf] }
 0x316   :  { %v2104_v2 = vpop.permute.xlu2 %2103  ;;  %v1906_v3 = vpop.permute.xlu0 %1905 }
 0x317   :  { %2192 = vst.msk [vmem:[#allocation2 + $0x18c] sm:$0x1] %vm535_vm14, %v2104_v2  ;;  %2335 = vrot.lane.b32.xlu1 %v2282_v62, %s10521_s24  ;;  %v2315_v60 = vrot.slane %v2314_v56, 4  ;;  %v2417_v2 = vld [vmem:[%s15901_s0] sm:$0xf] }
 0x318   :  { %1973 = vst.msk [vmem:[#allocation2 + $0x7ec] sm:$0x8] %vm286_vm7, %v1906_v3 }
 0x319   :  { %v1908_v8 = vpop.permute.xlu1 %1907  ;;  %v2317_v62 = vsel %vm10911_vm12, %v2315_v60, %v2316_v49  ;;  %v2611_v49 = vrot.slane %v2562_v46, 5 }
 0x31a   :  { %1974 = vst.msk [vmem:[#allocation2 + $0x7f0] sm:$0xf] %vm49_vm8, %v1908_v8  ;;  %v2420_v8 = vld [vmem:[%s15901_s0 + $0xc] sm:$0xf] }
 0x31b   :  { %v2613_v54 = vrot.slane %v2611_v49, 4 }
 0x31c   :  { %2343 = vrot.lane.b32.xlu2 %v2292_v5, %s10521_s24  ;;  %2339 = vrot.lane.b32.xlu0 %v2286_v1, %s10521_s24  ;;  %v2419_v1 = vld [vmem:[%s15901_s0 + $0x8] sm:$0x7] }
 0x31d   :  { %v2615_v60 = vsel %vm10590_vm2, %v2613_v54, %v2614_v55 }
 0x31e   :  { %v2110_v16 = vpop.permute.xlu2 %2109  ;;  %v1912_v17 = vpop.permute.xlu0 %1911 }
 0x31f   :  { %2195 = vst.msk [vmem:[#allocation2 + $0x29c] sm:$0xf] %vm49_vm8, %v2110_v16  ;;  %2341 = vrot.lane.b32.xlu1 %v2289_v12, %s10521_s24 }
 0x320   :  { %1976 = vst.msk [vmem:[#allocation2 + $0x7f8] sm:$0x3] %vm290_vm9, %v1912_v17  ;;  %v2424_v17 = vld [vmem:[%s15901_s0 + $0x1c] sm:$0xf] }
 0x321   :  { %v2090_v22 = vpop.permute.xlu1 %2089 }
 0x322   :  { %2185 = vst.msk [vmem:[#allocation2 + $0x6c] sm:$0xc] %vm531_vm13, %v2090_v22 }
 0x324   :  { %2349 = vrot.lane.b32.xlu2 %v2299_v19, %s10521_s24  ;;  %2345 = vrot.lane.b32.xlu0 %v2293_v15, %s10521_s24  ;;  %v2423_v15 = vld [vmem:[%s15901_s0 + $0x18] sm:$0xf] }
 0x326   :  { %v2116_v30 = vpop.permute.xlu2 %2115  ;;  %v2094_v31 = vpop.permute.xlu0 %2093 }
 0x327   :  { %2198 = vst.msk [vmem:[#allocation2 + $0x3ac] sm:$0xf] %vm49_vm8, %v2116_v30  ;;  %2347 = vrot.lane.b32.xlu1 %v2296_v26, %s10521_s24  ;;  %v2430_v30 = vld [vmem:[%s15901_s0 + $0x34] sm:$0xf] }
 0x328   :  { %2187 = vst.msk [vmem:[#allocation2 + $0x74] sm:$0xf] %vm49_vm8, %v2094_v31 }
 0x329   :  { %v2096_v37 = vpop.permute.xlu1 %2095 }
 0x32a   :  { %2188 = vst.msk [vmem:[#allocation2 + $0x78] sm:$0x1] %vm535_vm14, %v2096_v37  ;;  %v2433_v37 = vld [vmem:[%s15901_s0 + $0x40] sm:$0xf] }
 0x32c   :  { %2355 = vrot.lane.b32.xlu2 %v2306_v34, %s10521_s24  ;;  %2351 = vrot.lane.b32.xlu0 %v2300_v29, %s10521_s24  ;;  %v2434_v34 = vld [vmem:[%s15901_s0 + $0x44] sm:$0x7] }
 0x32e   :  { %v2122_v44 = vpop.permute.xlu2 %2121  ;;  %v2100_v45 = vpop.permute.xlu0 %2099 }
 0x32f   :  { %2201 = vst.msk [vmem:[#allocation2 + $0x4bc] sm:$0xc] %vm531_vm13, %v2122_v44  ;;  %2353 = vrot.lane.b32.xlu1 %v2303_v40, %s10521_s24  ;;  %v2437_v40 = vld [vmem:[%s15901_s0 + $0x50] sm:$0x7] }
 0x330   :  { %2190 = vst.msk [vmem:[#allocation2 + $0x184] sm:$0xf] %vm49_vm8, %v2100_v45 }
 0x331   :  { %v2102_v50 = vpop.permute.xlu1 %2101 }
 0x332   :  { %2191 = vst.msk [vmem:[#allocation2 + $0x188] sm:$0xf] %vm49_vm8, %v2102_v50 }
 0x334   :  { %2361 = vrot.lane.b32.xlu2 %v2313_v47, %s10521_s24  ;;  %2357 = vrot.lane.b32.xlu0 %v2307_v43, %s10521_s24  ;;  %v2436_v43 = vld [vmem:[%s15901_s0 + $0x4c] sm:$0xf]  ;;  %v2440_v47 = vld [vmem:[%s15901_s0 + $0x5c] sm:$0x7] }
 0x336   :  { %v2128_v57 = vpop.permute.xlu2 %2127  ;;  %v2106_v58 = vpop.permute.xlu0 %2105 }
 0x337   :  { %2204 = vst.msk [vmem:[#allocation2 + $0x4c8] sm:$0x1] %vm535_vm14, %v2128_v57  ;;  %2359 = vrot.lane.b32.xlu1 %v2310_v53, %s10521_s24  ;;  %v2439_v53 = vld [vmem:[%s15901_s0 + $0x58] sm:$0xf] }
 0x338   :  { %2193 = vst.msk [vmem:[#allocation2 + $0x294] sm:$0xc] %vm531_vm13, %v2106_v58 }
 0x339   :  { %v2108_v61 = vpop.permute.xlu1 %2107 }
 0x33a   :  { %2194 = vst.msk [vmem:[#allocation2 + $0x298] sm:$0xf] %vm49_vm8, %v2108_v61 }
 0x33c   :  { %2367 = vrot.lane.b32.xlu2 %v2320_v59, %s10521_s24  ;;  %2363 = vrot.lane.b32.xlu0 %v2314_v56, %s10521_s24  ;;  %v2609_v56 = vrot.slane %v2561_v52, 5  ;;  %v2564_v59 = vld [vmem:[%s15901_s0 + $0xc] sm:$0xf] }
 0x33d   :  { %v10142_v52 = vld [vmem:[#allocation2 + $0x14c] sm:$0xff] }
 0x33e   :  { %v2134_v63 = vpop.permute.xlu2 %2133  ;;  %v2112_v0 = vpop.permute.xlu0 %2111  ;;  %v2610_v61 = vrot.slane %v2609_v56, 4 }
 0x33f   :  { %2207 = vst.msk [vmem:[#allocation2 + $0x5d8] sm:$0xf] %vm49_vm8, %v2134_v63  ;;  %2365 = vrot.lane.b32.xlu1 %v2317_v62, %s10521_s24  ;;  %v2617_v62 = vrot.slane %v2564_v59, 5 }
 0x340   :  { %2196 = vst.msk [vmem:[#allocation2 + $0x2a0] sm:$0x1] %vm535_vm14, %v2112_v0 }
 0x341   :  { %v2114_v3 = vpop.permute.xlu1 %2113 }
 0x342   :  { %2197 = vst.msk [vmem:[#allocation2 + $0x3a8] sm:$0xc] %vm531_vm13, %v2114_v3  ;;  %v2618_v3 = vrot.slane %v2617_v62, 4 }
 0x344   :  { %2469 = vrot.lane.b32.xlu2 %v2419_v1, %s10522_s19  ;;  %2465 = vrot.lane.b32.xlu0 %v2417_v2, %s10522_s19  ;;  %v2565_v1 = vld [vmem:[%s15901_s0 + $0x10] sm:$0xf]  ;;  %v2612_v2 = vsel %vm10590_vm2, %v2610_v61, %v2611_v49 }
 0x346   :  { %v2140_v5 = vpop.permute.xlu2 %2139  ;;  %v2118_v6 = vpop.permute.xlu0 %2117 }
 0x347   :  { %2210 = vst.msk [vmem:[#allocation2 + $0x6e8] sm:$0xf] %vm49_vm8, %v2140_v5  ;;  %2467 = vrot.lane.b32.xlu1 %v2418_v4, %s10522_s19  ;;  %v2619_v4 = vrot.slane %v2565_v1, 5 }
 0x348   :  { %2199 = vst.msk [vmem:[#allocation2 + $0x3b0] sm:$0xf] %vm49_vm8, %v2118_v6 }
 0x349   :  { %v2120_v10 = vpop.permute.xlu1 %2119 }
 0x34a   :  { %2200 = vst.msk [vmem:[#allocation2 + $0x3b4] sm:$0x1] %vm535_vm14, %v2120_v10  ;;  %v2620_v10 = vsel %vm10590_vm2, %v2618_v3, %v2619_v4 }
 0x34c   :  { %2475 = vrot.lane.b32.xlu2 %v2422_v7, %s10522_s19  ;;  %2471 = vrot.lane.b32.xlu0 %v2420_v8, %s10522_s19  ;;  %v10115_v7 = vld [vmem:[#allocation2 + $0x70] sm:$0xff]  ;;  %v2616_v8 = vrot.slane %v2614_v55, 4 }
 0x34e   :  { %v2146_v12 = vpop.permute.xlu2 %2145  ;;  %v2124_v13 = vpop.permute.xlu0 %2123 }
 0x34f   :  { %2213 = vst.msk [vmem:[#allocation2 + $0x7f8] sm:$0xc] %vm531_vm13, %v2146_v12  ;;  %2473 = vrot.lane.b32.xlu1 %v2421_v11, %s10522_s19  ;;  %v2566_v12 = vld [vmem:[%s15901_s0 + $0x14] sm:$0x7] }
 0x350   :  { %2202 = vst.msk [vmem:[#allocation2 + $0x4c0] sm:$0xf] %vm49_vm8, %v2124_v13  ;;  %v10114_v13 = vld [vmem:[#allocation2 + $0x68] sm:$0xff] }
 0x351   :  { %v2126_v16 = vpop.permute.xlu1 %2125 }
 0x352   :  { %2203 = vst.msk [vmem:[#allocation2 + $0x4c4] sm:$0xf] %vm49_vm8, %v2126_v16  ;;  %v2622_v16 = vrot.slane %v2566_v12, 5  ;;  %v10138_v12 = vld [vmem:[#allocation2 + $0x12c] sm:$0xff] }
 0x354   :  { %2481 = vrot.lane.b32.xlu2 %v2425_v14, %s10522_s19  ;;  %2477 = vrot.lane.b32.xlu0 %v2423_v15, %s10522_s19  ;;  %v2567_v14 = vld [vmem:[%s15901_s0 + $0x18] sm:$0xf]  ;;  %v2621_v15 = vrot.slane %v2619_v4, 4 }
 0x355   :  { %v2575_v4 = vld [vmem:[%s15901_s0 + $0x38] sm:$0x7] }
 0x356   :  { %v2152_v18 = vpop.permute.xlu2 %2151  ;;  %v2130_v19 = vpop.permute.xlu0 %2129 }
 0x357   :  { %2216 = vst.msk [vmem:[#allocation2 + $0x804] sm:$0x1] %vm535_vm14, %v2152_v18  ;;  %2479 = vrot.lane.b32.xlu1 %v2424_v17, %s10522_s19 }
 0x358   :  { %2205 = vst.msk [vmem:[#allocation2 + $0x5d0] sm:$0xc] %vm531_vm13, %v2130_v19  ;;  %v10113_v19 = vld [vmem:[#allocation2 + $0x60] sm:$0xff] }
 0x359   :  { %v2132_v22 = vpop.permute.xlu1 %2131 }
 0x35a   :  { %2206 = vst.msk [vmem:[#allocation2 + $0x5d4] sm:$0xf] %vm49_vm8, %v2132_v22  ;;  %v2569_v22 = vld [vmem:[%s15901_s0 + $0x20] sm:$0x7] }
 0x35c   :  { %2487 = vrot.lane.b32.xlu2 %v2428_v20, %s10522_s19  ;;  %2483 = vrot.lane.b32.xlu0 %v2426_v21, %s10522_s19  ;;  %v2625_v20 = vrot.slane %v2567_v14, 5  ;;  %v2623_v21 = vsel %vm10590_vm2, %v2621_v15, %v2622_v16  ;;  %v2578_v15 = vld [vmem:[%s15901_s0 + $0x44] sm:$0x7] }
 0x35e   :  { %v2326_v24 = vpop.permute.xlu2 %2325  ;;  %v2136_v26 = vpop.permute.xlu0 %2135 }
 0x35f   :  { %2395 = vst.msk [vmem:[#allocation2 + $0x80] sm:$0xf] %vm49_vm8, %v2326_v24  ;;  %2485 = vrot.lane.b32.xlu1 %v2427_v23, %s10522_s19  ;;  %v2568_v24 = vld [vmem:[%s15901_s0 + $0x1c] sm:$0xf] }
 0x360   :  { %2208 = vst.msk [vmem:[#allocation2 + $0x5dc] sm:$0x1] %vm535_vm14, %v2136_v26  ;;  %v10112_v26 = vld [vmem:[#allocation2 + $0x58] sm:$0xff] }
 0x361   :  { %v2138_v29 = vpop.permute.xlu1 %2137 }
 0x362   :  { %2209 = vst.msk [vmem:[#allocation2 + $0x6e4] sm:$0xc] %vm531_vm13, %v2138_v29  ;;  %v2626_v29 = vrot.slane %v2625_v20, 4 }
 0x364   :  { %2493 = vrot.lane.b32.xlu2 %v2431_v27, %s10522_s19  ;;  %2489 = vrot.lane.b32.xlu0 %v2429_v28, %s10522_s19  ;;  %v2624_v27 = vrot.slane %v2622_v16, 4  ;;  %v2630_v28 = vrot.slane %v2569_v22, 5 }
 0x366   :  { %v2332_v31 = vpop.permute.xlu2 %2331  ;;  %v2142_v32 = vpop.permute.xlu0 %2141 }
 0x367   :  { %2398 = vst.msk [vmem:[#allocation2 + $0x194] sm:$0xf] %vm49_vm8, %v2332_v31  ;;  %2491 = vrot.lane.b32.xlu1 %v2430_v30, %s10522_s19  ;;  %v2627_v30 = vrot.slane %v2568_v24, 5 }
 0x368   :  { %2211 = vst.msk [vmem:[#allocation2 + $0x6ec] sm:$0xf] %vm49_vm8, %v2142_v32 }
 0x369   :  { %v2144_v36 = vpop.permute.xlu1 %2143 }
 0x36a   :  { %2212 = vst.msk [vmem:[#allocation2 + $0x6f0] sm:$0x1] %vm535_vm14, %v2144_v36  ;;  %v2632_v36 = vrot.slane %v2630_v28, 4 }
 0x36c   :  { %2499 = vrot.lane.b32.xlu2 %v2434_v34, %s10522_s19  ;;  %2495 = vrot.lane.b32.xlu0 %v2432_v35, %s10522_s19  ;;  %v2571_v34 = vld [vmem:[%s15901_s0 + $0x28] sm:$0xf]  ;;  %v10111_v35 = vld [vmem:[#allocation2 + $0x50] sm:$0xff] }
 0x36e   :  { %v2338_v38 = vpop.permute.xlu2 %2337  ;;  %v2148_v39 = vpop.permute.xlu0 %2147 }
 0x36f   :  { %2401 = vst.msk [vmem:[#allocation2 + $0x2a8] sm:$0xf] %vm49_vm8, %v2338_v38  ;;  %2497 = vrot.lane.b32.xlu1 %v2433_v37, %s10522_s19  ;;  %v2628_v37 = vsel %vm10590_vm2, %v2626_v29, %v2627_v30  ;;  %v2629_v38 = vrot.slane %v2627_v30, 4 }
 0x370   :  { %2214 = vst.msk [vmem:[#allocation2 + $0x7fc] sm:$0xf] %vm49_vm8, %v2148_v39  ;;  %v2635_v39 = vrot.slane %v2571_v34, 5  ;;  %v2581_v34 = vld [vmem:[%s15901_s0 + $0x50] sm:$0x7] }
 0x371   :  { %v2150_v42 = vpop.permute.xlu1 %2149 }
 0x372   :  { %2215 = vst.msk [vmem:[#allocation2 + $0x800] sm:$0xf] %vm49_vm8, %v2150_v42  ;;  %v2570_v42 = vld [vmem:[%s15901_s0 + $0x24] sm:$0xf] }
 0x374   :  { %2505 = vrot.lane.b32.xlu2 %v2437_v40, %s10522_s19  ;;  %2501 = vrot.lane.b32.xlu0 %v2435_v41, %s10522_s19  ;;  %v2572_v41 = vld [vmem:[%s15901_s0 + $0x2c] sm:$0x7] }
 0x375   :  { %v2638_v46 = vrot.slane %v2572_v41, 5 }
 0x376   :  { %v2344_v44 = vpop.permute.xlu2 %2343  ;;  %v2322_v45 = vpop.permute.xlu0 %2321 }
 0x377   :  { %2404 = vst.msk [vmem:[#allocation2 + $0x3bc] sm:$0xf] %vm49_vm8, %v2344_v44  ;;  %2503 = vrot.lane.b32.xlu1 %v2436_v43, %s10522_s19  ;;  %v10110_v43 = vld [vmem:[#allocation2 + $0x48] sm:$0xff]  ;;  %v2631_v44 = vsel %vm10590_vm2, %v2629_v38, %v2630_v28  ;;  %v2640_v1 = vrot.slane %v2638_v46, 4  ;;  %v2662_v38 = vrot.slane %v2581_v34, 5 }
 0x378   :  { %2393 = vst.msk [vmem:[#allocation2 + $0x78] sm:$0xe] %vm744_vm15, %v2322_v45  ;;  %v2637_v45 = vrot.slane %v2635_v39, 4 }
 0x379   :  { %v2324_v50 = vpop.permute.xlu1 %2323 }
 0x37a   :  { %2394 = vst.msk [vmem:[#allocation2 + $0x7c] sm:$0xf] %vm49_vm8, %v2324_v50  ;;  %v2573_v50 = vld [vmem:[%s15901_s0 + $0x30] sm:$0xf] }
 0x37b   :  { %v2641_v55 = vrot.slane %v2573_v50, 5 }
 0x37c   :  { %2511 = vrot.lane.b32.xlu2 %v2440_v47, %s10522_s19  ;;  %2507 = vrot.lane.b32.xlu0 %v2438_v48, %s10522_s19  ;;  %v2633_v47 = vrot.slane %v2570_v42, 5  ;;  %v2582_v42 = vld [vmem:[%s15901_s0 + $0x54] sm:$0xf] }
 0x37e   :  { %v2350_v57 = vpop.permute.xlu2 %2349  ;;  %v2328_v58 = vpop.permute.xlu0 %2327  ;;  %v2634_v54 = vrot.slane %v2633_v47, 4 }
 0x37f   :  { %2407 = vst.msk [vmem:[#allocation2 + $0x4d0] sm:$0xf] %vm49_vm8, %v2350_v57  ;;  %2509 = vrot.lane.b32.xlu1 %v2439_v53, %s10522_s19  ;;  %v2639_v53 = vsel %vm10590_vm2, %v2637_v45, %v2638_v46  ;;  %v2574_v57 = vld [vmem:[%s15901_s0 + $0x34] sm:$0xf]  ;;  %v2665_v45 = vrot.slane %v2582_v42, 5 }
 0x380   :  { %2396 = vst.msk [vmem:[#allocation2 + $0x18c] sm:$0xe] %vm744_vm15, %v2328_v58  ;;  %v10141_v58 = vld [vmem:[#allocation2 + $0x144] sm:$0xff]  ;;  %v2636_v59 = vsel %vm10590_vm2, %v2634_v54, %v2635_v39  ;;  %v2643_v61 = vrot.slane %v2574_v57, 5  ;;  %v2801_v57 = vld [vmem:[%s15901_s0] sm:$0xf] }
 0x381   :  { %v2330_v63 = vpop.permute.xlu1 %2329  ;;  %v10116_v0 = vld [vmem:[#allocation2 + $0x78] sm:$0xff] }
 0x382   :  { %2397 = vst.msk [vmem:[#allocation2 + $0x190] sm:$0xf] %vm49_vm8, %v2330_v63  ;;  %5941 = vmatpush.bf16.msra.mxu1 %v10116_v0  ;;  %v10140_v0 = vld [vmem:[#allocation2 + $0x13c] sm:$0xff] }
 0x384   :  { %2677 = vrot.lane.b32.xlu2 %v2615_v60, %s10523_s26  ;;  %2673 = vrot.lane.b32.xlu0 %v2609_v56, %s10523_s26  ;;  %v2642_v60 = vrot.slane %v2641_v55, 4 }
 0x386   :  { %v2356_v5 = vpop.permute.xlu2 %2355  ;;  %v2334_v6 = vpop.permute.xlu0 %2333  ;;  %5942 = vmatpush.bf16.msra.mxu1 %v10115_v7  ;;  %v2645_v7 = vrot.slane %v2643_v61, 4 }
 0x387   :  { %2410 = vst.msk [vmem:[#allocation2 + $0x5e4] sm:$0xf] %vm49_vm8, %v2356_v5  ;;  %2675 = vrot.lane.b32.xlu1 %v2612_v2, %s10523_s26  ;;  %v2644_v2 = vsel %vm10590_vm2, %v2642_v60, %v2643_v61  ;;  %v10139_v5 = vld [vmem:[#allocation2 + $0x134] sm:$0xff] }
 0x388   :  { %2399 = vst.msk [vmem:[#allocation2 + $0x2a0] sm:$0xe] %vm744_vm15, %v2334_v6  ;;  %v2576_v6 = vld [vmem:[%s15901_s0 + $0x3c] sm:$0xf] }
 0x389   :  { %v2336_v11 = vpop.permute.xlu1 %2335 }
 0x38a   :  { %2400 = vst.msk [vmem:[#allocation2 + $0x2a4] sm:$0xf] %vm49_vm8, %v2336_v11  ;;  %5943 = vmatpush.bf16.msra.mxu1 %v10114_v13  ;;  %v2649_v13 = vrot.slane %v2576_v6, 5 }
 0x38c   :  { %2683 = vrot.lane.b32.xlu2 %v2620_v10, %s10523_s26  ;;  %2679 = vrot.lane.b32.xlu0 %v2616_v8, %s10523_s26  ;;  %v2646_v8 = vrot.slane %v2575_v4, 5 }
 0x38e   :  { %v2362_v17 = vpop.permute.xlu2 %2361  ;;  %v2340_v18 = vpop.permute.xlu0 %2339  ;;  %5944 = vmatpush.bf16.msra.mxu1 %v10113_v19  ;;  %v2647_v14 = vsel %vm10590_vm2, %v2645_v7, %v2646_v8  ;;  %v2648_v19 = vrot.slane %v2646_v8, 4 }
 0x38f   :  { %2413 = vst.msk [vmem:[#allocation2 + $0x6f8] sm:$0xf] %vm49_vm8, %v2362_v17  ;;  %2681 = vrot.lane.b32.xlu1 %v2617_v62, %s10523_s26  ;;  %v2577_v17 = vld [vmem:[%s15901_s0 + $0x40] sm:$0xf] }
 0x390   :  { %2402 = vst.msk [vmem:[#allocation2 + $0x3b4] sm:$0xe] %vm744_vm15, %v2340_v18  ;;  %v10137_v18 = vld [vmem:[#allocation2 + $0x124] sm:$0xff]  ;;  %v2651_v22 = vrot.slane %v2577_v17, 5  ;;  %v2804_v17 = vld [vmem:[%s15901_s0 + $0xc] sm:$0xf] }
 0x391   :  { %v2342_v23 = vpop.permute.xlu1 %2341 }
 0x392   :  { %2403 = vst.msk [vmem:[#allocation2 + $0x3b8] sm:$0xf] %vm49_vm8, %v2342_v23  ;;  %5945 = vmatpush.bf16.msra.mxu1 %v10112_v26  ;;  %v2580_v26 = vld [vmem:[%s15901_s0 + $0x4c] sm:$0xf]  ;;  %v2653_v30 = vrot.slane %v2651_v22, 4 }
 0x394   :  { %2689 = vrot.lane.b32.xlu2 %v2625_v20, %s10523_s26  ;;  %2685 = vrot.lane.b32.xlu0 %v2623_v21, %s10523_s26  ;;  %v2654_v20 = vrot.slane %v2578_v15, 5  ;;  %v2650_v21 = vrot.slane %v2649_v13, 4 }
 0x396   :  { %v2368_v31 = vpop.permute.xlu2 %2367  ;;  %v2346_v32 = vpop.permute.xlu0 %2345  ;;  %5946 = vmatpush.bf16.msra.mxu1 %v10111_v35  ;;  %v2656_v28 = vrot.slane %v2654_v20, 4  ;;  %v2652_v29 = vsel %vm10590_vm2, %v2650_v21, %v2651_v22  ;;  %v2579_v35 = vld [vmem:[%s15901_s0 + $0x48] sm:$0xf]  ;;  %v2857_v21 = vrot.slane %v2804_v17, 6 }
 0x397   :  { %2416 = vst.msk [vmem:[#allocation2 + $0x80c] sm:$0xf] %vm49_vm8, %v2368_v31  ;;  %2687 = vrot.lane.b32.xlu1 %v2624_v27, %s10523_s26  ;;  %v10136_v27 = vld [vmem:[#allocation2 + $0x11c] sm:$0xff]  ;;  %v2659_v31 = vrot.slane %v2580_v26, 5  ;;  %v2657_v39 = vrot.slane %v2579_v35, 5 }
 0x398   :  { %2405 = vst.msk [vmem:[#allocation2 + $0x4c8] sm:$0xe] %vm744_vm15, %v2346_v32 }
 0x399   :  { %v2348_v40 = vpop.permute.xlu1 %2347 }
 0x39a   :  { %2406 = vst.msk [vmem:[#allocation2 + $0x4cc] sm:$0xf] %vm49_vm8, %v2348_v40  ;;  %5947 = vmatpush.bf16.msra.mxu1 %v10110_v43 }
 0x39c   :  { %2695 = vrot.lane.b32.xlu2 %v2632_v36, %s10523_s26  ;;  %2691 = vrot.lane.b32.xlu0 %v2628_v37, %s10523_s26  ;;  %v2655_v36 = vsel %vm10590_vm2, %v2653_v30, %v2654_v20  ;;  %v2661_v37 = vrot.slane %v2659_v31, 4  ;;  %v2808_v30 = vld [vmem:[%s15901_s0 + $0x1c] sm:$0xf] }
 0x39d   :  { %v2867_v34 = vrot.slane %v2808_v30, 6 }
 0x39e   :  { %v2470_v48 = vpop.permute.xlu2 %2469  ;;  %v2352_v49 = vpop.permute.xlu0 %2351  ;;  %5948 = vmatpush.bf16.msra.mxu1 %v10109_v51  ;;  %v2663_v43 = vsel %vm10590_vm2, %v2661_v37, %v2662_v38 }
 0x39f   :  { %2539 = vst.msk [vmem:[#allocation2 + $0x8c] sm:$0x7] %vm52_vm6, %v2470_v48  ;;  %2693 = vrot.lane.b32.xlu1 %v2631_v44, %s10523_s26  ;;  %v2658_v44 = vrot.slane %v2657_v39, 4  ;;  %v2869_v42 = vrot.slane %v2867_v34, 4 }
 0x3a0   :  { %2408 = vst.msk [vmem:[#allocation2 + $0x5dc] sm:$0xe] %vm744_vm15, %v2352_v49  ;;  %v2666_v49 = vrot.slane %v2665_v45, 4 }
 0x3a1   :  { %v2354_v56 = vpop.permute.xlu1 %2353  ;;  %v2660_v48 = vsel %vm10590_vm2, %v2658_v44, %v2659_v31 }
 0x3a2   :  { %6243 = vmatpush.bf16.msrb.mxu1 %v10142_v52  ;;  %2409 = vst.msk [vmem:[#allocation2 + $0x5e0] sm:$0xf] %vm49_vm8, %v2354_v56  ;;  %v2584_v56 = vld [vmem:[%s15901_s0 + $0x5c] sm:$0x7] }
 0x3a4   :  { %2701 = vrot.lane.b32.xlu2 %v2639_v53, %s10523_s26  ;;  %2697 = vrot.lane.b32.xlu0 %v2633_v47, %s10523_s26  ;;  %v2583_v47 = vld [vmem:[%s15901_s0 + $0x58] sm:$0xf]  ;;  %v2664_v53 = vrot.slane %v2662_v38, 4 }
 0x3a5   :  { %v2667_v50 = vrot.slane %v2583_v47, 5 }
 0x3a6   :  { %6244 = vmatpush.bf16.msrb.mxu1 %v10141_v58  ;;  %v2476_v62 = vpop.permute.xlu2 %2475  ;;  %v2358_v63 = vpop.permute.xlu0 %2357 }
 0x3a7   :  { %2542 = vst.msk [vmem:[#allocation2 + $0x1a0] sm:$0x7] %vm52_vm6, %v2476_v62  ;;  %2699 = vrot.lane.b32.xlu1 %v2636_v59, %s10523_s26  ;;  %v2668_v54 = vsel %vm10590_vm2, %v2666_v49, %v2667_v50  ;;  %v2669_v58 = vrot.slane %v2667_v50, 4  ;;  %v2670_v59 = vrot.slane %v2584_v56, 5  ;;  %v2849_v62 = vrot.slane %v2801_v57, 6 }
 0x3a8   :  { %2411 = vst.msk [vmem:[#allocation2 + $0x6f0] sm:$0xe] %vm744_vm15, %v2358_v63  ;;  %v2811_v50 = vld [vmem:[%s15901_s0 + $0x28] sm:$0xf]  ;;  %v2814_v57 = vld [vmem:[%s15901_s0 + $0x34] sm:$0xf] }
 0x3a9   :  { %v2360_v3 = vpop.permute.xlu1 %2359  ;;  %v2671_v63 = vsel %vm10590_vm2, %v2669_v58, %v2670_v59 }
 0x3aa   :  { %6245 = vmatpush.bf16.msrb.mxu1 %v10140_v0  ;;  %2412 = vst.msk [vmem:[#allocation2 + $0x6f4] sm:$0xf] %vm49_vm8, %v2360_v3  ;;  %v2803_v0 = vld [vmem:[%s15901_s0 + $0x8] sm:$0x7]  ;;  %v2672_v3 = vrot.slane %v2670_v59, 4 }
 0x3ab   :  { %v2854_v4 = vrot.slane %v2803_v0, 6  ;;  %v2813_v0 = vld [vmem:[%s15901_s0 + $0x30] sm:$0xf] }
 0x3ac   :  { %2707 = vrot.lane.b32.xlu2 %v2644_v2, %s10523_s26  ;;  %2703 = vrot.lane.b32.xlu0 %v2640_v1, %s10523_s26  ;;  %v2802_v2 = vld [vmem:[%s15901_s0 + $0x4] sm:$0xf] }
 0x3ad   :  { %v2851_v6 = vrot.slane %v2802_v2, 6 }
 0x3ae   :  { %6246 = vmatpush.bf16.msrb.mxu1 %v10139_v5  ;;  %v2482_v10 = vpop.permute.xlu2 %2481  ;;  %v2364_v11 = vpop.permute.xlu0 %2363  ;;  %v2850_v5 = vrot.slane %v2849_v62, 4 }
 0x3af   :  { %2545 = vst.msk [vmem:[#allocation2 + $0x2b4] sm:$0x7] %vm52_vm6, %v2482_v10  ;;  %2705 = vrot.lane.b32.xlu1 %v2641_v55, %s10523_s26  ;;  %v2805_v10 = vld [vmem:[%s15901_s0 + $0x10] sm:$0xf] }
 0x3b0   :  { %2414 = vst.msk [vmem:[#allocation2 + $0x804] sm:$0xe] %vm744_vm15, %v2364_v11  ;;  %v2856_v11 = vrot.slane %v2854_v4, 4 }
 0x3b1   :  { %v2366_v16 = vpop.permute.xlu1 %2365 }
 0x3b2   :  { %6247 = vmatpush.bf16.msrb.mxu1 %v10138_v12  ;;  %2415 = vst.msk [vmem:[#allocation2 + $0x808] sm:$0xf] %vm49_vm8, %v2366_v16  ;;  %v2852_v12 = vsel %vm10722_vm5, %v2850_v5, %v2851_v6  ;;  %v2806_v16 = vld [vmem:[%s15901_s0 + $0x14] sm:$0x7] }
 0x3b3   :  { %v2862_v20 = vrot.slane %v2806_v16, 6 }
 0x3b4   :  { %2713 = vrot.lane.b32.xlu2 %v2649_v13, %s10523_s26  ;;  %2709 = vrot.lane.b32.xlu0 %v2647_v14, %s10523_s26  ;;  %v2853_v13 = vrot.slane %v2851_v6, 4  ;;  %v2859_v14 = vrot.slane %v2805_v10, 6 }
 0x3b5   :  { %v2864_v37 = vrot.slane %v2862_v20, 4 }
 0x3b6   :  { %6248 = vmatpush.bf16.msrb.mxu1 %v10137_v18  ;;  %v2488_v23 = vpop.permute.xlu2 %2487  ;;  %v2466_v24 = vpop.permute.xlu0 %2465  ;;  %v2855_v18 = vsel %vm10722_vm5, %v2853_v13, %v2854_v4  ;;  %v2881_v4 = vrot.slane %v2813_v0, 6  ;;  %v2817_v13 = vld [vmem:[%s15901_s0 + $0x40] sm:$0xf] }
 0x3b7   :  { %2548 = vst.msk [vmem:[#allocation2 + $0x3c8] sm:$0x7] %vm52_vm6, %v2488_v23  ;;  %2711 = vrot.lane.b32.xlu1 %v2648_v19, %s10523_s26  ;;  %v2861_v19 = vrot.slane %v2859_v14, 4  ;;  %v2891_v16 = vrot.slane %v2817_v13, 6 }
 0x3b8   :  { %2537 = vst.msk [vmem:[#allocation2 + $0x84] sm:$0xf] %vm49_vm8, %v2466_v24  ;;  %v2807_v24 = vld [vmem:[%s15901_s0 + $0x18] sm:$0xf]  ;;  %v2882_v10 = vrot.slane %v2881_v4, 4 }
 0x3b9   :  { %v2468_v32 = vpop.permute.xlu1 %2467  ;;  %v2863_v26 = vsel %vm10722_vm5, %v2861_v19, %v2862_v20 }
 0x3ba   :  { %6249 = vmatpush.bf16.msrb.mxu1 %v10136_v27  ;;  %2538 = vst.msk [vmem:[#allocation2 + $0x88] sm:$0xf] %vm49_vm8, %v2468_v32  ;;  %v2858_v27 = vrot.slane %v2857_v21, 4 }
 0x3bc   :  { %2719 = vrot.lane.b32.xlu2 %v2656_v28, %s10523_s26  ;;  %2715 = vrot.lane.b32.xlu0 %v2652_v29, %s10523_s26  ;;  %v2865_v28 = vrot.slane %v2807_v24, 6  ;;  %v2860_v31 = vsel %vm10722_vm5, %v2858_v27, %v2859_v14  ;;  %v2893_v24 = vrot.slane %v2891_v16, 4 }
 0x3be   :  { %v2494_v40 = vpop.permute.xlu2 %2493  ;;  %v2472_v41 = vpop.permute.xlu0 %2471  ;;  %v2866_v32 = vrot.slane %v2865_v28, 4 }
 0x3bf   :  { %2551 = vst.msk [vmem:[#allocation2 + $0x4dc] sm:$0x7] %vm52_vm6, %v2494_v40  ;;  %2717 = vrot.lane.b32.xlu1 %v2655_v36, %s10523_s26  ;;  %v2809_v40 = vld [vmem:[%s15901_s0 + $0x20] sm:$0x7] }
 0x3c0   :  { %2540 = vst.msk [vmem:[#allocation2 + $0x198] sm:$0xf] %vm49_vm8, %v2472_v41  ;;  %v2868_v38 = vsel %vm10722_vm5, %v2866_v32, %v2867_v34  ;;  %v2810_v41 = vld [vmem:[%s15901_s0 + $0x24] sm:$0xf]  ;;  %v2820_v34 = vld [vmem:[%s15901_s0 + $0x4c] sm:$0xf] }
 0x3c1   :  { %v2474_v46 = vpop.permute.xlu1 %2473 }
 0x3c2   :  { %2541 = vst.msk [vmem:[#allocation2 + $0x19c] sm:$0xf] %vm49_vm8, %v2474_v46  ;;  %v2873_v46 = vrot.slane %v2810_v41, 6  ;;  %v2823_v41 = vld [vmem:[%s15901_s0 + $0x58] sm:$0xf] }
 0x3c4   :  { %2725 = vrot.lane.b32.xlu2 %v2663_v43, %s10523_s26  ;;  %2721 = vrot.lane.b32.xlu0 %v2657_v39, %s10523_s26  ;;  %v2870_v43 = vrot.slane %v2809_v40, 6 }
 0x3c6   :  { %v2500_v51 = vpop.permute.xlu2 %2499  ;;  %v2478_v52 = vpop.permute.xlu0 %2477  ;;  %v2871_v47 = vsel %vm10722_vm5, %v2869_v42, %v2870_v43 }
 0x3c7   :  { %2554 = vst.msk [vmem:[#allocation2 + $0x5f0] sm:$0x7] %vm52_vm6, %v2500_v51  ;;  %2723 = vrot.lane.b32.xlu1 %v2660_v48, %s10523_s26  ;;  %v2812_v48 = vld [vmem:[%s15901_s0 + $0x2c] sm:$0x7]  ;;  %v2872_v51 = vrot.slane %v2870_v43, 4 }
 0x3c8   :  { %2543 = vst.msk [vmem:[#allocation2 + $0x2ac] sm:$0xf] %vm49_vm8, %v2478_v52  ;;  %v2878_v52 = vrot.slane %v2812_v48, 6  ;;  %v2822_v48 = vld [vmem:[%s15901_s0 + $0x54] sm:$0xf] }
 0x3c9   :  { %v2480_v55 = vpop.permute.xlu1 %2479 }
 0x3ca   :  { %2544 = vst.msk [vmem:[#allocation2 + $0x2b0] sm:$0xf] %vm49_vm8, %v2480_v55  ;;  %v2880_v58 = vrot.slane %v2878_v52, 4 }
 0x3cc   :  { %2731 = vrot.lane.b32.xlu2 %v2668_v54, %s10523_s26  ;;  %2727 = vrot.lane.b32.xlu0 %v2664_v53, %s10523_s26  ;;  %v2874_v53 = vrot.slane %v2873_v46, 4  ;;  %v2875_v54 = vrot.slane %v2811_v50, 6 }
 0x3ce   :  { %v2506_v60 = vpop.permute.xlu2 %2505  ;;  %v2484_v61 = vpop.permute.xlu0 %2483  ;;  %v2876_v59 = vsel %vm10722_vm5, %v2874_v53, %v2875_v54 }
 0x3cf   :  { %2557 = vst.msk [vmem:[#allocation2 + $0x704] sm:$0x7] %vm52_vm6, %v2506_v60  ;;  %2729 = vrot.lane.b32.xlu1 %v2665_v45, %s10523_s26  ;;  %v2877_v60 = vrot.slane %v2875_v54, 4 }
 0x3d0   :  { %2546 = vst.msk [vmem:[#allocation2 + $0x3c0] sm:$0xf] %vm49_vm8, %v2484_v61  ;;  %v2883_v61 = vrot.slane %v2814_v57, 6 }
 0x3d1   :  { %v2486_v1 = vpop.permute.xlu1 %2485 }
 0x3d2   :  { %2547 = vst.msk [vmem:[#allocation2 + $0x3c4] sm:$0xf] %vm49_vm8, %v2486_v1  ;;  %v2879_v1 = vsel %vm10722_vm5, %v2877_v60, %v2878_v52  ;;  %v2885_v2 = vrot.slane %v2883_v61, 4  ;;  %v2884_v14 = vsel %vm10722_vm5, %v2882_v10, %v2883_v61  ;;  %v2905_v52 = vrot.slane %v2822_v48, 6  ;;  %v3042_v60 = vld [vmem:[%s15901_s0 + $0x4] sm:$0xf] }
 0x3d4   :  { %2913 = vrot.lane.b32.xlu2 %v2849_v62, %s10524_s16  ;;  %2733 = vrot.lane.b32.xlu0 %v2671_v63, %s10523_s26  ;;  %v2815_v63 = vld [vmem:[%s15901_s0 + $0x38] sm:$0x7]  ;;  %v2906_v57 = vrot.slane %v2905_v52, 4 }
 0x3d6   :  { %v2512_v7 = vpop.permute.xlu2 %2511  ;;  %v2490_v8 = vpop.permute.xlu0 %2489 }
 0x3d7   :  { %2560 = vst.msk [vmem:[#allocation2 + $0x818] sm:$0x7] %vm52_vm6, %v2512_v7  ;;  %2735 = vrot.lane.b32.xlu1 %v2672_v3, %s10523_s26  ;;  %v2886_v3 = vrot.slane %v2815_v63, 6  ;;  %v2816_v7 = vld [vmem:[%s15901_s0 + $0x3c] sm:$0xf]  ;;  %v3091_v63 = vrot.slane %v3042_v60, 7 }
 0x3d8   :  { %2549 = vst.msk [vmem:[#allocation2 + $0x4d4] sm:$0xf] %vm49_vm8, %v2490_v8  ;;  %s10525_s26 = smov 113  }
 0x3d9   :  { %v2492_v15 = vpop.permute.xlu1 %2491  ;;  %v2887_v8 = vsel %vm10722_vm5, %v2885_v2, %v2886_v3  ;;  %v2888_v19 = vrot.slane %v2886_v3, 4  ;;  %v3044_v2 = vld [vmem:[%s15901_s0 + $0xc] sm:$0xf] }
 0x3da   :  { %2550 = vst.msk [vmem:[#allocation2 + $0x4d8] sm:$0xf] %vm49_vm8, %v2492_v15 }
 0x3dc   :  { %2919 = vrot.lane.b32.xlu2 %v2856_v11, %s10524_s16  ;;  %2915 = vrot.lane.b32.xlu0 %v2852_v12, %s10524_s16  ;;  %v2889_v11 = vrot.slane %v2816_v7, 6  ;;  %v3045_v7 = vld [vmem:[%s15901_s0 + $0x10] sm:$0xf] }
 0x3de   :  { %v2678_v22 = vpop.permute.xlu2 %2677  ;;  %v2496_v23 = vpop.permute.xlu0 %2495  ;;  %v2890_v15 = vrot.slane %v2889_v11, 4 }
 0x3df   :  { %2771 = vst.msk [vmem:[#allocation2 + $0x94] sm:$0xf] %vm49_vm8, %v2678_v22  ;;  %2917 = vrot.lane.b32.xlu1 %v2855_v18, %s10524_s16  ;;  %v2818_v22 = vld [vmem:[%s15901_s0 + $0x44] sm:$0x7] }
 0x3e0   :  { %2552 = vst.msk [vmem:[#allocation2 + $0x5e8] sm:$0xf] %vm49_vm8, %v2496_v23  ;;  %v2892_v20 = vsel %vm10722_vm5, %v2890_v15, %v2891_v16  ;;  %v2819_v23 = vld [vmem:[%s15901_s0 + $0x48] sm:$0xf]  ;;  %v3047_v16 = vld [vmem:[%s15901_s0 + $0x18] sm:$0xf] }
 0x3e1   :  { %v2498_v29 = vpop.permute.xlu1 %2497 }
 0x3e2   :  { %2553 = vst.msk [vmem:[#allocation2 + $0x5ec] sm:$0xf] %vm49_vm8, %v2498_v29  ;;  %v2897_v29 = vrot.slane %v2819_v23, 6 }
 0x3e4   :  { %2925 = vrot.lane.b32.xlu2 %v2863_v26, %s10524_s16  ;;  %2921 = vrot.lane.b32.xlu0 %v2857_v21, %s10524_s16  ;;  %v2894_v26 = vrot.slane %v2818_v22, 6  ;;  %v3046_v22 = vld [vmem:[%s15901_s0 + $0x14] sm:$0x7] }
 0x3e6   :  { %v2684_v35 = vpop.permute.xlu2 %2683  ;;  %v2502_v36 = vpop.permute.xlu0 %2501  ;;  %v2895_v30 = vsel %vm10722_vm5, %v2893_v24, %v2894_v26 }
 0x3e7   :  { %2774 = vst.msk [vmem:[#allocation2 + $0x1a4] sm:$0xf] %vm49_vm8, %v2684_v35  ;;  %2923 = vrot.lane.b32.xlu1 %v2860_v31, %s10524_s16  ;;  %v2821_v31 = vld [vmem:[%s15901_s0 + $0x50] sm:$0x7]  ;;  %v2896_v35 = vrot.slane %v2894_v26, 4 }
 0x3e8   :  { %2555 = vst.msk [vmem:[#allocation2 + $0x6fc] sm:$0xf] %vm49_vm8, %v2502_v36  ;;  %v2902_v36 = vrot.slane %v2821_v31, 6 }
 0x3e9   :  { %v2504_v39 = vpop.permute.xlu1 %2503 }
 0x3ea   :  { %2556 = vst.msk [vmem:[#allocation2 + $0x700] sm:$0xf] %vm49_vm8, %v2504_v39  ;;  %v2904_v42 = vrot.slane %v2902_v36, 4 }
 0x3ec   :  { %2931 = vrot.lane.b32.xlu2 %v2868_v38, %s10524_s16  ;;  %2927 = vrot.lane.b32.xlu0 %v2864_v37, %s10524_s16  ;;  %v2898_v37 = vrot.slane %v2897_v29, 4  ;;  %v2899_v38 = vrot.slane %v2820_v34, 6 }
 0x3ee   :  { %v2690_v44 = vpop.permute.xlu2 %2689  ;;  %v2508_v45 = vpop.permute.xlu0 %2507  ;;  %v2900_v43 = vsel %vm10722_vm5, %v2898_v37, %v2899_v38  ;;  %v3049_v37 = vld [vmem:[%s15901_s0 + $0x20] sm:$0x7] }
 0x3ef   :  { %2777 = vst.msk [vmem:[#allocation2 + $0x2b4] sm:$0x8] %vm286_vm7, %v2690_v44  ;;  %2929 = vrot.lane.b32.xlu1 %v2865_v28, %s10524_s16  ;;  %v2901_v44 = vrot.slane %v2899_v38, 4 }
 0x3f0   :  { %2558 = vst.msk [vmem:[#allocation2 + $0x810] sm:$0xf] %vm49_vm8, %v2508_v45  ;;  %v2907_v45 = vrot.slane %v2823_v41, 6  ;;  %v3108_v41 = vrot.slane %v3049_v37, 7 }
 0x3f1   :  { %v2510_v49 = vpop.permute.xlu1 %2509 }
 0x3f2   :  { %2559 = vst.msk [vmem:[#allocation2 + $0x814] sm:$0xf] %vm49_vm8, %v2510_v49  ;;  %v2903_v49 = vsel %vm10722_vm5, %v2901_v44, %v2902_v36  ;;  %v2909_v50 = vrot.slane %v2907_v45, 4  ;;  %v2908_v61 = vsel %vm10722_vm5, %v2906_v57, %v2907_v45  ;;  %v3051_v36 = vld [vmem:[%s15901_s0 + $0x28] sm:$0xf] }
 0x3f3   :  { %v3053_v44 = vld [vmem:[%s15901_s0 + $0x30] sm:$0xf]  ;;  %v3056_v57 = vld [vmem:[%s15901_s0 + $0x3c] sm:$0xf] }
 0x3f4   :  { %2937 = vrot.lane.b32.xlu2 %v2873_v46, %s10524_s16  ;;  %2933 = vrot.lane.b32.xlu0 %v2871_v47, %s10524_s16  ;;  %v2824_v47 = vld [vmem:[%s15901_s0 + $0x5c] sm:$0x7]  ;;  %v3124_v60 = vrot.slane %v3056_v57, 7 }
 0x3f6   :  { %v2696_v55 = vpop.permute.xlu2 %2695  ;;  %v2674_v56 = vpop.permute.xlu0 %2673 }
 0x3f7   :  { %2780 = vst.msk [vmem:[#allocation2 + $0x2c0] sm:$0x3] %vm290_vm9, %v2696_v55  ;;  %2935 = vrot.lane.b32.xlu1 %v2872_v51, %s10524_s16  ;;  %v2910_v51 = vrot.slane %v2824_v47, 6  ;;  %v3041_v55 = vld [vmem:[%s15901_s0] sm:$0xf]  ;;  %v3117_v47 = vrot.slane %v3053_v44, 7 }
 0x3f8   :  { %2769 = vst.msk [vmem:[#allocation2 + $0x8c] sm:$0x8] %vm286_vm7, %v2674_v56 }
 0x3f9   :  { %v2676_v62 = vpop.permute.xlu1 %2675  ;;  %v2911_v56 = vsel %vm10722_vm5, %v2909_v50, %v2910_v51  ;;  %v2912_v3 = vrot.slane %v2910_v51, 4  ;;  %v3052_v50 = vld [vmem:[%s15901_s0 + $0x2c] sm:$0x7]  ;;  %v3118_v51 = vrot.slane %v3117_v47, 4 }
 0x3fa   :  { %2770 = vst.msk [vmem:[#allocation2 + $0x90] sm:$0xf] %vm49_vm8, %v2676_v62 }
 0x3fc   :  { %2943 = vrot.lane.b32.xlu2 %v2880_v58, %s10524_s16  ;;  %2939 = vrot.lane.b32.xlu0 %v2876_v59, %s10524_s16  ;;  %v3089_v58 = vrot.slane %v3041_v55, 7 }
 0x3fe   :  { %v2702_v5 = vpop.permute.xlu2 %2701  ;;  %v2680_v6 = vpop.permute.xlu0 %2679  ;;  %v3090_v62 = vrot.slane %v3089_v58, 4 }
 0x3ff   :  { %2783 = vst.msk [vmem:[#allocation2 + $0x3d0] sm:$0xf] %vm49_vm8, %v2702_v5  ;;  %2941 = vrot.lane.b32.xlu1 %v2879_v1, %s10524_s16  ;;  %v3096_v5 = vrot.slane %v3044_v2, 7 }
 0x400   :  { %2772 = vst.msk [vmem:[#allocation2 + $0x98] sm:$0x3] %vm290_vm9, %v2680_v6 }
 0x401   :  { %v2682_v12 = vpop.permute.xlu1 %2681  ;;  %v3097_v10 = vrot.slane %v3096_v5, 4 }
 0x402   :  { %2773 = vst.msk [vmem:[#allocation2 + $0x1a0] sm:$0x8] %vm286_vm7, %v2682_v12  ;;  %v3093_v12 = vrot.slane %v3091_v63, 4 }
 0x404   :  { %2949 = vrot.lane.b32.xlu2 %v2887_v8, %s10524_s16  ;;  %2945 = vrot.lane.b32.xlu0 %v2881_v4, %s10524_s16  ;;  %v3092_v4 = vsel %vm10911_vm12, %v3090_v62, %v3091_v63  ;;  %v3043_v8 = vld [vmem:[%s15901_s0 + $0x8] sm:$0x7]  ;;  %v3057_v62 = vld [vmem:[%s15901_s0 + $0x40] sm:$0xf] }
 0x405   :  { %v3094_v13 = vrot.slane %v3043_v8, 7  ;;  %v3055_v63 = vld [vmem:[%s15901_s0 + $0x38] sm:$0x7] }
 0x406   :  { %v2708_v17 = vpop.permute.xlu2 %2707  ;;  %v2686_v18 = vpop.permute.xlu0 %2685 }
 0x407   :  { %2786 = vst.msk [vmem:[#allocation2 + $0x4e0] sm:$0xf] %vm49_vm8, %v2708_v17  ;;  %2947 = vrot.lane.b32.xlu1 %v2884_v14, %s10524_s16 }
 0x408   :  { %2775 = vst.msk [vmem:[#allocation2 + $0x1a8] sm:$0xf] %vm49_vm8, %v2686_v18  ;;  %v3095_v18 = vsel %vm10911_vm12, %v3093_v12, %v3094_v13  ;;  %v3060_v12 = vld [vmem:[%s15901_s0 + $0x4c] sm:$0xf]  ;;  %v3058_v13 = vld [vmem:[%s15901_s0 + $0x44] sm:$0x7] }
 0x409   :  { %v2688_v21 = vpop.permute.xlu1 %2687 }
 0x40a   :  { %2776 = vst.msk [vmem:[#allocation2 + $0x1ac] sm:$0x3] %vm290_vm9, %v2688_v21  ;;  %v3048_v21 = vld [vmem:[%s15901_s0 + $0x1c] sm:$0xf] }
 0x40b   :  { %v3105_v24 = vrot.slane %v3048_v21, 7 }
 0x40c   :  { %2955 = vrot.lane.b32.xlu2 %v2892_v20, %s10524_s16  ;;  %2951 = vrot.lane.b32.xlu0 %v2888_v19, %s10524_s16  ;;  %v3103_v19 = vrot.slane %v3047_v16, 7 }
 0x40e   :  { %v2714_v27 = vpop.permute.xlu2 %2713  ;;  %v2692_v28 = vpop.permute.xlu0 %2691  ;;  %v3104_v23 = vrot.slane %v3103_v19, 4 }
 0x40f   :  { %2789 = vst.msk [vmem:[#allocation2 + $0x5f0] sm:$0x8] %vm286_vm7, %v2714_v27  ;;  %2953 = vrot.lane.b32.xlu1 %v2889_v11, %s10524_s16  ;;  %v3098_v11 = vrot.slane %v3045_v7, 7  ;;  %v3101_v27 = vrot.slane %v3046_v22, 7 }
 0x410   :  { %2778 = vst.msk [vmem:[#allocation2 + $0x2b8] sm:$0xf] %vm49_vm8, %v2692_v28  ;;  %v3106_v31 = vsel %vm10911_vm12, %v3104_v23, %v3105_v24 }
 0x411   :  { %v2694_v32 = vpop.permute.xlu1 %2693  ;;  %v3099_v17 = vsel %vm10911_vm12, %v3097_v10, %v3098_v11  ;;  %v3100_v26 = vrot.slane %v3098_v11, 4 }
 0x412   :  { %2779 = vst.msk [vmem:[#allocation2 + $0x2bc] sm:$0xf] %vm49_vm8, %v2694_v32 }
 0x413   :  { %v3102_v32 = vsel %vm10911_vm12, %v3100_v26, %v3101_v27  ;;  %v3063_v26 = vld [vmem:[%s15901_s0 + $0x58] sm:$0xf]  ;;  %v3061_v27 = vld [vmem:[%s15901_s0 + $0x50] sm:$0x7] }
 0x414   :  { %2961 = vrot.lane.b32.xlu2 %v2897_v29, %s10524_s16  ;;  %2957 = vrot.lane.b32.xlu0 %v2895_v30, %s10524_s16  ;;  %v3050_v30 = vld [vmem:[%s15901_s0 + $0x24] sm:$0xf] }
 0x415   :  { %v3110_v34 = vrot.slane %v3050_v30, 7 }
 0x416   :  { %v2720_v39 = vpop.permute.xlu2 %2719  ;;  %v2698_v40 = vpop.permute.xlu0 %2697 }
 0x417   :  { %2792 = vst.msk [vmem:[#allocation2 + $0x5fc] sm:$0x3] %vm290_vm9, %v2720_v39  ;;  %2959 = vrot.lane.b32.xlu1 %v2896_v35, %s10524_s16  ;;  %v3111_v38 = vrot.slane %v3110_v34, 4  ;;  %v3112_v39 = vrot.slane %v3051_v36, 7 }
 0x418   :  { %2781 = vst.msk [vmem:[#allocation2 + $0x3c8] sm:$0x8] %vm286_vm7, %v2698_v40  ;;  %v3107_v40 = vrot.slane %v3105_v24, 4 }
 0x419   :  { %v2700_v46 = vpop.permute.xlu1 %2699  ;;  %v3113_v45 = vsel %vm10911_vm12, %v3111_v38, %v3112_v39  ;;  %v3064_v38 = vld [vmem:[%s15901_s0 + $0x5c] sm:$0x7] }
 0x41a   :  { %2782 = vst.msk [vmem:[#allocation2 + $0x3cc] sm:$0xf] %vm49_vm8, %v2700_v46  ;;  %v3109_v46 = vsel %vm10911_vm12, %v3107_v40, %v3108_v41  ;;  %v3143_v40 = vrot.slane %v3064_v38, 7  ;;  %v4210_v38 = vld [vmem:[%s15901_s0 + $0x4] sm:$0xf] }
 0x41c   :  { %2967 = vrot.lane.b32.xlu2 %v2904_v42, %s10524_s16  ;;  %2963 = vrot.lane.b32.xlu0 %v2900_v43, %s10524_s16 }
 0x41e   :  { %v2726_v53 = vpop.permute.xlu2 %2725  ;;  %v2704_v54 = vpop.permute.xlu0 %2703 }
 0x41f   :  { %2795 = vst.msk [vmem:[#allocation2 + $0x70c] sm:$0xf] %vm49_vm8, %v2726_v53  ;;  %2965 = vrot.lane.b32.xlu1 %v2903_v49, %s10524_s16  ;;  %v3054_v49 = vld [vmem:[%s15901_s0 + $0x34] sm:$0xf]  ;;  %v3114_v53 = vrot.slane %v3112_v39, 4 }
 0x420   :  { %2784 = vst.msk [vmem:[#allocation2 + $0x3d4] sm:$0x3] %vm290_vm9, %v2704_v54  ;;  %v3115_v54 = vrot.slane %v3052_v50, 7  ;;  %v3243_v50 = vld [vmem:[%s15901_s0 + $0x8] sm:$0x7] }
 0x421   :  { %v2706_v59 = vpop.permute.xlu1 %2705 }
 0x422   :  { %2785 = vst.msk [vmem:[#allocation2 + $0x4dc] sm:$0x8] %vm286_vm7, %v2706_v59  ;;  %v3116_v59 = vsel %vm10911_vm12, %v3114_v53, %v3115_v54 }
 0x424   :  { %2973 = vrot.lane.b32.xlu2 %v2911_v56, %s10524_s16  ;;  %2969 = vrot.lane.b32.xlu0 %v2905_v52, %s10524_s16  ;;  %v3119_v52 = vrot.slane %v3054_v49, 7  ;;  %v3245_v49 = vld [vmem:[%s15901_s0 + $0x10] sm:$0xf] }
 0x426   :  { %v2732_v0 = vpop.permute.xlu2 %2731  ;;  %v2710_v1 = vpop.permute.xlu0 %2709  ;;  %v3121_v2 = vrot.slane %v3119_v52, 4 }
 0x427   :  { %2798 = vst.msk [vmem:[#allocation2 + $0x81c] sm:$0xf] %vm49_vm8, %v2732_v0  ;;  %2971 = vrot.lane.b32.xlu1 %v2908_v61, %s10524_s16  ;;  %v3125_v0 = vrot.slane %v3124_v60, 4 }
 0x428   :  { %2787 = vst.msk [vmem:[#allocation2 + $0x4e4] sm:$0xf] %vm49_vm8, %v2710_v1  ;;  %v3126_v1 = vrot.slane %v3057_v62, 7  ;;  %v3251_v62 = vld [vmem:[%s15901_s0 + $0x28] sm:$0xf] }
 0x429   :  { %v2712_v6 = vpop.permute.xlu1 %2711 }
 0x42a   :  { %2788 = vst.msk [vmem:[#allocation2 + $0x4e8] sm:$0x3] %vm290_vm9, %v2712_v6  ;;  %v3059_v6 = vld [vmem:[%s15901_s0 + $0x48] sm:$0xf]  ;;  %v3127_v7 = vsel %vm10911_vm12, %v3125_v0, %v3126_v1  ;;  %v3128_v16 = vrot.slane %v3126_v1, 4 }
 0x42b   :  { %v3131_v10 = vrot.slane %v3059_v6, 7 }
 0x42c   :  { %3147 = vrot.lane.b32.xlu2 %v3092_v4, %s10525_s26  ;;  %2975 = vrot.lane.b32.xlu0 %v2912_v3, %s10524_s16  ;;  %v3122_v3 = vrot.slane %v3055_v63, 7  ;;  %v3249_v63 = vld [vmem:[%s15901_s0 + $0x20] sm:$0x7]  ;;  %s10532_s16 = smov 109  }
 0x42e   :  { %v2914_v14 = vpop.permute.xlu2 %2913  ;;  %v2716_v15 = vpop.permute.xlu0 %2715  ;;  %v3123_v8 = vsel %vm10911_vm12, %v3121_v2, %v3122_v3  ;;  %v12942_v2 = vld [vmem:[%s15901_s0 + $0x4] sm:$0xf] }
 0x42f   :  { %3009 = vst.msk [vmem:[#allocation2 + $0x98] sm:$0xc] %vm531_vm13, %v2914_v14  ;;  %3145 = vrot.lane.b32.xlu1 %v3089_v58, %s10525_s26  ;;  %v3120_v58 = vsel %vm10911_vm12, %v3118_v51, %v3119_v52  ;;  %v3132_v14 = vrot.slane %v3131_v10, 4  ;;  %v3244_v52 = vld [vmem:[%s15901_s0 + $0xc] sm:$0xf] }
 0x430   :  { %2790 = vst.msk [vmem:[#allocation2 + $0x5f4] sm:$0xf] %vm49_vm8, %v2716_v15  ;;  %v3133_v15 = vrot.slane %v3060_v12, 7  ;;  %v3250_v3 = vld [vmem:[%s15901_s0 + $0x24] sm:$0xf] }
 0x431   :  { %v2718_v20 = vpop.permute.xlu1 %2717 }
 0x432   :  { %2791 = vst.msk [vmem:[#allocation2 + $0x5f8] sm:$0xf] %vm49_vm8, %v2718_v20  ;;  %v3062_v20 = vld [vmem:[%s15901_s0 + $0x54] sm:$0xf]  ;;  %v3134_v21 = vsel %vm10911_vm12, %v3132_v14, %v3133_v15  ;;  %v3135_v30 = vrot.slane %v3133_v15, 4 }
 0x433   :  { %v3138_v23 = vrot.slane %v3062_v20, 7  ;;  %v4451_v14 = vld [vmem:[%s15901_s0 + $0x8] sm:$0x7]  ;;  %v12973_v15 = vld [vmem:[%s15901_s0] sm:$0xf] }
 0x434   :  { %3153 = vrot.lane.b32.xlu2 %v3099_v17, %s10525_s26  ;;  %3149 = vrot.lane.b32.xlu0 %v3095_v18, %s10525_s26  ;;  %v3129_v17 = vrot.slane %v3058_v13, 7  ;;  %v4449_v20 = vld [vmem:[%s15901_s0] sm:$0xf] }
 0x436   :  { %v2920_v28 = vpop.permute.xlu2 %2919  ;;  %v2722_v29 = vpop.permute.xlu0 %2721  ;;  %v3130_v22 = vsel %vm10911_vm12, %v3128_v16, %v3129_v17  ;;  %v4502_v17 = vrot.slane %v4451_v14, 6 }
 0x437   :  { %3012 = vst.msk [vmem:[#allocation2 + $0xa4] sm:$0x1] %vm535_vm14, %v2920_v28  ;;  %3151 = vrot.lane.b32.xlu1 %v3096_v5, %s10525_s26  ;;  %v3139_v28 = vrot.slane %v3138_v23, 4 }
 0x438   :  { %2793 = vst.msk [vmem:[#allocation2 + $0x704] sm:$0x8] %vm286_vm7, %v2722_v29  ;;  %v3140_v29 = vrot.slane %v3063_v26, 7 }
 0x439   :  { %v2724_v35 = vpop.permute.xlu1 %2723 }
 0x43a   :  { %2794 = vst.msk [vmem:[#allocation2 + $0x708] sm:$0xf] %vm49_vm8, %v2724_v35  ;;  %v3141_v35 = vsel %vm10911_vm12, %v3139_v28, %v3140_v29  ;;  %v3142_v39 = vrot.slane %v3140_v29, 4 }
 0x43c   :  { %3159 = vrot.lane.b32.xlu2 %v3106_v31, %s10525_s26  ;;  %3155 = vrot.lane.b32.xlu0 %v3102_v32, %s10525_s26  ;;  %v3136_v31 = vrot.slane %v3061_v27, 7  ;;  %v3144_v44 = vsel %vm10911_vm12, %v3142_v39, %v3143_v40  ;;  %v4504_v27 = vrot.slane %v4502_v17, 4  ;;  %v4259_v40 = vrot.slane %v4210_v38, 5  ;;  %v4690_v38 = vld [vmem:[%s15901_s0 + $0x4] sm:$0xf] }
 0x43e   :  { %v2926_v42 = vpop.permute.xlu2 %2925  ;;  %v2728_v43 = vpop.permute.xlu0 %2727  ;;  %v3137_v36 = vsel %vm10911_vm12, %v3135_v30, %v3136_v31 }
 0x43f   :  { %3015 = vst.msk [vmem:[#allocation2 + $0x1b4] sm:$0xf] %vm49_vm8, %v2926_v42  ;;  %3157 = vrot.lane.b32.xlu1 %v3103_v19, %s10525_s26 }
 0x440   :  { %2796 = vst.msk [vmem:[#allocation2 + $0x710] sm:$0x3] %vm290_vm9, %v2728_v43  ;;  %v3242_v43 = vld [vmem:[%s15901_s0 + $0x4] sm:$0xf] }
 0x441   :  { %v2730_v48 = vpop.permute.xlu1 %2729 }
 0x442   :  { %2797 = vst.msk [vmem:[#allocation2 + $0x818] sm:$0x8] %vm286_vm7, %v2730_v48 }
 0x444   :  { %3165 = vrot.lane.b32.xlu2 %v3113_v45, %s10525_s26  ;;  %3161 = vrot.lane.b32.xlu0 %v3109_v46, %s10525_s26  ;;  %v3241_v46 = vld [vmem:[%s15901_s0] sm:$0xf] }
 0x446   :  { %v2932_v55 = vpop.permute.xlu2 %2931  ;;  %v2734_v56 = vpop.permute.xlu0 %2733 }
 0x447   :  { %3018 = vst.msk [vmem:[#allocation2 + $0x2c4] sm:$0xf] %vm49_vm8, %v2932_v55  ;;  %3163 = vrot.lane.b32.xlu1 %v3110_v34, %s10525_s26  ;;  %v3248_v55 = vld [vmem:[%s15901_s0 + $0x1c] sm:$0xf] }
 0x448   :  { %2799 = vst.msk [vmem:[#allocation2 + $0x820] sm:$0xf] %vm49_vm8, %v2734_v56  ;;  %v3246_v56 = vld [vmem:[%s15901_s0 + $0x14] sm:$0x7] }
 0x449   :  { %v2736_v61 = vpop.permute.xlu1 %2735 }
 0x44a   :  { %2800 = vst.msk [vmem:[#allocation2 + $0x824] sm:$0x3] %vm290_vm9, %v2736_v61  ;;  %v3385_v61 = vld [vmem:[%s15901_s0] sm:$0xf] }
 0x44b   :  { %v3433_v0 = vrot.slane %v3385_v61, 5 }
 0x44c   :  { %3171 = vrot.lane.b32.xlu2 %v3120_v58, %s10525_s26  ;;  %3167 = vrot.lane.b32.xlu0 %v3116_v59, %s10525_s26  ;;  %v3247_v58 = vld [vmem:[%s15901_s0 + $0x18] sm:$0xf] }
 0x44e   :  { %v2938_v4 = vpop.permute.xlu2 %2937  ;;  %v2916_v5 = vpop.permute.xlu0 %2915 }
 0x44f   :  { %3021 = vst.msk [vmem:[#allocation2 + $0x3d4] sm:$0xc] %vm531_vm13, %v2938_v4  ;;  %3169 = vrot.lane.b32.xlu1 %v3117_v47, %s10525_s26  ;;  %v3434_v4 = vrot.slane %v3433_v0, 4 }
 0x450   :  { %3010 = vst.msk [vmem:[#allocation2 + $0x9c] sm:$0xf] %vm49_vm8, %v2916_v5  ;;  %v3435_v5 = vrot.slane %v12942_v2, 5 }
 0x451   :  { %v2918_v11 = vpop.permute.xlu1 %2917 }
 0x452   :  { %3011 = vst.msk [vmem:[#allocation2 + $0xa0] sm:$0xf] %vm49_vm8, %v2918_v11  ;;  %v3252_v11 = vld [vmem:[%s15901_s0 + $0x2c] sm:$0x7] }
 0x454   :  { %3177 = vrot.lane.b32.xlu2 %v3127_v7, %s10525_s26  ;;  %3173 = vrot.lane.b32.xlu0 %v3123_v8, %s10525_s26  ;;  %v4450_v8 = vld [vmem:[%s15901_s0 + $0x4] sm:$0xf] }
 0x455   :  { %v4499_v12 = vrot.slane %v4450_v8, 6 }
 0x456   :  { %v2944_v18 = vpop.permute.xlu2 %2943  ;;  %v2922_v19 = vpop.permute.xlu0 %2921 }
 0x457   :  { %3024 = vst.msk [vmem:[#allocation2 + $0x3e0] sm:$0x1] %vm535_vm14, %v2944_v18  ;;  %3175 = vrot.lane.b32.xlu1 %v3124_v60, %s10525_s26  ;;  %v4501_v16 = vrot.slane %v4499_v12, 4 }
 0x458   :  { %3013 = vst.msk [vmem:[#allocation2 + $0x1ac] sm:$0xc] %vm531_vm13, %v2922_v19 }
 0x459   :  { %v2924_v24 = vpop.permute.xlu1 %2923 }
 0x45a   :  { %3014 = vst.msk [vmem:[#allocation2 + $0x1b0] sm:$0xf] %vm49_vm8, %v2924_v24  ;;  %v4211_v24 = vld [vmem:[%s15901_s0 + $0x8] sm:$0x7] }
 0x45b   :  { %v4262_v28 = vrot.slane %v4211_v24, 5 }
 0x45c   :  { %3183 = vrot.lane.b32.xlu2 %v3134_v21, %s10525_s26  ;;  %3179 = vrot.lane.b32.xlu0 %v3130_v22, %s10525_s26  ;;  %v4737_v21 = vrot.slane %v12973_v15, 7  ;;  %v4503_v22 = vsel %vm10722_vm5, %v4501_v16, %v4502_v17  ;;  %v4691_v15 = vld [vmem:[%s15901_s0 + $0x8] sm:$0x7] }
 0x45e   :  { %v2950_v32 = vpop.permute.xlu2 %2949  ;;  %v2928_v34 = vpop.permute.xlu0 %2927 }
 0x45f   :  { %3027 = vst.msk [vmem:[#allocation2 + $0x4f0] sm:$0xf] %vm49_vm8, %v2950_v32  ;;  %3181 = vrot.lane.b32.xlu1 %v3131_v10, %s10525_s26  ;;  %v3436_v10 = vsel %vm10590_vm2, %v3434_v4, %v3435_v5  ;;  %v4209_v32 = vld [vmem:[%s15901_s0] sm:$0xf] }
 0x460   :  { %3016 = vst.msk [vmem:[#allocation2 + $0x1b8] sm:$0x1] %vm535_vm14, %v2928_v34  ;;  %v4264_v34 = vrot.slane %v4262_v28, 4 }
 0x461   :  { %v2930_v37 = vpop.permute.xlu1 %2929 }
 0x462   :  { %3017 = vst.msk [vmem:[#allocation2 + $0x2c0] sm:$0xc] %vm531_vm13, %v2930_v37 }
 0x464   :  { %3189 = vrot.lane.b32.xlu2 %v3141_v35, %s10525_s26  ;;  %3185 = vrot.lane.b32.xlu0 %v3137_v36, %s10525_s26  ;;  %v4257_v36 = vrot.slane %v4209_v32, 5  ;;  %v13088_v32 = vld [vmem:[%s15901_s0 + $0x10] sm:$0xf] }
 0x466   :  { %v2956_v41 = vpop.permute.xlu2 %2955  ;;  %v2934_v42 = vpop.permute.xlu0 %2933  ;;  %v4258_v39 = vrot.slane %v4257_v36, 4 }
 0x467   :  { %3030 = vst.msk [vmem:[#allocation2 + $0x600] sm:$0xf] %vm49_vm8, %v2956_v41  ;;  %3187 = vrot.lane.b32.xlu1 %v3138_v23, %s10525_s26  ;;  %v4497_v23 = vrot.slane %v4449_v20, 6 }
 0x468   :  { %3019 = vst.msk [vmem:[#allocation2 + $0x2c8] sm:$0xf] %vm49_vm8, %v2934_v42 }
 0x469   :  { %v2936_v45 = vpop.permute.xlu1 %2935  ;;  %v4498_v29 = vrot.slane %v4497_v23, 4 }
 0x46a   :  { %3020 = vst.msk [vmem:[#allocation2 + $0x2cc] sm:$0x1] %vm535_vm14, %v2936_v45  ;;  %v4260_v45 = vsel %vm10590_vm2, %v4258_v39, %v4259_v40 }
 0x46b   :  { %v4500_v35 = vsel %vm10722_vm5, %v4498_v29, %v4499_v12  ;;  %v3388_v29 = vld [vmem:[%s15901_s0 + $0xc] sm:$0xf] }
 0x46c   :  { %3291 = vrot.lane.b32.xlu2 %v3242_v43, %s10526_s25  ;;  %3191 = vrot.lane.b32.xlu0 %v3144_v44, %s10525_s26  ;;  %v3866_v43 = vld [vmem:[%s15901_s0 + $0x4] sm:$0xf] }
 0x46d   :  { %v4066_v44 = vld [vmem:[%s15901_s0 + $0x4] sm:$0xf] }
 0x46e   :  { %v2962_v47 = vpop.permute.xlu2 %2961  ;;  %v2940_v48 = vpop.permute.xlu0 %2939 }
 0x46f   :  { %3033 = vst.msk [vmem:[#allocation2 + $0x710] sm:$0xc] %vm531_vm13, %v2962_v47  ;;  %3289 = vrot.lane.b32.xlu1 %v3241_v46, %s10526_s25  ;;  %v4261_v46 = vrot.slane %v4259_v40, 4  ;;  %v3915_v47 = vrot.slane %v3866_v43, 7  ;;  %v4738_v40 = vrot.slane %v4737_v21, 4 }
 0x470   :  { %3022 = vst.msk [vmem:[#allocation2 + $0x3d8] sm:$0xf] %vm49_vm8, %v2940_v48 }
 0x471   :  { %v2942_v51 = vpop.permute.xlu1 %2941 }
 0x472   :  { %3023 = vst.msk [vmem:[#allocation2 + $0x3dc] sm:$0xf] %vm49_vm8, %v2942_v51  ;;  %v3917_v51 = vrot.slane %v3915_v47, 4 }
 0x474   :  { %3297 = vrot.lane.b32.xlu2 %v3245_v49, %s10526_s25  ;;  %3293 = vrot.lane.b32.xlu0 %v3243_v50, %s10526_s25  ;;  %v3867_v49 = vld [vmem:[%s15901_s0 + $0x8] sm:$0x7]  ;;  %v4263_v50 = vsel %vm10590_vm2, %v4261_v46, %v4262_v28 }
 0x476   :  { %v2968_v53 = vpop.permute.xlu2 %2967  ;;  %v2946_v54 = vpop.permute.xlu0 %2945 }
 0x477   :  { %3036 = vst.msk [vmem:[#allocation2 + $0x71c] sm:$0x1] %vm535_vm14, %v2968_v53  ;;  %3295 = vrot.lane.b32.xlu1 %v3244_v52, %s10526_s25  ;;  %v3918_v52 = vrot.slane %v3867_v49, 7 }
 0x478   :  { %3025 = vst.msk [vmem:[#allocation2 + $0x4e8] sm:$0xc] %vm531_vm13, %v2946_v54 }
 0x479   :  { %v2948_v57 = vpop.permute.xlu1 %2947 }
 0x47a   :  { %3026 = vst.msk [vmem:[#allocation2 + $0x4ec] sm:$0xf] %vm49_vm8, %v2948_v57 }
 0x47c   :  { %3303 = vrot.lane.b32.xlu2 %v3248_v55, %s10526_s25  ;;  %3299 = vrot.lane.b32.xlu0 %v3246_v56, %s10526_s25  ;;  %v3919_v55 = vsel %vm10911_vm12, %v3917_v51, %v3918_v52  ;;  %v4067_v56 = vld [vmem:[%s15901_s0 + $0x8] sm:$0x7]  ;;  %v3254_v51 = vld [vmem:[%s15901_s0 + $0x34] sm:$0xf] }
 0x47e   :  { %v2974_v59 = vpop.permute.xlu2 %2973  ;;  %v2952_v60 = vpop.permute.xlu0 %2951 }
 0x47f   :  { %3039 = vst.msk [vmem:[#allocation2 + $0x82c] sm:$0xf] %vm49_vm8, %v2974_v59  ;;  %3301 = vrot.lane.b32.xlu1 %v3247_v58, %s10526_s25  ;;  %v3865_v58 = vld [vmem:[%s15901_s0] sm:$0xf]  ;;  %v3627_v59 = vld [vmem:[%s15901_s0 + $0x8] sm:$0x7] }
 0x480   :  { %3028 = vst.msk [vmem:[#allocation2 + $0x4f4] sm:$0x1] %vm535_vm14, %v2952_v60 }
 0x481   :  { %v2954_v1 = vpop.permute.xlu1 %2953 }
 0x482   :  { %3029 = vst.msk [vmem:[#allocation2 + $0x5fc] sm:$0xc] %vm531_vm13, %v2954_v1  ;;  %v4065_v1 = vld [vmem:[%s15901_s0] sm:$0xf] }
 0x484   :  { %3309 = vrot.lane.b32.xlu2 %v3251_v62, %s10526_s25  ;;  %3305 = vrot.lane.b32.xlu0 %v3249_v63, %s10526_s25  ;;  %v3626_v62 = vld [vmem:[%s15901_s0 + $0x4] sm:$0xf]  ;;  %v3913_v63 = vrot.slane %v3865_v58, 7 }
 0x486   :  { %v3148_v6 = vpop.permute.xlu2 %3147  ;;  %v2958_v7 = vpop.permute.xlu0 %2957 }
 0x487   :  { %3218 = vst.msk [vmem:[#allocation2 + $0xa8] sm:$0xf] %vm49_vm8, %v3148_v6  ;;  %3307 = vrot.lane.b32.xlu1 %v3250_v3, %s10526_s25  ;;  %v3675_v3 = vrot.slane %v3626_v62, 6  ;;  %v3625_v6 = vld [vmem:[%s15901_s0] sm:$0xf] }
 0x488   :  { %3031 = vst.msk [vmem:[#allocation2 + $0x604] sm:$0xf] %vm49_vm8, %v2958_v7  ;;  %v3255_v62 = vld [vmem:[%s15901_s0 + $0x38] sm:$0x7] }
 0x489   :  { %v2960_v13 = vpop.permute.xlu1 %2959  ;;  %v3677_v8 = vrot.slane %v3675_v3, 4 }
 0x48a   :  { %3032 = vst.msk [vmem:[#allocation2 + $0x608] sm:$0x1] %vm535_vm14, %v2960_v13 }
 0x48c   :  { %3499 = vrot.lane.b32.xlu2 %v3436_v10, %s10527_s11  ;;  %3311 = vrot.lane.b32.xlu0 %v3252_v11, %s10526_s25  ;;  %v3914_v10 = vrot.slane %v3913_v63, 4  ;;  %v3673_v11 = vrot.slane %v3625_v6, 6  ;;  %v4214_v6 = vld [vmem:[%s15901_s0 + $0x14] sm:$0x7] }
 0x48e   :  { %v3154_v18 = vpop.permute.xlu2 %3153  ;;  %v2964_v19 = vpop.permute.xlu0 %2963  ;;  %v3916_v16 = vsel %vm10911_vm12, %v3914_v10, %v3915_v47  ;;  %v3674_v17 = vrot.slane %v3673_v11, 4  ;;  %v4213_v10 = vld [vmem:[%s15901_s0 + $0x10] sm:$0xf] }
 0x48f   :  { %3221 = vst.msk [vmem:[#allocation2 + $0x1bc] sm:$0xf] %vm49_vm8, %v3154_v18  ;;  %3497 = vrot.lane.b32.xlu1 %v3433_v0, %s10527_s11  ;;  %v3678_v0 = vrot.slane %v3627_v59, 6 }
 0x490   :  { %3034 = vst.msk [vmem:[#allocation2 + $0x714] sm:$0xf] %vm49_vm8, %v2964_v19  ;;  %v3387_v19 = vld [vmem:[%s15901_s0 + $0x8] sm:$0x7]  ;;  %v3676_v20 = vsel %vm10722_vm5, %v3674_v17, %v3675_v3  ;;  %v4452_v3 = vld [vmem:[%s15901_s0 + $0xc] sm:$0xf] }
 0x491   :  { %v2966_v26 = vpop.permute.xlu1 %2965  ;;  %v3680_v7 = vrot.slane %v3678_v0, 4  ;;  %v3679_v14 = vsel %vm10722_vm5, %v3677_v8, %v3678_v0  ;;  %v4212_v17 = vld [vmem:[%s15901_s0 + $0xc] sm:$0xf] }
 0x492   :  { %3035 = vst.msk [vmem:[#allocation2 + $0x718] sm:$0xf] %vm49_vm8, %v2966_v26 }
 0x494   :  { %4793 = vrot.lane.b32.xlu2 %v4737_v21, %s10528_s15  ;;  %4565 = vrot.lane.b32.xlu0 %v4503_v22, %s10529_s17  ;;  %v3437_v22 = vrot.slane %v3435_v5, 4  ;;  %v3441_v5 = vrot.slane %v3388_v29, 5  ;;  %v4890_v21 = vld [vmem:[%s15901_s0 + $0x4] sm:$0xf] }
 0x496   :  { %v3160_v30 = vpop.permute.xlu2 %3159  ;;  %v2970_v31 = vpop.permute.xlu0 %2969 }
 0x497   :  { %3224 = vst.msk [vmem:[#allocation2 + $0x2d0] sm:$0xf] %vm49_vm8, %v3160_v30  ;;  %4567 = vrot.lane.b32.xlu1 %v4504_v27, %s10529_s17 }
 0x498   :  { %3037 = vst.msk [vmem:[#allocation2 + $0x824] sm:$0xc] %vm531_vm13, %v2970_v31 }
 0x499   :  { %v2972_v37 = vpop.permute.xlu1 %2971 }
 0x49a   :  { %3038 = vst.msk [vmem:[#allocation2 + $0x828] sm:$0xf] %vm49_vm8, %v2972_v37 }
 0x49c   :  { %4563 = vrot.lane.b32.xlu2 %v4500_v35, %s10529_s17  ;;  %4327 = vrot.lane.b32.xlu0 %v4264_v34, %s10530_s20  ;;  %v4891_v34 = vld [vmem:[%s15901_s0 + $0x8] sm:$0x7]  ;;  %v3442_v35 = vrot.slane %v3441_v5, 4 }
 0x49e   :  { %v3166_v41 = vpop.permute.xlu2 %3165  ;;  %v2976_v42 = vpop.permute.xlu0 %2975 }
 0x49f   :  { %3227 = vst.msk [vmem:[#allocation2 + $0x3e4] sm:$0xf] %vm49_vm8, %v3166_v41  ;;  %4561 = vrot.lane.b32.xlu1 %v4497_v23, %s10529_s17  ;;  %v3438_v23 = vrot.slane %v3387_v19, 5  ;;  %v4739_v41 = vrot.slane %v4690_v38, 7  ;;  %v3870_v38 = vld [vmem:[%s15901_s0 + $0x14] sm:$0x7] }
 0x4a0   :  { %3040 = vst.msk [vmem:[#allocation2 + $0x830] sm:$0x1] %vm535_vm14, %v2976_v42 }
 0x4a1   :  { %v3146_v48 = vpop.permute.xlu1 %3145  ;;  %v3439_v27 = vsel %vm10590_vm2, %v3437_v22, %v3438_v23  ;;  %v3440_v2 = vrot.slane %v3438_v23, 4  ;;  %v4741_v47 = vrot.slane %v4739_v41, 4  ;;  %v4265_v22 = vrot.slane %v4212_v17, 5 }
 0x4a2   :  { %3217 = vst.msk [vmem:[#allocation2 + $0xa4] sm:$0xe] %vm744_vm15, %v3146_v48  ;;  %v4742_v48 = vrot.slane %v4691_v15, 7 }
 0x4a4   :  { %4115 = vrot.lane.b32.xlu2 %v4066_v44, %s10531_s29  ;;  %4323 = vrot.lane.b32.xlu0 %v4260_v45, %s10530_s20  ;;  %v4740_v44 = vsel %vm10911_vm12, %v4738_v40, %v4739_v41  ;;  %v4889_v45 = vld [vmem:[%s15901_s0] sm:$0xf]  ;;  %v4743_v52 = vsel %vm10911_vm12, %v4741_v47, %v4742_v48  ;;  %v3925_v41 = vrot.slane %v3870_v38, 7 }
 0x4a6   :  { %v3172_v53 = vpop.permute.xlu2 %3171  ;;  %v3150_v54 = vpop.permute.xlu0 %3149 }
 0x4a7   :  { %3230 = vst.msk [vmem:[#allocation2 + $0x4f8] sm:$0xf] %vm49_vm8, %v3172_v53  ;;  %4325 = vrot.lane.b32.xlu1 %v4263_v50, %s10530_s20  ;;  %v4454_v53 = vld [vmem:[%s15901_s0 + $0x14] sm:$0x7] }
 0x4a8   :  { %3219 = vst.msk [vmem:[#allocation2 + $0xac] sm:$0xf] %vm49_vm8, %v3150_v54 }
 0x4a9   :  { %v3152_v57 = vpop.permute.xlu1 %3151 }
 0x4aa   :  { %3220 = vst.msk [vmem:[#allocation2 + $0x1b8] sm:$0xe] %vm744_vm15, %v3152_v57  ;;  %v3253_v57 = vld [vmem:[%s15901_s0 + $0x30] sm:$0xf] }
 0x4ac   :  { %3973 = vrot.lane.b32.xlu2 %v3919_v55, %s10532_s16  ;;  %4117 = vrot.lane.b32.xlu0 %v4067_v56, %s10531_s29  ;;  %v4453_v55 = vld [vmem:[%s15901_s0 + $0x10] sm:$0xf]  ;;  %v4510_v56 = vrot.slane %v4454_v53, 6  ;;  %v13236_v53 = vld [vmem:[%s15901_s0 + $0xc] sm:$0xf] }
 0x4ad   :  { %v4507_v58 = vrot.slane %v4453_v55, 6 }
 0x4ae   :  { %v3178_v60 = vpop.permute.xlu2 %3177  ;;  %v3156_v61 = vpop.permute.xlu0 %3155 }
 0x4af   :  { %3233 = vst.msk [vmem:[#allocation2 + $0x60c] sm:$0xf] %vm49_vm8, %v3178_v60  ;;  %4321 = vrot.lane.b32.xlu1 %v4257_v36, %s10530_s20  ;;  %v3443_v36 = vrot.slane %v13088_v32, 5 }
 0x4b0   :  { %3222 = vst.msk [vmem:[#allocation2 + $0x1c0] sm:$0xf] %vm49_vm8, %v3156_v61  ;;  %v4512_v61 = vrot.slane %v4510_v56, 4 }
 0x4b1   :  { %v3158_v4 = vpop.permute.xlu1 %3157  ;;  %v3444_v39 = vsel %vm10590_vm2, %v3442_v35, %v3443_v36 }
 0x4b2   :  { %3223 = vst.msk [vmem:[#allocation2 + $0x2cc] sm:$0xe] %vm744_vm15, %v3158_v4  ;;  %v13163_v4 = vld [vmem:[%s15901_s0 + $0xc] sm:$0xf] }
 0x4b4   :  { %3969 = vrot.lane.b32.xlu2 %v3913_v63, %s10532_s16  ;;  %4113 = vrot.lane.b32.xlu0 %v4065_v1, %s10531_s29  ;;  %v4509_v63 = vrot.slane %v4507_v58, 4 }
 0x4b6   :  { %v3184_v12 = vpop.permute.xlu2 %3183  ;;  %v3162_v13 = vpop.permute.xlu0 %3161  ;;  %v4511_v1 = vsel %vm10722_vm5, %v4509_v63, %v4510_v56  ;;  %v3681_v56 = vrot.slane %v13236_v53, 6 }
 0x4b7   :  { %3236 = vst.msk [vmem:[#allocation2 + $0x720] sm:$0xf] %vm49_vm8, %v3184_v12  ;;  %3743 = vrot.lane.b32.xlu1 %v3680_v7, %s10533_s23  ;;  %v4744_v12 = vrot.slane %v13163_v4, 7 }
 0x4b8   :  { %3225 = vst.msk [vmem:[#allocation2 + $0x2d4] sm:$0xf] %vm49_vm8, %v3162_v13  ;;  %v4270_v13 = vrot.slane %v4214_v6, 5 }
 0x4b9   :  { %v3164_v18 = vpop.permute.xlu1 %3163 }
 0x4ba   :  { %3226 = vst.msk [vmem:[#allocation2 + $0x3e0] sm:$0xe] %vm744_vm15, %v3164_v18  ;;  %v4272_v18 = vrot.slane %v4270_v13, 4 }
 0x4bc   :  { %3741 = vrot.lane.b32.xlu2 %v3679_v14, %s10533_s23  ;;  %3971 = vrot.lane.b32.xlu0 %v3916_v16, %s10532_s16  ;;  %v4267_v14 = vrot.slane %v4213_v10, 5 }
 0x4be   :  { %v3190_v24 = vpop.permute.xlu2 %3189  ;;  %v3168_v26 = vpop.permute.xlu0 %3167  ;;  %v4269_v19 = vrot.slane %v4267_v14, 4 }
 0x4bf   :  { %3239 = vst.msk [vmem:[#allocation2 + $0x834] sm:$0xf] %vm49_vm8, %v3190_v24  ;;  %3739 = vrot.lane.b32.xlu1 %v3676_v20, %s10533_s23 }
 0x4c0   :  { %3228 = vst.msk [vmem:[#allocation2 + $0x3e8] sm:$0xf] %vm49_vm8, %v3168_v26  ;;  %v4271_v26 = vsel %vm10590_vm2, %v4269_v19, %v4270_v13  ;;  %v10121_v19 = vld [vmem:[#allocation2 + $0xa0] sm:$0xff] }
 0x4c1   :  { %v3170_v28 = vpop.permute.xlu1 %3169 }
 0x4c2   :  { %3229 = vst.msk [vmem:[#allocation2 + $0x4f4] sm:$0xe] %vm744_vm15, %v3170_v28  ;;  %v4266_v28 = vrot.slane %v4265_v22, 4 }
 0x4c4   :  { %3737 = vrot.lane.b32.xlu2 %v3673_v11, %s10533_s23  ;;  %3501 = vrot.lane.b32.xlu0 %v3439_v27, %s10527_s11  ;;  %v4505_v11 = vrot.slane %v4452_v3, 6 }
 0x4c6   :  { %v3292_v30 = vpop.permute.xlu2 %3291  ;;  %v3174_v31 = vpop.permute.xlu0 %3173  ;;  %v4506_v20 = vrot.slane %v4505_v11, 4 }
 0x4c7   :  { %3362 = vst.msk [vmem:[#allocation2 + $0xb4] sm:$0xf] %vm49_vm8, %v3292_v30  ;;  %3503 = vrot.lane.b32.xlu1 %v3440_v2, %s10527_s11  ;;  %v4268_v2 = vsel %vm10590_vm2, %v4266_v28, %v4267_v14  ;;  %v4694_v28 = vld [vmem:[%s15901_s0 + $0x14] sm:$0x7] }
 0x4c8   :  { %3231 = vst.msk [vmem:[#allocation2 + $0x4fc] sm:$0xf] %vm49_vm8, %v3174_v31  ;;  %v4508_v27 = vsel %vm10722_vm5, %v4506_v20, %v4507_v58  ;;  %v3869_v31 = vld [vmem:[%s15901_s0 + $0x10] sm:$0xf] }
 0x4c9   :  { %v3176_v37 = vpop.permute.xlu1 %3175  ;;  %v3922_v35 = vrot.slane %v3869_v31, 7  ;;  %v13290_v31 = vld [vmem:[%s15901_s0 + $0x1c] sm:$0xf] }
 0x4ca   :  { %3232 = vst.msk [vmem:[#allocation2 + $0x608] sm:$0xe] %vm744_vm15, %v3176_v37  ;;  %v4515_v38 = vrot.slane %v13290_v31, 6  ;;  %v4073_v31 = vld [vmem:[%s15901_s0 + $0x20] sm:$0x7] }
 0x4cb   :  { %v3924_v40 = vrot.slane %v3922_v35, 4 }
 0x4cc   :  { %4941 = vrot.lane.b32.xlu2 %v4891_v34, %s10534_s7  ;;  %3505 = vrot.lane.b32.xlu0 %v3441_v5, %s10527_s11  ;;  %v4069_v34 = vld [vmem:[%s15901_s0 + $0x10] sm:$0xf] }
 0x4ce   :  { %v3298_v42 = vpop.permute.xlu2 %3297  ;;  %v3180_v43 = vpop.permute.xlu0 %3179 }
 0x4cf   :  { %3365 = vst.msk [vmem:[#allocation2 + $0x1c8] sm:$0xf] %vm49_vm8, %v3298_v42  ;;  %3507 = vrot.lane.b32.xlu1 %v3444_v39, %s10527_s11  ;;  %v4070_v39 = vld [vmem:[%s15901_s0 + $0x14] sm:$0x7] }
 0x4d0   :  { %3234 = vst.msk [vmem:[#allocation2 + $0x610] sm:$0xf] %vm49_vm8, %v3180_v43 }
 0x4d1   :  { %v3182_v46 = vpop.permute.xlu1 %3181 }
 0x4d2   :  { %3235 = vst.msk [vmem:[#allocation2 + $0x71c] sm:$0xe] %vm744_vm15, %v3182_v46  ;;  %v3926_v46 = vsel %vm10911_vm12, %v3924_v40, %v3925_v41  ;;  %v4457_v41 = vld [vmem:[%s15901_s0 + $0x20] sm:$0x7] }
 0x4d4   :  { %4795 = vrot.lane.b32.xlu2 %v4740_v44, %s10528_s15  ;;  %4937 = vrot.lane.b32.xlu0 %v4889_v45, %s10534_s7  ;;  %v3868_v44 = vld [vmem:[%s15901_s0 + $0xc] sm:$0xf]  ;;  %v4894_v45 = vld [vmem:[%s15901_s0 + $0x14] sm:$0x7] }
 0x4d5   :  { %v3920_v15 = vrot.slane %v3868_v44, 7  ;;  %v4518_v44 = vrot.slane %v4457_v41, 6  ;;  %v10145_v41 = vld [vmem:[#allocation2 + $0x164] sm:$0xff] }
 0x4d6   :  { %v3304_v49 = vpop.permute.xlu2 %3303  ;;  %v3186_v50 = vpop.permute.xlu0 %3185 }
 0x4d7   :  { %3368 = vst.msk [vmem:[#allocation2 + $0x2dc] sm:$0xf] %vm49_vm8, %v3304_v49  ;;  %4939 = vrot.lane.b32.xlu1 %v4890_v21, %s10534_s7  ;;  %v3630_v21 = vld [vmem:[%s15901_s0 + $0x14] sm:$0x7]  ;;  %v4068_v49 = vld [vmem:[%s15901_s0 + $0xc] sm:$0xf] }
 0x4d8   :  { %3237 = vst.msk [vmem:[#allocation2 + $0x724] sm:$0xf] %vm49_vm8, %v3186_v50  ;;  %v3686_v48 = vrot.slane %v3630_v21, 6  ;;  %v3921_v50 = vrot.slane %v3920_v15, 4 }
 0x4d9   :  { %v3188_v54 = vpop.permute.xlu1 %3187 }
 0x4da   :  { %3238 = vst.msk [vmem:[#allocation2 + $0x830] sm:$0xe] %vm744_vm15, %v3188_v54  ;;  %v3688_v54 = vrot.slane %v3686_v48, 4  ;;  %v3923_v55 = vsel %vm10911_vm12, %v3921_v50, %v3922_v35  ;;  %v10117_v50 = vld [vmem:[#allocation2 + $0x80] sm:$0xff] }
 0x4dc   :  { %3315 = vrot.lane.b32.xlu2 %v3254_v51, %s10526_s25  ;;  %4797 = vrot.lane.b32.xlu0 %v4743_v52, %s10528_s15 }
 0x4de   :  { %v3310_v59 = vpop.permute.xlu2 %3309  ;;  %v3192_v60 = vpop.permute.xlu0 %3191 }
 0x4df   :  { %3371 = vst.msk [vmem:[#allocation2 + $0x3f0] sm:$0xf] %vm49_vm8, %v3310_v59  ;;  %3313 = vrot.lane.b32.xlu1 %v3253_v57, %s10526_s25  ;;  %v3629_v59 = vld [vmem:[%s15901_s0 + $0x10] sm:$0xf] }
 0x4e0   :  { %3240 = vst.msk [vmem:[#allocation2 + $0x838] sm:$0xf] %vm49_vm8, %v3192_v60  ;;  %v3682_v60 = vrot.slane %v3681_v56, 4 }
 0x4e1   :  { %v3290_v0 = vpop.permute.xlu1 %3289 }
 0x4e2   :  { %3361 = vst.msk [vmem:[#allocation2 + $0xb0] sm:$0xf] %vm49_vm8, %v3290_v0 }
 0x4e4   :  { %4575 = vrot.lane.b32.xlu2 %v4512_v61, %s10529_s17  ;;  %3317 = vrot.lane.b32.xlu0 %v3255_v62, %s10526_s25  ;;  %v3683_v61 = vrot.slane %v3629_v59, 6 }
 0x4e6   :  { %v3500_v7 = vpop.permute.xlu2 %3499  ;;  %v3294_v8 = vpop.permute.xlu0 %3293  ;;  %v3684_v3 = vsel %vm10722_vm5, %v3682_v60, %v3683_v61  ;;  %v3685_v6 = vrot.slane %v3683_v61, 4  ;;  %v10149_v60 = vld [vmem:[#allocation2 + $0x184] sm:$0xff] }
 0x4e7   :  { %3594 = vst.msk [vmem:[#allocation2 + $0xbc] sm:$0xf] %vm49_vm8, %v3500_v7  ;;  %4573 = vrot.lane.b32.xlu1 %v4511_v1, %s10529_s17  ;;  %v4892_v1 = vld [vmem:[%s15901_s0 + $0xc] sm:$0xf]  ;;  %v3390_v7 = vld [vmem:[%s15901_s0 + $0x14] sm:$0x7] }
 0x4e8   :  { %3363 = vst.msk [vmem:[#allocation2 + $0xb8] sm:$0x7] %vm52_vm6, %v3294_v8  ;;  %v3446_v13 = vrot.slane %v3390_v7, 5  ;;  %v3687_v14 = vsel %vm10722_vm5, %v3685_v6, %v3686_v48  ;;  %v10094_v48 = vld [vmem:[%s15902_s1 + $0x18] sm:$0xf0] }
 0x4e9   :  { %v3296_v16 = vpop.permute.xlu1 %3295  ;;  %v10123_v0 = vld [vmem:[#allocation2 + $0xb0] sm:$0xff] }
 0x4ea   :  { %3364 = vst.msk [vmem:[#allocation2 + $0x1c4] sm:$0xf] %vm49_vm8, %v3296_v16  ;;  %v3448_v20 = vrot.slane %v3446_v13, 4 }
 0x4ec   :  { %4569 = vrot.lane.b32.xlu2 %v4505_v11, %s10529_s17  ;;  %4799 = vrot.lane.b32.xlu0 %v4744_v12, %s10528_s15  ;;  %v10122_v11 = vld [vmem:[#allocation2 + $0xa8] sm:$0xff] }
 0x4ee   :  { %v4794_v23 = vpop.permute.xlu2 %4793  ;;  %v3300_v24 = vpop.permute.xlu0 %3299 }
 0x4ef   :  { %4865 = vst.msk [vmem:[#allocation2 + $0xfc] sm:$0xe] %vm744_vm15, %v4794_v23  ;;  %4335 = vrot.lane.b32.xlu1 %v4272_v18, %s10530_s20  ;;  %v4693_v18 = vld [vmem:[%s15901_s0 + $0x10] sm:$0xf]  ;;  %v3445_v23 = vrot.slane %v3443_v36, 4 }
 0x4f0   :  { %3366 = vst.msk [vmem:[#allocation2 + $0x1cc] sm:$0x7] %vm52_vm6, %v3300_v24  ;;  %v4746_v24 = vrot.slane %v4693_v18, 7 }
 0x4f1   :  { %v3302_v29 = vpop.permute.xlu1 %3301  ;;  %v3447_v32 = vsel %vm10590_vm2, %v3445_v23, %v3446_v13  ;;  %v13369_v13 = vld [vmem:[%s15901_s0 + $0x18] sm:$0xf] }
 0x4f2   :  { %3367 = vst.msk [vmem:[#allocation2 + $0x2d8] sm:$0xf] %vm49_vm8, %v3302_v29  ;;  %v10120_v29 = vld [vmem:[#allocation2 + $0x98] sm:$0xff]  ;;  %v4748_v36 = vrot.slane %v4746_v24, 4 }
 0x4f3   :  { %v10147_v23 = vld [vmem:[#allocation2 + $0x174] sm:$0xff] }
 0x4f4   :  { %4333 = vrot.lane.b32.xlu2 %v4271_v26, %s10530_s20  ;;  %4571 = vrot.lane.b32.xlu0 %v4508_v27, %s10529_s17 }
 0x4f6   :  { %v4564_v5 = vpop.permute.xlu2 %4563  ;;  %v3306_v30 = vpop.permute.xlu0 %3305 }
 0x4f7   :  { %4658 = vst.msk [vmem:[#allocation2 + $0xf4] sm:$0xf] %vm49_vm8, %v4564_v5  ;;  %4331 = vrot.lane.b32.xlu1 %v4268_v2, %s10530_s20  ;;  %v4749_v2 = vrot.slane %v4694_v28, 7 }
 0x4f8   :  { %3369 = vst.msk [vmem:[#allocation2 + $0x2e0] sm:$0x7] %vm52_vm6, %v3306_v30 }
 0x4f9   :  { %v3308_v37 = vpop.permute.xlu1 %3307  ;;  %v4750_v35 = vsel %vm10911_vm12, %v4748_v36, %v4749_v2 }
 0x4fa   :  { %3370 = vst.msk [vmem:[#allocation2 + $0x3ec] sm:$0xf] %vm49_vm8, %v3308_v37  ;;  %v4745_v37 = vrot.slane %v4744_v12, 4  ;;  %v4517_v12 = vrot.slane %v4515_v38, 4 }
 0x4fc   :  { %4329 = vrot.lane.b32.xlu2 %v4265_v22, %s10530_s20  ;;  %4121 = vrot.lane.b32.xlu0 %v4069_v34, %s10531_s29  ;;  %v4893_v22 = vld [vmem:[%s15901_s0 + $0x10] sm:$0xf]  ;;  %v4747_v4 = vsel %vm10911_vm12, %v4745_v37, %v4746_v24  ;;  %v4519_v53 = vsel %vm10722_vm5, %v4517_v12, %v4518_v44  ;;  %v4751_v24 = vrot.slane %v13369_v13, 7  ;;  %v10153_v13 = vld [vmem:[#allocation2 + $0x1a4] sm:$0xff] }
 0x4fd   :  { %v10119_v34 = vld [vmem:[#allocation2 + $0x90] sm:$0xff] }
 0x4fe   :  { %v4116_v42 = vpop.permute.xlu2 %4115  ;;  %v3312_v43 = vpop.permute.xlu0 %3311 }
 0x4ff   :  { %4186 = vst.msk [vmem:[#allocation2 + $0xe0] sm:$0xf] %vm49_vm8, %v4116_v42  ;;  %4123 = vrot.lane.b32.xlu1 %v4070_v39, %s10531_s29  ;;  %v3391_v42 = vld [vmem:[%s15901_s0 + $0x18] sm:$0xf] }
 0x500   :  { %3372 = vst.msk [vmem:[#allocation2 + $0x3f4] sm:$0x7] %vm52_vm6, %v3312_v43  ;;  %v10118_v43 = vld [vmem:[#allocation2 + $0x88] sm:$0xff] }
 0x501   :  { %v3498_v47 = vpop.permute.xlu1 %3497 }
 0x502   :  { %3593 = vst.msk [vmem:[#allocation2 + $0xb8] sm:$0x8] %vm286_vm7, %v3498_v47  ;;  %v8908_v47 = vld [vmem:[%s15902_s1 + $0x8] sm:$0xf] }
 0x504   :  { %4947 = vrot.lane.b32.xlu2 %v4894_v45, %s10534_s7  ;;  %3979 = vrot.lane.b32.xlu0 %v3926_v46, %s10532_s16  ;;  %v3449_v45 = vrot.slane %v3391_v42, 5  ;;  %v13318_v46 = vld [vmem:[%s15901_s0 + $0x1c] sm:$0xf] }
 0x506   :  { %v3974_v51 = vpop.permute.xlu2 %3973  ;;  %v4566_v52 = vpop.permute.xlu0 %4565 }
 0x507   :  { %4043 = vst.msk [vmem:[#allocation2 + $0xd8] sm:$0xf] %vm49_vm8, %v3974_v51  ;;  %4119 = vrot.lane.b32.xlu1 %v4068_v49, %s10531_s29  ;;  %v25_v49 = vld [vmem:[%s15901_s0] sm:$0xf]  ;;  %v26_v51 = vld [vmem:[%s15901_s0 + $0x4] sm:$0xf] }
 0x508   :  { %4659 = vst.msk [vmem:[#allocation2 + $0xf8] sm:$0xf] %vm49_vm8, %v4566_v52  ;;  %v10150_v52 = vld [vmem:[#allocation2 + $0x18c] sm:$0xff] }
 0x509   :  { %v4568_v57 = vpop.permute.xlu1 %4567  ;;  %v10124_v58 = vld [vmem:[#allocation2 + $0xb8] sm:$0xff]  ;;  %50 = vst.msk [vmem:[#allocation2] sm:$0xf] %vm49_vm8, %v25_v49 }
 0x50a   :  { %4660 = vst.msk [vmem:[#allocation2 + $0xfc] sm:$0x1] %vm535_vm14, %v4568_v57  ;;  %5964 = vmatpush.bf16.msra.mxu2 %v10124_v58  ;;  %v13343_v57 = vor.u32 %v10094_v48, %v8908_v47  ;;  %v8910_v47 = vld [vmem:[%s15902_s1 + $0x1c] sm:$0xf0] }
 0x50b   :  { %51 = vst.msk [vmem:[#allocation2 + $0x4] sm:$0xf] %vm49_vm8, %v26_v51  ;;  %v10143_v51 = vld [vmem:[#allocation2 + $0x154] sm:$0xff] }
 0x50c   :  { %3977 = vrot.lane.b32.xlu2 %v3923_v55, %s10532_s16  ;;  %3751 = vrot.lane.b32.xlu0 %v3688_v54, %s10533_s23  ;;  %v3450_v54 = vrot.slane %v3449_v45, 4  ;;  %v3451_v55 = vrot.slane %v13318_v46, 5 }
 0x50e   :  { %v3970_v62 = vpop.permute.xlu2 %3969  ;;  %v4328_v63 = vpop.permute.xlu0 %4327  ;;  %5965 = vmatpush.bf16.msra.mxu2 %v10123_v0 }
 0x50f   :  { %4041 = vst.msk [vmem:[#allocation2 + $0xd0] sm:$0xe] %vm744_vm15, %v3970_v62  ;;  %3975 = vrot.lane.b32.xlu1 %v3920_v15, %s10532_s16  ;;  %v3452_v62 = vsel %vm10590_vm2, %v3450_v54, %v3451_v55  ;;  %v10098_v54 = vld [vmem:[%s15902_s1 + $0x38] sm:$0xf0] }
 0x510   :  { %4420 = vst.msk [vmem:[#allocation2 + $0xf0] sm:$0x3] %vm290_vm9, %v4328_v63 }
 0x511   :  { %v4562_v8 = vpop.permute.xlu1 %4561  ;;  %v10132_v10 = vld [vmem:[#allocation2 + $0xf8] sm:$0xff] }
 0x512   :  { %4657 = vst.msk [vmem:[#allocation2 + $0xf0] sm:$0xc] %vm531_vm13, %v4562_v8  ;;  %5966 = vmatpush.bf16.msra.mxu2 %v10122_v11  ;;  %5987 = vmatpush.bf16.msra.mxu3 %v10132_v10  ;;  %v10148_v8 = vld [vmem:[#allocation2 + $0x17c] sm:$0xff]  ;;  %v4520_v11 = vrot.slane %v4518_v44, 4 }
 0x513   :  { %v13411_v44 = vld [vmem:[%s15901_s0 + $0x1c] sm:$0xf] }
 0x514   :  { %4943 = vrot.lane.b32.xlu2 %v4892_v1, %s10534_s7  ;;  %3747 = vrot.lane.b32.xlu0 %v3684_v3, %s10533_s23  ;;  %v13359_v1 = vld [vmem:[%s15901_s0 + $0x18] sm:$0xf] }
 0x516   :  { %v3742_v16 = vpop.permute.xlu2 %3741  ;;  %v4324_v17 = vpop.permute.xlu0 %4323  ;;  %5967 = vmatpush.bf16.msra.mxu2 %v10121_v19  ;;  %v4216_v19 = vld [vmem:[%s15901_s0 + $0x1c] sm:$0xf] }
 0x517   :  { %3835 = vst.msk [vmem:[#allocation2 + $0xcc] sm:$0xf] %vm49_vm8, %v3742_v16  ;;  %3749 = vrot.lane.b32.xlu1 %v3687_v14, %s10533_s23  ;;  %v4273_v14 = vrot.slane %v13359_v1, 5  ;;  %v10101_v16 = vld [vmem:[#allocation2] sm:$0xff]  ;;  %v4275_v28 = vrot.slane %v4216_v19, 5 }
 0x518   :  { %4418 = vst.msk [vmem:[#allocation2 + $0xe8] sm:$0xf] %vm49_vm8, %v4324_v17  ;;  %5925 = vmatpush.bf16.msra.mxu0 %v10101_v16  ;;  %v13472_v16 = vld [vmem:[%s15901_s0 + $0x20] sm:$0x7]  ;;  %v10157_v1 = vld [vmem:[#allocation2 + $0x1c4] sm:$0xff] }
 0x519   :  { %v4326_v26 = vpop.permute.xlu1 %4325  ;;  %v10131_v27 = vld [vmem:[#allocation2 + $0xf0] sm:$0xff] }
 0x51a   :  { %4419 = vst.msk [vmem:[#allocation2 + $0xec] sm:$0xf] %vm49_vm8, %v4326_v26  ;;  %5968 = vmatpush.bf16.msra.mxu2 %v10120_v29  ;;  %5988 = vmatpush.bf16.msra.mxu3 %v10131_v27  ;;  %v8900_v26 = vld [vmem:[%s15902_s1] sm:$0xf]  ;;  %v4274_v27 = vrot.slane %v4273_v14, 4 }
 0x51c   :  { %3511 = vrot.lane.b32.xlu2 %v3448_v20, %s10527_s11  ;;  %4945 = vrot.lane.b32.xlu0 %v4893_v22, %s10534_s7  ;;  %v4455_v20 = vld [vmem:[%s15901_s0 + $0x18] sm:$0xf] }
 0x51d   :  { %v4513_v29 = vrot.slane %v4455_v20, 6  ;;  %v3694_v20 = vrot.slane %v13472_v16, 6 }
 0x51e   :  { %v3738_v5 = vpop.permute.xlu2 %3737  ;;  %v4118_v30 = vpop.permute.xlu0 %4117  ;;  %5969 = vmatpush.bf16.msra.mxu2 %v10119_v34  ;;  %v10146_v34 = vld [vmem:[#allocation2 + $0x16c] sm:$0xff] }
 0x51f   :  { %3833 = vst.msk [vmem:[#allocation2 + $0xc4] sm:$0xc] %vm531_vm13, %v3738_v5  ;;  %3509 = vrot.lane.b32.xlu1 %v3447_v32, %s10527_s11  ;;  %v10093_v32 = vld [vmem:[%s15902_s1 + $0x10] sm:$0xf0]  ;;  %v4514_v37 = vrot.slane %v4513_v29, 4 }
 0x520   :  { %4187 = vst.msk [vmem:[#allocation2 + $0xe4] sm:$0x7] %vm52_vm6, %v4118_v30  ;;  %v13391_v5 = vor.u32 %v10093_v32, %v8900_v26  ;;  %v8930_v26 = vld [vmem:[%s15902_s1 + $0x44] sm:$0xf0]  ;;  %v10156_v32 = vld [vmem:[#allocation2 + $0x1bc] sm:$0xff] }
 0x521   :  { %v4322_v39 = vpop.permute.xlu1 %4321  ;;  %v10130_v40 = vld [vmem:[#allocation2 + $0xe8] sm:$0xff]  ;;  %v4516_v42 = vsel %vm10722_vm5, %v4514_v37, %v4515_v38  ;;  %v10172_v37 = vld [vmem:[#allocation2 + $0x240] sm:$0xff] }
 0x522   :  { %4417 = vst.msk [vmem:[#allocation2 + $0xe4] sm:$0x8] %vm286_vm7, %v4322_v39  ;;  %5970 = vmatpush.bf16.msra.mxu2 %v10118_v43  ;;  %5989 = vmatpush.bf16.msra.mxu3 %v10130_v40  ;;  %v4277_v43 = vrot.slane %v4275_v28, 4 }
 0x523   :  { %5926 = vmatmul.bf16.vlgmr.msra.gmra.mxu0 %v13391_v5 }
 0x524   :  { %4803 = vrot.lane.b32.xlu2 %v4750_v35, %s10528_s15  ;;  %3745 = vrot.lane.b32.xlu0 %v3681_v56, %s10533_s23  ;;  %v13341_v56 = vld [vmem:[%s15901_s0 + $0x20] sm:$0x7]  ;;  %v4276_v35 = vsel %vm10590_vm2, %v4274_v27, %v4275_v28 }
 0x525   :  { %v4278_v61 = vrot.slane %v13341_v56, 5  ;;  %v10176_v56 = vld [vmem:[#allocation2 + $0x260] sm:$0xff] }
 0x526   :  { %v4942_v15 = vpop.permute.xlu2 %4941  ;;  %v4114_v21 = vpop.permute.xlu0 %4113  ;;  %5971 = vmatpush.bf16.msra.mxu2 %v10117_v50  ;;  %v3873_v50 = vld [vmem:[%s15901_s0 + $0x20] sm:$0x7] }
 0x527   :  { %5011 = vst.msk [vmem:[#allocation2 + $0x110] sm:$0x7] %vm52_vm6, %v4942_v15  ;;  %4801 = vrot.lane.b32.xlu1 %v4747_v4, %s10528_s15  ;;  %v4280_v10 = vrot.slane %v4278_v61, 4  ;;  %v4279_v38 = vsel %vm10590_vm2, %v4277_v43, %v4278_v61  ;;  %v3929_v15 = vrot.slane %v13411_v44, 7  ;;  %v13511_v43 = vld [vmem:[%s15901_s0 + $0x18] sm:$0xf] }
 0x528   :  { %4185 = vst.msk [vmem:[#allocation2 + $0xdc] sm:$0xf] %vm49_vm8, %v4114_v21  ;;  %v10092_v21 = vld [vmem:[%s15902_s1 + $0xc] sm:$0xf] }
 0x529   :  { %v3744_v58 = vpop.permute.xlu1 %3743  ;;  %v10129_v59 = vld [vmem:[#allocation2 + $0xe0] sm:$0xff]  ;;  %5972 = vmatmul.bf16.vlgmr.msra.gmra.mxu2 %v13343_v57  ;;  %v10154_v44 = vld [vmem:[#allocation2 + $0x1ac] sm:$0xff] }
 0x52a   :  { %6266 = vmatpush.bf16.msrb.mxu2 %v10150_v52  ;;  %3836 = vst.msk [vmem:[#allocation2 + $0xd0] sm:$0x1] %vm535_vm14, %v3744_v58  ;;  %5990 = vmatpush.bf16.msra.mxu3 %v10129_v59  ;;  %v13436_v52 = vor.u32 %v10092_v21, %v8910_v47  ;;  %v4072_v58 = vld [vmem:[%s15901_s0 + $0x1c] sm:$0xf]  ;;  %v3931_v59 = vrot.slane %v3929_v15, 4  ;;  %v3689_v47 = vrot.slane %v13511_v43, 6 }
 0x52b   :  { %v13659_v43 = vld [vmem:[%s15901_s0 + $0x24] sm:$0xf] }
 0x52c   :  { %4581 = vrot.lane.b32.xlu2 %v4519_v53, %s10529_s17  ;;  %3513 = vrot.lane.b32.xlu0 %v3449_v45, %s10527_s11  ;;  %v10144_v45 = vld [vmem:[#allocation2 + $0x15c] sm:$0xff]  ;;  %v8920_v53 = vld [vmem:[%s15902_s1 + $0x28] sm:$0xf] }
 0x52d   :  { %v13449_v61 = vor.u32 %v10098_v54, %v8920_v53  ;;  %v4752_v53 = vrot.slane %v4751_v24, 4 }
 0x52e   :  { %6267 = vmatpush.bf16.msrb.mxu2 %v10149_v60  ;;  %v4796_v63 = vpop.permute.xlu2 %4795  ;;  %v3972_v0 = vpop.permute.xlu0 %3971  ;;  %v5116_v3 = vld [vmem:[#allocation2 + $0x110] sm:$0x7]  ;;  %v3932_v60 = vrot.slane %v3873_v50, 7  ;;  %v3632_v50 = vld [vmem:[%s15901_s0 + $0x1c] sm:$0xf] }
 0x52f   :  { %4866 = vst.msk [vmem:[#allocation2 + $0x100] sm:$0xf] %vm49_vm8, %v4796_v63  ;;  %v10128_v6 = vld [vmem:[#allocation2 + $0xd8] sm:$0xff]  ;;  %v5834_v7 = vunpack.c.l.b16 %v5116_v3  ;;  %3515 = vrot.lane.b32.xlu1 %v3452_v62, %s10527_s11 }
 0x530   :  { %4042 = vst.msk [vmem:[#allocation2 + $0xd4] sm:$0xf] %vm49_vm8, %v3972_v0  ;;  %5991 = vmatpush.bf16.msra.mxu3 %v10128_v6  ;;  %v10175_v0 = vld [vmem:[#allocation2 + $0x258] sm:$0xff]  ;;  %v3933_v3 = vsel %vm10911_vm12, %v3931_v59, %v3932_v60 }
 0x531   :  { %v5869_v17 = vpack.c.b16 %v5834_v7, %v5834_v7  ;;  %v3740_v18 = vpop.permute.xlu1 %3739  ;;  %v13548_v59 = vld [vmem:[%s15902_s1 + $0x58] sm:$0xff] }
 0x532   :  { %6268 = vmatpush.bf16.msrb.mxu2 %v10148_v8  ;;  %3834 = vst.msk [vmem:[#allocation2 + $0xc8] sm:$0xf] %vm49_vm8, %v3740_v18  ;;  %v10174_v8 = vld [vmem:[#allocation2 + $0x250] sm:$0xff] }
 0x533   :  { %v5916_v22 = vsel %vm123_vm0, %v5869_v17, 0  ;;  %5931 = vmatmul.bf16.gmra.mxu0 %v13449_v61 }
 0x534   :  { %4343 = vrot.lane.b32.xlu2 %v4280_v10, %s10530_s20  ;;  %4583 = vrot.lane.b32.xlu0 %v4520_v11, %s10529_s17  ;;  %v4897_v10 = vld [vmem:[%s15901_s0 + $0x20] sm:$0x7]  ;;  %v3871_v11 = vld [vmem:[%s15901_s0 + $0x18] sm:$0xf] }
 0x535   :  { %6015 = vmatpush.bf16.msrb.mxu0 %v5916_v22  ;;  %v3927_v19 = vrot.slane %v3871_v11, 7  ;;  %v4071_v22 = vld [vmem:[%s15901_s0 + $0x18] sm:$0xf]  ;;  %v4697_v11 = vld [vmem:[%s15901_s0 + $0x20] sm:$0x7] }
 0x536   :  { %6269 = vmatpush.bf16.msrb.mxu2 %v10147_v23  ;;  %v3316_v36 = vpop.permute.xlu2 %3315  ;;  %v3502_v2 = vpop.permute.xlu0 %3501  ;;  %v10097_v23 = vld [vmem:[%s15902_s1 + $0x34] sm:$0xf] }
 0x537   :  { %3374 = vst.msk [vmem:[#allocation2 + $0x504] sm:$0xf] %vm49_vm8, %v3316_v36  ;;  %v10127_v30 = vld [vmem:[#allocation2 + $0xd0] sm:$0xff]  ;;  %4805 = vrot.lane.b32.xlu1 %v4751_v24, %s10528_s15 }
 0x538   :  { %3595 = vst.msk [vmem:[#allocation2 + $0xc0] sm:$0xf] %vm49_vm8, %v3502_v2  ;;  %5992 = vmatpush.bf16.msra.mxu3 %v10127_v30  ;;  %v3696_v2 = vrot.slane %v3694_v20, 4  ;;  %v13498_v30 = vor.u32 %v10097_v23, %v8930_v26  ;;  %v29_v24 = vld [vmem:[%s15901_s0 + $0x10] sm:$0xf]  ;;  %v4756_v26 = vrot.slane %v4697_v11, 7 }
 0x539   :  { %v3504_v39 = vpop.permute.xlu1 %3503  ;;  %v10126_v40 = vld [vmem:[#allocation2 + $0xc8] sm:$0xff]  ;;  %55 = vst.msk [vmem:[#allocation2 + $0x118] sm:$0xf] %vm49_vm8, %v29_v24 }
 0x53a   :  { %6270 = vmatpush.bf16.msrb.mxu2 %v10146_v34  ;;  %3596 = vst.msk [vmem:[#allocation2 + $0xc4] sm:$0x3] %vm290_vm9, %v3504_v39  ;;  %v10091_v34 = vld [vmem:[%s15902_s1 + $0x4] sm:$0xf]  ;;  %v3928_v39 = vrot.slane %v3927_v19, 4 }
 0x53b   :  { %v10100_v11 = vld [vmem:[%s15902_s1 + $0x48] sm:$0xf0] }
 0x53c   :  { %4339 = vrot.lane.b32.xlu2 %v4276_v35, %s10530_s20  ;;  %4577 = vrot.lane.b32.xlu0 %v4513_v29, %s10529_s17  ;;  %v13490_v29 = vld [vmem:[%s15902_s1 + $0x50] sm:$0xff]  ;;  %v8902_v35 = vld [vmem:[%s15902_s1 + $0x14] sm:$0xf0]  ;;  %v3930_v21 = vsel %vm10911_vm12, %v3928_v39, %v3929_v15  ;;  %v10184_v39 = vld [vmem:[#allocation2 + $0x2a0] sm:$0xff] }
 0x53d   :  { %5993 = vmatpush.bf16.msra.mxu3 %v10126_v40  ;;  %v5665_v36 = vunpack.c.l.b16 %v13490_v29  ;;  %v13506_v40 = vor.u32 %v10091_v34, %v8902_v35  ;;  %v4895_v15 = vld [vmem:[%s15901_s0 + $0x18] sm:$0xf] }
 0x53e   :  { %6271 = vmatpush.bf16.msrb.mxu2 %v10145_v41  ;;  %v4576_v4 = vpop.permute.xlu2 %4575  ;;  %v3506_v12 = vpop.permute.xlu0 %3505 }
 0x53f   :  { %4664 = vst.msk [vmem:[#allocation2 + $0x210] sm:$0x1] %vm535_vm14, %v4576_v4  ;;  %4579 = vrot.lane.b32.xlu1 %v4516_v42, %s10529_s17  ;;  %v13513_v4 = vpack.c.b16 %v5665_v36, %v5665_v36  ;;  %5949 = vmatmul.bf16.vlgmr.msra.gmra.mxu1 %v13506_v40 }
 0x540   :  { %3597 = vst.msk [vmem:[#allocation2 + $0x1cc] sm:$0x8] %vm286_vm7, %v3506_v12  ;;  %v10155_v12 = vld [vmem:[#allocation2 + $0x1b4] sm:$0xff] }
 0x541   :  { %v3508_v48 = vpop.permute.xlu1 %3507  ;;  %v10125_v49 = vld [vmem:[#allocation2 + $0xc0] sm:$0xff] }
 0x542   :  { %6272 = vmatpush.bf16.msrb.mxu2 %v10144_v45  ;;  %3598 = vst.msk [vmem:[#allocation2 + $0x1d0] sm:$0xf] %vm49_vm8, %v3508_v48  ;;  %5994 = vmatpush.bf16.msra.mxu3 %v10125_v49  ;;  %v4696_v49 = vld [vmem:[%s15901_s0 + $0x1c] sm:$0xf] }
 0x543   :  { %5936 = vmatmul.bf16.gmra.mxu0 %v13513_v4  ;;  %v4753_v54 = vrot.slane %v4696_v49, 7 }
 0x544   :  { %4129 = vrot.lane.b32.xlu2 %v4073_v31, %s10531_s29  ;;  %4341 = vrot.lane.b32.xlu0 %v4279_v38, %s10530_s20  ;;  %v10171_v31 = vld [vmem:[#allocation2 + $0x238] sm:$0xff] }
 0x545   :  { %5995 = vmatmul.bf16.vlgmr.msra.gmra.mxu3 %v13436_v52  ;;  %v4896_v38 = vld [vmem:[%s15901_s0 + $0x1c] sm:$0xf]  ;;  %v4755_v23 = vrot.slane %v4753_v54, 4 }
 0x546   :  { %6273 = vmatpush.bf16.msrb.mxu2 %v10143_v51  ;;  %v4570_v62 = vpop.permute.xlu2 %4569  ;;  %v4938_v63 = vpop.permute.xlu0 %4937  ;;  %v10170_v51 = vld [vmem:[#allocation2 + $0x230] sm:$0xff] }
 0x547   :  { %4661 = vst.msk [vmem:[#allocation2 + $0x204] sm:$0xc] %vm531_vm13, %v4570_v62  ;;  %4127 = vrot.lane.b32.xlu1 %v4072_v58, %s10531_s29  ;;  %v3691_v58 = vrot.slane %v3632_v50, 6 }
 0x548   :  { %5009 = vst.msk [vmem:[#allocation2 + $0x108] sm:$0xf] %vm49_vm8, %v4938_v63  ;;  %v28_v63 = vld [vmem:[%s15901_s0 + $0xc] sm:$0xf] }
 0x549   :  { %v4940_v6 = vpop.permute.xlu1 %4939  ;;  %v10158_v7 = vld [vmem:[#allocation2 + $0x1cc] sm:$0xff]  ;;  %54 = vst.msk [vmem:[#allocation2 + $0x114] sm:$0xf] %vm49_vm8, %v28_v63  ;;  %v13637_v63 = vld [vmem:[%s15901_s0 + $0x28] sm:$0xf] }
 0x54a   :  { %6568 = vmatpush.bf16.msra.mxu2 %v10176_v56  ;;  %5010 = vst.msk [vmem:[#allocation2 + $0x10c] sm:$0xf] %vm49_vm8, %v4940_v6  ;;  %6289 = vmatpush.bf16.msrb.mxu3 %v10158_v7  ;;  %v3690_v56 = vrot.slane %v3689_v47, 4  ;;  %v3693_v7 = vrot.slane %v3691_v58, 4 }
 0x54c   :  { %3985 = vrot.lane.b32.xlu2 %v3933_v3, %s10532_s16  ;;  %4337 = vrot.lane.b32.xlu0 %v4273_v14, %s10530_s20  ;;  %v10173_v14 = vld [vmem:[#allocation2 + $0x248] sm:$0xff]  ;;  %v4754_v3 = vsel %vm10911_vm12, %v4752_v53, %v4753_v54  ;;  %v3692_v6 = vsel %vm10722_vm5, %v3690_v56, %v3691_v58  ;;  %v10182_v56 = vld [vmem:[#allocation2 + $0x290] sm:$0xff] }
 0x54e   :  { %6569 = vmatpush.bf16.msra.mxu2 %v10175_v0  ;;  %v4334_v17 = vpop.permute.xlu2 %4333  ;;  %v4798_v18 = vpop.permute.xlu0 %4797  ;;  %6290 = vmatpush.bf16.msrb.mxu3 %v10157_v1  ;;  %v5668_v0 = vunpack.c.h.b16 %v13548_v59 }
 0x54f   :  { %4423 = vst.msk [vmem:[#allocation2 + $0x200] sm:$0xf] %vm49_vm8, %v4334_v17  ;;  %4953 = vrot.lane.b32.xlu1 %v4897_v10, %s10534_s7  ;;  %v10152_v17 = vld [vmem:[#allocation2 + $0x19c] sm:$0xff] }
 0x550   :  { %4867 = vst.msk [vmem:[#allocation2 + $0x104] sm:$0xf] %vm49_vm8, %v4798_v18  ;;  %v13575_v1 = vpack.c.b16 %v5668_v0, %v5668_v0  ;;  %v5666_v0 = vunpack.c.h.b16 %v13490_v29  ;;  %v13654_v29 = vld [vmem:[%s15901_s0 + $0x24] sm:$0xf] }
 0x551   :  { %v3314_v27 = vpop.permute.xlu1 %3313  ;;  %v10134_v28 = vld [vmem:[#allocation2 + $0x108] sm:$0xff] }
 0x552   :  { %6570 = vmatpush.bf16.msra.mxu2 %v10174_v8  ;;  %3373 = vst.msk [vmem:[#allocation2 + $0x500] sm:$0xf] %vm49_vm8, %v3314_v27  ;;  %6016 = vmatpush.bf16.msrb.mxu0 %v10134_v28  ;;  %v3393_v8 = vld [vmem:[%s15901_s0 + $0x20] sm:$0x7]  ;;  %v8916_v28 = vld [vmem:[%s15902_s1 + $0x10] sm:$0xf] }
 0x553   :  { %6291 = vmatpush.bf16.msrb.mxu3 %v10156_v32  ;;  %v3454_v18 = vrot.slane %v3393_v8, 5  ;;  %v10095_v32 = vld [vmem:[%s15902_s1 + $0x20] sm:$0xf0]  ;;  %v8936_v8 = vld [vmem:[%s15902_s1 + $0x38] sm:$0xf] }
 0x554   :  { %3981 = vrot.lane.b32.xlu2 %v3927_v19, %s10532_s16  ;;  %4125 = vrot.lane.b32.xlu0 %v4071_v22, %s10531_s29  ;;  %v8922_v19 = vld [vmem:[%s15902_s1 + $0x3c] sm:$0xf0]  ;;  %v3695_v22 = vsel %vm10722_vm5, %v3693_v7, %v3694_v20  ;;  %v13595_v34 = vor.u32 %v10095_v32, %v8916_v28  ;;  %v10151_v20 = vld [vmem:[#allocation2 + $0x194] sm:$0xff]  ;;  %v3459_v7 = vrot.slane %v13637_v63, 5  ;;  %v13682_v28 = vld [vmem:[%s15901_s0 + $0x2c] sm:$0x7] }
 0x555   :  { %6000 = vmatmul.bf16.gmra.mxu3 %v13498_v30  ;;  %v8928_v32 = vld [vmem:[%s15902_s1 + $0x30] sm:$0xf] }
 0x556   :  { %6571 = vmatpush.bf16.msra.mxu2 %v10173_v14  ;;  %v4330_v41 = vpop.permute.xlu2 %4329  ;;  %v3318_v42 = vpop.permute.xlu0 %3317  ;;  %v10096_v14 = vld [vmem:[%s15902_s1 + $0x2c] sm:$0xf] }
 0x557   :  { %4421 = vst.msk [vmem:[#allocation2 + $0x1f8] sm:$0x8] %vm286_vm7, %v4330_v41  ;;  %v10133_v45 = vld [vmem:[#allocation2 + $0x100] sm:$0xff]  ;;  %3759 = vrot.lane.b32.xlu1 %v3696_v2, %s10533_s23  ;;  %6292 = vmatpush.bf16.msrb.mxu3 %v10155_v12  ;;  %v13587_v27 = vor.u32 %v10096_v14, %v8922_v19  ;;  %v3456_v41 = vrot.slane %v3454_v18, 4  ;;  %v3453_v12 = vrot.slane %v3451_v55, 4  ;;  %v10183_v55 = vld [vmem:[#allocation2 + $0x298] sm:$0xff]  ;;  %v13666_v14 = vor.u32 %v10100_v11, %v8936_v8 }
 0x558   :  { %3375 = vst.msk [vmem:[#allocation2 + $0x508] sm:$0x7] %vm52_vm6, %v3318_v42  ;;  %6017 = vmatpush.bf16.msrb.mxu0 %v10133_v45  ;;  %v4757_v42 = vsel %vm10911_vm12, %v4755_v23, %v4756_v26  ;;  %v4460_v45 = vld [vmem:[%s15901_s0 + $0x2c] sm:$0x7]  ;;  %v10180_v19 = vld [vmem:[#allocation2 + $0x280] sm:$0xff]  ;;  %v4521_v23 = vrot.slane %v13659_v43, 6 }
 0x559   :  { %v4574_v48 = vpop.permute.xlu1 %4573  ;;  %5954 = vmatmul.bf16.gmra.mxu1 %v13587_v27  ;;  %v4526_v49 = vrot.slane %v4460_v45, 6  ;;  %v3455_v50 = vsel %vm10590_vm2, %v3453_v12, %v3454_v18  ;;  %v13704_v12 = vld [vmem:[%s15901_s0 + $0x24] sm:$0xf]  ;;  %v10178_v45 = vld [vmem:[#allocation2 + $0x270] sm:$0xff]  ;;  %v3876_v43 = vld [vmem:[%s15901_s0 + $0x2c] sm:$0x7] }
 0x55a   :  { %6572 = vmatpush.bf16.msra.mxu2 %v10172_v37  ;;  %4663 = vst.msk [vmem:[#allocation2 + $0x20c] sm:$0xf] %vm49_vm8, %v4574_v48  ;;  %v13612_v48 = vld [vmem:[%s15901_s0 + $0x28] sm:$0xf] }
 0x55b   :  { %6293 = vmatpush.bf16.msrb.mxu3 %v10154_v44  ;;  %9074 = vmatmul.msk.bf16.vlgmr.msrb.gmra.mxu0 %vm5904_vm1, %v13595_v34  ;;  %v4523_v44 = vrot.slane %v13612_v48, 6  ;;  %v4528_v58 = vrot.slane %v4526_v49, 4  ;;  %v10177_v48 = vld [vmem:[#allocation2 + $0x268] sm:$0xff] }
 0x55c   :  { %4951 = vrot.lane.b32.xlu2 %v4896_v38, %s10534_s7  ;;  %3983 = vrot.lane.b32.xlu0 %v3930_v21, %s10532_s16  ;;  %v10208_v11 = vld [vmem:[#allocation2 + $0x364] sm:$0xff] }
 0x55e   :  { %6573 = vmatpush.bf16.msra.mxu2 %v10171_v31  ;;  %v4948_v60 = vpop.permute.xlu2 %4947  ;;  %v4800_v62 = vpop.permute.xlu0 %4799  ;;  %v10135_v31 = vld [vmem:[#allocation2 + $0x114] sm:$0xff] }
 0x55f   :  { %5014 = vst.msk [vmem:[#allocation2 + $0x224] sm:$0x7] %vm52_vm6, %v4948_v60  ;;  %4949 = vrot.lane.b32.xlu1 %v4895_v15, %s10534_s7  ;;  %6294 = vmatpush.bf16.msrb.mxu3 %v10153_v13  ;;  %v13626_v15 = vld [vmem:[%s15901_s0 + $0x24] sm:$0xf] }
 0x560   :  { %4868 = vst.msk [vmem:[#allocation2 + $0x210] sm:$0xe] %vm744_vm15, %v4800_v62  ;;  %6250 = vmatpush.bf16.msrb.mxu1 %v10135_v31  ;;  %v3457_v60 = vrot.slane %v13626_v15, 5  ;;  %v4525_v62 = vrot.slane %v4523_v44, 4 }
 0x561   :  { %v4336_v10 = vpop.permute.xlu1 %4335 }
 0x562   :  { %6574 = vmatpush.bf16.msra.mxu2 %v10170_v51  ;;  %4424 = vst.msk [vmem:[#allocation2 + $0x204] sm:$0x3] %vm290_vm9, %v4336_v10  ;;  %v4527_v10 = vsel %vm10722_vm5, %v4525_v62, %v4526_v49  ;;  %v4219_v49 = vld [vmem:[%s15901_s0 + $0x28] sm:$0xf]  ;;  %v5667_v62 = vunpack.c.l.b16 %v13548_v59 }
 0x563   :  { %6295 = vmatpush.bf16.msrb.mxu3 %v10152_v17 }
 0x564   :  { %4807 = vrot.lane.b32.xlu2 %v4754_v3, %s10528_s15  ;;  %3755 = vrot.lane.b32.xlu0 %v3692_v6, %s10533_s23  ;;  %v10181_v3 = vld [vmem:[#allocation2 + $0x288] sm:$0xff]  ;;  %v3458_v6 = vrot.slane %v3457_v60, 4  ;;  %v13749_v59 = vpack.c.b16 %v5667_v62, %v5667_v62 }
 0x565   :  { %6005 = vmatmul.bf16.gmra.mxu3 %v13575_v1 }
 0x566   :  { %v3978_v36 = vpop.permute.xlu2 %3977  ;;  %v4572_v2 = vpop.permute.xlu0 %4571  ;;  %v5185_v16 = vld [vmem:[#allocation2 + $0x224] sm:$0x7]  ;;  %v3460_v26 = vsel %vm10590_vm2, %v3458_v6, %v3459_v7 }
 0x567   :  { %4045 = vst.msk [vmem:[#allocation2 + $0x1e8] sm:$0xf] %vm49_vm8, %v3978_v36  ;;  %v10166_v35 = vld [vmem:[#allocation2 + $0x20c] sm:$0xff]  ;;  %v6170_v37 = vunpack.c.l.b16 %v5185_v16  ;;  %3757 = vrot.lane.b32.xlu1 %v3695_v22, %s10533_s23  ;;  %6296 = vmatpush.bf16.msrb.mxu3 %v10151_v20  ;;  %v4758_v22 = vrot.slane %v13654_v29, 7  ;;  %v10099_v36 = vld [vmem:[%s15902_s1 + $0x40] sm:$0xf0] }
 0x568   :  { %4662 = vst.msk [vmem:[#allocation2 + $0x208] sm:$0xf] %vm49_vm8, %v4572_v2  ;;  %6312 = vmatpush.bf16.msra.mxu0 %v10166_v35  ;;  %v13692_v20 = vor.u32 %v10099_v36, %v8928_v32  ;;  %v10179_v35 = vld [vmem:[#allocation2 + $0x278] sm:$0xff]  ;;  %v4076_v36 = vld [vmem:[%s15901_s0 + $0x2c] sm:$0x7] }
 0x569   :  { %v6205_v38 = vpack.c.b16 %v6170_v37, %v6170_v37  ;;  %v4332_v21 = vpop.permute.xlu1 %4331  ;;  %v4286_v37 = vrot.slane %v13682_v28, 5  ;;  %v10207_v28 = vld [vmem:[#allocation2 + $0x35c] sm:$0xff] }
 0x56a   :  { %4422 = vst.msk [vmem:[#allocation2 + $0x1fc] sm:$0xf] %vm49_vm8, %v4332_v21  ;;  %5977 = vmatmul.bf16.gmra.mxu2 %v13692_v20  ;;  %v4281_v21 = vrot.slane %v13704_v12, 5  ;;  %v3874_v12 = vld [vmem:[%s15901_s0 + $0x24] sm:$0xf] }
 0x56b   :  { %6591 = vmatpush.bf16.msra.mxu3 %v10184_v39  ;;  %v6241_v46 = vsel %vm123_vm0, %v6205_v38, 0  ;;  %9075 = vmatmul.msk.bf16.gmra.mxu0 %vm5904_vm1, %v13666_v14  ;;  %v4522_v39 = vrot.slane %v4521_v23, 4  ;;  %v4288_v31 = vrot.slane %v4286_v37, 4 }
 0x56c   :  { %3519 = vrot.lane.b32.xlu2 %v3456_v41, %s10527_s11  ;;  %4809 = vrot.lane.b32.xlu0 %v4757_v42, %s10528_s15 }
 0x56d   :  { %6340 = vmatpush.bf16.msra.mxu1 %v6241_v46  ;;  %v4524_v38 = vsel %vm10722_vm5, %v4522_v39, %v4523_v44  ;;  %v10210_v44 = vld [vmem:[#allocation2 + $0x374] sm:$0xff] }
 0x56e   :  { %v4944_v51 = vpop.permute.xlu2 %4943  ;;  %v4122_v53 = vpop.permute.xlu0 %4121  ;;  %v10206_v39 = vld [vmem:[#allocation2 + $0x354] sm:$0xff] }
 0x56f   :  { %6592 = vmatpush.bf16.msra.mxu3 %v10183_v55  ;;  %5012 = vst.msk [vmem:[#allocation2 + $0x21c] sm:$0xf] %vm49_vm8, %v4944_v51  ;;  %v10165_v54 = vld [vmem:[#allocation2 + $0x204] sm:$0xff]  ;;  %3517 = vrot.lane.b32.xlu1 %v3455_v50, %s10527_s11  ;;  %v5047_v50 = vld [vmem:[%s15902_s1 + $0x60] sm:$0xf]  ;;  %v4282_v51 = vrot.slane %v4281_v21, 4 }
 0x570   :  { %4189 = vst.msk [vmem:[#allocation2 + $0x1f4] sm:$0xf] %vm49_vm8, %v4122_v53  ;;  %6313 = vmatpush.bf16.msra.mxu0 %v10165_v54  ;;  %v5669_v15 = vunpack.c.l.b16 %v5047_v50  ;;  %v4283_v53 = vrot.slane %v4219_v49, 5 }
 0x571   :  { %v4124_v13 = vpop.permute.xlu1 %4123  ;;  %v10164_v24 = vld [vmem:[#allocation2 + $0x1fc] sm:$0xff] }
 0x572   :  { %4190 = vst.msk [vmem:[#allocation2 + $0x1f8] sm:$0x7] %vm52_vm6, %v4124_v13  ;;  %v10209_v13 = vld [vmem:[#allocation2 + $0x36c] sm:$0xff] }
 0x573   :  { %6593 = vmatpush.bf16.msra.mxu3 %v10182_v56 }
 0x574   :  { %4591 = vrot.lane.b32.xlu2 %v4528_v58, %s10529_s17  ;;  %3753 = vrot.lane.b32.xlu0 %v3689_v47, %s10533_s23  ;;  %v13661_v47 = vpack.c.b16 %v5666_v0, %v5666_v0  ;;  %v13728_v58 = vld [vmem:[%s15901_s0 + $0x28] sm:$0xf]  ;;  %v4284_v0 = vsel %vm10590_vm2, %v4282_v51, %v4283_v53 }
 0x575   :  { %6314 = vmatpush.bf16.msra.mxu0 %v10164_v24  ;;  %6297 = vmatmul.bf16.vlgmr.msrb.gmra.mxu3 %v13343_v57  ;;  %v4075_v24 = vld [vmem:[%s15901_s0 + $0x28] sm:$0xf]  ;;  %v3936_v6 = vrot.slane %v13728_v58, 7  ;;  %v32_v58 = vld [vmem:[%s15901_s0 + $0x1c] sm:$0xf] }
 0x576   :  { %v3512_v17 = vpop.permute.xlu2 %3511  ;;  %v3980_v18 = vpop.permute.xlu0 %3979  ;;  %5959 = vmatmul.bf16.gmra.mxu1 %v13661_v47  ;;  %58 = vst.msk [vmem:[#allocation2 + $0x22c] sm:$0xf] %vm49_vm8, %v32_v58 }
 0x577   :  { %6594 = vmatpush.bf16.msra.mxu3 %v10181_v3  ;;  %3600 = vst.msk [vmem:[#allocation2 + $0x1d8] sm:$0x3] %vm290_vm9, %v3512_v17  ;;  %4589 = vrot.lane.b32.xlu1 %v4527_v10, %s10529_s17  ;;  %v4285_v3 = vrot.slane %v4283_v53, 4  ;;  %v3934_v53 = vrot.slane %v3874_v12, 7 }
 0x578   :  { %4046 = vst.msk [vmem:[#allocation2 + $0x1ec] sm:$0xf] %vm49_vm8, %v3980_v18  ;;  %v3938_v18 = vrot.slane %v3936_v6, 4 }
 0x579   :  { %v4120_v2 = vpop.permute.xlu1 %4119  ;;  %v10163_v16 = vld [vmem:[#allocation2 + $0x1f4] sm:$0xff]  ;;  %v4287_v17 = vsel %vm10590_vm2, %v4285_v3, %v4286_v37 }
 0x57a   :  { %4188 = vst.msk [vmem:[#allocation2 + $0x1f0] sm:$0xf] %vm49_vm8, %v4120_v2  ;;  %6315 = vmatpush.bf16.msra.mxu0 %v10163_v16  ;;  %5982 = vmatmul.bf16.gmra.mxu2 %v13749_v59  ;;  %v13770_v2 = vld [vmem:[%s15901_s0 + $0x2c] sm:$0x7] }
 0x57b   :  { %6595 = vmatpush.bf16.msra.mxu3 %v10180_v19  ;;  %v3939_v19 = vrot.slane %v3876_v43, 7  ;;  %v3702_v37 = vrot.slane %v13770_v2, 6 }
 0x57c   :  { %3523 = vrot.lane.b32.xlu2 %v3460_v26, %s10527_s11  ;;  %4811 = vrot.lane.b32.xlu0 %v4758_v22, %s10528_s15 }
 0x57d   :  { %v3940_v32 = vsel %vm10911_vm12, %v3938_v18, %v3939_v19 }
 0x57e   :  { %v4804_v41 = vpop.permute.xlu2 %4803  ;;  %v3752_v42 = vpop.permute.xlu0 %3751 }
 0x57f   :  { %6596 = vmatpush.bf16.msra.mxu3 %v10179_v35  ;;  %4870 = vst.msk [vmem:[#allocation2 + $0x218] sm:$0xf] %vm49_vm8, %v4804_v41  ;;  %3521 = vrot.lane.b32.xlu1 %v3457_v60, %s10527_s11  ;;  %v13730_v60 = vpack.c.b16 %v5669_v15, %v5669_v15  ;;  %v3635_v15 = vld [vmem:[%s15901_s0 + $0x28] sm:$0xf] }
 0x580   :  { %3840 = vst.msk [vmem:[#allocation2 + $0x1e4] sm:$0x1] %vm535_vm14, %v3752_v42  ;;  %v3699_v51 = vrot.slane %v3635_v15, 6 }
 0x581   :  { %v3976_v46 = vpop.permute.xlu1 %3975  ;;  %v10162_v55 = vld [vmem:[#allocation2 + $0x1ec] sm:$0xff]  ;;  %9076 = vmatmul.msk.bf16.gmra.mxu0 %vm5904_vm1, %v13730_v60 }
 0x582   :  { %4044 = vst.msk [vmem:[#allocation2 + $0x1e4] sm:$0xe] %vm744_vm15, %v3976_v46  ;;  %6316 = vmatpush.bf16.msra.mxu0 %v10162_v55  ;;  %v10205_v46 = vld [vmem:[#allocation2 + $0x34c] sm:$0xff]  ;;  %v4074_v55 = vld [vmem:[%s15901_s0 + $0x24] sm:$0xf] }
 0x583   :  { %6597 = vmatpush.bf16.msra.mxu3 %v10178_v45  ;;  %v13779_v45 = vld [vmem:[%s15901_s0 + $0x24] sm:$0xf] }
 0x584   :  { %4587 = vrot.lane.b32.xlu2 %v4524_v38, %s10529_s17  ;;  %4351 = vrot.lane.b32.xlu0 %v4288_v31, %s10530_s20  ;;  %v3704_v38 = vrot.slane %v3702_v37, 4  ;;  %v3697_v49 = vrot.slane %v13779_v45, 6  ;;  %v4700_v45 = vld [vmem:[%s15901_s0 + $0x2c] sm:$0x7] }
 0x585   :  { %6302 = vmatmul.bf16.gmra.mxu3 %v13692_v20 }
 0x586   :  { %v4582_v54 = vpop.permute.xlu2 %4581  ;;  %v3748_v56 = vpop.permute.xlu0 %3747  ;;  %6251 = vmatmul.bf16.vlgmr.msrb.gmra.mxu1 %v13391_v5 }
 0x587   :  { %6598 = vmatpush.bf16.msra.mxu3 %v10177_v48  ;;  %4667 = vst.msk [vmem:[#allocation2 + $0x320] sm:$0xf] %vm49_vm8, %v4582_v54  ;;  %4585 = vrot.lane.b32.xlu1 %v4521_v23, %s10529_s17  ;;  %v4900_v48 = vld [vmem:[%s15901_s0 + $0x2c] sm:$0x7] }
 0x588   :  { %3838 = vst.msk [vmem:[#allocation2 + $0x1dc] sm:$0xf] %vm49_vm8, %v3748_v56 }
 0x589   :  { %v3750_v8 = vpop.permute.xlu1 %3749  ;;  %v10161_v10 = vld [vmem:[#allocation2 + $0x1e4] sm:$0xff] }
 0x58a   :  { %3839 = vst.msk [vmem:[#allocation2 + $0x1e0] sm:$0xf] %vm49_vm8, %v3750_v8  ;;  %6317 = vmatpush.bf16.msra.mxu0 %v10161_v10  ;;  %6274 = vmatmul.bf16.vlgmr.msrb.gmra.mxu2 %v13506_v40  ;;  %v3701_v10 = vrot.slane %v3699_v51, 4 }
 0x58b   :  { %6893 = vmatpush.bf16.msrb.mxu3 %v10210_v44  ;;  %v3698_v44 = vrot.slane %v3697_v49, 4 }
 0x58c   :  { %4133 = vrot.lane.b32.xlu2 %v4075_v24, %s10531_s29  ;;  %4347 = vrot.lane.b32.xlu0 %v4284_v0, %s10530_s20  ;;  %v3935_v24 = vrot.slane %v3934_v53, 4  ;;  %v3703_v18 = vsel %vm10722_vm5, %v3701_v10, %v3702_v37 }
 0x58e   :  { %v4344_v23 = vpop.permute.xlu2 %4343  ;;  %v4946_v26 = vpop.permute.xlu0 %4945  ;;  %v3937_v8 = vsel %vm10911_vm12, %v3935_v24, %v3936_v6  ;;  %v4899_v6 = vld [vmem:[%s15901_s0 + $0x28] sm:$0xf] }
 0x58f   :  { %6894 = vmatpush.bf16.msrb.mxu3 %v10209_v13  ;;  %4428 = vst.msk [vmem:[#allocation2 + $0x318] sm:$0x3] %vm290_vm9, %v4344_v23  ;;  %4349 = vrot.lane.b32.xlu1 %v4287_v17, %s10530_s20  ;;  %v3700_v13 = vsel %vm10722_vm5, %v3698_v44, %v3699_v51  ;;  %v31_v17 = vld [vmem:[%s15901_s0 + $0x18] sm:$0xf] }
 0x590   :  { %5013 = vst.msk [vmem:[#allocation2 + $0x220] sm:$0xf] %vm49_vm8, %v4946_v26  ;;  %v3396_v26 = vld [vmem:[%s15901_s0 + $0x2c] sm:$0x7] }
 0x591   :  { %v3510_v16 = vpop.permute.xlu1 %3509  ;;  %v10160_v35 = vld [vmem:[#allocation2 + $0x1dc] sm:$0xff]  ;;  %57 = vst.msk [vmem:[#allocation2 + $0x228] sm:$0xf] %vm49_vm8, %v31_v17 }
 0x592   :  { %3599 = vst.msk [vmem:[#allocation2 + $0x1d4] sm:$0xf] %vm49_vm8, %v3510_v16  ;;  %6318 = vmatpush.bf16.msra.mxu0 %v10160_v35  ;;  %v10191_v35 = vld [vmem:[#allocation2 + $0x2d8] sm:$0xff] }
 0x593   :  { %6895 = vmatpush.bf16.msrb.mxu3 %v10208_v11 }
 0x594   :  { %3991 = vrot.lane.b32.xlu2 %v3940_v32, %s10532_s16  ;;  %4135 = vrot.lane.b32.xlu0 %v4076_v36, %s10531_s29  ;;  %v3461_v32 = vrot.slane %v3459_v7, 4  ;;  %v3462_v36 = vrot.slane %v3396_v26, 5  ;;  %v4699_v7 = vld [vmem:[%s15901_s0 + $0x28] sm:$0xf]  ;;  %v4461_v26 = vld [vmem:[%s15901_s0 + $0x30] sm:$0xf] }
 0x595   :  { %6307 = vmatmul.bf16.gmra.mxu3 %v13749_v59 }
 0x596   :  { %v4340_v41 = vpop.permute.xlu2 %4339  ;;  %v3746_v42 = vpop.permute.xlu0 %3745  ;;  %6256 = vmatmul.bf16.gmra.mxu1 %v13449_v61  ;;  %v3463_v37 = vsel %vm10590_vm2, %v3461_v32, %v3462_v36  ;;  %v4223_v32 = vld [vmem:[%s15901_s0 + $0x38] sm:$0x7] }
 0x597   :  { %6896 = vmatpush.bf16.msrb.mxu3 %v10207_v28  ;;  %4426 = vst.msk [vmem:[#allocation2 + $0x310] sm:$0xf] %vm49_vm8, %v4340_v41  ;;  %v10168_v31 = vld [vmem:[#allocation2 + $0x21c] sm:$0xff]  ;;  %4345 = vrot.lane.b32.xlu1 %v4281_v21, %s10530_s20  ;;  %v10204_v21 = vld [vmem:[#allocation2 + $0x344] sm:$0xff] }
 0x598   :  { %3837 = vst.msk [vmem:[#allocation2 + $0x1d8] sm:$0xc] %vm531_vm13, %v3746_v42  ;;  %6341 = vmatpush.bf16.msra.mxu1 %v10168_v31  ;;  %v4898_v28 = vld [vmem:[%s15901_s0 + $0x24] sm:$0xf]  ;;  %v10190_v42 = vld [vmem:[#allocation2 + $0x2d0] sm:$0xff]  ;;  %v3464_v31 = vrot.slane %v3462_v36, 4 }
 0x599   :  { %v4802_v50 = vpop.permute.xlu1 %4801 }
 0x59a   :  { %4869 = vst.msk [vmem:[#allocation2 + $0x214] sm:$0xf] %vm49_vm8, %v4802_v50  ;;  %6279 = vmatmul.bf16.gmra.mxu2 %v13587_v27 }
 0x59b   :  { %6897 = vmatpush.bf16.msrb.mxu3 %v10206_v39  ;;  %v10169_v39 = vld [vmem:[#allocation2 + $0x228] sm:$0xff] }
 0x59c   :  { %3767 = vrot.lane.b32.xlu2 %v3704_v38, %s10533_s23  ;;  %4131 = vrot.lane.b32.xlu0 %v4074_v55, %s10531_s29  ;;  %v3397_v38 = vld [vmem:[%s15901_s0 + $0x30] sm:$0xf]  ;;  %v4760_v55 = vrot.slane %v4699_v7, 7  ;;  %v4294_v7 = vrot.slane %v4223_v32, 5 }
 0x59d   :  { %6575 = vmatpush.bf16.msra.mxu2 %v10169_v39  ;;  %v3465_v29 = vrot.slane %v3397_v38, 5  ;;  %v10218_v39 = vld [vmem:[#allocation2 + $0x3b4] sm:$0xff]  ;;  %v10213_v32 = vld [vmem:[#allocation2 + $0x38c] sm:$0xff] }
 0x59e   :  { %v4130_v54 = vpop.permute.xlu2 %4129  ;;  %v3514_v56 = vpop.permute.xlu0 %3513  ;;  %v4762_v12 = vrot.slane %v4760_v55, 4 }
 0x59f   :  { %6898 = vmatpush.bf16.msrb.mxu3 %v10205_v46  ;;  %4193 = vst.msk [vmem:[#allocation2 + $0x30c] sm:$0x7] %vm52_vm6, %v4130_v54  ;;  %v10159_v62 = vld [vmem:[#allocation2 + $0x1d4] sm:$0xff]  ;;  %4959 = vrot.lane.b32.xlu1 %v4900_v48, %s10534_s7  ;;  %v4759_v46 = vrot.slane %v4758_v22, 4  ;;  %v3466_v24 = vrot.slane %v3465_v29, 4 }
 0x5a0   :  { %3601 = vst.msk [vmem:[#allocation2 + $0x2e0] sm:$0x8] %vm286_vm7, %v3514_v56  ;;  %6319 = vmatpush.bf16.msra.mxu0 %v10159_v62  ;;  %v4463_v48 = vld [vmem:[%s15901_s0 + $0x38] sm:$0x7]  ;;  %v13891_v54 = vld [vmem:[%s15901_s0 + $0x34] sm:$0xf] }
 0x5a1   :  { %v3516_v0 = vpop.permute.xlu1 %3515  ;;  %v10167_v3 = vld [vmem:[#allocation2 + $0x214] sm:$0xff]  ;;  %v4761_v22 = vsel %vm10911_vm12, %v4759_v46, %v4760_v55  ;;  %v10188_v56 = vld [vmem:[#allocation2 + $0x2c0] sm:$0xff]  ;;  %v4534_v62 = vrot.slane %v4463_v48, 6  ;;  %v4221_v46 = vld [vmem:[%s15901_s0 + $0x30] sm:$0xf] }
 0x5a2   :  { %3602 = vst.msk [vmem:[#allocation2 + $0x2e4] sm:$0xf] %vm49_vm8, %v3516_v0  ;;  %6342 = vmatpush.bf16.msra.mxu1 %v10167_v3  ;;  %v4531_v3 = vrot.slane %v13891_v54, 6  ;;  %v13964_v54 = vld [vmem:[%s15901_s0 + $0x34] sm:$0xf] }
 0x5a3   :  { %6899 = vmatpush.bf16.msrb.mxu3 %v10204_v21  ;;  %6320 = vmatmul.bf16.vlgmr.msra.gmra.mxu0 %v13436_v52  ;;  %v4763_v21 = vrot.slane %v4700_v45, 7  ;;  %v4536_v17 = vrot.slane %v4534_v62, 4 }
 0x5a4   :  { %3763 = vrot.lane.b32.xlu2 %v3700_v13, %s10533_s23  ;;  %3987 = vrot.lane.b32.xlu0 %v3934_v53, %s10532_s16  ;;  %v13886_v53 = vld [vmem:[%s15901_s0 + $0x34] sm:$0xf] }
 0x5a5   :  { %6599 = vmatmul.bf16.vlgmr.msra.gmra.mxu3 %v13506_v40  ;;  %v4764_v13 = vsel %vm10911_vm12, %v4762_v12, %v4763_v21  ;;  %v3467_v0 = vrot.slane %v13886_v53, 5 }
 0x5a6   :  { %v3986_v43 = vpop.permute.xlu2 %3985  ;;  %v4584_v11 = vpop.permute.xlu0 %4583  ;;  %6261 = vmatmul.bf16.gmra.mxu1 %v13513_v4 }
 0x5a7   :  { %4049 = vst.msk [vmem:[#allocation2 + $0x300] sm:$0xf] %vm49_vm8, %v3986_v43  ;;  %3989 = vrot.lane.b32.xlu1 %v3937_v8, %s10532_s16  ;;  %v10187_v43 = vld [vmem:[#allocation2 + $0x2b8] sm:$0xff]  ;;  %v3468_v58 = vsel %vm10590_vm2, %v3466_v24, %v3467_v0 }
 0x5a8   :  { %4668 = vst.msk [vmem:[#allocation2 + $0x324] sm:$0x1] %vm535_vm14, %v4584_v11 }
 0x5a9   :  { %v4806_v19 = vpop.permute.xlu1 %4805  ;;  %v10192_v23 = vld [vmem:[#allocation2 + $0x2e0] sm:$0xff] }
 0x5aa   :  { %4871 = vst.msk [vmem:[#allocation2 + $0x324] sm:$0xe] %vm744_vm15, %v4806_v19  ;;  %6614 = vmatpush.bf16.msrb.mxu0 %v10192_v23  ;;  %6284 = vmatmul.bf16.gmra.mxu2 %v13661_v47  ;;  %v10186_v19 = vld [vmem:[#allocation2 + $0x2b0] sm:$0xff] }
 0x5ac   :  { %4957 = vrot.lane.b32.xlu2 %v4899_v6, %s10534_s7  ;;  %3765 = vrot.lane.b32.xlu0 %v3703_v18, %s10533_s23  ;;  %v4533_v6 = vrot.slane %v4531_v3, 4 }
 0x5ae   :  { %v3982_v2 = vpop.permute.xlu2 %3981  ;;  %v4578_v16 = vpop.permute.xlu0 %4577  ;;  %6615 = vmatpush.bf16.msrb.mxu0 %v10191_v35  ;;  %v4535_v23 = vsel %vm10722_vm5, %v4533_v6, %v4534_v62  ;;  %v10185_v35 = vld [vmem:[#allocation2 + $0x2a8] sm:$0xff]  ;;  %v13978_v6 = vld [vmem:[%s15901_s0 + $0x38] sm:$0x7] }
 0x5af   :  { %4047 = vst.msk [vmem:[#allocation2 + $0x2f8] sm:$0xe] %vm744_vm15, %v3982_v2  ;;  %4955 = vrot.lane.b32.xlu1 %v4898_v28, %s10534_s7  ;;  %v13921_v28 = vld [vmem:[%s15901_s0 + $0x30] sm:$0xf] }
 0x5b0   :  { %4665 = vst.msk [vmem:[#allocation2 + $0x318] sm:$0xc] %vm531_vm13, %v4578_v16  ;;  %v4222_v16 = vld [vmem:[%s15901_s0 + $0x34] sm:$0xf] }
 0x5b1   :  { %v4580_v41 = vpop.permute.xlu1 %4579  ;;  %v10200_v63 = vld [vmem:[#allocation2 + $0x320] sm:$0xff] }
 0x5b2   :  { %4666 = vst.msk [vmem:[#allocation2 + $0x31c] sm:$0xf] %vm49_vm8, %v4580_v41  ;;  %6616 = vmatpush.bf16.msrb.mxu0 %v10190_v42  ;;  %6637 = vmatpush.bf16.msrb.mxu1 %v10200_v63  ;;  %v4529_v41 = vrot.slane %v4461_v26, 6  ;;  %v4765_v63 = vrot.slane %v13921_v28, 7  ;;  %v4291_v42 = vrot.slane %v4222_v16, 5 }
 0x5b3   :  { %6325 = vmatmul.bf16.gmra.mxu0 %v13498_v30  ;;  %v3879_v26 = vld [vmem:[%s15901_s0 + $0x38] sm:$0x7] }
 0x5b4   :  { %3761 = vrot.lane.b32.xlu2 %v3697_v49, %s10533_s23  ;;  %3525 = vrot.lane.b32.xlu0 %v3463_v37, %s10527_s11  ;;  %v10189_v49 = vld [vmem:[#allocation2 + $0x2c8] sm:$0xff]  ;;  %v4293_v45 = vrot.slane %v4291_v42, 4 }
 0x5b5   :  { %6604 = vmatmul.bf16.gmra.mxu3 %v13587_v27 }
 0x5b6   :  { %v4952_v50 = vpop.permute.xlu2 %4951  ;;  %v4342_v15 = vpop.permute.xlu0 %4341  ;;  %9213 = vmatmul.msk.bf16.vlgmr.msra.gmra.mxu1 %vm5904_vm1, %v13595_v34  ;;  %6617 = vmatpush.bf16.msrb.mxu0 %v10189_v49  ;;  %v4530_v49 = vrot.slane %v4529_v41, 4 }
 0x5b7   :  { %5016 = vst.msk [vmem:[#allocation2 + $0x334] sm:$0xf] %vm49_vm8, %v4952_v50  ;;  %3527 = vrot.lane.b32.xlu1 %v3464_v31, %s10527_s11  ;;  %v10217_v50 = vld [vmem:[#allocation2 + $0x3ac] sm:$0xff] }
 0x5b8   :  { %4427 = vst.msk [vmem:[#allocation2 + $0x314] sm:$0xf] %vm49_vm8, %v4342_v15  ;;  %v4296_v15 = vrot.slane %v4294_v7, 4  ;;  %v4532_v62 = vsel %vm10722_vm5, %v4530_v49, %v4531_v3  ;;  %v10244_v49 = vld [vmem:[#allocation2 + $0x488] sm:$0xff] }
 0x5b9   :  { %v4128_v44 = vpop.permute.xlu1 %4127  ;;  %v10199_v51 = vld [vmem:[#allocation2 + $0x318] sm:$0xff] }
 0x5ba   :  { %4192 = vst.msk [vmem:[#allocation2 + $0x308] sm:$0xf] %vm49_vm8, %v4128_v44  ;;  %6618 = vmatpush.bf16.msrb.mxu0 %v10188_v56  ;;  %6638 = vmatpush.bf16.msrb.mxu1 %v10199_v51  ;;  %v10216_v51 = vld [vmem:[#allocation2 + $0x3a4] sm:$0xff]  ;;  %v4295_v56 = vsel %vm10590_vm2, %v4293_v45, %v4294_v7  ;;  %v10211_v45 = vld [vmem:[#allocation2 + $0x37c] sm:$0xff] }
 0x5bb   :  { %6576 = vmatmul.bf16.vlgmr.msra.gmra.mxu2 %v13391_v5  ;;  %v10212_v7 = vld [vmem:[#allocation2 + $0x384] sm:$0xff] }
 0x5bc   :  { %3529 = vrot.lane.b32.xlu2 %v3465_v29, %s10527_s11  ;;  %4813 = vrot.lane.b32.xlu0 %v4761_v22, %s10528_s15  ;;  %v4289_v22 = vrot.slane %v4221_v46, 5 }
 0x5be   :  { %v4808_v8 = vpop.permute.xlu2 %4807  ;;  %v4338_v10 = vpop.permute.xlu0 %4337  ;;  %6619 = vmatpush.bf16.msrb.mxu0 %v10187_v43 }
 0x5bf   :  { %4872 = vst.msk [vmem:[#allocation2 + $0x328] sm:$0xf] %vm49_vm8, %v4808_v8  ;;  %v10198_v11 = vld [vmem:[#allocation2 + $0x310] sm:$0xff]  ;;  %4815 = vrot.lane.b32.xlu1 %v4764_v13, %s10528_s15  ;;  %v4290_v13 = vrot.slane %v4289_v22, 4  ;;  %v10215_v8 = vld [vmem:[#allocation2 + $0x39c] sm:$0xff] }
 0x5c0   :  { %4425 = vst.msk [vmem:[#allocation2 + $0x30c] sm:$0x8] %vm286_vm7, %v4338_v10  ;;  %6639 = vmatpush.bf16.msrb.mxu1 %v10198_v11 }
 0x5c1   :  { %v4954_v18 = vpop.permute.xlu1 %4953  ;;  %v4292_v10 = vsel %vm10590_vm2, %v4290_v13, %v4291_v42 }
 0x5c2   :  { %5017 = vst.msk [vmem:[#allocation2 + $0x338] sm:$0x7] %vm52_vm6, %v4954_v18  ;;  %6620 = vmatpush.bf16.msrb.mxu0 %v10186_v19  ;;  %v3943_v18 = vrot.slane %v13964_v54, 7  ;;  %v10241_v54 = vld [vmem:[#allocation2 + $0x470] sm:$0xff] }
 0x5c3   :  { %6330 = vmatmul.bf16.gmra.mxu0 %v13575_v1 }
 0x5c4   :  { %4599 = vrot.lane.b32.xlu2 %v4536_v17, %s10529_s17  ;;  %3531 = vrot.lane.b32.xlu0 %v3468_v58, %s10527_s11  ;;  %v10214_v17 = vld [vmem:[#allocation2 + $0x394] sm:$0xff]  ;;  %v3945_v16 = vrot.slane %v3943_v18, 4 }
 0x5c5   :  { %6609 = vmatmul.bf16.gmra.mxu3 %v13661_v47  ;;  %v4078_v58 = vld [vmem:[%s15901_s0 + $0x34] sm:$0xf] }
 0x5c6   :  { %v3520_v36 = vpop.permute.xlu2 %3519  ;;  %v4126_v2 = vpop.permute.xlu0 %4125  ;;  %9214 = vmatmul.msk.bf16.gmra.mxu1 %vm5904_vm1, %v13666_v14  ;;  %6621 = vmatpush.bf16.msrb.mxu0 %v10185_v35  ;;  %v3946_v35 = vrot.slane %v3879_v26, 7 }
 0x5c7   :  { %3604 = vst.msk [vmem:[#allocation2 + $0x2ec] sm:$0x3] %vm290_vm9, %v3520_v36  ;;  %v10197_v37 = vld [vmem:[#allocation2 + $0x308] sm:$0xff]  ;;  %4597 = vrot.lane.b32.xlu1 %v4535_v23, %s10529_s17  ;;  %v3710_v36 = vrot.slane %v13978_v6, 6  ;;  %v3400_v6 = vld [vmem:[%s15901_s0 + $0x3c] sm:$0xf] }
 0x5c8   :  { %4191 = vst.msk [vmem:[#allocation2 + $0x304] sm:$0xf] %vm49_vm8, %v4126_v2  ;;  %6640 = vmatpush.bf16.msrb.mxu1 %v10197_v37  ;;  %v4079_v2 = vld [vmem:[%s15901_s0 + $0x38] sm:$0x7] }
 0x5c9   :  { %v3760_v31 = vpop.permute.xlu1 %3759  ;;  %v5254_v38 = vld [vmem:[#allocation2 + $0x338] sm:$0x7]  ;;  %v3712_v42 = vrot.slane %v3710_v36, 4 }
 0x5ca   :  { %6916 = vmatpush.bf16.msra.mxu0 %v10218_v39  ;;  %3844 = vst.msk [vmem:[#allocation2 + $0x2f8] sm:$0x1] %vm535_vm14, %v3760_v31  ;;  %v6495_v55 = vunpack.c.l.b16 %v5254_v38  ;;  %v3947_v31 = vsel %vm10911_vm12, %v3945_v16, %v3946_v35  ;;  %v10240_v35 = vld [vmem:[#allocation2 + $0x468] sm:$0xff] }
 0x5cb   :  { %6581 = vmatmul.bf16.gmra.mxu2 %v13449_v61 }
 0x5cc   :  { %4593 = vrot.lane.b32.xlu2 %v4529_v41, %s10529_s17  ;;  %4817 = vrot.lane.b32.xlu0 %v4765_v63, %s10528_s15  ;;  %v6530_v29 = vpack.c.b16 %v6495_v55, %v6495_v55  ;;  %v13996_v41 = vld [vmem:[%s15901_s0 + $0x30] sm:$0xf] }
 0x5cd   :  { %v3705_v38 = vrot.slane %v13996_v41, 6  ;;  %v10225_v41 = vld [vmem:[#allocation2 + $0x3ec] sm:$0xff] }
 0x5ce   :  { %6917 = vmatpush.bf16.msra.mxu0 %v10217_v50  ;;  %v4592_v12 = vpop.permute.xlu2 %4591  ;;  %v3984_v21 = vpop.permute.xlu0 %3983  ;;  %v6566_v44 = vsel %vm123_vm0, %v6530_v29, 0  ;;  %v3638_v50 = vld [vmem:[%s15901_s0 + $0x34] sm:$0xf]  ;;  %v4077_v29 = vld [vmem:[%s15901_s0 + $0x30] sm:$0xf] }
 0x5cf   :  { %4672 = vst.msk [vmem:[#allocation2 + $0x438] sm:$0x1] %vm535_vm14, %v4592_v12  ;;  %v10196_v48 = vld [vmem:[#allocation2 + $0x300] sm:$0xff]  ;;  %4359 = vrot.lane.b32.xlu1 %v4296_v15, %s10530_s20  ;;  %6665 = vmatpush.bf16.msrb.mxu2 %v6566_v44  ;;  %v3877_v15 = vld [vmem:[%s15901_s0 + $0x30] sm:$0xf]  ;;  %v3707_v12 = vrot.slane %v3638_v50, 6 }
 0x5d0   :  { %4048 = vst.msk [vmem:[#allocation2 + $0x2fc] sm:$0xf] %vm49_vm8, %v3984_v21  ;;  %6641 = vmatpush.bf16.msrb.mxu1 %v10196_v48  ;;  %v3941_v21 = vrot.slane %v3877_v15, 7  ;;  %v14021_v48 = vpop.f32.mrf.mxu0  ;;  %v14076_v15 = vld [vmem:[%s15901_s0 + $0x40] sm:$0xf] }
 0x5d1   :  { %v4950_v24 = vpop.permute.xlu1 %4949 }
 0x5d2   :  { %6918 = vmatpush.bf16.msra.mxu0 %v10216_v51  ;;  %5015 = vst.msk [vmem:[#allocation2 + $0x330] sm:$0xf] %vm49_vm8, %v4950_v24  ;;  %v3942_v24 = vrot.slane %v3941_v21, 4 }
 0x5d3   :  { %6622 = vmatmul.bf16.vlgmr.msrb.gmra.mxu0 %v13343_v57 }
 0x5d4   :  { %4357 = vrot.lane.b32.xlu2 %v4295_v56, %s10530_s20  ;;  %4595 = vrot.lane.b32.xlu0 %v4532_v62, %s10529_s17  ;;  %v10243_v62 = vld [vmem:[#allocation2 + $0x480] sm:$0xff] }
 0x5d6   :  { %6919 = vmatpush.bf16.msra.mxu0 %v10215_v8  ;;  %v3524_v43 = vpop.permute.xlu2 %3523  ;;  %v3756_v11 = vpop.permute.xlu0 %3755  ;;  %9215 = vmatmul.msk.bf16.gmra.mxu1 %vm5904_vm1, %v13730_v60  ;;  %v3399_v8 = vld [vmem:[%s15901_s0 + $0x38] sm:$0x7] }
 0x5d7   :  { %3606 = vst.msk [vmem:[#allocation2 + $0x3f8] sm:$0xf] %vm49_vm8, %v3524_v43  ;;  %v10195_v3 = vld [vmem:[#allocation2 + $0x2f8] sm:$0xff]  ;;  %4355 = vrot.lane.b32.xlu1 %v4292_v10, %s10530_s20  ;;  %v3470_v43 = vrot.slane %v3399_v8, 5 }
 0x5d8   :  { %3842 = vst.msk [vmem:[#allocation2 + $0x2f0] sm:$0xf] %vm49_vm8, %v3756_v11  ;;  %6642 = vmatpush.bf16.msrb.mxu1 %v10195_v3  ;;  %v10242_v11 = vld [vmem:[#allocation2 + $0x478] sm:$0xff]  ;;  %v3944_v3 = vsel %vm10911_vm12, %v3942_v24, %v3943_v18 }
 0x5d9   :  { %v3758_v19 = vpop.permute.xlu1 %3757  ;;  %v10202_v23 = vld [vmem:[#allocation2 + $0x330] sm:$0xff] }
 0x5da   :  { %6920 = vmatpush.bf16.msra.mxu0 %v10214_v17  ;;  %3843 = vst.msk [vmem:[#allocation2 + $0x2f4] sm:$0xf] %vm49_vm8, %v3758_v19  ;;  %6666 = vmatpush.bf16.msrb.mxu2 %v10202_v23  ;;  %v3709_v17 = vrot.slane %v3707_v12, 4 }
 0x5db   :  { %6586 = vmatmul.bf16.gmra.mxu2 %v13513_v4 }
 0x5dc   :  { %4353 = vrot.lane.b32.xlu2 %v4289_v22, %s10530_s20  ;;  %4139 = vrot.lane.b32.xlu0 %v4078_v58, %s10531_s29  ;;  %v3706_v22 = vrot.slane %v3705_v38, 4  ;;  %v14039_v58 = vpop.f32.mrf.mxu0  ;;  %v3711_v18 = vsel %vm10722_vm5, %v3709_v17, %v3710_v36 }
 0x5dd   :  { %15929 = vst [vmem:[#allocation6_spill] sm:$0xff] %v14039_v58 }
 0x5de   :  { %6921 = vmatpush.bf16.msra.mxu0 %v10213_v32  ;;  %v4588_v37 = vpop.permute.xlu2 %4587  ;;  %v4810_v39 = vpop.permute.xlu0 %4809  ;;  %v3708_v13 = vsel %vm10722_vm5, %v3706_v22, %v3707_v12  ;;  %v3472_v32 = vrot.slane %v3470_v43, 4  ;;  %v15909_v12 = vrot.slane %v14076_v15, 5 }
 0x5df   :  { %4670 = vst.msk [vmem:[#allocation2 + $0x430] sm:$0xf] %vm49_vm8, %v4588_v37  ;;  %4141 = vrot.lane.b32.xlu1 %v4079_v2, %s10531_s29  ;;  %v3469_v2 = vrot.slane %v3467_v0, 4 }
 0x5e0   :  { %4873 = vst.msk [vmem:[#allocation2 + $0x32c] sm:$0xf] %vm49_vm8, %v4810_v39  ;;  %v34_v39 = vld [vmem:[%s15901_s0 + $0x24] sm:$0xf] }
 0x5e1   :  { %v3518_v46 = vpop.permute.xlu1 %3517  ;;  %v10194_v55 = vld [vmem:[#allocation2 + $0x2f0] sm:$0xff]  ;;  %v3471_v37 = vsel %vm10590_vm2, %v3469_v2, %v3470_v43  ;;  %60 = vst.msk [vmem:[#allocation2 + $0x33c] sm:$0xf] %vm49_vm8, %v34_v39  ;;  %v14107_v43 = vpop.f32.mrf.mxu3 }
 0x5e2   :  { %6922 = vmatpush.bf16.msra.mxu0 %v10212_v7  ;;  %3603 = vst.msk [vmem:[#allocation2 + $0x2e8] sm:$0xf] %vm49_vm8, %v3518_v46  ;;  %6643 = vmatpush.bf16.msrb.mxu1 %v10194_v55  ;;  %v10239_v46 = vld [vmem:[#allocation2 + $0x460] sm:$0xff]  ;;  %v4901_v39 = vld [vmem:[%s15901_s0 + $0x30] sm:$0xf] }
 0x5e3   :  { %6627 = vmatmul.bf16.gmra.mxu0 %v13692_v20  ;;  %15933 = vst [vmem:[#allocation10_spill] sm:$0xff] %v14107_v43 }
 0x5e4   :  { %3775 = vrot.lane.b32.xlu2 %v3712_v42, %s10533_s23  ;;  %3997 = vrot.lane.b32.xlu0 %v3947_v31, %s10532_s16  ;;  %v14060_v53 = vpop.f32.mrf.mxu0  ;;  %v35_v42 = vld [vmem:[%s15901_s0 + $0x28] sm:$0xf]  ;;  %v3473_v31 = vrot.slane %v3400_v6, 5 }
 0x5e5   :  { %61 = vst.msk [vmem:[#allocation2 + $0x340] sm:$0xf] %vm49_vm8, %v35_v42 }
 0x5e6   :  { %6923 = vmatpush.bf16.msra.mxu0 %v10211_v45  ;;  %v4134_v44 = vpop.permute.xlu2 %4133  ;;  %v3754_v51 = vpop.permute.xlu0 %3753  ;;  %v3474_v22 = vrot.slane %v3473_v31, 4 }
 0x5e7   :  { %4195 = vst.msk [vmem:[#allocation2 + $0x41c] sm:$0xf] %vm49_vm8, %v4134_v44  ;;  %v10201_v56 = vld [vmem:[#allocation2 + $0x328] sm:$0xff]  ;;  %4137 = vrot.lane.b32.xlu1 %v4077_v29, %s10531_s29  ;;  %v14078_v45 = vpop.f32.mrf.mxu1  ;;  %v3258_v29 = vld [vmem:[%s15901_s0 + $0x44] sm:$0x7] }
 0x5e8   :  { %3841 = vst.msk [vmem:[#allocation2 + $0x2ec] sm:$0xc] %vm531_vm13, %v3754_v51  ;;  %6667 = vmatpush.bf16.msrb.mxu2 %v10201_v56  ;;  %v3476_v56 = vsel %vm10590_vm2, %v3474_v22, %v15909_v12  ;;  %v10221_v22 = vld [vmem:[#allocation2 + $0x3cc] sm:$0xff] }
 0x5e9   :  { %v4590_v10 = vpop.permute.xlu1 %4589  ;;  %15930 = vst [vmem:[#allocation7_spill] sm:$0xff] %v14078_v45 }
 0x5ea   :  { %7218 = vmatpush.bf16.msrb.mxu0 %v10244_v49  ;;  %4671 = vst.msk [vmem:[#allocation2 + $0x434] sm:$0xf] %vm49_vm8, %v4590_v10  ;;  %v10238_v49 = vld [vmem:[#allocation2 + $0x458] sm:$0xff]  ;;  %v10224_v10 = vld [vmem:[#allocation2 + $0x3e4] sm:$0xff] }
 0x5eb   :  { %9352 = vmatmul.msk.bf16.vlgmr.msrb.gmra.mxu2 %vm5904_vm1, %v13595_v34 }
 0x5ec   :  { %3771 = vrot.lane.b32.xlu2 %v3708_v13, %s10533_s23  ;;  %3993 = vrot.lane.b32.xlu0 %v3941_v21, %s10532_s16  ;;  %v14090_v21 = vpop.f32.mrf.mxu0 }
 0x5ed   :  { %15931 = vst [vmem:[#allocation8_spill] sm:$0xff] %v14090_v21 }
 0x5ee   :  { %7219 = vmatpush.bf16.msrb.mxu0 %v10243_v62  ;;  %v3992_v19 = vpop.permute.xlu2 %3991  ;;  %v4812_v23 = vpop.permute.xlu0 %4811  ;;  %v10203_v62 = vld [vmem:[#allocation2 + $0x33c] sm:$0xff] }
 0x5ef   :  { %4052 = vst.msk [vmem:[#allocation2 + $0x414] sm:$0xf] %vm49_vm8, %v3992_v19  ;;  %v10193_v26 = vld [vmem:[#allocation2 + $0x2e8] sm:$0xff]  ;;  %3995 = vrot.lane.b32.xlu1 %v3944_v3, %s10532_s16  ;;  %v14104_v8 = vpop.f32.mrf.mxu1  ;;  %6900 = vmatpush.bf16.msrb.mxu3 %v10203_v62 }
 0x5f0   :  { %4874 = vst.msk [vmem:[#allocation2 + $0x438] sm:$0xe] %vm744_vm15, %v4812_v23  ;;  %6644 = vmatpush.bf16.msrb.mxu1 %v10193_v26  ;;  %v14119_v23 = vld [vmem:[%s15901_s0 + $0x40] sm:$0xf] }
 0x5f1   :  { %v3522_v16 = vpop.permute.xlu1 %3521  ;;  %15932 = vst [vmem:[#allocation9_spill] sm:$0xff] %v14104_v8  ;;  %v10223_v26 = vld [vmem:[#allocation2 + $0x3dc] sm:$0xff] }
 0x5f2   :  { %7220 = vmatpush.bf16.msrb.mxu0 %v10242_v11  ;;  %3605 = vst.msk [vmem:[#allocation2 + $0x3f4] sm:$0x8] %vm286_vm7, %v3522_v16  ;;  %v3256_v11 = vld [vmem:[%s15901_s0 + $0x3c] sm:$0xf]  ;;  %6901 = vmatmul.bf16.vlgmr.msrb.gmra.mxu3 %v13391_v5 }
 0x5f3   :  { %6645 = vmatmul.bf16.vlgmr.msrb.gmra.mxu1 %v13436_v52  ;;  %6632 = vmatmul.bf16.gmra.mxu0 %v13749_v59 }
 0x5f4   :  { %3535 = vrot.lane.b32.xlu2 %v3472_v32, %s10527_s11  ;;  %3773 = vrot.lane.b32.xlu0 %v3711_v18, %s10533_s23  ;;  %v14114_v3 = vpop.f32.mrf.mxu0  ;;  %v4902_v32 = vld [vmem:[%s15901_s0 + $0x34] sm:$0xf]  ;;  %v4539_v18 = vrot.slane %v14119_v23, 6  ;;  %v10248_v23 = vld [vmem:[#allocation2 + $0x4a8] sm:$0xff] }
 0x5f6   :  { %7221 = vmatpush.bf16.msrb.mxu0 %v10241_v54  ;;  %v3768_v0 = vpop.permute.xlu2 %3767  ;;  %v4352_v36 = vpop.permute.xlu0 %4351  ;;  %v4903_v54 = vld [vmem:[%s15901_s0 + $0x38] sm:$0x7] }
 0x5f7   :  { %3848 = vst.msk [vmem:[#allocation2 + $0x40c] sm:$0x1] %vm535_vm14, %v3768_v0  ;;  %v10234_v7 = vld [vmem:[#allocation2 + $0x434] sm:$0xff]  ;;  %3533 = vrot.lane.b32.xlu1 %v3471_v37, %s10527_s11  ;;  %v14140_v6 = vpop.f32.mrf.mxu1 }
 0x5f8   :  { %4432 = vst.msk [vmem:[#allocation2 + $0x42c] sm:$0x3] %vm290_vm9, %v4352_v36  ;;  %6962 = vmatpush.bf16.msra.mxu2 %v10234_v7  ;;  %v4702_v37 = vld [vmem:[%s15901_s0 + $0x34] sm:$0xf]  ;;  %v14143_v36 = vpop.f32.mrf.mxu3  ;;  %v4541_v7 = vrot.slane %v4539_v18, 4 }
 0x5f9   :  { %v4586_v55 = vpop.permute.xlu1 %4585  ;;  %v10226_v50 = vld [vmem:[#allocation2 + $0x3f4] sm:$0xff]  ;;  %15934 = vst [vmem:[#allocation11_spill] sm:$0xff] %v14143_v36 }
 0x5fa   :  { %7222 = vmatpush.bf16.msrb.mxu0 %v10240_v35  ;;  %4669 = vst.msk [vmem:[#allocation2 + $0x42c] sm:$0xc] %vm531_vm13, %v4586_v55  ;;  %6939 = vmatpush.bf16.msra.mxu1 %v10226_v50  ;;  %v4466_v35 = vld [vmem:[%s15901_s0 + $0x44] sm:$0x7]  ;;  %v10222_v0 = vld [vmem:[#allocation2 + $0x3d4] sm:$0xff] }
 0x5fb   :  { %v4542_v42 = vrot.slane %v4466_v35, 6  ;;  %9353 = vmatmul.msk.bf16.gmra.mxu2 %vm5904_vm1, %v13666_v14 }
 0x5fc   :  { %3537 = vrot.lane.b32.xlu2 %v3473_v31, %s10527_s11  ;;  %3769 = vrot.lane.b32.xlu0 %v3705_v38, %s10533_s23  ;;  %v3257_v38 = vld [vmem:[%s15901_s0 + $0x40] sm:$0xf]  ;;  %v4766_v31 = vrot.slane %v4765_v63, 4  ;;  %v5939_v55 = vpop.f32.mrf.mxu0 }
 0x5fd   :  { %v4543_v28 = vsel %vm10722_vm5, %v4541_v7, %v4542_v42  ;;  %v14203_v7 = vld [vmem:[%s15901_s0 + $0x3c] sm:$0xf]  ;;  %v4225_v55 = vld [vmem:[%s15901_s0 + $0x40] sm:$0xf] }
 0x5fe   :  { %7223 = vmatpush.bf16.msrb.mxu0 %v10239_v46  ;;  %v3764_v44 = vpop.permute.xlu2 %3763  ;;  %v4348_v51 = vpop.permute.xlu0 %4347  ;;  %6940 = vmatpush.bf16.msra.mxu1 %v10225_v41  ;;  %v4767_v46 = vrot.slane %v4702_v37, 7  ;;  %v10252_v37 = vld [vmem:[#allocation2 + $0x4c8] sm:$0xff] }
 0x5ff   :  { %3846 = vst.msk [vmem:[#allocation2 + $0x404] sm:$0xf] %vm49_vm8, %v3764_v44  ;;  %3323 = vrot.lane.b32.xlu1 %v3258_v29, %s10526_s25  ;;  %v4703_v29 = vld [vmem:[%s15901_s0 + $0x38] sm:$0x7]  ;;  %v14160_v44 = vpop.f32.mrf.mxu2 }
 0x600   :  { %4430 = vst.msk [vmem:[#allocation2 + $0x424] sm:$0xf] %vm49_vm8, %v4348_v51  ;;  %v4768_v63 = vsel %vm10911_vm12, %v4766_v31, %v4767_v46  ;;  %v4769_v51 = vrot.slane %v4767_v46, 4  ;;  %v4770_v41 = vrot.slane %v4703_v29, 7 }
 0x601   :  { %v4350_v13 = vpop.permute.xlu1 %4349  ;;  %v10233_v24 = vld [vmem:[#allocation2 + $0x42c] sm:$0xff]  ;;  %15935 = vst [vmem:[#allocation12_spill] sm:$0xff] %v14160_v44 }
 0x602   :  { %7224 = vmatpush.bf16.msrb.mxu0 %v10238_v49  ;;  %4431 = vst.msk [vmem:[#allocation2 + $0x428] sm:$0xf] %vm49_vm8, %v4350_v13  ;;  %6941 = vmatpush.bf16.msra.mxu1 %v10224_v10  ;;  %v14173_v13 = vpop.f32.mrf.mxu1  ;;  %v14176_v10 = vpop.f32.mrf.mxu3 }
 0x603   :  { %6963 = vmatpush.bf16.msra.mxu2 %v10233_v24  ;;  %6650 = vmatmul.bf16.gmra.mxu1 %v13498_v30  ;;  %15936 = vst [vmem:[#allocation13_spill] sm:$0xff] %v14173_v13  ;;  %v10220_v24 = vld [vmem:[#allocation2 + $0x3c4] sm:$0xff]  ;;  %v10258_v13 = vld [vmem:[#allocation2 + $0x4f8] sm:$0xff] }
 0x604   :  { %3321 = vrot.lane.b32.xlu2 %v3257_v38, %s10526_s25  ;;  %3539 = vrot.lane.b32.xlu0 %v3476_v56, %s10527_s11  ;;  %v14171_v38 = vld [vmem:[%s15901_s0 + $0x44] sm:$0x7] }
 0x605   :  { %6924 = vmatmul.bf16.vlgmr.msra.gmra.mxu0 %v13506_v40  ;;  %6906 = vmatmul.bf16.gmra.mxu3 %v13449_v61 }
 0x606   :  { %v4958_v17 = vpop.permute.xlu2 %4957  ;;  %v4136_v19 = vpop.permute.xlu0 %4135  ;;  %6942 = vmatpush.bf16.msra.mxu1 %v10223_v26 }
 0x607   :  { %5019 = vst.msk [vmem:[#allocation2 + $0x448] sm:$0xf] %vm49_vm8, %v4958_v17  ;;  %3319 = vrot.lane.b32.xlu1 %v3256_v11, %s10526_s25  ;;  %v4302_v11 = vrot.slane %v14171_v38, 5  ;;  %v4771_v17 = vsel %vm10911_vm12, %v4769_v51, %v4770_v41  ;;  %v14193_v35 = vpop.f32.mrf.mxu2  ;;  %v4299_v41 = vrot.slane %v4225_v55, 5  ;;  %v10247_v38 = vld [vmem:[#allocation2 + $0x4a0] sm:$0xff] }
 0x608   :  { %4196 = vst.msk [vmem:[#allocation2 + $0x420] sm:$0x7] %vm52_vm6, %v4136_v19  ;;  %v14183_v19 = vpop.f32.mrf.mxu0 }
 0x609   :  { %v4346_v2 = vpop.permute.xlu1 %4345  ;;  %v10232_v16 = vld [vmem:[#allocation2 + $0x424] sm:$0xff]  ;;  %15937 = vst [vmem:[#allocation14_spill] sm:$0xff] %v14183_v19 }
 0x60a   :  { %4429 = vst.msk [vmem:[#allocation2 + $0x420] sm:$0x8] %vm286_vm7, %v4346_v2  ;;  %6943 = vmatpush.bf16.msra.mxu1 %v10222_v0  ;;  %6964 = vmatpush.bf16.msra.mxu2 %v10232_v16  ;;  %v10219_v2 = vld [vmem:[#allocation2 + $0x3bc] sm:$0xff]  ;;  %v4304_v0 = vrot.slane %v4302_v11, 4 }
 0x60b   :  { %15938 = vst [vmem:[#allocation15_spill] sm:$0xff] %v14193_v35  ;;  %9354 = vmatmul.msk.bf16.gmra.mxu2 %vm5904_vm1, %v13730_v60  ;;  %v3259_v35 = vld [vmem:[%s15901_s0 + $0x48] sm:$0xf] }
 0x60c   :  { %4963 = vrot.lane.b32.xlu2 %v4902_v32, %s10534_s7  ;;  %4965 = vrot.lane.b32.xlu0 %v4903_v54, %s10534_s7  ;;  %v14188_v54 = vld [vmem:[%s15901_s0 + $0x3c] sm:$0xf] }
 0x60d   :  { %v4297_v31 = vrot.slane %v14188_v54, 5 }
 0x60e   :  { %v3762_v50 = vpop.permute.xlu2 %3761  ;;  %v4132_v49 = vpop.permute.xlu0 %4131  ;;  %6944 = vmatpush.bf16.msra.mxu1 %v10221_v22 }
 0x60f   :  { %3845 = vst.msk [vmem:[#allocation2 + $0x400] sm:$0xc] %vm531_vm13, %v3762_v50  ;;  %4961 = vrot.lane.b32.xlu1 %v4901_v39, %s10534_s7  ;;  %v4544_v39 = vrot.slane %v4542_v42, 4  ;;  %v4464_v42 = vld [vmem:[%s15901_s0 + $0x3c] sm:$0xf]  ;;  %v14215_v22 = vpop.f32.mrf.mxu3  ;;  %v4298_v51 = vrot.slane %v4297_v31, 4 }
 0x610   :  { %4194 = vst.msk [vmem:[#allocation2 + $0x418] sm:$0xf] %vm49_vm8, %v4132_v49  ;;  %v14212_v49 = vpop.f32.mrf.mxu1 }
 0x611   :  { %v4960_v56 = vpop.permute.xlu1 %4959  ;;  %v10231_v62 = vld [vmem:[#allocation2 + $0x41c] sm:$0xff]  ;;  %15939 = vst [vmem:[#allocation16_spill] sm:$0xff] %v14215_v22 }
 0x612   :  { %5020 = vst.msk [vmem:[#allocation2 + $0x44c] sm:$0x7] %vm52_vm6, %v4960_v56  ;;  %6945 = vmatpush.bf16.msra.mxu1 %v10220_v24  ;;  %6965 = vmatpush.bf16.msra.mxu2 %v10231_v62  ;;  %v4537_v56 = vrot.slane %v4464_v42, 6  ;;  %v14222_v24 = vpop.f32.mrf.mxu0 }
 0x613   :  { %6655 = vmatmul.bf16.gmra.mxu1 %v13575_v1  ;;  %15940 = vst [vmem:[#allocation17_spill] sm:$0xff] %v14222_v24 }
 0x614   :  { %4605 = vrot.lane.b32.xlu2 %v4543_v28, %s10529_s17  ;;  %4819 = vrot.lane.b32.xlu0 %v4768_v63, %s10528_s15  ;;  %v10251_v28 = vld [vmem:[#allocation2 + $0x4c0] sm:$0xff]  ;;  %v15908_v63 = vrot.slane %v14203_v7, 7 }
 0x615   :  { %6929 = vmatmul.bf16.gmra.mxu0 %v13587_v27  ;;  %6911 = vmatmul.bf16.gmra.mxu3 %v13513_v4 }
 0x616   :  { %v3530_v26 = vpop.permute.xlu2 %3529  ;;  %v3988_v32 = vpop.permute.xlu0 %3987  ;;  %6946 = vmatpush.bf16.msra.mxu1 %v10219_v2 }
 0x617   :  { %3609 = vst.msk [vmem:[#allocation2 + $0x508] sm:$0x8] %vm286_vm7, %v3530_v26  ;;  %v10230_v16 = vld [vmem:[#allocation2 + $0x414] sm:$0xff]  ;;  %4821 = vrot.lane.b32.xlu1 %v4771_v17, %s10528_s15  ;;  %v14228_v2 = vpop.f32.mrf.mxu2  ;;  %v14237_v42 = vpop.f32.mrf.mxu3 }
 0x618   :  { %4050 = vst.msk [vmem:[#allocation2 + $0x40c] sm:$0xe] %vm744_vm15, %v3988_v32  ;;  %6966 = vmatpush.bf16.msra.mxu2 %v10230_v16  ;;  %v10250_v16 = vld [vmem:[#allocation2 + $0x4b8] sm:$0xff]  ;;  %v5962_v55 = vpop.f32.mrf.mxu1 }
 0x619   :  { %v3990_v46 = vpop.permute.xlu1 %3989  ;;  %v5323_v50 = vld [vmem:[#allocation2 + $0x44c] sm:$0x7]  ;;  %15941 = vst [vmem:[#allocation18_spill] sm:$0xff] %v14237_v42 }
 0x61a   :  { %7241 = vmatpush.bf16.msrb.mxu1 %v10252_v37  ;;  %4051 = vst.msk [vmem:[#allocation2 + $0x410] sm:$0xf] %vm49_vm8, %v3990_v46  ;;  %v6820_v29 = vunpack.c.l.b16 %v5323_v50  ;;  %v4300_v37 = vsel %vm10590_vm2, %v4298_v51, %v4299_v41  ;;  %v10249_v50 = vld [vmem:[#allocation2 + $0x4b0] sm:$0xff]  ;;  %v14245_v51 = vpop.f32.mrf.mxu0 }
 0x61c   :  { %4367 = vrot.lane.b32.xlu2 %v4304_v0, %s10530_s20  ;;  %4607 = vrot.lane.b32.xlu0 %v4544_v39, %s10529_s17  ;;  %v6855_v62 = vpack.c.b16 %v6820_v29, %v6820_v29  ;;  %v4538_v0 = vrot.slane %v4537_v56, 4 }
 0x61e   :  { %7242 = vmatpush.bf16.msrb.mxu1 %v10251_v28  ;;  %v4600_v17 = vpop.permute.xlu2 %4599  ;;  %v3766_v26 = vpop.permute.xlu0 %3765  ;;  %v6891_v32 = vsel %vm123_vm0, %v6855_v62, 0  ;;  %v4540_v29 = vsel %vm10722_vm5, %v4538_v0, %v4539_v18  ;;  %v4301_v28 = vrot.slane %v4299_v41, 4  ;;  %v4082_v18 = vld [vmem:[%s15901_s0 + $0x44] sm:$0x7] }
 0x61f   :  { %4676 = vst.msk [vmem:[#allocation2 + $0x54c] sm:$0x1] %vm535_vm14, %v4600_v17  ;;  %4823 = vrot.lane.b32.xlu1 %v15908_v63, %s10528_s15  ;;  %6990 = vmatpush.bf16.msra.mxu3 %v6891_v32 }
 0x620   :  { %3847 = vst.msk [vmem:[#allocation2 + $0x408] sm:$0xf] %vm49_vm8, %v3766_v26  ;;  %v4303_v41 = vsel %vm10590_vm2, %v4301_v28, %v4302_v11  ;;  %v14267_v0 = vpop.f32.mrf.mxu1  ;;  %v4081_v11 = vld [vmem:[%s15901_s0 + $0x40] sm:$0xf]  ;;  %v3882_v28 = vld [vmem:[%s15901_s0 + $0x44] sm:$0x7] }
 0x621   :  { %v4956_v39 = vpop.permute.xlu1 %4955  ;;  %v10229_v46 = vld [vmem:[#allocation2 + $0x40c] sm:$0xff] }
 0x622   :  { %7243 = vmatpush.bf16.msrb.mxu1 %v10250_v16  ;;  %5018 = vst.msk [vmem:[#allocation2 + $0x444] sm:$0xf] %vm49_vm8, %v4956_v39  ;;  %6967 = vmatpush.bf16.msra.mxu2 %v10229_v46  ;;  %v6008_v39 = vpop.f32.mrf.mxu3  ;;  %v14276_v55 = vpop.f32.mrf.mxu0 }
 0x623   :  { %6947 = vmatmul.bf16.vlgmr.msra.gmra.mxu1 %v13343_v57  ;;  %15943 = vst [vmem:[#allocation20_spill] sm:$0xff] %v14276_v55 }
 0x624   :  { %4363 = vrot.lane.b32.xlu2 %v4300_v37, %s10530_s20  ;;  %4601 = vrot.lane.b32.xlu0 %v4537_v56, %s10529_s17  ;;  %v14250_v56 = vpop.f32.mrf.mxu2  ;;  %v14265_v37 = vld [vmem:[%s15901_s0 + $0x40] sm:$0xf] }
 0x625   :  { %15942 = vst [vmem:[#allocation19_spill] sm:$0xff] %v14250_v56  ;;  %6934 = vmatmul.bf16.gmra.mxu0 %v13661_v47  ;;  %v15910_v46 = vrot.slane %v14265_v37, 7 }
 0x626   :  { %7244 = vmatpush.bf16.msrb.mxu1 %v10249_v50  ;;  %v4594_v62 = vpop.permute.xlu2 %4593  ;;  %v3526_v17 = vpop.permute.xlu0 %3525 }
 0x627   :  { %4673 = vst.msk [vmem:[#allocation2 + $0x540] sm:$0xc] %vm531_vm13, %v4594_v62  ;;  %v10228_v26 = vld [vmem:[#allocation2 + $0x404] sm:$0xff]  ;;  %4603 = vrot.lane.b32.xlu1 %v4540_v29, %s10529_s17 }
 0x628   :  { %3607 = vst.msk [vmem:[#allocation2 + $0x3fc] sm:$0xf] %vm49_vm8, %v3526_v17  ;;  %6968 = vmatpush.bf16.msra.mxu2 %v10228_v26  ;;  %v10246_v17 = vld [vmem:[#allocation2 + $0x498] sm:$0xff] }
 0x629   :  { %v3528_v32 = vpop.permute.xlu1 %3527  ;;  %v10236_v16 = vld [vmem:[#allocation2 + $0x444] sm:$0xff]  ;;  %v4080_v26 = vld [vmem:[%s15901_s0 + $0x3c] sm:$0xf] }
 0x62a   :  { %7245 = vmatpush.bf16.msrb.mxu1 %v10248_v23  ;;  %3608 = vst.msk [vmem:[#allocation2 + $0x400] sm:$0x3] %vm290_vm9, %v3528_v32  ;;  %6991 = vmatpush.bf16.msra.mxu3 %v10236_v16  ;;  %v3952_v23 = vrot.slane %v15910_v46, 4  ;;  %v14291_v16 = vpop.f32.mrf.mxu1  ;;  %v14294_v39 = vpop.f32.mrf.mxu3 }
 0x62b   :  { %15944 = vst [vmem:[#allocation21_spill] sm:$0xff] %v14291_v16 }
 0x62c   :  { %4147 = vrot.lane.b32.xlu2 %v4082_v18, %s10531_s29  ;;  %4365 = vrot.lane.b32.xlu0 %v4303_v41, %s10530_s20  ;;  %v14282_v62 = vpop.f32.mrf.mxu2  ;;  %v3953_v18 = vrot.slane %v3882_v28, 7  ;;  %15945 = vst [vmem:[#allocation22_spill] sm:$0xff] %v14294_v39  ;;  %v3642_v28 = vld [vmem:[%s15901_s0 + $0x44] sm:$0x7] }
 0x62e   :  { %7246 = vmatpush.bf16.msrb.mxu1 %v10247_v38  ;;  %v4358_v50 = vpop.permute.xlu2 %4357  ;;  %v4814_v29 = vpop.permute.xlu0 %4813  ;;  %v10245_v38 = vld [vmem:[#allocation2 + $0x490] sm:$0xff] }
 0x62f   :  { %4435 = vst.msk [vmem:[#allocation2 + $0x53c] sm:$0xf] %vm49_vm8, %v4358_v50  ;;  %4145 = vrot.lane.b32.xlu1 %v4081_v11, %s10531_s29  ;;  %v10278_v11 = vld [vmem:[#allocation2 + $0x59c] sm:$0xff]  ;;  %v3954_v50 = vsel %vm10911_vm12, %v3952_v23, %v3953_v18 }
 0x630   :  { %4875 = vst.msk [vmem:[#allocation2 + $0x43c] sm:$0xf] %vm49_vm8, %v4814_v29  ;;  %v3880_v29 = vld [vmem:[%s15901_s0 + $0x3c] sm:$0xf] }
 0x631   :  { %v4816_v41 = vpop.permute.xlu1 %4815  ;;  %v10227_v32 = vld [vmem:[#allocation2 + $0x3fc] sm:$0xff]  ;;  %v3948_v18 = vrot.slane %v3880_v29, 7 }
 0x632   :  { %7247 = vmatpush.bf16.msrb.mxu1 %v10246_v17  ;;  %4876 = vst.msk [vmem:[#allocation2 + $0x440] sm:$0xf] %vm49_vm8, %v4816_v41  ;;  %6969 = vmatpush.bf16.msra.mxu2 %v10227_v32  ;;  %v14308_v17 = vpop.f32.mrf.mxu0  ;;  %v3718_v41 = vrot.slane %v3642_v28, 6  ;;  %v10277_v32 = vld [vmem:[#allocation2 + $0x594] sm:$0xff]  ;;  %v14329_v29 = vpop.f32.mrf.mxu3 }
 0x633   :  { %15946 = vst [vmem:[#allocation23_spill] sm:$0xff] %v14308_v17  ;;  %6952 = vmatmul.bf16.gmra.mxu1 %v13692_v20 }
 0x634   :  { %4143 = vrot.lane.b32.xlu2 %v4080_v26, %s10531_s29  ;;  %4361 = vrot.lane.b32.xlu0 %v4297_v31, %s10530_s20  ;;  %v3641_v31 = vld [vmem:[%s15901_s0 + $0x40] sm:$0xf]  ;;  %v5985_v23 = vpop.f32.mrf.mxu2  ;;  %15947 = vst [vmem:[#allocation24_spill] sm:$0xff] %v14329_v29  ;;  %v3720_v28 = vrot.slane %v3718_v41, 4 }
 0x635   :  { %6970 = vmatmul.bf16.vlgmr.msra.gmra.mxu2 %v13436_v52  ;;  %v3715_v63 = vrot.slane %v3641_v31, 6  ;;  %v3949_v23 = vrot.slane %v3948_v18, 4 }
 0x636   :  { %7248 = vmatpush.bf16.msrb.mxu1 %v10245_v38  ;;  %v4354_v26 = vpop.permute.xlu2 %4353  ;;  %v3532_v54 = vpop.permute.xlu0 %3531  ;;  %v4906_v38 = vld [vmem:[%s15901_s0 + $0x44] sm:$0x7] }
 0x637   :  { %4433 = vst.msk [vmem:[#allocation2 + $0x534] sm:$0x8] %vm286_vm7, %v4354_v26  ;;  %4003 = vrot.lane.b32.xlu1 %v3954_v50, %s10532_s16  ;;  %v14326_v50 = vpop.f32.mrf.mxu1  ;;  %v3717_v31 = vrot.slane %v3715_v63, 4 }
 0x638   :  { %3610 = vst.msk [vmem:[#allocation2 + $0x50c] sm:$0xf] %vm49_vm8, %v3532_v54  ;;  %v10276_v54 = vld [vmem:[#allocation2 + $0x58c] sm:$0xff] }
 0x639   :  { %v4598_v12 = vpop.permute.xlu1 %4597  ;;  %v10235_v26 = vld [vmem:[#allocation2 + $0x43c] sm:$0xff] }
 0x63a   :  { %7543 = vmatpush.bf16.msra.mxu1 %v10278_v11  ;;  %v14324_v11 = vld [vmem:[%s15901_s0 + $0x3c] sm:$0xf]  ;;  %4675 = vst.msk [vmem:[#allocation2 + $0x548] sm:$0xf] %vm49_vm8, %v4598_v12  ;;  %6992 = vmatpush.bf16.msra.mxu3 %v10235_v26  ;;  %v6031_v55 = vpop.f32.mrf.mxu0 }
 0x63b   :  { %v15911_v46 = vrot.slane %v14324_v11, 6  ;;  %v3719_v55 = vsel %vm10722_vm5, %v3717_v31, %v3718_v41  ;;  %v14355_v41 = vpop.f32.mrf.mxu3 }
 0x63c   :  { %3999 = vrot.lane.b32.xlu2 %v3948_v18, %s10532_s16  ;;  %4971 = vrot.lane.b32.xlu0 %v4906_v38, %s10534_s7  ;;  %v10275_v18 = vld [vmem:[#allocation2 + $0x584] sm:$0xff]  ;;  %v15948_v38 = vrot.slane %v14265_v37, 7  ;;  %v10274_v37 = vld [vmem:[#allocation2 + $0x57c] sm:$0xff] }
 0x63d   :  { %9491 = vmatmul.msk.bf16.vlgmr.msra.gmra.mxu3 %vm5904_vm1, %v13595_v34  ;;  %v3714_v26 = vrot.slane %v15911_v46, 4 }
 0x63e   :  { %7544 = vmatpush.bf16.msra.mxu1 %v10277_v32  ;;  %v3776_v22 = vpop.permute.xlu2 %3775  ;;  %v4818_v56 = vpop.permute.xlu0 %4817 }
 0x63f   :  { %3852 = vst.msk [vmem:[#allocation2 + $0x520] sm:$0x1] %vm535_vm14, %v3776_v22  ;;  %v10260_v12 = vld [vmem:[#allocation2 + $0x508] sm:$0xff]  ;;  %v14335_v32 = vpop.f32.mrf.mxu2  ;;  %3783 = vrot.lane.b32.xlu1 %v3720_v28, %s10533_s23  ;;  %v3951_v22 = vsel %vm10911_vm12, %v3949_v23, %v15948_v38  ;;  %v14352_v28 = vpop.f32.mrf.mxu1  ;;  %v3716_v31 = vsel %vm10722_vm5, %v3714_v26, %v3715_v63  ;;  %v15950_v23 = vrot.slane %v14076_v15, 5  ;;  %v10273_v15 = vld [vmem:[#allocation2 + $0x574] sm:$0xff] }
 0x640   :  { %4877 = vst.msk [vmem:[#allocation2 + $0x54c] sm:$0xe] %vm744_vm15, %v4818_v56  ;;  %7264 = vmatpush.bf16.msrb.mxu2 %v10260_v12  ;;  %v3402_v56 = vld [vmem:[%s15901_s0 + $0x44] sm:$0x7] }
 0x641   :  { %15949 = vst [vmem:[#allocation25_spill] sm:$0xff] %v14352_v28  ;;  %v10259_v12 = vld [vmem:[#allocation2 + $0x500] sm:$0xff]  ;;  %v3477_v38 = vrot.slane %v15950_v23, 4  ;;  %v3478_v46 = vrot.slane %v3402_v56, 5  ;;  %v37_v23 = vld [vmem:[%s15901_s0 + $0x30] sm:$0xf] }
 0x642   :  { %7545 = vmatpush.bf16.msra.mxu1 %v10276_v54  ;;  %v4360_v54 = vpop.permute.xlu1 %4359  ;;  %v14363_v28 = vpop.f32.mrf.mxu0  ;;  %v4705_v56 = vld [vmem:[%s15901_s0 + $0x40] sm:$0xf]  ;;  %63 = vst.msk [vmem:[#allocation2 + $0x450] sm:$0xf] %vm49_vm8, %v37_v23 }
 0x643   :  { %4436 = vst.msk [vmem:[#allocation2 + $0x540] sm:$0x3] %vm290_vm9, %v4360_v54  ;;  %v3479_v63 = vsel %vm10590_vm2, %v3477_v38, %v3478_v46  ;;  %6957 = vmatmul.bf16.gmra.mxu1 %v13749_v59  ;;  %v38_v38 = vld [vmem:[%s15901_s0 + $0x34] sm:$0xf] }
 0x644   :  { %3781 = vrot.lane.b32.xlu2 %v3719_v55, %s10533_s23  ;;  %4001 = vrot.lane.b32.xlu0 %v3951_v22, %s10532_s16  ;;  %15951 = vst [vmem:[#allocation26_spill] sm:$0xff] %v14363_v28  ;;  %v4904_v22 = vld [vmem:[%s15901_s0 + $0x3c] sm:$0xf] }
 0x645   :  { %7265 = vmatpush.bf16.msrb.mxu2 %v10259_v12  ;;  %64 = vst.msk [vmem:[#allocation2 + $0x454] sm:$0xf] %vm49_vm8, %v38_v38 }
 0x646   :  { %7546 = vmatpush.bf16.msra.mxu1 %v10275_v18  ;;  %v3772_v54 = vpop.permute.xlu2 %3771  ;;  %v4596_v18 = vpop.permute.xlu0 %4595  ;;  %6975 = vmatmul.bf16.gmra.mxu2 %v13498_v30 }
 0x647   :  { %3850 = vst.msk [vmem:[#allocation2 + $0x518] sm:$0xf] %vm49_vm8, %v3772_v54  ;;  %v10268_v55 = vld [vmem:[#allocation2 + $0x548] sm:$0xff]  ;;  %v14366_v21 = vpop.f32.mrf.mxu2  ;;  %3779 = vrot.lane.b32.xlu1 %v3716_v31, %s10533_s23  ;;  %v14379_v12 = vpop.f32.mrf.mxu1  ;;  %v4905_v54 = vld [vmem:[%s15901_s0 + $0x40] sm:$0xf] }
 0x648   :  { %15952 = vst [vmem:[#allocation27_spill] sm:$0xff] %v14366_v21  ;;  %7287 = vmatpush.bf16.msrb.mxu3 %v10268_v55  ;;  %v10272_v31 = vld [vmem:[#allocation2 + $0x56c] sm:$0xff] }
 0x649   :  { %4674 = vst.msk [vmem:[#allocation2 + $0x544] sm:$0xf] %vm49_vm8, %v4596_v18  ;;  %7266 = vmatpush.bf16.msrb.mxu2 %v10258_v13  ;;  %v10257_v13 = vld [vmem:[#allocation2 + $0x4f0] sm:$0xff]  ;;  %v15954_v18 = vrot.slane %v14203_v7, 7  ;;  %v3480_v7 = vrot.slane %v3478_v46, 4 }
 0x64a   :  { %7547 = vmatpush.bf16.msra.mxu1 %v10274_v37  ;;  %v4356_v26 = vpop.permute.xlu1 %4355  ;;  %v14383_v37 = vpop.f32.mrf.mxu3  ;;  %v3403_v46 = vld [vmem:[%s15901_s0 + $0x48] sm:$0xf] }
 0x64b   :  { %4434 = vst.msk [vmem:[#allocation2 + $0x538] sm:$0xf] %vm49_vm8, %v4356_v26  ;;  %v4773_v55 = vrot.slane %v15954_v18, 4 }
 0x64c   :  { %15953 = vst [vmem:[#allocation28_spill] sm:$0xff] %v14383_v37  ;;  %3541 = vrot.lane.b32.xlu2 %v3479_v63, %s10527_s11  ;;  %4967 = vrot.lane.b32.xlu0 %v4904_v22, %s10534_s7  ;;  %v14398_v63 = vpop.f32.mrf.mxu0 }
 0x64d   :  { %7267 = vmatpush.bf16.msrb.mxu2 %v10257_v13  ;;  %15955 = vst [vmem:[#allocation29_spill] sm:$0xff] %v14398_v63  ;;  %v10256_v13 = vld [vmem:[#allocation2 + $0x4e8] sm:$0xff]  ;;  %9492 = vmatmul.msk.bf16.gmra.mxu3 %vm5904_vm1, %v13666_v14  ;;  %v10254_v63 = vld [vmem:[#allocation2 + $0x4d8] sm:$0xff] }
 0x64e   :  { %7548 = vmatpush.bf16.msra.mxu1 %v10273_v15  ;;  %v4774_v15 = vrot.slane %v4705_v56, 7  ;;  %v3536_v22 = vpop.permute.xlu2 %3535  ;;  %v4140_v26 = vpop.permute.xlu0 %4139 }
 0x64f   :  { %3612 = vst.msk [vmem:[#allocation2 + $0x514] sm:$0x3] %vm290_vm9, %v3536_v22  ;;  %v14403_v24 = vpop.f32.mrf.mxu2  ;;  %4969 = vrot.lane.b32.xlu1 %v4905_v54, %s10534_s7  ;;  %v6264_v18 = vpop.f32.mrf.mxu1  ;;  %v10255_v22 = vld [vmem:[#allocation2 + $0x4e0] sm:$0xff] }
 0x650   :  { %v10267_v37 = vld [vmem:[#allocation2 + $0x540] sm:$0xff]  ;;  %4198 = vst.msk [vmem:[#allocation2 + $0x530] sm:$0xf] %vm49_vm8, %v4140_v26  ;;  %v4775_v56 = vsel %vm10911_vm12, %v4773_v55, %v4774_v15 }
 0x651   :  { %7268 = vmatpush.bf16.msrb.mxu2 %v10256_v13  ;;  %7288 = vmatpush.bf16.msrb.mxu3 %v10267_v37  ;;  %v4776_v37 = vrot.slane %v4774_v15, 4  ;;  %v10237_v13 = vld [vmem:[#allocation2 + $0x450] sm:$0xff] }
 0x652   :  { %7549 = vmatpush.bf16.msra.mxu1 %v10272_v31  ;;  %v4142_v23 = vpop.permute.xlu1 %4141  ;;  %v10266_v38 = vld [vmem:[#allocation2 + $0x538] sm:$0xff]  ;;  %v4706_v31 = vld [vmem:[%s15901_s0 + $0x44] sm:$0x7]  ;;  %v14415_v54 = vpop.f32.mrf.mxu3  ;;  %7225 = vmatpush.bf16.msrb.mxu0 %v10237_v13 }
 0x653   :  { %4199 = vst.msk [vmem:[#allocation2 + $0x534] sm:$0x7] %vm52_vm6, %v4142_v23  ;;  %v4777_v55 = vrot.slane %v4706_v31, 7  ;;  %v4469_v31 = vld [vmem:[%s15901_s0 + $0x50] sm:$0x7]  ;;  %7249 = vmatmul.bf16.vlgmr.msrb.gmra.mxu1 %v13506_v40 }
 0x654   :  { %4825 = vrot.lane.b32.xlu2 %v4775_v56, %s10528_s15  ;;  %3543 = vrot.lane.b32.xlu0 %v3480_v7, %s10527_s11  ;;  %v14422_v26 = vpop.f32.mrf.mxu0  ;;  %v15957_v7 = vrot.slane %v14324_v11, 6  ;;  %v14445_v11 = vld [vmem:[%s15901_s0 + $0x4c] sm:$0xf] }
 0x655   :  { %7269 = vmatpush.bf16.msrb.mxu2 %v10255_v22  ;;  %7289 = vmatpush.bf16.msrb.mxu3 %v10266_v38  ;;  %v3481_v38 = vrot.slane %v3403_v46, 5  ;;  %v4778_v15 = vsel %vm10911_vm12, %v4776_v37, %v4777_v55  ;;  %v10253_v46 = vld [vmem:[#allocation2 + $0x4d0] sm:$0xff]  ;;  %v10286_v55 = vld [vmem:[#allocation2 + $0x5dc] sm:$0xff]  ;;  %v15913_v17 = vrot.slane %v14445_v11, 6 }
 0x656   :  { %v3538_v18 = vpop.permute.xlu2 %3537  ;;  %v3998_v23 = vpop.permute.xlu0 %3997  ;;  %6980 = vmatmul.bf16.gmra.mxu2 %v13575_v1  ;;  %7226 = vmatmul.bf16.vlgmr.msrb.gmra.mxu0 %v13391_v5 }
 0x657   :  { %3613 = vst.msk [vmem:[#allocation2 + $0x61c] sm:$0x8] %vm286_vm7, %v3538_v18  ;;  %v14425_v56 = vpop.f32.mrf.mxu2  ;;  %3777 = vrot.lane.b32.xlu1 %v15957_v7, %s10533_s23  ;;  %v14440_v18 = vld [vmem:[%s15901_s0 + $0x4c] sm:$0xf]  ;;  %v3261_v7 = vld [vmem:[%s15901_s0 + $0x50] sm:$0x7] }
 0x658   :  { %15956 = vst [vmem:[#allocation30_spill] sm:$0xff] %v14425_v56  ;;  %v3482_v56 = vrot.slane %v3481_v38, 4  ;;  %v15912_v36 = vrot.slane %v14440_v18, 5 }
 0x659   :  { %4055 = vst.msk [vmem:[#allocation2 + $0x528] sm:$0xf] %vm49_vm8, %v3998_v23  ;;  %7270 = vmatpush.bf16.msrb.mxu2 %v10254_v63  ;;  %v14448_v63 = vpop.f32.mrf.mxu1  ;;  %v4550_v23 = vrot.slane %v4469_v31, 6  ;;  %v10285_v31 = vld [vmem:[#allocation2 + $0x5d4] sm:$0xff] }
 0x65a   :  { %v4138_v22 = vpop.permute.xlu1 %4137  ;;  %v10265_v13 = vld [vmem:[#allocation2 + $0x530] sm:$0xff]  ;;  %15958 = vst [vmem:[#allocation31_spill] sm:$0xff] %v14448_v63  ;;  %v6310_v37 = vpop.f32.mrf.mxu3 }
 0x65b   :  { %4197 = vst.msk [vmem:[#allocation2 + $0x52c] sm:$0xf] %vm49_vm8, %v4138_v22  ;;  %7290 = vmatpush.bf16.msrb.mxu3 %v10265_v13  ;;  %v4552_v13 = vrot.slane %v4550_v23, 4 }
 0x65c   :  { %3545 = vrot.lane.b32.xlu2 %v3481_v38, %s10527_s11  ;;  %4827 = vrot.lane.b32.xlu0 %v4778_v15, %s10528_s15  ;;  %v14459_v22 = vpop.f32.mrf.mxu0  ;;  %v3484_v38 = vsel %vm10590_vm2, %v3482_v56, %v15912_v36 }
 0x65d   :  { %7271 = vmatpush.bf16.msrb.mxu2 %v10253_v46  ;;  %15959 = vst [vmem:[#allocation32_spill] sm:$0xff] %v14459_v22  ;;  %9493 = vmatmul.msk.bf16.gmra.mxu3 %vm5904_vm1, %v13730_v60  ;;  %v4549_v46 = vrot.slane %v15913_v17, 4 }
 0x65e   :  { %v3322_v37 = vpop.permute.xlu2 %3321  ;;  %v3994_v29 = vpop.permute.xlu0 %3993 }
 0x65f   :  { %3377 = vst.msk [vmem:[#allocation2 + $0x618] sm:$0xf] %vm49_vm8, %v3322_v37  ;;  %v14462_v15 = vpop.f32.mrf.mxu2  ;;  %3329 = vrot.lane.b32.xlu1 %v3261_v7, %s10526_s25  ;;  %v10284_v7 = vld [vmem:[#allocation2 + $0x5cc] sm:$0xff]  ;;  %v4551_v56 = vsel %vm10722_vm5, %v4549_v46, %v4550_v23  ;;  %v10283_v23 = vld [vmem:[#allocation2 + $0x5c4] sm:$0xff] }
 0x660   :  { %4053 = vst.msk [vmem:[#allocation2 + $0x520] sm:$0xe] %vm744_vm15, %v3994_v29 }
 0x661   :  { %7566 = vmatpush.bf16.msra.mxu2 %v10286_v55  ;;  %v14474_v22 = vpop.f32.mrf.mxu1 }
 0x662   :  { %v3996_v55 = vpop.permute.xlu1 %3995  ;;  %v10264_v37 = vld [vmem:[#allocation2 + $0x528] sm:$0xff]  ;;  %15960 = vst [vmem:[#allocation33_spill] sm:$0xff] %v14474_v22  ;;  %v14477_v29 = vpop.f32.mrf.mxu3  ;;  %v14504_v22 = vld [vmem:[%s15901_s0 + $0x50] sm:$0x7] }
 0x663   :  { %4054 = vst.msk [vmem:[#allocation2 + $0x524] sm:$0xf] %vm49_vm8, %v3996_v55  ;;  %7291 = vmatpush.bf16.msrb.mxu3 %v10264_v37  ;;  %v3260_v37 = vld [vmem:[%s15901_s0 + $0x4c] sm:$0xf]  ;;  %7254 = vmatmul.bf16.gmra.mxu1 %v13587_v27 }
 0x664   :  { %15961 = vst [vmem:[#allocation34_spill] sm:$0xff] %v14477_v29  ;;  %4615 = vrot.lane.b32.xlu2 %v4552_v13, %s10529_s17  ;;  %3547 = vrot.lane.b32.xlu0 %v3484_v38, %s10527_s11  ;;  %v14488_v36 = vpop.f32.mrf.mxu0  ;;  %v4467_v13 = vld [vmem:[%s15901_s0 + $0x48] sm:$0xf] }
 0x665   :  { %7567 = vmatpush.bf16.msra.mxu2 %v10285_v31  ;;  %v14486_v31 = vld [vmem:[%s15901_s0 + $0x48] sm:$0xf]  ;;  %15962 = vst [vmem:[#allocation35_spill] sm:$0xff] %v14488_v36 }
 0x666   :  { %v4964_v17 = vpop.permute.xlu2 %4963  ;;  %v3774_v55 = vpop.permute.xlu0 %3773  ;;  %v15914_v46 = vrot.slane %v14486_v31, 7  ;;  %7272 = vmatmul.bf16.vlgmr.msrb.gmra.mxu2 %v13343_v57  ;;  %7231 = vmatmul.bf16.gmra.mxu0 %v13449_v61 }
 0x667   :  { %5022 = vst.msk [vmem:[#allocation2 + $0x55c] sm:$0xf] %vm49_vm8, %v4964_v17  ;;  %v6287_v38 = vpop.f32.mrf.mxu2  ;;  %4613 = vrot.lane.b32.xlu1 %v4551_v56, %s10529_s17 }
 0x668   :  { %3851 = vst.msk [vmem:[#allocation2 + $0x51c] sm:$0xf] %vm49_vm8, %v3774_v55 }
 0x669   :  { %7568 = vmatpush.bf16.msra.mxu2 %v10284_v7  ;;  %v4545_v7 = vrot.slane %v4467_v13, 6  ;;  %v14507_v56 = vpop.f32.mrf.mxu1  ;;  %v10282_v13 = vld [vmem:[#allocation2 + $0x5bc] sm:$0xff] }
 0x66a   :  { %v3534_v17 = vpop.permute.xlu1 %3533  ;;  %v10263_v55 = vld [vmem:[#allocation2 + $0x520] sm:$0xff]  ;;  %v14510_v38 = vpop.f32.mrf.mxu3 }
 0x66b   :  { %3611 = vst.msk [vmem:[#allocation2 + $0x510] sm:$0xf] %vm49_vm8, %v3534_v17  ;;  %7292 = vmatpush.bf16.msrb.mxu3 %v10263_v55  ;;  %v4546_v19 = vrot.slane %v4545_v7, 4 }
 0x66c   :  { %15963 = vst [vmem:[#allocation36_spill] sm:$0xff] %v14510_v38  ;;  %3327 = vrot.lane.b32.xlu2 %v3260_v37, %s10526_s25  ;;  %4829 = vrot.lane.b32.xlu0 %v15914_v46, %s10528_s15  ;;  %v6333_v17 = vpop.f32.mrf.mxu0  ;;  %v14524_v37 = vld [vmem:[%s15901_s0 + $0x48] sm:$0xf] }
 0x66d   :  { %7569 = vmatpush.bf16.msra.mxu2 %v10283_v23  ;;  %v4310_v23 = vrot.slane %v14504_v22, 5  ;;  %v10281_v22 = vld [vmem:[#allocation2 + $0x5b4] sm:$0xff]  ;;  %v15965_v17 = vrot.slane %v14445_v11, 6  ;;  %v15915_v21 = vrot.slane %v14524_v37, 5  ;;  %v10280_v11 = vld [vmem:[#allocation2 + $0x5ac] sm:$0xff] }
 0x66e   :  { %v4606_v63 = vpop.permute.xlu2 %4605  ;;  %v3770_v38 = vpop.permute.xlu0 %3769 }
 0x66f   :  { %4679 = vst.msk [vmem:[#allocation2 + $0x65c] sm:$0xf] %vm49_vm8, %v4606_v63  ;;  %v10262_v46 = vld [vmem:[#allocation2 + $0x518] sm:$0xff]  ;;  %v14527_v29 = vpop.f32.mrf.mxu2  ;;  %3325 = vrot.lane.b32.xlu1 %v3259_v35, %s10526_s25  ;;  %v4312_v55 = vrot.slane %v4310_v23, 4  ;;  %v4228_v63 = vld [vmem:[%s15901_s0 + $0x4c] sm:$0xf] }
 0x670   :  { %15964 = vst [vmem:[#allocation37_spill] sm:$0xff] %v14527_v29  ;;  %7293 = vmatpush.bf16.msrb.mxu3 %v10262_v46  ;;  %v4307_v46 = vrot.slane %v4228_v63, 5  ;;  %v4084_v63 = vld [vmem:[%s15901_s0 + $0x4c] sm:$0xf] }
 0x671   :  { %7570 = vmatpush.bf16.msra.mxu2 %v10282_v13  ;;  %3849 = vst.msk [vmem:[#allocation2 + $0x514] sm:$0xc] %vm531_vm13, %v3770_v38  ;;  %v4548_v13 = vsel %vm10722_vm5, %v4546_v19, %v15965_v17  ;;  %v14539_v43 = vpop.f32.mrf.mxu1  ;;  %v4306_v19 = vrot.slane %v15915_v21, 4 }
 0x672   :  { %v3324_v8 = vpop.permute.xlu1 %3323  ;;  %15966 = vst [vmem:[#allocation38_spill] sm:$0xff] %v14539_v43  ;;  %v14542_v35 = vpop.f32.mrf.mxu3 }
 0x673   :  { %3378 = vst.msk [vmem:[#allocation2 + $0x61c] sm:$0x7] %vm52_vm6, %v3324_v8  ;;  %7259 = vmatmul.bf16.gmra.mxu1 %v13661_v47 }
 0x674   :  { %4611 = vrot.lane.b32.xlu2 %v4548_v13, %s10529_s17  ;;  %4375 = vrot.lane.b32.xlu0 %v4312_v55, %s10530_s20  ;;  %v14548_v38 = vpop.f32.mrf.mxu0  ;;  %v10279_v55 = vld [vmem:[#allocation2 + $0x5a4] sm:$0xff]  ;;  %v10312_v13 = vld [vmem:[#allocation2 + $0x6b0] sm:$0xff] }
 0x675   :  { %7571 = vmatpush.bf16.msra.mxu2 %v10281_v22  ;;  %15967 = vst [vmem:[#allocation39_spill] sm:$0xff] %v14548_v38 }
 0x676   :  { %v4368_v22 = vpop.permute.xlu2 %4367  ;;  %v3540_v17 = vpop.permute.xlu0 %3539  ;;  %7277 = vmatmul.bf16.gmra.mxu2 %v13692_v20  ;;  %7236 = vmatmul.bf16.gmra.mxu0 %v13513_v4 }
 0x677   :  { %4440 = vst.msk [vmem:[#allocation2 + $0x654] sm:$0x3] %vm290_vm9, %v4368_v22  ;;  %v14551_v8 = vpop.f32.mrf.mxu2  ;;  %4609 = vrot.lane.b32.xlu1 %v4545_v7, %s10529_s17  ;;  %v4309_v22 = vrot.slane %v4307_v46, 4 }
 0x678   :  { %v10261_v43 = vld [vmem:[#allocation2 + $0x510] sm:$0xff]  ;;  %15968 = vst [vmem:[#allocation40_spill] sm:$0xff] %v14551_v8 }
 0x679   :  { %7572 = vmatpush.bf16.msra.mxu2 %v10280_v11  ;;  %3614 = vst.msk [vmem:[#allocation2 + $0x620] sm:$0xf] %vm49_vm8, %v3540_v17  ;;  %7294 = vmatpush.bf16.msrb.mxu3 %v10261_v43  ;;  %v4308_v11 = vsel %vm10590_vm2, %v4306_v19, %v4307_v46  ;;  %v14562_v17 = vpop.f32.mrf.mxu1  ;;  %v4311_v43 = vsel %vm10590_vm2, %v4309_v22, %v4310_v23  ;;  %v10311_v19 = vld [vmem:[#allocation2 + $0x6a8] sm:$0xff]  ;;  %v4909_v23 = vld [vmem:[%s15901_s0 + $0x50] sm:$0x7] }
 0x67a   :  { %v3320_v21 = vpop.permute.xlu1 %3319  ;;  %15969 = vst [vmem:[#allocation41_spill] sm:$0xff] %v14562_v17  ;;  %v14565_v7 = vpop.f32.mrf.mxu3  ;;  %v4085_v22 = vld [vmem:[%s15901_s0 + $0x50] sm:$0x7] }
 0x67b   :  { %3376 = vst.msk [vmem:[#allocation2 + $0x614] sm:$0xf] %vm49_vm8, %v3320_v21  ;;  %v14578_v21 = vld [vmem:[%s15901_s0 + $0x4c] sm:$0xf] }
 0x67c   :  { %15970 = vst [vmem:[#allocation42_spill] sm:$0xff] %v14565_v7  ;;  %4151 = vrot.lane.b32.xlu2 %v4084_v63, %s10531_s29  ;;  %4371 = vrot.lane.b32.xlu0 %v4308_v11, %s10530_s20  ;;  %v14573_v46 = vpop.f32.mrf.mxu0  ;;  %v10310_v11 = vld [vmem:[#allocation2 + $0x6a0] sm:$0xff]  ;;  %v15973_v17 = vrot.slane %v14578_v21, 7 }
 0x67d   :  { %7573 = vmatpush.bf16.msra.mxu2 %v10279_v55  ;;  %7295 = vmatmul.bf16.vlgmr.msrb.gmra.mxu3 %v13436_v52  ;;  %15971 = vst [vmem:[#allocation43_spill] sm:$0xff] %v14573_v46 }
 0x67e   :  { %v4364_v55 = vpop.permute.xlu2 %4363  ;;  %v4966_v8 = vpop.permute.xlu0 %4965  ;;  %v3959_v28 = vrot.slane %v15973_v17, 4 }
 0x67f   :  { %4438 = vst.msk [vmem:[#allocation2 + $0x64c] sm:$0xf] %vm49_vm8, %v4364_v55  ;;  %v14581_v63 = vpop.f32.mrf.mxu2  ;;  %4373 = vrot.lane.b32.xlu1 %v4311_v43, %s10530_s20  ;;  %v3885_v43 = vld [vmem:[%s15901_s0 + $0x50] sm:$0x7]  ;;  %v10309_v55 = vld [vmem:[#allocation2 + $0x698] sm:$0xff] }
 0x680   :  { %5023 = vst.msk [vmem:[#allocation2 + $0x560] sm:$0x7] %vm52_vm6, %v4966_v8  ;;  %v3960_v36 = vrot.slane %v3885_v43, 7  ;;  %v10308_v43 = vld [vmem:[#allocation2 + $0x690] sm:$0xff] }
 0x681   :  { %7868 = vmatpush.bf16.msrb.mxu2 %v10312_v13  ;;  %v10294_v13 = vld [vmem:[#allocation2 + $0x61c] sm:$0xff]  ;;  %v6356_v46 = vpop.f32.mrf.mxu1 }
 0x682   :  { %7589 = vmatpush.bf16.msra.mxu3 %v10294_v13  ;;  %v4962_v8 = vpop.permute.xlu1 %4961  ;;  %v10293_v7 = vld [vmem:[#allocation2 + $0x614] sm:$0xff]  ;;  %v14601_v13 = vpop.f32.mrf.mxu3 }
 0x683   :  { %5021 = vst.msk [vmem:[#allocation2 + $0x558] sm:$0xf] %vm49_vm8, %v4962_v8 }
 0x684   :  { %15972 = vst [vmem:[#allocation44_spill] sm:$0xff] %v14601_v13  ;;  %4977 = vrot.lane.b32.xlu2 %v4909_v23, %s10534_s7  ;;  %4153 = vrot.lane.b32.xlu0 %v4085_v22, %s10531_s29  ;;  %v14608_v16 = vpop.f32.mrf.mxu0 }
 0x685   :  { %7869 = vmatpush.bf16.msrb.mxu2 %v10311_v19  ;;  %v14594_v19 = vld [vmem:[%s15901_s0 + $0x50] sm:$0x7] }
 0x686   :  { %v15916_v38 = vrot.slane %v14594_v19, 6  ;;  %7590 = vmatpush.bf16.msra.mxu3 %v10293_v7  ;;  %v4148_v46 = vpop.permute.xlu2 %4147  ;;  %v4820_v58 = vpop.permute.xlu0 %4819  ;;  %v15975_v7 = vrot.slane %v14524_v37, 5  ;;  %7282 = vmatmul.bf16.gmra.mxu2 %v13749_v59  ;;  %v10291_v37 = vld [vmem:[#allocation2 + $0x604] sm:$0xff] }
 0x687   :  { %4202 = vst.msk [vmem:[#allocation2 + $0x648] sm:$0x7] %vm52_vm6, %v4148_v46  ;;  %v5392_v8 = vld [vmem:[#allocation2 + $0x560] sm:$0x7]  ;;  %v14611_v23 = vpop.f32.mrf.mxu2 }
 0x688   :  { %15974 = vst [vmem:[#allocation45_spill] sm:$0xff] %v14611_v23  ;;  %4369 = vrot.lane.b32.xlu1 %v15975_v7, %s10530_s20  ;;  %v3728_v17 = vrot.slane %v15916_v38, 4  ;;  %v7145_v22 = vunpack.c.l.b16 %v5392_v8 }
 0x689   :  { %7870 = vmatpush.bf16.msrb.mxu2 %v10310_v11  ;;  %v10292_v11 = vld [vmem:[#allocation2 + $0x60c] sm:$0xff]  ;;  %4878 = vst.msk [vmem:[#allocation2 + $0x550] sm:$0xf] %vm49_vm8, %v4820_v58  ;;  %v3883_v58 = vld [vmem:[%s15901_s0 + $0x48] sm:$0xf]  ;;  %v14625_v23 = vpop.f32.mrf.mxu1 }
 0x68a   :  { %7591 = vmatpush.bf16.msra.mxu3 %v10292_v11  ;;  %v4822_v46 = vpop.permute.xlu1 %4821  ;;  %v7180_v13 = vpack.c.b16 %v7145_v22, %v7145_v22  ;;  %15976 = vst [vmem:[#allocation46_spill] sm:$0xff] %v14625_v23  ;;  %v6612_v8 = vpop.f32.mrf.mxu3  ;;  %v3955_v7 = vrot.slane %v3883_v58, 7  ;;  %v40_v58 = vld [vmem:[%s15901_s0 + $0x3c] sm:$0xf] }
 0x68b   :  { %4879 = vst.msk [vmem:[#allocation2 + $0x554] sm:$0xf] %vm49_vm8, %v4822_v46 }
 0x68c   :  { %3791 = vrot.lane.b32.xlu2 %v3728_v17, %s10533_s23  ;;  %v7216_v11 = vsel %vm123_vm0, %v7180_v13, 0  ;;  %v14634_v22 = vpop.f32.mrf.mxu0  ;;  %v14640_v17 = vld [vmem:[%s15901_s0 + $0x4c] sm:$0xf]  ;;  %v10270_v13 = vld [vmem:[#allocation2 + $0x558] sm:$0xff]  ;;  %66 = vst.msk [vmem:[#allocation2 + $0x564] sm:$0xf] %vm49_vm8, %v40_v58 }
 0x68d   :  { %7871 = vmatpush.bf16.msrb.mxu2 %v10309_v55  ;;  %v3961_v55 = vsel %vm10911_vm12, %v3959_v28, %v3960_v36  ;;  %7315 = vmatpush.bf16.msra.mxu0 %v7216_v11  ;;  %v4083_v36 = vld [vmem:[%s15901_s0 + $0x48] sm:$0xf]  ;;  %15977 = vst [vmem:[#allocation47_spill] sm:$0xff] %v14634_v22  ;;  %v41_v11 = vld [vmem:[%s15901_s0 + $0x40] sm:$0xf]  ;;  %v3723_v38 = vrot.slane %v14640_v17, 6 }
 0x68e   :  { %4009 = vrot.lane.b32.xlu0 %v3961_v55, %s10532_s16  ;;  %7592 = vmatpush.bf16.msra.mxu3 %v10291_v37  ;;  %v10307_v28 = vld [vmem:[#allocation2 + $0x688] sm:$0xff]  ;;  %v4144_v46 = vpop.permute.xlu2 %4143  ;;  %v10290_v55 = vld [vmem:[#allocation2 + $0x5fc] sm:$0xff]  ;;  %67 = vst.msk [vmem:[#allocation2 + $0x568] sm:$0xf] %vm49_vm8, %v41_v11  ;;  %v15981_v17 = vrot.slane %v14578_v21, 7  ;;  %v15983_v21 = vrot.slane %v14594_v19, 6 }
 0x68f   :  { %7300 = vmatmul.bf16.gmra.mxu3 %v13498_v30  ;;  %4200 = vst.msk [vmem:[#allocation2 + $0x640] sm:$0xf] %vm49_vm8, %v4144_v46  ;;  %v10306_v37 = vld [vmem:[#allocation2 + $0x680] sm:$0xff]  ;;  %v14643_v8 = vpop.f32.mrf.mxu2  ;;  %v3956_v46 = vrot.slane %v3955_v7, 4  ;;  %v14661_v22 = vld [vmem:[%s15901_s0 + $0x48] sm:$0xf] }
 0x690   :  { %15978 = vst [vmem:[#allocation48_spill] sm:$0xff] %v14643_v8  ;;  %4149 = vrot.lane.b32.xlu1 %v4083_v36, %s10531_s29  ;;  %v15917_v11 = vrot.slane %v14661_v22, 6 }
 0x691   :  { %7872 = vmatpush.bf16.msrb.mxu2 %v10308_v43  ;;  %v4608_v43 = vpop.permute.xlu0 %4607  ;;  %7316 = vmatpush.bf16.msra.mxu0 %v10270_v13  ;;  %v14663_v8 = vpop.f32.mrf.mxu1  ;;  %v10289_v13 = vld [vmem:[#allocation2 + $0x5f4] sm:$0xff]  ;;  %v3958_v58 = vsel %vm10911_vm12, %v3956_v46, %v15981_v17  ;;  %v4908_v46 = vld [vmem:[%s15901_s0 + $0x4c] sm:$0xf] }
 0x692   :  { %4680 = vst.msk [vmem:[#allocation2 + $0x660] sm:$0x1] %vm535_vm14, %v4608_v43  ;;  %7593 = vmatpush.bf16.msra.mxu3 %v10290_v55  ;;  %v4824_v36 = vpop.permute.xlu1 %4823  ;;  %v10269_v43 = vld [vmem:[#allocation2 + $0x550] sm:$0xff]  ;;  %v14667_v55 = vpop.f32.mrf.mxu3 }
 0x693   :  { %15979 = vst [vmem:[#allocation49_spill] sm:$0xff] %v14663_v8  ;;  %v3725_v8 = vrot.slane %v3723_v38, 4 }
 0x694   :  { %4880 = vst.msk [vmem:[#allocation2 + $0x660] sm:$0xe] %vm744_vm15, %v4824_v36  ;;  %v14676_v23 = vpop.f32.mrf.mxu0 }
 0x695   :  { %7873 = vmatpush.bf16.msrb.mxu2 %v10307_v28  ;;  %v4907_v28 = vld [vmem:[%s15901_s0 + $0x48] sm:$0xf]  ;;  %15980 = vst [vmem:[#allocation50_spill] sm:$0xff] %v14667_v55  ;;  %7317 = vmatpush.bf16.msra.mxu0 %v10269_v43  ;;  %v10288_v55 = vld [vmem:[#allocation2 + $0x5ec] sm:$0xff]  ;;  %v3722_v43 = vrot.slane %v15917_v11, 4 }
 0x696   :  { %4973 = vrot.lane.b32.xlu2 %v4907_v28, %s10534_s7  ;;  %4005 = vrot.lane.b32.xlu0 %v3955_v7, %s10532_s16  ;;  %15982 = vst [vmem:[#allocation51_spill] sm:$0xff] %v14676_v23  ;;  %v3727_v7 = vsel %vm10722_vm5, %v3725_v8, %v15983_v21  ;;  %v10271_v17 = vld [vmem:[#allocation2 + $0x564] sm:$0xff]  ;;  %v4708_v8 = vld [vmem:[%s15901_s0 + $0x4c] sm:$0xf]  ;;  %v15985_v21 = vrot.slane %v14440_v18, 5 }
 0x697   :  { %7594 = vmatpush.bf16.msra.mxu3 %v10289_v13  ;;  %v6589_v28 = vpop.f32.mrf.mxu2  ;;  %v14695_v13 = vld [vmem:[%s15901_s0 + $0x50] sm:$0x7]  ;;  %7574 = vmatmul.bf16.vlgmr.msra.gmra.mxu2 %v13506_v40  ;;  %v3724_v44 = vsel %vm10722_vm5, %v3722_v43, %v3723_v38  ;;  %v4781_v39 = vrot.slane %v4708_v8, 7  ;;  %v10319_v38 = vld [vmem:[#allocation2 + $0x6e8] sm:$0xff] }
 0x698   :  { %4007 = vrot.lane.b32.xlu1 %v3958_v58, %s10532_s16  ;;  %9630 = vmatmul.msk.bf16.vlgmr.msra.gmra.mxu0 %vm5904_vm1, %v13595_v34  ;;  %v10320_v28 = vld [vmem:[#allocation2 + $0x6f0] sm:$0xff]  ;;  %v3485_v11 = vrot.slane %v15985_v21, 4  ;;  %v3486_v23 = vrot.slane %v14695_v13, 5 }
 0x699   :  { %7874 = vmatpush.bf16.msrb.mxu2 %v10306_v37  ;;  %v4000_v37 = vpop.permute.xlu2 %3999  ;;  %v4602_v36 = vpop.permute.xlu0 %4601  ;;  %7550 = vmatpush.bf16.msra.mxu1 %v10271_v17  ;;  %v4709_v18 = vld [vmem:[%s15901_s0 + $0x50] sm:$0x7] }
 0x69a   :  { %4056 = vst.msk [vmem:[#allocation2 + $0x634] sm:$0xe] %vm744_vm15, %v4000_v37  ;;  %v14701_v58 = vpop.f32.mrf.mxu1  ;;  %v10287_v37 = vld [vmem:[#allocation2 + $0x5e4] sm:$0xff]  ;;  %v3487_v43 = vsel %vm10590_vm2, %v3485_v11, %v3486_v23  ;;  %v4784_v8 = vrot.slane %v4709_v18, 7 }
 0x69b   :  { %4677 = vst.msk [vmem:[#allocation2 + $0x654] sm:$0xc] %vm531_vm13, %v4602_v36  ;;  %7595 = vmatpush.bf16.msra.mxu3 %v10288_v55  ;;  %v4604_v55 = vpop.permute.xlu1 %4603  ;;  %v10302_v19 = vld [vmem:[#allocation2 + $0x65c] sm:$0xff]  ;;  %v14704_v36 = vpop.f32.mrf.mxu3 }
 0x69c   :  { %4678 = vst.msk [vmem:[#allocation2 + $0x658] sm:$0xf] %vm49_vm8, %v4604_v55  ;;  %7612 = vmatpush.bf16.msrb.mxu0 %v10302_v19  ;;  %v15986_v55 = vrot.slane %v14486_v31, 7  ;;  %7551 = vmatmul.bf16.vlgmr.msra.gmra.mxu1 %v13391_v5  ;;  %v4783_v19 = vrot.slane %v4781_v39, 4 }
 0x69d   :  { %15984 = vst [vmem:[#allocation52_spill] sm:$0xff] %v14704_v36  ;;  %v6635_v36 = vpop.f32.mrf.mxu0 }
 0x69e   :  { %3789 = vrot.lane.b32.xlu2 %v3727_v7, %s10533_s23  ;;  %4975 = vrot.lane.b32.xlu0 %v4908_v46, %s10534_s7  ;;  %v4780_v17 = vrot.slane %v15986_v55, 4  ;;  %v14721_v46 = vld [vmem:[%s15901_s0 + $0x58] sm:$0xf]  ;;  %v4785_v11 = vsel %vm10911_vm12, %v4783_v19, %v4784_v8  ;;  %v3488_v19 = vrot.slane %v3486_v23, 4  ;;  %v10316_v23 = vld [vmem:[#allocation2 + $0x6d0] sm:$0xff] }
 0x69f   :  { %7596 = vmatpush.bf16.msra.mxu3 %v10287_v37  ;;  %v14726_v31 = vpop.f32.mrf.mxu2  ;;  %v15918_v37 = vrot.slane %v14721_v46, 6 }
 0x6a0   :  { %7305 = vmatmul.bf16.gmra.mxu3 %v13575_v1  ;;  %15987 = vst [vmem:[#allocation53_spill] sm:$0xff] %v14726_v31  ;;  %3787 = vrot.lane.b32.xlu1 %v3724_v44, %s10533_s23  ;;  %v4782_v13 = vsel %vm10911_vm12, %v4780_v17, %v4781_v39  ;;  %v10318_v39 = vld [vmem:[#allocation2 + $0x6e0] sm:$0xff] }
 0x6a1   :  { %v3782_v42 = vpop.permute.xlu2 %3781  ;;  %v4366_v7 = vpop.permute.xlu0 %4365  ;;  %v4557_v55 = vrot.slane %v15918_v37, 4  ;;  %v10314_v37 = vld [vmem:[#allocation2 + $0x6c0] sm:$0xff] }
 0x6a2   :  { %3855 = vst.msk [vmem:[#allocation2 + $0x630] sm:$0xf] %vm49_vm8, %v3782_v42  ;;  %v14738_v21 = vpop.f32.mrf.mxu1 }
 0x6a3   :  { %7891 = vmatpush.bf16.msrb.mxu3 %v10320_v28  ;;  %4439 = vst.msk [vmem:[#allocation2 + $0x650] sm:$0xf] %vm49_vm8, %v4366_v7  ;;  %v4146_v42 = vpop.permute.xlu1 %4145  ;;  %v10301_v36 = vld [vmem:[#allocation2 + $0x654] sm:$0xff]  ;;  %v4472_v28 = vld [vmem:[%s15901_s0 + $0x5c] sm:$0x7]  ;;  %v14741_v44 = vpop.f32.mrf.mxu3 }
 0x6a4   :  { %15988 = vst [vmem:[#allocation54_spill] sm:$0xff] %v14738_v21  ;;  %7613 = vmatpush.bf16.msrb.mxu0 %v10301_v36  ;;  %v4558_v17 = vrot.slane %v4472_v28, 6 }
 0x6a5   :  { %4201 = vst.msk [vmem:[#allocation2 + $0x644] sm:$0xf] %vm49_vm8, %v4146_v42  ;;  %v14749_v7 = vpop.f32.mrf.mxu0 }
 0x6a6   :  { %3549 = vrot.lane.b32.xlu2 %v3487_v43, %s10527_s11  ;;  %4831 = vrot.lane.b32.xlu0 %v4782_v13, %s10528_s15  ;;  %15989 = vst [vmem:[#allocation55_spill] sm:$0xff] %v14749_v7  ;;  %v10317_v13 = vld [vmem:[#allocation2 + $0x6d8] sm:$0xff]  ;;  %v4559_v8 = vsel %vm10722_vm5, %v4557_v55, %v4558_v17 }
 0x6a7   :  { %7892 = vmatpush.bf16.msrb.mxu3 %v10319_v38  ;;  %v14752_v43 = vpop.f32.mrf.mxu2  ;;  %7579 = vmatmul.bf16.gmra.mxu2 %v13587_v27 }
 0x6a8   :  { %15990 = vst [vmem:[#allocation56_spill] sm:$0xff] %v14752_v43  ;;  %4833 = vrot.lane.b32.xlu1 %v4785_v11, %s10528_s15  ;;  %9631 = vmatmul.msk.bf16.gmra.mxu0 %vm5904_vm1, %v13666_v14 }
 0x6a9   :  { %v3542_v18 = vpop.permute.xlu2 %3541  ;;  %v4362_v38 = vpop.permute.xlu0 %4361 }
 0x6aa   :  { %3615 = vst.msk [vmem:[#allocation2 + $0x624] sm:$0xf] %vm49_vm8, %v3542_v18  ;;  %v10300_v42 = vld [vmem:[#allocation2 + $0x64c] sm:$0xff]  ;;  %v14761_v28 = vpop.f32.mrf.mxu1 }
 0x6ab   :  { %7893 = vmatpush.bf16.msrb.mxu3 %v10318_v39  ;;  %4437 = vst.msk [vmem:[#allocation2 + $0x648] sm:$0x8] %vm286_vm7, %v4362_v38  ;;  %7614 = vmatpush.bf16.msrb.mxu0 %v10300_v42  ;;  %v4004_v36 = vpop.permute.xlu1 %4003  ;;  %v14764_v39 = vpop.f32.mrf.mxu3 }
 0x6ac   :  { %15991 = vst [vmem:[#allocation57_spill] sm:$0xff] %v14761_v28  ;;  %7556 = vmatmul.bf16.gmra.mxu1 %v13449_v61 }
 0x6ad   :  { %4058 = vst.msk [vmem:[#allocation2 + $0x63c] sm:$0xf] %vm49_vm8, %v4004_v36  ;;  %v14768_v11 = vpop.f32.mrf.mxu0  ;;  %v3264_v36 = vld [vmem:[%s15901_s0 + $0x5c] sm:$0x7] }
 0x6ae   :  { %15992 = vst [vmem:[#allocation58_spill] sm:$0xff] %v14764_v39  ;;  %4621 = vrot.lane.b32.xlu2 %v4559_v8, %s10529_s17  ;;  %3551 = vrot.lane.b32.xlu0 %v3488_v19, %s10527_s11  ;;  %v10315_v19 = vld [vmem:[#allocation2 + $0x6c8] sm:$0xff]  ;;  %v4560_v8 = vrot.slane %v4558_v17, 4  ;;  %v3406_v17 = vld [vmem:[%s15901_s0 + $0x54] sm:$0xf] }
 0x6af   :  { %7894 = vmatpush.bf16.msrb.mxu3 %v10317_v13  ;;  %15993 = vst [vmem:[#allocation59_spill] sm:$0xff] %v14768_v11  ;;  %v14773_v42 = vpop.f32.mrf.mxu2  ;;  %v15994_v13 = vrot.slane %v14661_v22, 6 }
 0x6b0   :  { %7597 = vmatmul.bf16.vlgmr.msra.gmra.mxu3 %v13343_v57 }
 0x6b1   :  { %v4826_v18 = vpop.permute.xlu2 %4825  ;;  %v4972_v38 = vpop.permute.xlu0 %4971  ;;  %3785 = vrot.lane.b32.xlu1 %v15994_v13, %s10533_s23 }
 0x6b2   :  { %4881 = vst.msk [vmem:[#allocation2 + $0x664] sm:$0xf] %vm49_vm8, %v4826_v18  ;;  %v10299_v55 = vld [vmem:[#allocation2 + $0x644] sm:$0xff]  ;;  %v14790_v18 = vld [vmem:[%s15901_s0 + $0x5c] sm:$0x7] }
 0x6b3   :  { %7895 = vmatpush.bf16.msrb.mxu3 %v10316_v23  ;;  %5026 = vst.msk [vmem:[#allocation2 + $0x674] sm:$0x7] %vm52_vm6, %v4972_v38  ;;  %7615 = vmatpush.bf16.msrb.mxu0 %v10299_v55  ;;  %v14785_v23 = vld [vmem:[%s15901_s0 + $0x54] sm:$0xf]  ;;  %v3784_v38 = vpop.permute.xlu1 %3783  ;;  %v6658_v55 = vpop.f32.mrf.mxu1  ;;  %v15920_v39 = vrot.slane %v14790_v18, 5 }
 0x6b4   :  { %v10298_v22 = vld [vmem:[#allocation2 + $0x63c] sm:$0xff]  ;;  %3856 = vst.msk [vmem:[#allocation2 + $0x634] sm:$0x1] %vm535_vm14, %v3784_v38  ;;  %v14796_v13 = vpop.f32.mrf.mxu3  ;;  %v15919_v28 = vrot.slane %v14785_v23, 7  ;;  %v14807_v38 = vld [vmem:[%s15901_s0 + $0x58] sm:$0xf] }
 0x6b5   :  { %15995 = vst [vmem:[#allocation60_spill] sm:$0xff] %v14796_v13  ;;  %v14802_v21 = vpop.f32.mrf.mxu0  ;;  %v10346_v55 = vld [vmem:[#allocation2 + $0x7c4] sm:$0xff] }
 0x6b6   :  { %3335 = vrot.lane.b32.xlu2 %v3264_v36, %s10526_s25  ;;  %4623 = vrot.lane.b32.xlu0 %v4560_v8, %s10529_s17 }
 0x6b7   :  { %7896 = vmatpush.bf16.msrb.mxu3 %v10315_v19  ;;  %7616 = vmatpush.bf16.msrb.mxu0 %v10298_v22  ;;  %v3489_v19 = vrot.slane %v3406_v17, 5  ;;  %v14810_v36 = vpop.f32.mrf.mxu2  ;;  %v10313_v22 = vld [vmem:[#allocation2 + $0x6b8] sm:$0xff] }
 0x6b8   :  { %15996 = vst [vmem:[#allocation61_spill] sm:$0xff] %v14810_v36  ;;  %9632 = vmatmul.msk.bf16.gmra.mxu0 %vm5904_vm1, %v13730_v60  ;;  %7584 = vmatmul.bf16.gmra.mxu2 %v13661_v47 }
 0x6b9   :  { %v3546_v11 = vpop.permute.xlu2 %3545  ;;  %v4002_v7 = vpop.permute.xlu0 %4001  ;;  %4835 = vrot.lane.b32.xlu1 %v15919_v28, %s10528_s15  ;;  %v3490_v13 = vrot.slane %v3489_v19, 4  ;;  %v4470_v28 = vld [vmem:[%s15901_s0 + $0x54] sm:$0xf] }
 0x6ba   :  { %3617 = vst.msk [vmem:[#allocation2 + $0x730] sm:$0x8] %vm286_vm7, %v3546_v11  ;;  %v5461_v8 = vld [vmem:[#allocation2 + $0x674] sm:$0x7]  ;;  %v15921_v11 = vrot.slane %v14807_v38, 5  ;;  %v4553_v31 = vrot.slane %v4470_v28, 6 }
 0x6bb   :  { %7897 = vmatpush.bf16.msrb.mxu3 %v10314_v37  ;;  %4057 = vst.msk [vmem:[#allocation2 + $0x638] sm:$0xf] %vm49_vm8, %v4002_v7  ;;  %v4320_v37 = vrot.slane %v15920_v39, 4  ;;  %v7470_v17 = vunpack.c.l.b16 %v5461_v8  ;;  %v3780_v36 = vpop.permute.xlu1 %3779  ;;  %v14825_v43 = vpop.f32.mrf.mxu1  ;;  %v10344_v28 = vld [vmem:[#allocation2 + $0x7b4] sm:$0xff] }
 0x6bc   :  { %15997 = vst [vmem:[#allocation62_spill] sm:$0xff] %v14825_v43  ;;  %v6914_v8 = vpop.f32.mrf.mxu3  ;;  %7561 = vmatmul.bf16.gmra.mxu1 %v13513_v4 }
 0x6bd   :  { %v7505_v7 = vpack.c.b16 %v7470_v17, %v7470_v17  ;;  %3854 = vst.msk [vmem:[#allocation2 + $0x62c] sm:$0xf] %vm49_vm8, %v3780_v36  ;;  %v10345_v17 = vld [vmem:[#allocation2 + $0x7bc] sm:$0xff]  ;;  %v14835_v29 = vpop.f32.mrf.mxu0 }
 0x6be   :  { %4383 = vrot.lane.b32.xlu2 %v4320_v37, %s10530_s20  ;;  %3553 = vrot.lane.b32.xlu0 %v3489_v19, %s10527_s11  ;;  %15998 = vst [vmem:[#allocation63_spill] sm:$0xff] %v14835_v29  ;;  %v4231_v37 = vld [vmem:[%s15901_s0 + $0x58] sm:$0xf] }
 0x6bf   :  { %7898 = vmatpush.bf16.msrb.mxu3 %v10313_v22  ;;  %v7541_v39 = vsel %vm123_vm0, %v7505_v7, 0  ;;  %v3492_v22 = vsel %vm10590_vm2, %v3490_v13, %v15921_v11  ;;  %v14842_v19 = vpop.f32.mrf.mxu2  ;;  %v3262_v13 = vld [vmem:[%s15901_s0 + $0x54] sm:$0xf]  ;;  %v4315_v7 = vrot.slane %v4231_v37, 5 }
 0x6c0   :  { %7640 = vmatpush.bf16.msrb.mxu1 %v7541_v39  ;;  %15999 = vst [vmem:[#allocation64_spill] sm:$0xff] %v14842_v19  ;;  %7602 = vmatmul.bf16.gmra.mxu3 %v13692_v20 }
 0x6c1   :  { %v4616_v43 = vpop.permute.xlu2 %4615  ;;  %v4968_v36 = vpop.permute.xlu0 %4967  ;;  %3555 = vrot.lane.b32.xlu1 %v3492_v22, %s10527_s11  ;;  %v4317_v19 = vrot.slane %v4315_v7, 4 }
 0x6c2   :  { %4684 = vst.msk [vmem:[#allocation2 + $0x774] sm:$0x1] %vm535_vm14, %v4616_v43  ;;  %v10297_v39 = vld [vmem:[#allocation2 + $0x634] sm:$0xff] }
 0x6c3   :  { %8193 = vmatpush.bf16.msra.mxu3 %v10346_v55  ;;  %5024 = vst.msk [vmem:[#allocation2 + $0x66c] sm:$0xf] %vm49_vm8, %v4968_v36  ;;  %7617 = vmatpush.bf16.msrb.mxu0 %v10297_v39  ;;  %v4554_v55 = vrot.slane %v4553_v31, 4  ;;  %v4970_v8 = vpop.permute.xlu1 %4969  ;;  %v14853_v11 = vpop.f32.mrf.mxu1  ;;  %v16002_v36 = vrot.slane %v14721_v46, 6  ;;  %v10343_v39 = vld [vmem:[#allocation2 + $0x7ac] sm:$0xff]  ;;  %v16004_v46 = vrot.slane %v14790_v18, 5 }
 0x6c4   :  { %v10296_v43 = vld [vmem:[#allocation2 + $0x62c] sm:$0xff]  ;;  %16000 = vst [vmem:[#allocation65_spill] sm:$0xff] %v14853_v11  ;;  %v14856_v22 = vpop.f32.mrf.mxu3 }
 0x6c5   :  { %5025 = vst.msk [vmem:[#allocation2 + $0x670] sm:$0xf] %vm49_vm8, %v4970_v8  ;;  %v4556_v37 = vsel %vm10722_vm5, %v4554_v55, %v16002_v36  ;;  %v14864_v45 = vpop.f32.mrf.mxu0  ;;  %v3263_v55 = vld [vmem:[%s15901_s0 + $0x58] sm:$0xf] }
 0x6c6   :  { %16001 = vst [vmem:[#allocation66_spill] sm:$0xff] %v14856_v22  ;;  %3331 = vrot.lane.b32.xlu2 %v3262_v13, %s10526_s25  ;;  %4617 = vrot.lane.b32.xlu0 %v4553_v31, %s10529_s17  ;;  %v10342_v31 = vld [vmem:[#allocation2 + $0x7a4] sm:$0xff]  ;;  %v4319_v13 = vsel %vm10590_vm2, %v4317_v19, %v16004_v46  ;;  %v10341_v19 = vld [vmem:[#allocation2 + $0x79c] sm:$0xff]  ;;  %v14888_v46 = vld [vmem:[%s15901_s0 + $0x58] sm:$0xf] }
 0x6c7   :  { %8194 = vmatpush.bf16.msra.mxu3 %v10345_v17  ;;  %v4230_v17 = vld [vmem:[%s15901_s0 + $0x54] sm:$0xf]  ;;  %7618 = vmatpush.bf16.msrb.mxu0 %v10296_v43  ;;  %16003 = vst [vmem:[#allocation67_spill] sm:$0xff] %v14864_v45 }
 0x6c8   :  { %v4313_v29 = vrot.slane %v4230_v17, 5 }
 0x6c9   :  { %v3328_v11 = vpop.permute.xlu2 %3327  ;;  %v3544_v8 = vpop.permute.xlu0 %3543  ;;  %4619 = vrot.lane.b32.xlu1 %v4556_v37, %s10529_s17 }
 0x6ca   :  { %3380 = vst.msk [vmem:[#allocation2 + $0x72c] sm:$0xf] %vm49_vm8, %v3328_v11  ;;  %v4314_v43 = vrot.slane %v4313_v29, 4 }
 0x6cb   :  { %8195 = vmatpush.bf16.msra.mxu3 %v10344_v28  ;;  %v6681_v28 = vpop.f32.mrf.mxu2  ;;  %3616 = vst.msk [vmem:[#allocation2 + $0x628] sm:$0x3] %vm290_vm9, %v3544_v8  ;;  %v3778_v17 = vpop.permute.xlu1 %3777 }
 0x6cc   :  { %v10304_v36 = vld [vmem:[#allocation2 + $0x66c] sm:$0xff]  ;;  %v14876_v11 = vpop.f32.mrf.mxu1  ;;  %3853 = vst.msk [vmem:[#allocation2 + $0x628] sm:$0xc] %vm531_vm13, %v3778_v17  ;;  %v4316_v18 = vsel %vm10590_vm2, %v4314_v43, %v4315_v7  ;;  %v4087_v43 = vld [vmem:[%s15901_s0 + $0x58] sm:$0xf]  ;;  %v3964_v17 = vrot.slane %v14888_v46, 7 }
 0x6cd   :  { %7641 = vmatpush.bf16.msrb.mxu1 %v10304_v36  ;;  %v6937_v37 = vpop.f32.mrf.mxu0  ;;  %v44_v7 = vld [vmem:[%s15901_s0 + $0x4c] sm:$0xf] }
 0x6ce   :  { %4381 = vrot.lane.b32.xlu2 %v4319_v13, %s10530_s20  ;;  %3333 = vrot.lane.b32.xlu0 %v3263_v55, %s10526_s25  ;;  %v43_v13 = vld [vmem:[%s15901_s0 + $0x48] sm:$0xf]  ;;  %v10340_v55 = vld [vmem:[#allocation2 + $0x794] sm:$0xff]  ;;  %v3888_v37 = vld [vmem:[%s15901_s0 + $0x5c] sm:$0x7]  ;;  %v3966_v46 = vrot.slane %v3964_v17, 4 }
 0x6cf   :  { %8196 = vmatpush.bf16.msra.mxu3 %v10343_v39  ;;  %v14879_v39 = vpop.f32.mrf.mxu3  ;;  %69 = vst.msk [vmem:[#allocation2 + $0x678] sm:$0xf] %vm49_vm8, %v43_v13  ;;  %v3967_v13 = vrot.slane %v3888_v37, 7  ;;  %v14940_v37 = vld [vmem:[%s15901_s0 + $0x5c] sm:$0x7] }
 0x6d0   :  { %16005 = vst [vmem:[#allocation68_spill] sm:$0xff] %v14879_v39  ;;  %7607 = vmatmul.bf16.gmra.mxu3 %v13749_v59 }
 0x6d1   :  { %v4612_v8 = vpop.permute.xlu2 %4611  ;;  %v4828_v28 = vpop.permute.xlu0 %4827  ;;  %4379 = vrot.lane.b32.xlu1 %v4316_v18, %s10530_s20  ;;  %70 = vst.msk [vmem:[#allocation2 + $0x67c] sm:$0xf] %vm49_vm8, %v44_v7 }
 0x6d2   :  { %4682 = vst.msk [vmem:[#allocation2 + $0x76c] sm:$0xf] %vm49_vm8, %v4612_v8 }
 0x6d3   :  { %8197 = vmatpush.bf16.msra.mxu3 %v10342_v31  ;;  %v14891_v31 = vpop.f32.mrf.mxu2  ;;  %4882 = vst.msk [vmem:[#allocation2 + $0x668] sm:$0xf] %vm49_vm8, %v4828_v28  ;;  %v3330_v36 = vpop.permute.xlu1 %3329  ;;  %v4088_v28 = vld [vmem:[%s15901_s0 + $0x5c] sm:$0x7] }
 0x6d4   :  { %16006 = vst [vmem:[#allocation69_spill] sm:$0xff] %v14891_v31  ;;  %v14911_v18 = vpop.f32.mrf.mxu1 }
 0x6d5   :  { %16007 = vst [vmem:[#allocation70_spill] sm:$0xff] %v14911_v18  ;;  %v14925_v18 = vpop.f32.mrf.mxu0 }
 0x6d6   :  { %3381 = vst.msk [vmem:[#allocation2 + $0x730] sm:$0x7] %vm52_vm6, %v3330_v36  ;;  %4377 = vrot.lane.b32.xlu2 %v4313_v29, %s10530_s20  ;;  %4157 = vrot.lane.b32.xlu0 %v4087_v43, %s10531_s29  ;;  %v3886_v36 = vld [vmem:[%s15901_s0 + $0x54] sm:$0xf]  ;;  %v4912_v43 = vld [vmem:[%s15901_s0 + $0x5c] sm:$0x7] }
 0x6d7   :  { %8198 = vmatpush.bf16.msra.mxu3 %v10341_v19  ;;  %v10295_v19 = vld [vmem:[#allocation2 + $0x624] sm:$0xff]  ;;  %v14914_v8 = vpop.f32.mrf.mxu3  ;;  %16009 = vst [vmem:[#allocation72_spill] sm:$0xff] %v14925_v18  ;;  %s10536_s20 = smov [#allocation3]  }
 0x6d8   :  { %16008 = vst [vmem:[#allocation71_spill] sm:$0xff] %v14914_v8  ;;  %7619 = vmatpush.bf16.msrb.mxu0 %v10295_v19  ;;  %v3968_v19 = vsel %vm10911_vm12, %v3966_v46, %v3967_v13  ;;  %v10305_v18 = vld [vmem:[#allocation2 + $0x678] sm:$0xff]  ;;  %v3734_v46 = vrot.slane %v14940_v37, 6  ;;  %v4086_v13 = vld [vmem:[%s15901_s0 + $0x54] sm:$0xf]  ;;  %s8887_s10 = sshll.u32 %s10536_s20, 4  ;;  %s8888_s10 = int_to_ptr.vmem [resolvable:$true] %s8887_s10 }
 0x6d9   :  { %v4152_v45 = vpop.permute.xlu2 %4151  ;;  %v3548_v7 = vpop.permute.xlu0 %3547  ;;  %4159 = vrot.lane.b32.xlu1 %v4088_v28, %s10531_s29  ;;  %7875 = vmatpush.bf16.msrb.mxu2 %v10305_v18  ;;  %v14958_v18 = vld [vmem:[%s15901_s0 + $0x54] sm:$0xf] }
 0x6da   :  { %4204 = vst.msk [vmem:[#allocation2 + $0x758] sm:$0xf] %vm49_vm8, %v4152_v45  ;;  %v3962_v45 = vrot.slane %v3886_v36, 7 }
 0x6db   :  { %8199 = vmatpush.bf16.msra.mxu3 %v10340_v55  ;;  %v10303_v55 = vld [vmem:[#allocation2 + $0x664] sm:$0xff]  ;;  %v14927_v29 = vpop.f32.mrf.mxu2  ;;  %3618 = vst.msk [vmem:[#allocation2 + $0x734] sm:$0xf] %vm49_vm8, %v3548_v7  ;;  %7620 = vmatmul.bf16.vlgmr.msrb.gmra.mxu0 %v13436_v52  ;;  %v4614_v7 = vpop.permute.xlu1 %4613 }
 0x6dc   :  { %16010 = vst [vmem:[#allocation73_spill] sm:$0xff] %v14927_v29  ;;  %7642 = vmatpush.bf16.msrb.mxu1 %v10303_v55  ;;  %v14942_v39 = vpop.f32.mrf.mxu1  ;;  %v3963_v36 = vrot.slane %v3962_v45, 4  ;;  %7876 = vmatmul.bf16.vlgmr.msrb.gmra.mxu2 %v13391_v5  ;;  %v15922_v29 = vrot.slane %v14958_v18, 6 }
 0x6dd   :  { %16011 = vst [vmem:[#allocation74_spill] sm:$0xff] %v14942_v39 }
 0x6de   :  { %4683 = vst.msk [vmem:[#allocation2 + $0x770] sm:$0xf] %vm49_vm8, %v4614_v7  ;;  %4983 = vrot.lane.b32.xlu2 %v4912_v43, %s10534_s7  ;;  %4015 = vrot.lane.b32.xlu0 %v3968_v19, %s10532_s16  ;;  %v14962_v19 = vpop.f32.mrf.mxu0  ;;  %v3736_v7 = vrot.slane %v3734_v46, 4 }
 0x6df   :  { %v14945_v28 = vpop.f32.mrf.mxu3  ;;  %9769 = vmatmul.msk.bf16.vlgmr.msrb.gmra.mxu1 %vm5904_vm1, %v13595_v34  ;;  %16013 = vst [vmem:[#allocation76_spill] sm:$0xff] %v14962_v19 }
 0x6e0   :  { %16012 = vst [vmem:[#allocation75_spill] sm:$0xff] %v14945_v28  ;;  %7899 = vmatmul.bf16.vlgmr.msrb.gmra.mxu3 %v13506_v40  ;;  %v3965_v28 = vsel %vm10911_vm12, %v3963_v36, %v3964_v17  ;;  %v10535_v36 = vmov 0  }
 0x6e1   :  { %v4978_v55 = vpop.permute.xlu2 %4977  ;;  %v4830_v39 = vpop.permute.xlu0 %4829  ;;  %4155 = vrot.lane.b32.xlu1 %v4086_v13, %s10531_s29  ;;  %v3730_v13 = vrot.slane %v15922_v29, 4  ;;  %10401 = vset.pattern.permute.xlu2 %v10535_v36 }
 0x6e2   :  { %5029 = vst.msk [vmem:[#allocation2 + $0x788] sm:$0x7] %vm52_vm6, %v4978_v55  ;;  %v10328_v43 = vld [vmem:[#allocation2 + $0x730] sm:$0xff]  ;;  %v3647_v55 = vld [vmem:[%s15901_s0 + $0x58] sm:$0xf]  ;;  %10399 = vset.pattern.permute.xlu0 %v10535_v36  ;;  %10400 = vset.pattern.permute.xlu1 %v10535_v36 }
 0x6e3   :  { %v14964_v37 = vpop.f32.mrf.mxu2  ;;  %4883 = vst.msk [vmem:[#allocation2 + $0x774] sm:$0xe] %vm744_vm15, %v4830_v39  ;;  %7914 = vmatpush.bf16.msra.mxu0 %v10328_v43  ;;  %v3326_v22 = vpop.permute.xlu1 %3325  ;;  %v3731_v17 = vrot.slane %v3647_v55, 6 }
 0x6e4   :  { %v6960_v19 = vpop.f32.mrf.mxu1  ;;  %3379 = vst.msk [vmem:[#allocation2 + $0x728] sm:$0xf] %vm49_vm8, %v3326_v22 }
 0x6e5   :  { %v3732_v55 = vsel %vm10722_vm5, %v3730_v13, %v3731_v17  ;;  %v3733_v36 = vrot.slane %v3731_v17, 4 }
 0x6e6   :  { %4013 = vrot.lane.b32.xlu2 %v3965_v28, %s10532_s16  ;;  %3799 = vrot.lane.b32.xlu0 %v3736_v7, %s10533_s23  ;;  %v14983_v19 = vpop.f32.mrf.mxu0  ;;  %v4910_v7 = vld [vmem:[%s15901_s0 + $0x54] sm:$0xf] }
 0x6e7   :  { %v14976_v39 = vpop.f32.mrf.mxu3  ;;  %16015 = vst [vmem:[#allocation78_spill] sm:$0xff] %v14983_v19  ;;  %v3735_v17 = vsel %vm10722_vm5, %v3733_v36, %v3734_v46  ;;  %v4911_v46 = vld [vmem:[%s15901_s0 + $0x58] sm:$0xf]  ;;  %v16020_v36 = vrot.slane %v14807_v38, 5 }
 0x6e8   :  { %16014 = vst [vmem:[#allocation77_spill] sm:$0xff] %v14976_v39  ;;  %v10325_v38 = vld [vmem:[#allocation2 + $0x718] sm:$0xff] }
 0x6e9   :  { %v3792_v43 = vpop.permute.xlu2 %3791  ;;  %v4376_v31 = vpop.permute.xlu0 %4375  ;;  %v5530_v8 = vld [vmem:[#allocation2 + $0x788] sm:$0x7]  ;;  %4011 = vrot.lane.b32.xlu1 %v3962_v45, %s10532_s16 }
 0x6ea   :  { %3860 = vst.msk [vmem:[#allocation2 + $0x748] sm:$0x1] %vm535_vm14, %v3792_v43  ;;  %v10336_v22 = vld [vmem:[#allocation2 + $0x770] sm:$0xff]  ;;  %v7795_v28 = vunpack.c.l.b16 %v5530_v8  ;;  %v3408_v43 = vld [vmem:[%s15901_s0 + $0x5c] sm:$0x7] }
 0x6eb   :  { %v14985_v39 = vpop.f32.mrf.mxu2  ;;  %4444 = vst.msk [vmem:[#allocation2 + $0x768] sm:$0x3] %vm290_vm9, %v4376_v31  ;;  %7625 = vmatmul.bf16.gmra.mxu0 %v13498_v30  ;;  %7937 = vmatpush.bf16.msra.mxu1 %v10336_v22  ;;  %v4610_v29 = vpop.permute.xlu1 %4609  ;;  %v10327_v31 = vld [vmem:[#allocation2 + $0x728] sm:$0xff]  ;;  %v3494_v13 = vrot.slane %v3408_v43, 5 }
 0x6ec   :  { %16016 = vst [vmem:[#allocation79_spill] sm:$0xff] %v14985_v39  ;;  %v7830_v8 = vpack.c.b16 %v7795_v28, %v7795_v28  ;;  %v14998_v39 = vpop.f32.mrf.mxu1  ;;  %7915 = vmatpush.bf16.msra.mxu0 %v10327_v31  ;;  %7881 = vmatmul.bf16.gmra.mxu2 %v13449_v61  ;;  %v4712_v31 = vld [vmem:[%s15901_s0 + $0x5c] sm:$0x7] }
 0x6ed   :  { %16017 = vst [vmem:[#allocation80_spill] sm:$0xff] %v14998_v39  ;;  %v3496_v33 = vrot.slane %v3494_v13, 4 }
 0x6ee   :  { %4681 = vst.msk [vmem:[#allocation2 + $0x768] sm:$0xc] %vm531_vm13, %v4610_v29  ;;  %v7866_v45 = vsel %vm123_vm0, %v7830_v8, 0  ;;  %4979 = vrot.lane.b32.xlu2 %v4910_v7, %s10534_s7  ;;  %3795 = vrot.lane.b32.xlu0 %v3732_v55, %s10533_s23  ;;  %v4711_v29 = vld [vmem:[%s15901_s0 + $0x58] sm:$0xf]  ;;  %v10326_v7 = vld [vmem:[#allocation2 + $0x720] sm:$0xff]  ;;  %v15013_v55 = vpop.f32.mrf.mxu0 }
 0x6ef   :  { %v7006_v22 = vpop.f32.mrf.mxu3  ;;  %9770 = vmatmul.msk.bf16.gmra.mxu1 %vm5904_vm1, %v13666_v14  ;;  %7965 = vmatpush.bf16.msra.mxu2 %v7866_v45  ;;  %16018 = vst [vmem:[#allocation81_spill] sm:$0xff] %v15013_v55  ;;  %v3493_v8 = vrot.slane %v16020_v36, 4  ;;  %v4788_v45 = vrot.slane %v4711_v29, 7 }
 0x6f0   :  { %7904 = vmatmul.bf16.gmra.mxu3 %v13587_v27  ;;  %7916 = vmatpush.bf16.msra.mxu0 %v10326_v7  ;;  %v47_v7 = vld [vmem:[%s15901_s0 + $0x58] sm:$0xf] }
 0x6f1   :  { %v4974_v28 = vpop.permute.xlu2 %4973  ;;  %v4372_v19 = vpop.permute.xlu0 %4371  ;;  %3797 = vrot.lane.b32.xlu1 %v3735_v17, %s10533_s23  ;;  %v46_v17 = vld [vmem:[%s15901_s0 + $0x54] sm:$0xf]  ;;  %v3495_v29 = vsel %vm10590_vm2, %v3493_v8, %v3494_v13  ;;  %v4790_v36 = vrot.slane %v4788_v45, 4  ;;  %73 = vst.msk [vmem:[#allocation2 + $0x790] sm:$0xf] %vm49_vm8, %v47_v7  ;;  %v16023_v13 = vrot.slane %v14785_v23, 7 }
 0x6f2   :  { %5027 = vst.msk [vmem:[#allocation2 + $0x780] sm:$0xf] %vm49_vm8, %v4974_v28 }
 0x6f3   :  { %v15015_v43 = vpop.f32.mrf.mxu2  ;;  %4442 = vst.msk [vmem:[#allocation2 + $0x760] sm:$0xf] %vm49_vm8, %v4372_v19  ;;  %v4374_v22 = vpop.permute.xlu1 %4373 }
 0x6f4   :  { %16019 = vst [vmem:[#allocation82_spill] sm:$0xff] %v15015_v43  ;;  %v15028_v28 = vpop.f32.mrf.mxu1  ;;  %7917 = vmatpush.bf16.msra.mxu0 %v10325_v38  ;;  %v4791_v43 = vrot.slane %v4712_v31, 7  ;;  %v10322_v38 = vld [vmem:[#allocation2 + $0x700] sm:$0xff] }
 0x6f5   :  { %v10335_v19 = vld [vmem:[#allocation2 + $0x768] sm:$0xff]  ;;  %16021 = vst [vmem:[#allocation83_spill] sm:$0xff] %v15028_v28 }
 0x6f6   :  { %4443 = vst.msk [vmem:[#allocation2 + $0x764] sm:$0xf] %vm49_vm8, %v4374_v22  ;;  %3559 = vrot.lane.b32.xlu2 %v3496_v33, %s10527_s11  ;;  %4981 = vrot.lane.b32.xlu0 %v4911_v46, %s10534_s7  ;;  %v10324_v22 = vld [vmem:[#allocation2 + $0x710] sm:$0xff]  ;;  %v15044_v39 = vpop.f32.mrf.mxu0  ;;  %v4792_v9 = vsel %vm10911_vm12, %v4790_v36, %v4791_v43  ;;  %v4787_v46 = vrot.slane %v16023_v13, 4  ;;  %v5600_v36 = vld [vmem:[%s15903_s2] sm:$0xff]  ;;  %v10321_v13 = vld [vmem:[#allocation2 + $0x6f8] sm:$0xff] }
 0x6f7   :  { %72 = vst.msk [vmem:[#allocation2 + $0x78c] sm:$0xf] %vm49_vm8, %v46_v17  ;;  %7938 = vmatpush.bf16.msra.mxu1 %v10335_v19  ;;  %v10323_v19 = vld [vmem:[#allocation2 + $0x708] sm:$0xff] }
 0x6f8   :  { %16022 = vst [vmem:[#allocation84_spill] sm:$0xff] %v15044_v39  ;;  %7918 = vmatpush.bf16.msra.mxu0 %v10324_v22  ;;  %v4789_v23 = vsel %vm10911_vm12, %v4787_v46, %v4788_v45  ;;  %v5602_v45 = vld [vmem:[%s15903_s2 + $0x10] sm:$0xff]  ;;  %v10354_v46 = vld [vmem:[#allocation2 + $0x804] sm:$0xff] }
 0x6f9   :  { %v3790_v55 = vpop.permute.xlu2 %3789  ;;  %v4154_v28 = vpop.permute.xlu0 %4153  ;;  %3557 = vrot.lane.b32.xlu1 %v3495_v29, %s10527_s11  ;;  %s8889_s11 = sshll.u32 %s15907_s6, 4  ;;  %s8890_s11 = int_to_ptr.hbm [resolvable:$true] %s8889_s11 }
 0x6fa   :  { %3859 = vst.msk [vmem:[#allocation2 + $0x744] sm:$0xf] %vm49_vm8, %v3790_v55 }
 0x6fb   :  { %v6983_v33 = vpop.f32.mrf.mxu2  ;;  %4205 = vst.msk [vmem:[#allocation2 + $0x75c] sm:$0x7] %vm52_vm6, %v4154_v28  ;;  %7630 = vmatmul.bf16.gmra.mxu0 %v13575_v1  ;;  %v4370_v8 = vpop.permute.xlu1 %4369  ;;  %v16025_v28 = vrot.slane %v14958_v18, 6 }
 0x6fc   :  { %v15053_v55 = vpop.f32.mrf.mxu1  ;;  %4441 = vst.msk [vmem:[#allocation2 + $0x75c] sm:$0x8] %vm286_vm7, %v4370_v8  ;;  %7919 = vmatpush.bf16.msra.mxu0 %v10323_v19  ;;  %7886 = vmatmul.bf16.gmra.mxu2 %v13513_v4  ;;  %v5601_v8 = vld [vmem:[%s15903_s2 + $0x8] sm:$0xff] }
 0x6fd   :  { %v10334_v31 = vld [vmem:[#allocation2 + $0x760] sm:$0xff]  ;;  %16024 = vst [vmem:[#allocation85_spill] sm:$0xff] %v15053_v55 }
 0x6fe   :  { %4839 = vrot.lane.b32.xlu2 %v4792_v9, %s10528_s15  ;;  %3793 = vrot.lane.b32.xlu0 %v16025_v28, %s10533_s23  ;;  %v10339_v17 = vld [vmem:[#allocation2 + $0x78c] sm:$0xff]  ;;  %v7239_v29 = vpop.f32.mrf.mxu0 }
 0x6ff   :  { %7939 = vmatpush.bf16.msra.mxu1 %v10334_v31  ;;  %8200 = vmatpush.bf16.msra.mxu3 %v10339_v17  ;;  %v10353_v17 = vld [vmem:[#allocation2 + $0x7fc] sm:$0xff] }
 0x700   :  { %9771 = vmatmul.msk.bf16.gmra.mxu1 %vm5904_vm1, %v13730_v60  ;;  %7909 = vmatmul.bf16.gmra.mxu3 %v13661_v47  ;;  %v15071_v25 = vpop.f32.mrf.mxu3 }
 0x701   :  { %v3550_v43 = vpop.permute.xlu2 %3549  ;;  %v4010_v7 = vpop.permute.xlu0 %4009  ;;  %4837 = vrot.lane.b32.xlu1 %v4789_v23, %s10528_s15  ;;  %16026 = vst [vmem:[#allocation86_spill] sm:$0xff] %v15071_v25  ;;  %7920 = vmatpush.bf16.msra.mxu0 %v10322_v38 }
 0x702   :  { %3619 = vst.msk [vmem:[#allocation2 + $0x738] sm:$0xf] %vm49_vm8, %v3550_v43  ;;  %v5604_v43 = vld [vmem:[%s15903_s2 + $0x20] sm:$0xff] }
 0x703   :  { %v15066_v18 = vpop.f32.mrf.mxu2  ;;  %4061 = vst.msk [vmem:[#allocation2 + $0x750] sm:$0xf] %vm49_vm8, %v4010_v7  ;;  %v4150_v22 = vpop.permute.xlu1 %4149  ;;  %v10333_v33 = vld [vmem:[#allocation2 + $0x758] sm:$0xff] }
 0x704   :  { %v15079_v9 = vpop.f32.mrf.mxu1  ;;  %4203 = vst.msk [vmem:[#allocation2 + $0x754] sm:$0xf] %vm49_vm8, %v4150_v22  ;;  %7940 = vmatpush.bf16.msra.mxu1 %v10333_v33 }
 0x705   :  { %16027 = vst [vmem:[#allocation87_spill] sm:$0xff] %v15079_v9  ;;  %7921 = vmatpush.bf16.msra.mxu0 %v10321_v13 }
 0x706   :  { %5617 = vperm.xlu2 %10401, %v5602_v45   ;;  %5607 = vperm.xlu0 %10399, %v5600_v36   ;;  %v10352_v45 = vld [vmem:[#allocation2 + $0x7f4] sm:$0xff] }
 0x707   :  { %v5603_v36 = vld [vmem:[%s15903_s2 + $0x18] sm:$0xff] }
 0x708   :  { %v15090_v23 = vpop.f32.mrf.mxu3 }
 0x709   :  { %8216 = vmatpush.bf16.msrb.mxu0 %v10354_v46  ;;  %v4622_v31 = vpop.permute.xlu2 %4621  ;;  %v4006_v19 = vpop.permute.xlu0 %4005  ;;  %5612 = vperm.xlu1 %10400, %v5601_v8   ;;  %16029 = vst [vmem:[#allocation89_spill] sm:$0xff] %v15090_v23  ;;  %v10351_v46 = vld [vmem:[#allocation2 + $0x7ec] sm:$0xff] }
 0x70a   :  { %4687 = vst.msk [vmem:[#allocation2 + $0x884] sm:$0xf] %vm49_vm8, %v4622_v31 }
 0x70b   :  { %v15086_v28 = vpop.f32.mrf.mxu2  ;;  %4059 = vst.msk [vmem:[#allocation2 + $0x748] sm:$0xe] %vm744_vm15, %v4006_v19  ;;  %7922 = vmatmul.bf16.vlgmr.msra.gmra.mxu0 %v13343_v57  ;;  %v4008_v7 = vpop.permute.xlu1 %4007  ;;  %v10332_v38 = vld [vmem:[#allocation2 + $0x750] sm:$0xff] }
 0x70c   :  { %16028 = vst [vmem:[#allocation88_spill] sm:$0xff] %v15086_v28  ;;  %v15095_v29 = vpop.f32.mrf.mxu1  ;;  %7941 = vmatpush.bf16.msra.mxu1 %v10332_v38 }
 0x70d   :  { %8217 = vmatpush.bf16.msrb.mxu0 %v10353_v17  ;;  %16030 = vst [vmem:[#allocation90_spill] sm:$0xff] %v15095_v29 }
 0x70e   :  { %4060 = vst.msk [vmem:[#allocation2 + $0x74c] sm:$0xf] %vm49_vm8, %v4008_v7  ;;  %5627 = vperm.xlu2 %10401, %v5604_v43   ;;  %v10350_v43 = vld [vmem:[#allocation2 + $0x7e4] sm:$0xff] }
 0x710   :  { %8201 = vmatmul.bf16.vlgmr.msra.gmra.mxu3 %v13391_v5  ;;  %v10349_v5 = vld [vmem:[#allocation2 + $0x7dc] sm:$0xff] }
 0x711   :  { %8218 = vmatpush.bf16.msrb.mxu0 %v10352_v45  ;;  %v3336_v22 = vpop.permute.xlu2 %3335  ;;  %v4976_v33 = vpop.permute.xlu0 %4975  ;;  %5622 = vperm.xlu1 %10400, %v5603_v36  }
 0x712   :  { %3384 = vst.msk [vmem:[#allocation2 + $0x844] sm:$0x7] %vm52_vm6, %v3336_v22  ;;  %v15106_v8 = vpop.f32.mrf.mxu3 }
 0x713   :  { %v15102_v13 = vpop.f32.mrf.mxu2  ;;  %5028 = vst.msk [vmem:[#allocation2 + $0x784] sm:$0xf] %vm49_vm8, %v4976_v33  ;;  %v3788_v31 = vpop.permute.xlu1 %3787 }
 0x714   :  { %16031 = vst [vmem:[#allocation91_spill] sm:$0xff] %v15102_v13  ;;  %v7262_v17 = vpop.f32.mrf.mxu1 }
 0x715   :  { %16032 = vst [vmem:[#allocation92_spill] sm:$0xff] %v15106_v8  ;;  %8219 = vmatpush.bf16.msrb.mxu0 %v10351_v46  ;;  %v10331_v19 = vld [vmem:[#allocation2 + $0x748] sm:$0xff]  ;;  %v15109_v7 = vpop.f32.mrf.mxu0  ;;  %v10348_v17 = vld [vmem:[#allocation2 + $0x7d4] sm:$0xff] }
 0x716   :  { %3858 = vst.msk [vmem:[#allocation2 + $0x740] sm:$0xf] %vm49_vm8, %v3788_v31  ;;  %7942 = vmatpush.bf16.msra.mxu1 %v10331_v19 }
 0x717   :  { %16033 = vst [vmem:[#allocation93_spill] sm:$0xff] %v15109_v7 }
 0x719   :  { %8220 = vmatpush.bf16.msrb.mxu0 %v10350_v43  ;;  %v4384_v38 = vpop.permute.xlu2 %4383  ;;  %v4832_v45 = vpop.permute.xlu0 %4831 }
 0x71a   :  { %4448 = vst.msk [vmem:[#allocation2 + $0x87c] sm:$0x3] %vm290_vm9, %v4384_v38  ;;  %v10338_v36 = vld [vmem:[#allocation2 + $0x780] sm:$0xff]  ;;  %v15116_v33 = vpop.f32.mrf.mxu3 }
 0x71b   :  { %v15112_v22 = vpop.f32.mrf.mxu2  ;;  %4884 = vst.msk [vmem:[#allocation2 + $0x778] sm:$0xf] %vm49_vm8, %v4832_v45  ;;  %7927 = vmatmul.bf16.gmra.mxu0 %v13692_v20  ;;  %7966 = vmatpush.bf16.msra.mxu2 %v10338_v36  ;;  %v4834_v46 = vpop.permute.xlu1 %4833  ;;  %v10347_v36 = vld [vmem:[#allocation2 + $0x7cc] sm:$0xff] }
 0x71c   :  { %16034 = vst [vmem:[#allocation94_spill] sm:$0xff] %v15112_v22  ;;  %v15119_v19 = vpop.f32.mrf.mxu1 }
 0x71d   :  { %16035 = vst [vmem:[#allocation95_spill] sm:$0xff] %v15116_v33  ;;  %8221 = vmatpush.bf16.msrb.mxu0 %v10349_v5  ;;  %v10330_v31 = vld [vmem:[#allocation2 + $0x740] sm:$0xff]  ;;  %v15121_v43 = vpop.f32.mrf.mxu0 }
 0x71e   :  { %4885 = vst.msk [vmem:[#allocation2 + $0x77c] sm:$0xf] %vm49_vm8, %v4834_v46  ;;  %7943 = vmatpush.bf16.msra.mxu1 %v10330_v31 }
 0x71f   :  { %16036 = vst [vmem:[#allocation96_spill] sm:$0xff] %v15119_v19 }
 0x720   :  { %16037 = vst [vmem:[#allocation97_spill] sm:$0xff] %v15121_v43  ;;  %8206 = vmatmul.bf16.gmra.mxu3 %v13449_v61 }
 0x721   :  { %8222 = vmatpush.bf16.msrb.mxu0 %v10348_v17  ;;  %v3332_v38 = vpop.permute.xlu2 %3331  ;;  %v3552_v45 = vpop.permute.xlu0 %3551 }
 0x722   :  { %3382 = vst.msk [vmem:[#allocation2 + $0x83c] sm:$0xf] %vm49_vm8, %v3332_v38 }
 0x723   :  { %v15124_v29 = vpop.f32.mrf.mxu2  ;;  %3620 = vst.msk [vmem:[#allocation2 + $0x73c] sm:$0x3] %vm290_vm9, %v3552_v45  ;;  %v3786_v5 = vpop.permute.xlu1 %3785 }
 0x724   :  { %16038 = vst [vmem:[#allocation98_spill] sm:$0xff] %v15124_v29  ;;  %v15128_v39 = vpop.f32.mrf.mxu3  ;;  %v15131_v31 = vpop.f32.mrf.mxu1 }
 0x725   :  { %8223 = vmatpush.bf16.msrb.mxu0 %v10347_v36  ;;  %v10337_v46 = vld [vmem:[#allocation2 + $0x778] sm:$0xff]  ;;  %16039 = vst [vmem:[#allocation99_spill] sm:$0xff] %v15128_v39  ;;  %v15133_v17 = vpop.f32.mrf.mxu0 }
 0x726   :  { %3857 = vst.msk [vmem:[#allocation2 + $0x73c] sm:$0xc] %vm531_vm13, %v3786_v5  ;;  %7967 = vmatpush.bf16.msra.mxu2 %v10337_v46 }
 0x727   :  { %16040 = vst [vmem:[#allocation100_spill] sm:$0xff] %v15133_v17 }
 0x729   :  { %v4382_v38 = vpop.permute.xlu2 %4381  ;;  %v4624_v33 = vpop.permute.xlu0 %4623  ;;  %9908 = vmatmul.msk.bf16.vlgmr.msra.gmra.mxu2 %vm5904_vm1, %v13595_v34 }
 0x72a   :  { %4447 = vst.msk [vmem:[#allocation2 + $0x878] sm:$0xf] %vm49_vm8, %v4382_v38 }
 0x72b   :  { %v7285_v61 = vpop.f32.mrf.mxu2  ;;  %4688 = vst.msk [vmem:[#allocation2 + $0x888] sm:$0x1] %vm535_vm14, %v4624_v33  ;;  %7932 = vmatmul.bf16.gmra.mxu0 %v13749_v59  ;;  %v4836_v45 = vpop.permute.xlu1 %4835 }
 0x72c   :  { %v7308_v5 = vpop.f32.mrf.mxu3  ;;  %4886 = vst.msk [vmem:[#allocation2 + $0x888] sm:$0xe] %vm744_vm15, %v4836_v45  ;;  %v15141_v46 = vpop.f32.mrf.mxu1 }
 0x72d   :  { %v10329_v36 = vld [vmem:[#allocation2 + $0x738] sm:$0xff]  ;;  %v15143_v39 = vpop.f32.mrf.mxu0 }
 0x72e   :  { %7944 = vmatpush.bf16.msra.mxu1 %v10329_v36  ;;  %16041 = vst [vmem:[#allocation101_spill] sm:$0xff] %v15143_v39 }
 0x730   :  { %8211 = vmatmul.bf16.gmra.mxu3 %v13513_v4 }
 0x731   :  { %v4378_v29 = vpop.permute.xlu2 %4377  ;;  %v3554_v38 = vpop.permute.xlu0 %3553  ;;  %7945 = vmatmul.bf16.vlgmr.msra.gmra.mxu1 %v13436_v52 }
 0x732   :  { %4445 = vst.msk [vmem:[#allocation2 + $0x870] sm:$0x8] %vm286_vm7, %v4378_v29 }
 0x733   :  { %v15147_v61 = vpop.f32.mrf.mxu2  ;;  %3621 = vst.msk [vmem:[#allocation2 + $0x844] sm:$0x8] %vm286_vm7, %v3554_v38  ;;  %v3556_v33 = vpop.permute.xlu1 %3555  ;;  %v10370_v5 = vld [vmem:[#allocation2 + $0x884] sm:$0xff] }
 0x734   :  { %16042 = vst [vmem:[#allocation102_spill] sm:$0xff] %v15147_v61  ;;  %v15151_v45 = vpop.f32.mrf.mxu3  ;;  %v15154_v36 = vpop.f32.mrf.mxu1  ;;  %8262 = vmatpush.bf16.msrb.mxu2 %v10370_v5 }
 0x735   :  { %16043 = vst [vmem:[#allocation103_spill] sm:$0xff] %v15151_v45  ;;  %v15156_v39 = vpop.f32.mrf.mxu0 }
 0x736   :  { %3622 = vst.msk [vmem:[#allocation2 + $0x848] sm:$0xf] %vm49_vm8, %v3556_v33 }
 0x737   :  { %16044 = vst [vmem:[#allocation104_spill] sm:$0xff] %v15156_v39 }
 0x739   :  { %v4984_v29 = vpop.permute.xlu2 %4983  ;;  %v4618_v22 = vpop.permute.xlu0 %4617  ;;  %9909 = vmatmul.msk.bf16.gmra.mxu2 %vm5904_vm1, %v13666_v14 }
 0x73a   :  { %5032 = vst.msk [vmem:[#allocation2 + $0x89c] sm:$0x7] %vm52_vm6, %v4984_v29 }
 0x73b   :  { %v15161_v38 = vpop.f32.mrf.mxu2  ;;  %4685 = vst.msk [vmem:[#allocation2 + $0x87c] sm:$0xc] %vm531_vm13, %v4618_v22  ;;  %8224 = vmatmul.bf16.vlgmr.msrb.gmra.mxu0 %v13506_v40  ;;  %v4620_v4 = vpop.permute.xlu1 %4619 }
 0x73c   :  { %v15165_v9 = vpop.f32.mrf.mxu3  ;;  %4686 = vst.msk [vmem:[#allocation2 + $0x880] sm:$0xf] %vm49_vm8, %v4620_v4  ;;  %v15168_v5 = vpop.f32.mrf.mxu1 }
 0x73d   :  { %v10362_v33 = vld [vmem:[#allocation2 + $0x844] sm:$0xff]  ;;  %v7331_v39 = vpop.f32.mrf.mxu0 }
 0x73e   :  { %8239 = vmatpush.bf16.msrb.mxu1 %v10362_v33 }
 0x741   :  { %v4014_v29 = vpop.permute.xlu2 %4013  ;;  %v3334_v45 = vpop.permute.xlu0 %3333  ;;  %v5599_v61 = vld [vmem:[#allocation2 + $0x89c] sm:$0x7]  ;;  %7950 = vmatmul.bf16.gmra.mxu1 %v13498_v30 }
 0x742   :  { %4063 = vst.msk [vmem:[#allocation2 + $0x860] sm:$0xf] %vm49_vm8, %v4014_v29  ;;  %v8120_v40 = vunpack.c.l.b16 %v5599_v61 }
 0x743   :  { %v15172_v22 = vpop.f32.mrf.mxu2  ;;  %3383 = vst.msk [vmem:[#allocation2 + $0x840] sm:$0xf] %vm49_vm8, %v3334_v45  ;;  %v4380_v19 = vpop.permute.xlu1 %4379  ;;  %v10369_v8 = vld [vmem:[#allocation2 + $0x87c] sm:$0xff] }
 0x744   :  { %v8155_v17 = vpack.c.b16 %v8120_v40, %v8120_v40  ;;  %4446 = vst.msk [vmem:[#allocation2 + $0x874] sm:$0xf] %vm49_vm8, %v4380_v19  ;;  %v15177_v39 = vpop.f32.mrf.mxu3  ;;  %v7564_v33 = vpop.f32.mrf.mxu1  ;;  %8263 = vmatpush.bf16.msrb.mxu2 %v10369_v8  ;;  %v10360_v8 = vld [vmem:[#allocation2 + $0x834] sm:$0xff] }
 0x745   :  { %v10359_v33 = vld [vmem:[#allocation2 + $0x82c] sm:$0xff] }
 0x746   :  { %v8191_v4 = vsel %vm123_vm0, %v8155_v17, 0 }
 0x747   :  { %8290 = vmatpush.bf16.msrb.mxu3 %v8191_v4 }
 0x749   :  { %v4980_v29 = vpop.permute.xlu2 %4979  ;;  %v4158_v13 = vpop.permute.xlu0 %4157  ;;  %9910 = vmatmul.msk.bf16.gmra.mxu2 %vm5904_vm1, %v13730_v60 }
 0x74a   :  { %5030 = vst.msk [vmem:[#allocation2 + $0x894] sm:$0xf] %vm49_vm8, %v4980_v29  ;;  %v10361_v43 = vld [vmem:[#allocation2 + $0x83c] sm:$0xff]  ;;  %v10358_v29 = vld [vmem:[#allocation2 + $0x824] sm:$0xff] }
 0x74b   :  { %v15182_v61 = vpop.f32.mrf.mxu2  ;;  %4207 = vst.msk [vmem:[#allocation2 + $0x86c] sm:$0xf] %vm49_vm8, %v4158_v13  ;;  %8229 = vmatmul.bf16.gmra.mxu0 %v13587_v27  ;;  %8240 = vmatpush.bf16.msrb.mxu1 %v10361_v43  ;;  %v4160_v19 = vpop.permute.xlu1 %4159  ;;  %v10368_v17 = vld [vmem:[#allocation2 + $0x874] sm:$0xff] }
 0x74c   :  { %4208 = vst.msk [vmem:[#allocation2 + $0x870] sm:$0x7] %vm52_vm6, %v4160_v19  ;;  %v15187_v45 = vpop.f32.mrf.mxu3  ;;  %8264 = vmatpush.bf16.msrb.mxu2 %v10368_v17 }
 0x74f   :  { %8241 = vmatpush.bf16.msrb.mxu1 %v10360_v8 }
 0x751   :  { %v3560_v40 = vpop.permute.xlu2 %3559  ;;  %v4016_v4 = vpop.permute.xlu0 %4015  ;;  %7955 = vmatmul.bf16.gmra.mxu1 %v13575_v1 }
 0x752   :  { %3624 = vst.msk [vmem:[#allocation2 + $0x850] sm:$0x3] %vm290_vm9, %v3560_v40  ;;  %v10357_v40 = vld [vmem:[#allocation2 + $0x81c] sm:$0xff] }
 0x753   :  { %v7585_v13 = vpop.f32.mrf.mxu2  ;;  %4064 = vst.msk [vmem:[#allocation2 + $0x864] sm:$0xf] %vm49_vm8, %v4016_v4  ;;  %8242 = vmatpush.bf16.msrb.mxu1 %v10359_v33  ;;  %v4156_v27 = vpop.permute.xlu1 %4155  ;;  %v10367_v43 = vld [vmem:[#allocation2 + $0x86c] sm:$0xff] }
 0x754   :  { %4206 = vst.msk [vmem:[#allocation2 + $0x868] sm:$0xf] %vm49_vm8, %v4156_v27  ;;  %v7608_v19 = vpop.f32.mrf.mxu3  ;;  %8265 = vmatpush.bf16.msrb.mxu2 %v10367_v43  ;;  %v10356_v43 = vld [vmem:[#allocation2 + $0x814] sm:$0xff] }
 0x757   :  { %8243 = vmatpush.bf16.msrb.mxu1 %v10358_v29 }
 0x758   :  { %v15193_v17 = vpop.f32.mrf.mxu0 }
 0x759   :  { %16045 = vst [vmem:[#allocation105_spill] sm:$0xff] %v15193_v17  ;;  %v4840_v8 = vpop.permute.xlu2 %4839  ;;  %v3800_v55 = vpop.permute.xlu0 %3799 }
 0x75a   :  { %4888 = vst.msk [vmem:[#allocation2 + $0x890] sm:$0xf] %vm49_vm8, %v4840_v8 }
 0x75b   :  { %v7587_v23 = vpop.f32.mrf.mxu2  ;;  %3864 = vst.msk [vmem:[#allocation2 + $0x85c] sm:$0x1] %vm535_vm14, %v3800_v55  ;;  %8234 = vmatmul.bf16.gmra.mxu0 %v13661_v47  ;;  %8244 = vmatpush.bf16.msrb.mxu1 %v10357_v40  ;;  %v4012_v4 = vpop.permute.xlu1 %4011  ;;  %v10366_v33 = vld [vmem:[#allocation2 + $0x864] sm:$0xff]  ;;  %v10355_v55 = vld [vmem:[#allocation2 + $0x80c] sm:$0xff] }
 0x75c   :  { %v15198_v27 = vpop.f32.mrf.mxu1  ;;  %4062 = vst.msk [vmem:[#allocation2 + $0x85c] sm:$0xe] %vm744_vm15, %v4012_v4  ;;  %v7610_v17 = vpop.f32.mrf.mxu3  ;;  %8266 = vmatpush.bf16.msrb.mxu2 %v10366_v33 }
 0x75d   :  { %16046 = vst [vmem:[#allocation106_spill] sm:$0xff] %v15198_v27 }
 0x75f   :  { %8245 = vmatpush.bf16.msrb.mxu1 %v10356_v43 }
 0x760   :  { %v15201_v29 = vpop.f32.mrf.mxu0 }
 0x761   :  { %v15203_v8 = vpop.permute.xlu2 %5617  ;;  %v3796_v23 = vpop.permute.xlu0 %3795 }
 0x762   :  { %3862 = vst.msk [vmem:[#allocation2 + $0x854] sm:$0xf] %vm49_vm8, %v3796_v23  ;;  %v7558_v47 = vadd.f32 %v15141_v46, %v15203_v8  ;;  %v5933_v40 = vadd.f32 %v14060_v53, %v15203_v8  ;;  %v6258_v4 = vadd.f32 %v14326_v50, %v15203_v8  ;;  %v6583_v17 = vadd.f32 %v14581_v63, %v15203_v8 }
 0x763   :  { %8246 = vmatpush.bf16.msrb.mxu1 %v10355_v55  ;;  %v15215_v43 = vpop.f32.mrf.mxu2  ;;  %v3798_v27 = vpop.permute.xlu1 %3797  ;;  %v10365_v23 = vld [vmem:[#allocation2 + $0x85c] sm:$0xff] }
 0x764   :  { %v7581_v33 = vadd.f32 %v15172_v22, %v7558_v47  ;;  %v15217_v7 = vpop.f32.mrf.mxu1  ;;  %3863 = vst.msk [vmem:[#allocation2 + $0x858] sm:$0xf] %vm49_vm8, %v3798_v27  ;;  %v15221_v53 = vpop.f32.mrf.mxu3  ;;  %v5956_v50 = vadd.f32 %v14140_v6, %v5933_v40  ;;  %8267 = vmatpush.bf16.msrb.mxu2 %v10365_v23  ;;  %v6281_v63 = vadd.f32 %v14403_v24, %v6258_v4 }
 0x765   :  { %v6606_v22 = vadd.f32 %v14542_v35, %v6583_v17 }
 0x766   :  { %v7604_v46 = vadd.f32 %v15177_v39, %v7581_v33  ;;  %8247 = vmatmul.bf16.vlgmr.msrb.gmra.mxu1 %v13343_v57  ;;  %v5979_v27 = vadd.f32 %v14228_v2, %v5956_v50  ;;  %v6304_v6 = vadd.f32 %v14355_v41, %v6281_v63 }
 0x767   :  { %v6629_v57 = vadd.f32 %v14608_v16, %v6606_v22 }
 0x768   :  { %v7626_v47 = vpop.f32.mrf.mxu0  ;;  %v6327_v2 = vadd.f32 %v14422_v26, %v6304_v6 }
 0x769   :  { %v7627_v55 = vadd.f32 %v7626_v47, %v7604_v46  ;;  %v15227_v28 = vpop.permute.xlu2 %5627  ;;  %v4982_v25 = vpop.permute.xlu0 %4981  ;;  %v6652_v41 = vadd.f32 %v14701_v58, %v6629_v57 }
 0x76a   :  { %5031 = vst.msk [vmem:[#allocation2 + $0x898] sm:$0xf] %vm49_vm8, %v4982_v25  ;;  %v7563_v39 = vadd.f32 %v15168_v5, %v15227_v28  ;;  %v6002_v5 = vadd.f32 %v14176_v10, %v5979_v27  ;;  %v15254_v10 = vadd.f32 %v14507_v56, %v6327_v2  ;;  %v6263_v58 = vadd.f32 %v14379_v12, %v15227_v28 }
 0x76b   :  { %v7879_v24 = vpop.f32.mrf.mxu2  ;;  %v3558_v4 = vpop.permute.xlu1 %3557  ;;  %v10364_v35 = vld [vmem:[#allocation2 + $0x854] sm:$0xff]  ;;  %v15257_v26 = vadd.f32 %v14773_v42, %v6652_v41 }
 0x76c   :  { %v7586_v40 = vadd.f32 %v7585_v13, %v7563_v39  ;;  %v7649_v17 = vpop.f32.mrf.mxu1  ;;  %3623 = vst.msk [vmem:[#allocation2 + $0x84c] sm:$0xf] %vm49_vm8, %v3558_v4  ;;  %v15238_v25 = vpop.f32.mrf.mxu3  ;;  %8268 = vmatpush.bf16.msrb.mxu2 %v10364_v35  ;;  %v6908_v13 = vadd.f32 %v14741_v44, %v15203_v8  ;;  %v15251_v63 = vadd.f32 %v14245_v51, %v6002_v5  ;;  %v8355_v42 = vmin.f32 %v15254_v10, 0.0 }
 0x76d   :  { %v15236_v23 = vadd.f32 %v7649_v17, %v7627_v55  ;;  %v8360_v39 = vmin.f32 %v15257_v26, 0.0  ;;  %v6286_v12 = vadd.f32 %v14462_v15, %v6263_v58  ;;  %vm8315_vm2 = vcmp.gt.f32.partialorder %v15254_v10, 0.0 }
 0x76e   :  { %v7609_v33 = vadd.f32 %v7608_v19, %v7586_v40  ;;  %v5938_v19 = vadd.f32 %v14114_v3, %v15227_v28  ;;  %v6931_v44 = vadd.f32 %v14802_v21, %v6908_v13  ;;  %v8350_v56 = vmin.f32 %v15251_v63, 0.0 }
 0x76f   :  { %v6309_v5 = vadd.f32 %v14415_v54, %v6286_v12  ;;  %v16049_v54 = vld [vmem:[#allocation18_spill] sm:$0xff]  ;;  %v16053_v12 = vld [vmem:[#allocation21_spill] sm:$0xff]  ;;  %vm8310_vm0 = vcmp.gt.f32.partialorder %v15251_v63, 0.0  ;;  %vm8320_vm6 = vcmp.gt.f32.partialorder %v15257_v26, 0.0 }
 0x770   :  { %v15243_v16 = vpop.f32.mrf.mxu0  ;;  %v5961_v3 = vadd.f32 %v14212_v49, %v5938_v19  ;;  %v6954_v27 = vadd.f32 %v14876_v11, %v6931_v44  ;;  %v8392_v17 = vmul.f32 1.442695, %v8350_v56  ;;  %v8402_v11 = vmul.f32 1.442695, %v8355_v42  ;;  %v16048_v19 = vld [vmem:[#allocation37_spill] sm:$0xff] }
 0x771   :  { %v3794_v46 = vpop.permute.xlu0 %3793  ;;  %v10372_v50 = vld [vmem:[#allocation2 + $0x894] sm:$0xff] }
 0x772   :  { %3861 = vst.msk [vmem:[#allocation2 + $0x850] sm:$0xc] %vm531_vm13, %v3794_v46  ;;  %8291 = vmatpush.bf16.msrb.mxu3 %v10372_v50  ;;  %v5984_v40 = vadd.f32 %v14282_v62, %v5961_v3  ;;  %v8375_v46 = vmin.f32 %v15236_v23, 0.0  ;;  %v16051_v3 = vld [vmem:[#allocation12_spill] sm:$0xff]  ;;  %10404 = vpow2.f32 %v8392_v17  ;;  %v16064_v17 = vld [vmem:[#allocation71_spill] sm:$0xff] }
 0x773   :  { %v4838_v22 = vpop.permute.xlu1 %4837  ;;  %v7882_v51 = vpop.f32.mrf.mxu2  ;;  %10406 = vpow2.f32 %v8402_v11 }
 0x774   :  { %v15262_v47 = vpop.f32.mrf.mxu1  ;;  %4887 = vst.msk [vmem:[#allocation2 + $0x88c] sm:$0xf] %vm49_vm8, %v4838_v22  ;;  %v7905_v55 = vpop.f32.mrf.mxu3  ;;  %v7883_v15 = vadd.f32 %v7882_v51, %v15203_v8  ;;  %v6007_v44 = vadd.f32 %v16049_v54, %v5984_v40 }
 0x776   :  { %8252 = vmatmul.bf16.gmra.mxu1 %v13692_v20  ;;  %v15292_v50 = vadd.f32 %v7905_v55, %v7883_v15  ;;  %v16052_v55 = vld [vmem:[#allocation6_spill] sm:$0xff] }
 0x777   :  { %v16056_v15 = vld [vmem:[#allocation10_spill] sm:$0xff] }
 0x778   :  { %v7631_v21 = vpop.f32.mrf.mxu0 }
 0x779   :  { %v7632_v6 = vadd.f32 %v7631_v21, %v7609_v33  ;;  %v15272_v57 = vpop.permute.xlu0 %5607  ;;  %v10363_v49 = vld [vmem:[#allocation2 + $0x84c] sm:$0xff]  ;;  %v8412_v33 = vmul.f32 1.442695, %v8360_v39 }
 0x77a   :  { %v7878_v4 = vadd.f32 %v15215_v43, %v15272_v57  ;;  %v6253_v20 = vadd.f32 %v14267_v0, %v15272_v57  ;;  %v5928_v35 = vadd.f32 %v14021_v48, %v15272_v57  ;;  %8269 = vmatpush.bf16.msrb.mxu2 %v10363_v49  ;;  %v16047_v43 = vld [vmem:[#allocation7_spill] sm:$0xff]  ;;  %v6977_v0 = vadd.f32 %v14964_v37, %v6954_v27  ;;  %v16050_v37 = vld [vmem:[#allocation22_spill] sm:$0xff] }
 0x77b   :  { %v15289_v13 = vpop.permute.xlu1 %5612  ;;  %v10371_v48 = vld [vmem:[#allocation2 + $0x88c] sm:$0xff]  ;;  %v6578_v58 = vadd.f32 %v16048_v19, %v15272_v57  ;;  %v7884_v56 = vpop.f32.mrf.mxu2  ;;  %10408 = vpow2.f32 %v8412_v33  ;;  %v16068_v33 = vld [vmem:[#allocation29_spill] sm:$0xff] }
 0x77c   :  { %v15284_v2 = vadd.f32 %v15221_v53, %v7878_v4  ;;  %v6276_v62 = vadd.f32 %v14335_v32, %v6253_v20  ;;  %v5951_v41 = vadd.f32 %v16047_v43, %v5928_v35  ;;  %v7555_v53 = vadd.f32 %v15131_v31, %v15289_v13  ;;  %8292 = vmatpush.bf16.msrb.mxu3 %v10371_v48  ;;  %v7907_v31 = vpop.f32.mrf.mxu3  ;;  %v16054_v49 = vld [vmem:[#allocation35_spill] sm:$0xff]  ;;  %v16055_v20 = vld [vmem:[#allocation26_spill] sm:$0xff]  ;;  %v16057_v43 = vld [vmem:[#allocation9_spill] sm:$0xff] }
 0x77d   :  { %8270 = vmatmul.bf16.vlgmr.msrb.gmra.mxu2 %v13436_v52  ;;  %v7880_v32 = vadd.f32 %v7879_v24, %v15289_v13  ;;  %v7654_v42 = vpop.f32.mrf.mxu1  ;;  %v5930_v39 = vadd.f32 %v16052_v55, %v15289_v13  ;;  %v6255_v21 = vadd.f32 %v16053_v12, %v15289_v13  ;;  %v6332_v52 = vadd.f32 %v16054_v49, %v6309_v5  ;;  %v16058_v48 = vld [vmem:[#allocation27_spill] sm:$0xff] }
 0x77e   :  { %v6299_v22 = vadd.f32 %v16050_v37, %v6276_v62  ;;  %v5974_v51 = vadd.f32 %v16051_v3, %v5951_v41  ;;  %v15307_v27 = vadd.f32 %v7654_v42, %v7632_v6  ;;  %v7578_v24 = vadd.f32 %v15161_v38, %v7555_v53  ;;  %v16059_v6 = vld [vmem:[#allocation34_spill] sm:$0xff]  ;;  %v16060_v38 = vld [vmem:[#allocation31_spill] sm:$0xff]  ;;  %v16063_v3 = vld [vmem:[#allocation24_spill] sm:$0xff] }
 0x77f   :  { %v15312_v4 = vadd.f32 %v15238_v25, %v7880_v32  ;;  %v5953_v41 = vadd.f32 %v16057_v43, %v5930_v39  ;;  %v6278_v19 = vadd.f32 %v16058_v48, %v6255_v21  ;;  %v6601_v54 = vadd.f32 %v16059_v6, %v6578_v58  ;;  %10047 = vmatmul.msk.bf16.vlgmr.msrb.gmra.mxu3 %vm5904_vm1, %v13595_v34  ;;  %v16061_v25 = vld [vmem:[#allocation14_spill] sm:$0xff]  ;;  %v16062_v32 = vld [vmem:[#allocation15_spill] sm:$0xff]  ;;  %v16066_v39 = vld [vmem:[#allocation41_spill] sm:$0xff] }
 0x780   :  { %v7633_v40 = vpop.f32.mrf.mxu0  ;;  %v6322_v35 = vadd.f32 %v16055_v20, %v6299_v22  ;;  %v5997_v62 = vadd.f32 %v16056_v15, %v5974_v51  ;;  %v7601_v37 = vadd.f32 %v15165_v9, %v7578_v24  ;;  %v15331_v42 = vadd.f32 %v16064_v17, %v6977_v0  ;;  %v16065_v34 = vld [vmem:[#allocation23_spill] sm:$0xff]  ;;  %v16070_v15 = vld [vmem:[#allocation40_spill] sm:$0xff] }
 0x781   :  { %v5976_v22 = vadd.f32 %v16062_v32, %v5953_v41  ;;  %v6301_v51 = vadd.f32 %v16063_v3, %v6278_v19  ;;  %v15336_v55 = vadd.f32 %v16065_v34, %v6007_v44  ;;  %v15339_v12 = vadd.f32 %v16066_v39, %v6332_v52  ;;  %v16067_v49 = vld [vmem:[#allocation11_spill] sm:$0xff]  ;;  %v10405_v41 = vpop.eup %10404  ;;  %v16071_v19 = vld [vmem:[#allocation17_spill] sm:$0xff] }
 0x782   :  { %v15323_v5 = vadd.f32 %v16060_v38, %v6322_v35  ;;  %v15326_v53 = vadd.f32 %v16061_v25, %v5997_v62  ;;  %v7624_v9 = vadd.f32 %v15201_v29, %v7601_v37  ;;  %v16069_v0 = vld [vmem:[#allocation39_spill] sm:$0xff]  ;;  %v6580_v62 = vadd.f32 %v16070_v15, %v15289_v13 }
 0x783   :  { %v15341_v21 = vpop.permute.xlu1 %5622  ;;  %v5999_v24 = vadd.f32 %v16067_v49, %v5976_v22  ;;  %v6324_v40 = vadd.f32 %v16068_v33, %v6301_v51  ;;  %v6624_v29 = vadd.f32 %v16069_v0, %v6601_v54  ;;  %v7887_v35 = vpop.f32.mrf.mxu2  ;;  %v8352_v22 = vmin.f32 %v15336_v55, 0.0  ;;  %v16076_v15 = vld [vmem:[#allocation43_spill] sm:$0xff] }
 0x784   :  { %v8353_v58 = vmin.f32 %v15323_v5, 0.0  ;;  %v8348_v11 = vmin.f32 %v15326_v53, 0.0  ;;  %v15349_v20 = vadd.f32 %v15217_v7, %v7624_v9  ;;  %v7560_v44 = vadd.f32 %v15154_v36, %v15341_v21  ;;  %v16072_v7 = vld [vmem:[#allocation33_spill] sm:$0xff]  ;;  %v7910_v38 = vpop.f32.mrf.mxu3  ;;  %v10407_v36 = vpop.eup %10406 }
 0x785   :  { %v7656_v43 = vpop.f32.mrf.mxu1  ;;  %v15357_v6 = vadd.f32 %v16071_v19, %v5999_v24  ;;  %v7885_v54 = vadd.f32 %v7884_v56, %v15341_v21  ;;  %v15361_v37 = vadd.f32 %v16072_v7, %v6324_v40  ;;  %v8365_v3 = vmin.f32 %v15331_v42, 0.0  ;;  %v16074_v24 = vld [vmem:[#allocation36_spill] sm:$0xff] }
 0x786   :  { %v8398_v52 = vmul.f32 1.442695, %v8353_v58  ;;  %8257 = vmatmul.bf16.gmra.mxu1 %v13749_v59  ;;  %v8388_v48 = vmul.f32 1.442695, %v8348_v11  ;;  %v7583_v32 = vadd.f32 %v15182_v61, %v7560_v44  ;;  %v10409_v59 = vpop.eup %10408  ;;  %v7888_v17 = vadd.f32 %v7887_v35, %v15227_v28 }
 0x787   :  { %v8349_v56 = vmin.f32 %v15357_v6, 0.0  ;;  %v8354_v58 = vmin.f32 %v15361_v37, 0.0  ;;  %v10052_v34 = vadd.f32 -1.0, %v10405_v41  ;;  %v8357_v61 = vmin.f32 %v15339_v12, 0.0 }
 0x788   :  { %v7923_v25 = vpop.f32.mrf.mxu0  ;;  %10410 = vpow2.f32 %v8398_v52  ;;  %v7606_v9 = vadd.f32 %v15187_v45, %v7583_v32  ;;  %v15375_v11 = vadd.f32 %v7907_v31, %v7885_v54  ;;  %v6603_v33 = vadd.f32 %v16074_v24, %v6580_v62  ;;  %v16075_v52 = vld [vmem:[#allocation53_spill] sm:$0xff] }
 0x789   :  { %v15367_v51 = vadd.f32 %v7923_v25, %v15284_v2  ;;  %10412 = vpow2.f32 %v8388_v48  ;;  %v8390_v39 = vmul.f32 1.442695, %v8349_v56  ;;  %v16073_v2 = vld [vmem:[#allocation46_spill] sm:$0xff]  ;;  %v8400_v0 = vmul.f32 1.442695, %v8354_v58  ;;  %v16079_v56 = vld [vmem:[#allocation13_spill] sm:$0xff] }
 0x78a   :  { %v6647_v49 = vadd.f32 %v16073_v2, %v6624_v29  ;;  %v7629_v40 = vadd.f32 %v15243_v16, %v7606_v9  ;;  %v10057_v44 = vadd.f32 -1.0, %v10407_v36  ;;  %v8396_v45 = vmul.f32 1.442695, %v8352_v22  ;;  %v16077_v29 = vld [vmem:[#allocation8_spill] sm:$0xff]  ;;  %v16078_v36 = vld [vmem:[#allocation49_spill] sm:$0xff] }
 0x78b   :  { %10414 = vpow2.f32 %v8390_v39  ;;  %v6626_v43 = vadd.f32 %v16076_v15, %v6603_v33  ;;  %v15384_v41 = vadd.f32 %v7910_v38, %v7888_v17  ;;  %v8510_v16 = vsel %vm8310_vm0, %v15251_v63, %v10052_v34  ;;  %v7889_v19 = vpop.f32.mrf.mxu2  ;;  %v15398_v38 = vld [vmem:[%s15904_s3] ss:$0 sm:$0xff]  ;;  %v16080_v34 = vld [vmem:[#allocation56_spill] sm:$0xff]  ;;  %v16082_v33 = vld [vmem:[#allocation19_spill] sm:$0xff] }
 0x78c   :  { %v15381_v35 = vadd.f32 %v16075_v52, %v6647_v49  ;;  %v15387_v31 = vadd.f32 %v15262_v47, %v7629_v40  ;;  %10416 = vpow2.f32 %v8400_v0  ;;  %v5935_v62 = vadd.f32 %v16077_v29, %v15341_v21  ;;  %v7912_v32 = vpop.f32.mrf.mxu3  ;;  %v16081_v2 = vld [vmem:[#allocation25_spill] sm:$0xff] }
 0x78d   :  { %8275 = vmatmul.bf16.gmra.mxu2 %v13498_v30  ;;  %v6649_v30 = vadd.f32 %v16078_v36, %v6626_v43  ;;  %v10062_v25 = vadd.f32 -1.0, %v10409_v59  ;;  %vm8313_vm4 = vcmp.gt.f32.partialorder %v15323_v5, 0.0  ;;  %vm8308_vm5 = vcmp.gt.f32.partialorder %v15326_v53, 0.0  ;;  %v16086_v32 = vld [vmem:[#allocation20_spill] sm:$0xff] }
 0x78e   :  { %v10411_v48 = vpop.eup %10410  ;;  %v8358_v47 = vmin.f32 %v15381_v35, 0.0  ;;  %v5958_v17 = vadd.f32 %v16079_v56, %v5935_v62  ;;  %v6260_v49 = vadd.f32 %v16081_v2, %v15341_v21  ;;  %10418 = vpow2.f32 %v8396_v45  ;;  %v16083_v62 = vld [vmem:[#allocation16_spill] sm:$0xff]  ;;  %v16088_v2 = vld [vmem:[#allocation55_spill] sm:$0xff] }
 0x78f   :  { %v10413_v54 = vpop.eup %10412  ;;  %v10055_v7 = vadd.f32 -1.0, %v10411_v48  ;;  %v15409_v39 = vadd.f32 %v16080_v34, %v6649_v30  ;;  %10048 = vmatmul.msk.bf16.gmra.mxu3 %vm5904_vm1, %v13666_v14  ;;  %v8554_v52 = vmul.f32 %v15398_v38, %v8510_v16  ;;  %v8515_v15 = vsel %vm8315_vm2, %v15254_v10, %v10057_v44  ;;  %v16084_v16 = vld [vmem:[#allocation30_spill] sm:$0xff]  ;;  %v16087_v56 = vld [vmem:[#allocation28_spill] sm:$0xff] }
 0x790   :  { %v15402_v22 = vpop.f32.mrf.mxu0  ;;  %v10050_v63 = vadd.f32 -1.0, %v10413_v54  ;;  %v8408_v58 = vmul.f32 1.442695, %v8358_v47  ;;  %v5981_v40 = vadd.f32 %v16082_v33, %v5958_v17  ;;  %vm8309_vm7 = vcmp.gt.f32.partialorder %v15357_v6, 0.0 }
 0x791   :  { %v8513_v9 = vsel %vm8313_vm4, %v15323_v5, %v10055_v7  ;;  %v10415_v5 = vpop.eup %10414  ;;  %v8359_v48 = vmin.f32 %v15409_v39, 0.0  ;;  %v6283_v54 = vadd.f32 %v16084_v16, %v6260_v49  ;;  %vm8314_vm8 = vcmp.gt.f32.partialorder %v15361_v37, 0.0  ;;  %v16085_v7 = vld [vmem:[#allocation50_spill] sm:$0xff] }
 0x792   :  { %v8557_v59 = vmul.f32 %v15398_v38, %v8513_v9  ;;  %v8508_v24 = vsel %vm8308_vm5, %v15326_v53, %v10050_v63  ;;  %10420 = vpow2.f32 %v8408_v58  ;;  %v10417_v14 = vpop.eup %10416  ;;  %v10051_v53 = vadd.f32 -1.0, %v10415_v5  ;;  %v16089_v5 = vld [vmem:[#allocation32_spill] sm:$0xff] }
 0x793   :  { %v8552_v0 = vmul.f32 %v15398_v38, %v8508_v24  ;;  %v10056_v29 = vadd.f32 -1.0, %v10417_v14  ;;  %v6004_v19 = vadd.f32 %v16083_v62, %v5981_v40  ;;  %v8410_v44 = vmul.f32 1.442695, %v8359_v48  ;;  %v16090_v14 = vld [vmem:[#allocation62_spill] sm:$0xff] }
 0x794   :  { %v8608_v43 = vsel %vm8592_vm3, %v8557_v59, 0.0  ;;  %v8509_v10 = vsel %vm8309_vm7, %v15357_v6, %v10051_v53  ;;  %v6903_v47 = vadd.f32 %v16085_v7, %v15272_v57  ;;  %v6306_v17 = vadd.f32 %v16087_v56, %v6283_v54  ;;  %v10419_v9 = vpop.eup %10418  ;;  %v16093_v54 = vld [vmem:[#allocation69_spill] sm:$0xff] }
 0x795   :  { %8609 = vadd.xlane.f32.xlu2 %v8608_v43  ;;  %v8593_v45 = vsel %vm8592_vm3, %v8552_v0, 0.0  ;;  %v8553_v36 = vmul.f32 %v15398_v38, %v8509_v10  ;;  %v8514_v30 = vsel %vm8314_vm8, %v15361_v37, %v10056_v29  ;;  %v15437_v63 = vadd.f32 %v16086_v32, %v6004_v19  ;;  %v16091_v29 = vld [vmem:[#allocation52_spill] sm:$0xff]  ;;  %v16092_v19 = vld [vmem:[#allocation38_spill] sm:$0xff] }
 0x796   :  { %8594 = vadd.xlane.f32.xlu0 %v8593_v45  ;;  %v15442_v58 = vmul.f32 1.442695, %v8375_v46  ;;  %v8558_v34 = vmul.f32 %v15398_v38, %v8514_v30  ;;  %10422 = vpow2.f32 %v8410_v44  ;;  %v6926_v49 = vadd.f32 %v16088_v2, %v6903_v47  ;;  %v16097_v2 = vld [vmem:[#allocation45_spill] sm:$0xff] }
 0x797   :  { %v8596_v37 = vsel %vm8592_vm3, %v8553_v36, 0.0  ;;  %v8559_v24 = vmul.f32 %v15398_v38, %v8515_v15  ;;  %v8351_v33 = vmin.f32 %v15437_v63, 0.0  ;;  %v8422_v40 = vmul.f32 1.442695, %v8365_v3  ;;  %v16095_v36 = vld [vmem:[#allocation66_spill] sm:$0xff] }
 0x798   :  { %v15444_v6 = vpop.f32.mrf.mxu0  ;;  %v10421_v59 = vpop.eup %10420  ;;  %8597 = vadd.xlane.f32.xlu1 %v8596_v37  ;;  %v6329_v0 = vadd.f32 %v16089_v5, %v6306_v17  ;;  %v6949_v43 = vadd.f32 %v16090_v14, %v6926_v49  ;;  %v8406_v53 = vmul.f32 1.442695, %v8357_v61  ;;  %v8599_v48 = vsel %vm8592_vm3, %v8554_v52, 0.0 }
 0x799   :  { %v10060_v46 = vadd.f32 -1.0, %v10421_v59  ;;  %v8394_v45 = vmul.f32 1.442695, %v8351_v33  ;;  %v8520_v15 = vsel %vm8320_vm6, %v15257_v26, %v10062_v25  ;;  %v6905_v62 = vadd.f32 %v16091_v29, %v15289_v13  ;;  %v16094_v26 = vld [vmem:[#allocation59_spill] sm:$0xff] }
 0x79a   :  { %v8611_v3 = vsel %vm8592_vm3, %v8558_v34, 0.0  ;;  %vm8318_vm9 = vcmp.gt.f32.partialorder %v15381_v35, 0.0  ;;  %v15466_v16 = vadd.f32 %v16092_v19, %v6329_v0  ;;  %v6972_v10 = vadd.f32 %v16093_v54, %v6949_v43  ;;  %v15482_v34 = vpop.f32.mrf.mxu3  ;;  %v16098_v0 = vld [vmem:[#allocation73_spill] sm:$0xff]  ;;  %v16103_v54 = vld [vmem:[#allocation47_spill] sm:$0xff] }
 0x79b   :  { %vm8312_vm10 = vcmp.gt.f32.partialorder %v15336_v55, 0.0  ;;  %v8614_v61 = vsel %vm8592_vm3, %v8559_v24, 0.0  ;;  %v8518_v52 = vsel %vm8318_vm9, %v15381_v35, %v10060_v46  ;;  %10424 = vpow2.f32 %v8394_v45  ;;  %v16096_v35 = vld [vmem:[#allocation65_spill] sm:$0xff]  ;;  %v16099_v45 = vld [vmem:[#allocation42_spill] sm:$0xff] }
 0x79c   :  { %v6928_v25 = vadd.f32 %v16094_v26, %v6905_v62  ;;  %v10423_v44 = vpop.eup %10422  ;;  %v8374_v7 = vmin.f32 %v15349_v20, 0.0  ;;  %vm8319_vm12 = vcmp.gt.f32.partialorder %v15409_v39, 0.0  ;;  %v8356_v47 = vmin.f32 %v15466_v16, 0.0 }
 0x79d   :  { %8612 = vadd.xlane.f32.xlu2 %v8611_v3  ;;  %8280 = vmatmul.bf16.gmra.mxu2 %v13575_v1  ;;  %v15478_v30 = vadd.f32 %v16095_v36, %v6972_v10  ;;  %v10061_v32 = vadd.f32 -1.0, %v10423_v44  ;;  %v8564_v56 = vmul.f32 %v15398_v38, %v8520_v15  ;;  %v6585_v49 = vadd.f32 %v16097_v2, %v15341_v21 }
 0x79e   :  { %8600 = vadd.xlane.f32.xlu0 %v8599_v48  ;;  %v6951_v17 = vadd.f32 %v16096_v35, %v6928_v25  ;;  %v8562_v1 = vmul.f32 %v15398_v38, %v8518_v52  ;;  %v8404_v37 = vmul.f32 1.442695, %v8356_v47  ;;  %v10054_v33 = vadd.f32 -1.0, %v10419_v9  ;;  %v16100_v9 = vld [vmem:[#allocation68_spill] sm:$0xff]  ;;  %v16104_v47 = vld [vmem:[#allocation54_spill] sm:$0xff] }
 0x79f   :  { %v8363_v24 = vmin.f32 %v15478_v30, 0.0  ;;  %v8519_v5 = vsel %vm8319_vm12, %v15409_v39, %v10061_v32  ;;  %10426 = vpow2.f32 %v8406_v53  ;;  %10049 = vmatmul.msk.bf16.gmra.mxu3 %vm5904_vm1, %v13730_v60  ;;  %v6608_v15 = vadd.f32 %v16099_v45, %v6585_v49  ;;  %v16102_v53 = vld [vmem:[#allocation48_spill] sm:$0xff] }
 0x7a0   :  { %v7930_v59 = vpop.f32.mrf.mxu0  ;;  %v6974_v14 = vadd.f32 %v16098_v0, %v6951_v17  ;;  %8615 = vadd.xlane.f32.xlu1 %v8614_v61  ;;  %v8563_v43 = vmul.f32 %v15398_v38, %v8519_v5  ;;  %10428 = vpow2.f32 %v8404_v37  ;;  %v6588_v3 = vadd.f32 %v16102_v53, %v15227_v28  ;;  %v16105_v49 = vld [vmem:[#allocation80_spill] sm:$0xff] }
 0x7a1   :  { %v15489_v46 = vadd.f32 %v7930_v59, %v15375_v11  ;;  %v8418_v48 = vmul.f32 1.442695, %v8363_v24  ;;  %v10425_v29 = vpop.eup %10424  ;;  %10430 = vpow2.f32 %v8422_v40  ;;  %v16101_v11 = vld [vmem:[#allocation72_spill] sm:$0xff]  ;;  %v8623_v19 = vsel %vm8592_vm3, %v8562_v1, 0.0 }
 0x7a2   :  { %v15498_v62 = vadd.f32 %v16100_v9, %v6974_v14  ;;  %v7228_v39 = vadd.f32 %v16101_v11, %v15272_v57  ;;  %v10053_v60 = vadd.f32 -1.0, %v10425_v29  ;;  %v6631_v10 = vadd.f32 %v16103_v54, %v6608_v15  ;;  %v8204_v2 = vpop.f32.mrf.mxu3  ;;  %v16108_v29 = vld [vmem:[#allocation83_spill] sm:$0xff] }
 0x7a3   :  { %10432 = vpow2.f32 %v8418_v48  ;;  %v8626_v61 = vsel %vm8592_vm3, %v8563_v43, 0.0  ;;  %vm8311_vm13 = vcmp.gt.f32.partialorder %v15437_v63, 0.0  ;;  %v8512_v40 = vsel %vm8312_vm10, %v15336_v55, %v10054_v33  ;;  %v16106_v55 = vld [vmem:[#allocation76_spill] sm:$0xff] }
 0x7a4   :  { %v8364_v52 = vmin.f32 %v15498_v62, 0.0  ;;  %v15512_v26 = vmul.f32 1.442695, %v8374_v7  ;;  %v8511_v25 = vsel %vm8311_vm13, %v15437_v63, %v10053_v60  ;;  %v8629_v44 = vsel %vm8592_vm3, %v8564_v56, 0.0  ;;  %v16107_v56 = vld [vmem:[#allocation61_spill] sm:$0xff] }
 0x7a5   :  { %8624 = vadd.xlane.f32.xlu2 %v8623_v19  ;;  %v6654_v36 = vadd.f32 %v16104_v47, %v6631_v10  ;;  %v10427_v32 = vpop.eup %10426  ;;  %v8555_v35 = vmul.f32 %v15398_v38, %v8511_v25  ;;  %vm8317_vm14 = vcmp.gt.f32.partialorder %v15339_v12, 0.0  ;;  %v7251_v59 = vadd.f32 %v16105_v49, %v7228_v39  ;;  %v16109_v39 = vld [vmem:[#allocation44_spill] sm:$0xff]  ;;  %v16110_v19 = vld [vmem:[#allocation58_spill] sm:$0xff]  ;;  %v16113_v47 = vld [vmem:[#allocation51_spill] sm:$0xff] }
 0x7a6   :  { %8627 = vadd.xlane.f32.xlu0 %v8626_v61  ;;  %v8420_v17 = vmul.f32 1.442695, %v8364_v52  ;;  %v7230_v7 = vadd.f32 %v16106_v55, %v15289_v13  ;;  %v10429_v1 = vpop.eup %10428  ;;  %vm8316_vm15 = vcmp.gt.f32.partialorder %v15466_v16, 0.0  ;;  %v8556_v63 = vmul.f32 %v15398_v38, %v8512_v40  ;;  %v16111_v61 = vld [vmem:[#allocation86_spill] sm:$0xff]  ;;  %v16112_v40 = vld [vmem:[#allocation88_spill] sm:$0xff] }
 0x7a7   :  { %v15527_v24 = vadd.f32 %v16107_v56, %v6654_v36  ;;  %v15530_v33 = vadd.f32 %v8204_v2, %v15289_v13  ;;  %v10431_v5 = vpop.eup %10430  ;;  %v8602_v0 = vsel %vm8592_vm3, %v8555_v35, 0.0  ;;  %v10058_v14 = vadd.f32 -1.0, %v10429_v1  ;;  %v16115_v35 = vld [vmem:[#allocation78_spill] sm:$0xff]  ;;  %v16117_v1 = vld [vmem:[#allocation89_spill] sm:$0xff] }
 0x7a8   :  { %v15522_v37 = vpop.f32.mrf.mxu0  ;;  %vm8323_vm1 = vcmp.gt.f32.partialorder %v15478_v30, 0.0  ;;  %10434 = vpow2.f32 %v8420_v17  ;;  %8603 = vadd.xlane.f32.xlu1 %v8602_v0  ;;  %v10059_v48 = vadd.f32 -1.0, %v10427_v32  ;;  %v7274_v15 = vadd.f32 %v15066_v18, %v7251_v59  ;;  %v16114_v32 = vld [vmem:[#allocation63_spill] sm:$0xff]  ;;  %v16116_v59 = vld [vmem:[#allocation93_spill] sm:$0xff] }
 0x7a9   :  { %v10433_v43 = vpop.eup %10432  ;;  %v8361_v45 = vmin.f32 %v15527_v24, 0.0  ;;  %v7253_v9 = vadd.f32 %v16108_v29, %v7230_v7  ;;  %v8516_v11 = vsel %vm8316_vm15, %v15466_v16, %v10058_v14  ;;  %vm8325_vm0 = vcmp.gt.f32.partialorder %v15331_v42, 0.0  ;;  %v16118_v0 = vld [vmem:[#allocation57_spill] sm:$0xff] }
 0x7aa   :  { %v10065_v13 = vadd.f32 -1.0, %v10433_v43  ;;  %v6611_v53 = vadd.f32 %v16109_v39, %v6588_v3  ;;  %v6910_v60 = vadd.f32 %v16110_v19, %v15341_v21  ;;  %v8560_v54 = vmul.f32 %v15398_v38, %v8516_v11  ;;  %v15561_v43 = vpop.f32.mrf.mxu3  ;;  %v16120_v29 = vld [vmem:[#allocation85_spill] sm:$0xff] }
 0x7ab   :  { %v8414_v10 = vmul.f32 1.442695, %v8361_v45  ;;  %v7297_v52 = vadd.f32 %v16111_v61, %v7274_v15  ;;  %v7276_v25 = vadd.f32 %v16112_v40, %v7253_v9  ;;  %v7233_v17 = vadd.f32 %v16115_v35, %v15203_v8  ;;  %v16119_v45 = vld [vmem:[#allocation70_spill] sm:$0xff]  ;;  %v16123_v40 = vld [vmem:[#allocation79_spill] sm:$0xff] }
 0x7ac   :  { %v8523_v18 = vsel %vm8323_vm1, %v15478_v30, %v10065_v13  ;;  %v15548_v16 = vpop.f32.mrf.mxu2  ;;  %v6634_v36 = vadd.f32 %v16113_v47, %v6611_v53  ;;  %v6933_v3 = vadd.f32 %v16114_v32, %v6910_v60  ;;  %v8617_v2 = vsel %vm8592_vm3, %v8560_v54, 0.0  ;;  %v16121_v60 = vld [vmem:[#allocation97_spill] sm:$0xff] }
 0x7ad   :  { %v8567_v49 = vmul.f32 %v15398_v38, %v8523_v18  ;;  %10436 = vpow2.f32 %v8414_v10  ;;  %v15557_v55 = vadd.f32 %v16116_v59, %v7297_v52  ;;  %8618 = vadd.xlane.f32.xlu2 %v8617_v2  ;;  %v7299_v56 = vadd.f32 %v16117_v1, %v7276_v25  ;;  %v16122_v10 = vld [vmem:[#allocation64_spill] sm:$0xff]  ;;  %v16124_v18 = vld [vmem:[#allocation91_spill] sm:$0xff] }
 0x7ae   :  { %8630 = vadd.xlane.f32.xlu0 %v8629_v44  ;;  %v10435_v7 = vpop.eup %10434  ;;  %v7946_v30 = vpop.f32.mrf.mxu1  ;;  %v6657_v14 = vadd.f32 %v16118_v0, %v6634_v36  ;;  %v6956_v15 = vadd.f32 %v16119_v45, %v6933_v3  ;;  %v7256_v9 = vadd.f32 %v16120_v29, %v7233_v17  ;;  %vm8324_vm2 = vcmp.gt.f32.partialorder %v15498_v62, 0.0  ;;  %v16126_v1 = vld [vmem:[#allocation92_spill] sm:$0xff] }
 0x7af   :  { %v10066_v11 = vadd.f32 -1.0, %v10435_v7  ;;  %v8517_v13 = vsel %vm8317_vm14, %v15339_v12, %v10059_v48  ;;  %v10067_v39 = vadd.f32 -1.0, %v10431_v5  ;;  %v8638_v53 = vsel %vm8592_vm3, %v8567_v49, 0.0 }
 0x7b0   :  { %v7935_v44 = vpop.f32.mrf.mxu0  ;;  %v8368_v19 = vmin.f32 %v15557_v55, 0.0  ;;  %v15572_v54 = vadd.f32 %v16121_v60, %v7299_v56  ;;  %v15575_v61 = vadd.f32 %v16122_v10, %v6657_v14  ;;  %10438 = vpow2.f32 %v15512_v26  ;;  %8639 = vadd.xlane.f32.xlu1 %v8638_v53  ;;  %v16127_v14 = vld [vmem:[#allocation96_spill] sm:$0xff]  ;;  %v16129_v60 = vld [vmem:[#allocation102_spill] sm:$0xff] }
 0x7b1   :  { %v8524_v52 = vsel %vm8324_vm2, %v15498_v62, %v10066_v11  ;;  %v6979_v25 = vadd.f32 %v16123_v40, %v6956_v15  ;;  %v7279_v12 = vadd.f32 %v16124_v18, %v7256_v9  ;;  %v8605_v48 = vsel %vm8592_vm3, %v8556_v63, 0.0 }
 0x7b2   :  { %v8568_v5 = vmul.f32 %v15398_v38, %v8524_v52  ;;  %v8428_v47 = vmul.f32 1.442695, %v8368_v19  ;;  %v8369_v36 = vmin.f32 %v15572_v54, 0.0  ;;  %v8203_v3 = vadd.f32 %v15482_v34, %v15272_v57  ;;  %v16125_v34 = vld [vmem:[#allocation75_spill] sm:$0xff]  ;;  %v15602_v15 = vpop.f32.mrf.mxu3 }
 0x7b3   :  { %v10437_v32 = vpop.eup %10436  ;;  %v8561_v26 = vmul.f32 %v15398_v38, %v8517_v13  ;;  %v8525_v62 = vsel %vm8325_vm0, %v15331_v42, %v10067_v39  ;;  %v8362_v35 = vmin.f32 %v15575_v61, 0.0  ;;  %vm8321_vm4 = vcmp.gt.f32.partialorder %v15527_v24, 0.0 }
 0x7b4   :  { %v15591_v17 = vpop.f32.mrf.mxu2  ;;  %v10063_v63 = vadd.f32 -1.0, %v10437_v32  ;;  %10440 = vpow2.f32 %v8428_v47  ;;  %v8430_v2 = vmul.f32 1.442695, %v8369_v36  ;;  %v8641_v49 = vsel %vm8592_vm3, %v8568_v5, 0.0  ;;  %v16130_v5 = vld [vmem:[#allocation103_spill] sm:$0xff] }
 0x7b5   :  { %v8416_v59 = vmul.f32 1.442695, %v8362_v35  ;;  %v15596_v7 = vadd.f32 %v16125_v34, %v6979_v25  ;;  %v7302_v56 = vadd.f32 %v16126_v1, %v7279_v12  ;;  %8642 = vadd.xlane.f32.xlu2 %v8641_v49  ;;  %v7553_v45 = vadd.f32 %v16127_v14, %v15272_v57 }
 0x7b6   :  { %8606 = vadd.xlane.f32.xlu0 %v8605_v48  ;;  %v7948_v42 = vpop.f32.mrf.mxu1  ;;  %v8521_v0 = vsel %vm8321_vm4, %v15527_v24, %v10063_v63  ;;  %10442 = vpow2.f32 %v8430_v2  ;;  %v10439_v29 = vpop.eup %10438  ;;  %v7947_v9 = vadd.f32 %v7946_v30, %v15367_v51  ;;  %v8620_v11 = vsel %vm8592_vm3, %v8561_v26, 0.0  ;;  %v16128_v24 = vld [vmem:[#allocation100_spill] sm:$0xff] }
 0x7b7   :  { %v8569_v13 = vmul.f32 %v15398_v38, %v8525_v62  ;;  %10444 = vpow2.f32 %v8416_v59  ;;  %v8366_v53 = vmin.f32 %v15596_v7, 0.0  ;;  %v15611_v19 = vadd.f32 %v16128_v24, %v7302_v56  ;;  %v16132_v62 = vld [vmem:[#allocation105_spill] sm:$0xff]  ;;  %v16133_v59 = vld [vmem:[#allocation67_spill] sm:$0xff] }
 0x7b8   :  { %v8225_v44 = vpop.f32.mrf.mxu0  ;;  %10446 = vpow2.f32 %v15442_v58  ;;  %8621 = vadd.xlane.f32.xlu1 %v8620_v11  ;;  %v8565_v57 = vmul.f32 %v15398_v38, %v8521_v0  ;;  %v7576_v51 = vadd.f32 %v16129_v60, %v7553_v45  ;;  %v15616_v10 = vadd.f32 -1.0, %v10439_v29  ;;  %v16134_v11 = vld [vmem:[#allocation106_spill] sm:$0xff] }
 0x7b9   :  { %v15607_v39 = vadd.f32 %v8225_v44, %v8203_v3  ;;  %v7926_v52 = vadd.f32 %v15402_v22, %v15312_v4  ;;  %v8424_v40 = vmul.f32 1.442695, %v8366_v53  ;;  %v8370_v25 = vmin.f32 %v15611_v19, 0.0  ;;  %v16131_v4 = vld [vmem:[#allocation60_spill] sm:$0xff] }
 0x7ba   :  { %v10441_v30 = vpop.eup %10440  ;;  %v15622_v18 = vadd.f32 %v15548_v16, %v7947_v9  ;;  %v8644_v12 = vsel %vm8592_vm3, %v8569_v13, 0.0  ;;  %v7599_v48 = vadd.f32 %v16130_v5, %v7576_v51  ;;  %vm8328_vm5 = vcmp.gt.f32.partialorder %v15557_v55, 0.0  ;;  %v15638_v1 = vpop.f32.mrf.mxu3 }
 0x7bb   :  { %v10070_v58 = vadd.f32 -1.0, %v10441_v30  ;;  %10448 = vpow2.f32 %v8424_v40  ;;  %v8432_v32 = vmul.f32 1.442695, %v8370_v25  ;;  %v6913_v22 = vadd.f32 %v16131_v4, %v15227_v28 }
 0x7bc   :  { %v10443_v47 = vpop.eup %10442  ;;  %v15627_v36 = vpop.f32.mrf.mxu2  ;;  %v8632_v3 = vsel %vm8592_vm3, %v8565_v57, 0.0  ;;  %v7622_v35 = vadd.f32 %v16132_v62, %v7599_v48  ;;  %vm8334_vm6 = vcmp.gt.f32.partialorder %v15349_v20, 0.0  ;;  %vm8329_vm7 = vcmp.gt.f32.partialorder %v15572_v54, 0.0  ;;  %v16135_v57 = vld [vmem:[#allocation74_spill] sm:$0xff] }
 0x7bd   :  { %v8528_v16 = vsel %vm8328_vm5, %v15557_v55, %v10070_v58  ;;  %v10071_v26 = vadd.f32 -1.0, %v10443_v47  ;;  %v10445_v63 = vpop.eup %10444  ;;  %8633 = vadd.xlane.f32.xlu2 %v8632_v3  ;;  %10450 = vpow2.f32 %v8432_v32  ;;  %v6936_v34 = vadd.f32 %v16133_v59, %v6913_v22  ;;  %v16138_v32 = vld [vmem:[#allocation87_spill] sm:$0xff]  ;;  %v16139_v3 = vld [vmem:[#allocation77_spill] sm:$0xff]  ;;  %v16140_v62 = vld [vmem:[#allocation94_spill] sm:$0xff] }
 0x7be   :  { %8645 = vadd.xlane.f32.xlu0 %v8644_v12  ;;  %v7951_v2 = vpop.f32.mrf.mxu1  ;;  %v8572_v49 = vmul.f32 %v15398_v38, %v8528_v16  ;;  %v15640_v56 = vpop.eup %10446  ;;  %v8378_v55 = vmin.f32 %v15622_v18, 0.0  ;;  %vm8322_vm8 = vcmp.gt.f32.partialorder %v15575_v61, 0.0  ;;  %v10064_v45 = vadd.f32 -1.0, %v10445_v63  ;;  %v16137_v12 = vld [vmem:[#allocation82_spill] sm:$0xff] }
 0x7bf   :  { %v8529_v14 = vsel %vm8329_vm7, %v15572_v54, %v10071_v26  ;;  %v7949_v29 = vadd.f32 %v7948_v42, %v7926_v52  ;;  %v15650_v13 = vadd.f32 %v16134_v11, %v7622_v35  ;;  %v6959_v60 = vadd.f32 %v16135_v57, %v6936_v34  ;;  %v16136_v54 = vld [vmem:[#allocation81_spill] sm:$0xff] }
 0x7c0   :  { %v8227_v0 = vpop.f32.mrf.mxu0  ;;  %v8653_v44 = vsel %vm8592_vm3, %v8572_v49, 0.0  ;;  %v8573_v53 = vmul.f32 %v15398_v38, %v8529_v14  ;;  %v8522_v24 = vsel %vm8322_vm8, %v15575_v61, %v10064_v45  ;;  %v7235_v51 = vadd.f32 %v16136_v54, %v15341_v21 }
 0x7c1   :  { %v15646_v9 = vadd.f32 %v8227_v0, %v15530_v33  ;;  %8654 = vadd.xlane.f32.xlu1 %v8653_v44  ;;  %v10449_v30 = vpop.eup %10448  ;;  %v7929_v33 = vadd.f32 %v15444_v6, %v15292_v50  ;;  %v8566_v42 = vmul.f32 %v15398_v38, %v8522_v24  ;;  %v8208_v52 = vadd.f32 %v15561_v43, %v15203_v8  ;;  %v16141_v44 = vld [vmem:[#allocation95_spill] sm:$0xff]  ;;  %v16142_v24 = vld [vmem:[#allocation101_spill] sm:$0xff] }
 0x7c2   :  { %v8373_v40 = vmin.f32 %v15650_v13, 0.0  ;;  %v8448_v25 = vmul.f32 1.442695, %v8378_v55  ;;  %vm8326_vm9 = vcmp.gt.f32.partialorder %v15596_v7, 0.0  ;;  %v10068_v61 = vadd.f32 -1.0, %v10449_v30  ;;  %v8214_v63 = vpop.f32.mrf.mxu3 }
 0x7c3   :  { %v6982_v58 = vadd.f32 %v16137_v12, %v6959_v60  ;;  %v10451_v5 = vpop.eup %10450  ;;  %v15666_v48 = vadd.f32 %v15591_v17, %v7949_v29  ;;  %v8635_v47 = vsel %vm8592_vm3, %v8566_v42, 0.0  ;;  %v7258_v4 = vadd.f32 %v16138_v32, %v7235_v51 }
 0x7c4   :  { %v7976_v50 = vpop.f32.mrf.mxu2  ;;  %v8438_v6 = vmul.f32 1.442695, %v8373_v40  ;;  %v8656_v8 = vsel %vm8592_vm3, %v8573_v53, 0.0  ;;  %v8526_v43 = vsel %vm8326_vm9, %v15596_v7, %v10068_v61  ;;  %v10072_v22 = vadd.f32 -1.0, %v10451_v5  ;;  %v16143_v61 = vld [vmem:[#allocation84_spill] sm:$0xff] }
 0x7c5   :  { %v15673_v16 = vadd.f32 %v16139_v3, %v6982_v58  ;;  %8657 = vadd.xlane.f32.xlu2 %v8656_v8  ;;  %v8570_v17 = vmul.f32 %v15398_v38, %v8526_v43  ;;  %vm8330_vm10 = vcmp.gt.f32.partialorder %v15611_v19, 0.0  ;;  %v7281_v35 = vadd.f32 %v16140_v62, %v7258_v4  ;;  %v16144_v4 = vld [vmem:[#allocation90_spill] sm:$0xff] }
 0x7c6   :  { %8636 = vadd.xlane.f32.xlu0 %v8635_v47  ;;  %v7953_v26 = vpop.f32.mrf.mxu1  ;;  %10452 = vpow2.f32 %v8438_v6  ;;  %v7952_v49 = vadd.f32 %v7951_v2, %v7929_v33  ;;  %v8530_v7 = vsel %vm8330_vm10, %v15611_v19, %v10072_v22  ;;  %v8534_v55 = vsel %vm8334_vm6, %v15349_v20, %v15616_v10  ;;  %v16145_v22 = vld [vmem:[#allocation98_spill] sm:$0xff] }
 0x7c7   :  { %v7954_v59 = vadd.f32 %v7953_v26, %v15489_v46  ;;  %v8379_v0 = vmin.f32 %v15666_v48, 0.0  ;;  %v8647_v45 = vsel %vm8592_vm3, %v8570_v17, 0.0  ;;  %v8367_v29 = vmin.f32 %v15673_v16, 0.0 }
 0x7c8   :  { %v8230_v34 = vpop.f32.mrf.mxu0  ;;  %v8574_v46 = vmul.f32 %v15398_v38, %v8530_v7  ;;  %v7304_v19 = vadd.f32 %v16141_v44, %v7281_v35  ;;  %v8376_v11 = vmin.f32 %v15387_v31, 0.0  ;;  %10454 = vpow2.f32 %v8448_v25  ;;  %v16146_v35 = vld [vmem:[#allocation99_spill] sm:$0xff] }
 0x7c9   :  { %v15685_v14 = vadd.f32 %v8230_v34, %v8208_v52  ;;  %8648 = vadd.xlane.f32.xlu1 %v8647_v45  ;;  %v15689_v2 = vadd.f32 %v7976_v50, %v7954_v59  ;;  %v8426_v53 = vmul.f32 1.442695, %v8367_v29  ;;  %v15695_v20 = vadd.f32 %v15627_v36, %v7952_v49  ;;  %v16147_v45 = vld [vmem:[#allocation104_spill] sm:$0xff] }
 0x7ca   :  { %v8578_v10 = vmul.f32 %v15398_v38, %v8534_v55  ;;  %v15699_v57 = vadd.f32 %v16142_v24, %v7304_v19  ;;  %vm8335_vm12 = vcmp.gt.f32.partialorder %v15236_v23, 0.0  ;;  %v8450_v54 = vmul.f32 1.442695, %v8379_v0 }
 0x7cb   :  { %10456 = vpow2.f32 %v8426_v53  ;;  %v10077_v30 = vadd.f32 -1.0, %v15640_v56  ;;  %v8659_v33 = vsel %vm8592_vm3, %v8574_v46, 0.0  ;;  %v8444_v52 = vmul.f32 1.442695, %v8376_v11 }
 0x7cc   :  { %v10453_v60 = vpop.eup %10452  ;;  %v15702_v51 = vpop.f32.mrf.mxu2  ;;  %v8371_v36 = vmin.f32 %v15699_v57, 0.0  ;;  %vm8333_vm13 = vcmp.gt.f32.partialorder %v15650_v13, 0.0  ;;  %v8210_v40 = vadd.f32 %v15602_v15, %v15341_v21  ;;  %v7238_v12 = vadd.f32 %v16143_v61, %v15227_v28 }
 0x7cd   :  { %v10075_v42 = vadd.f32 -1.0, %v10453_v60  ;;  %8660 = vadd.xlane.f32.xlu2 %v8659_v33  ;;  %v8380_v58 = vmin.f32 %v15695_v20, 0.0  ;;  %v8671_v47 = vsel %vm8592_vm3, %v8578_v10, 0.0  ;;  %10458 = vpow2.f32 %v8450_v54 }
 0x7ce   :  { %v7956_v25 = vpop.f32.mrf.mxu1  ;;  %v8434_v50 = vmul.f32 1.442695, %v8371_v36  ;;  %v7261_v8 = vadd.f32 %v16144_v4, %v7238_v12  ;;  %v10455_v21 = vpop.eup %10454  ;;  %v8535_v15 = vsel %vm8335_vm12, %v15236_v23, %v10077_v30  ;;  %vm8327_vm14 = vcmp.gt.f32.partialorder %v15673_v16, 0.0 }
 0x7cf   :  { %v8533_v56 = vsel %vm8333_vm13, %v15650_v13, %v10075_v42  ;;  %v8452_v26 = vmul.f32 1.442695, %v8380_v58  ;;  %v8579_v62 = vmul.f32 %v15398_v38, %v8535_v15  ;;  %v10080_v59 = vadd.f32 -1.0, %v10455_v21 }
 0x7d0   :  { %v8232_v5 = vpop.f32.mrf.mxu0  ;;  %v8577_v6 = vmul.f32 %v15398_v38, %v8533_v56  ;;  %10460 = vpow2.f32 %v8434_v50  ;;  %v7284_v3 = vadd.f32 %v16145_v22, %v7261_v8  ;;  %v8213_v55 = vadd.f32 %v15638_v1, %v15227_v28 }
 0x7d1   :  { %v15716_v32 = vadd.f32 %v8232_v5, %v8210_v40  ;;  %8672 = vadd.xlane.f32.xlu1 %v8671_v47  ;;  %v10457_v43 = vpop.eup %10456  ;;  %10462 = vpow2.f32 %v8444_v52  ;;  %v8377_v44 = vmin.f32 %v15307_v27, 0.0  ;;  %v7934_v19 = vadd.f32 %v15522_v37, %v15384_v41 }
 0x7d2   :  { %v8668_v13 = vsel %vm8592_vm3, %v8577_v6, 0.0  ;;  %v10069_v17 = vadd.f32 -1.0, %v10457_v43  ;;  %v7307_v63 = vadd.f32 %v16146_v35, %v7284_v3  ;;  %vm8338_vm15 = vcmp.gt.f32.partialorder %v15622_v18, 0.0 }
 0x7d3   :  { %8669 = vadd.xlane.f32.xlu0 %v8668_v13  ;;  %v10459_v23 = vpop.eup %10458  ;;  %10464 = vpow2.f32 %v8452_v26  ;;  %v8674_v28 = vsel %vm8592_vm3, %v8579_v62, 0.0  ;;  %v7957_v24 = vadd.f32 %v7956_v25, %v7934_v19  ;;  %vm8331_vm1 = vcmp.gt.f32.partialorder %v15699_v57, 0.0 }
 0x7d4   :  { %v7981_v49 = vpop.f32.mrf.mxu2  ;;  %v8527_v34 = vsel %vm8327_vm14, %v15673_v16, %v10069_v17  ;;  %v7330_v29 = vadd.f32 %v16147_v45, %v7307_v63  ;;  %v8538_v60 = vsel %vm8338_vm15, %v15622_v18, %v10080_v59  ;;  %v10081_v37 = vadd.f32 -1.0, %v10459_v23 }
 0x7d5   :  { %v8571_v7 = vmul.f32 %v15398_v38, %v8527_v34  ;;  %v8446_v36 = vmul.f32 1.442695, %v8377_v44  ;;  %v8582_v52 = vmul.f32 %v15398_v38, %v8538_v60  ;;  %vm8339_vm0 = vcmp.gt.f32.partialorder %v15666_v48, 0.0 }
 0x7d6   :  { %v7958_v0 = vpop.f32.mrf.mxu1  ;;  %v10461_v46 = vpop.eup %10460  ;;  %v8372_v41 = vmin.f32 %v7330_v29, 0.0  ;;  %v7980_v25 = vadd.f32 %v15702_v51, %v7957_v24  ;;  %v8539_v18 = vsel %vm8339_vm0, %v15666_v48, %v10081_v37  ;;  %vm8336_vm2 = vcmp.gt.f32.partialorder %v15387_v31, 0.0 }
 0x7d7   :  { %v8650_v16 = vsel %vm8592_vm3, %v8571_v7, 0.0  ;;  %v10073_v53 = vadd.f32 -1.0, %v10461_v46  ;;  %v10463_v1 = vpop.eup %10462  ;;  %v8583_v56 = vmul.f32 %v15398_v38, %v8539_v18  ;;  %vm8340_vm4 = vcmp.gt.f32.partialorder %v15695_v20, 0.0 }
 0x7d8   :  { %v8235_v11 = vpop.f32.mrf.mxu0  ;;  %8651 = vadd.xlane.f32.xlu2 %v8650_v16  ;;  %v8436_v33 = vmul.f32 1.442695, %v8372_v41  ;;  %v10078_v42 = vadd.f32 -1.0, %v10463_v1  ;;  %v8382_v58 = vmin.f32 %v7980_v25, 0.0  ;;  %vm8332_vm5 = vcmp.gt.f32.partialorder %v7330_v29, 0.0 }
 0x7d9   :  { %v15737_v10 = vadd.f32 %v8235_v11, %v8213_v55  ;;  %8675 = vadd.xlane.f32.xlu1 %v8674_v28  ;;  %v8531_v54 = vsel %vm8331_vm1, %v15699_v57, %v10073_v53  ;;  %v10465_v40 = vpop.eup %10464  ;;  %v8683_v57 = vsel %vm8592_vm3, %v8582_v52, 0.0  ;;  %v8686_v8 = vsel %vm8592_vm3, %v8583_v56, 0.0 }
 0x7da   :  { %v8575_v30 = vmul.f32 %v15398_v38, %v8531_v54  ;;  %10466 = vpow2.f32 %v8436_v33  ;;  %v8536_v5 = vsel %vm8336_vm2, %v15387_v31, %v10078_v42  ;;  %v10082_v47 = vadd.f32 -1.0, %v10465_v40 }
 0x7db   :  { %10468 = vpow2.f32 %v8446_v36  ;;  %v8580_v4 = vmul.f32 %v15398_v38, %v8536_v5  ;;  %v8456_v48 = vmul.f32 1.442695, %v8382_v58  ;;  %vm8337_vm6 = vcmp.gt.f32.partialorder %v15307_v27, 0.0 }
 0x7dc   :  { %v8662_v61 = vsel %vm8592_vm3, %v8575_v30, 0.0  ;;  %v8540_v15 = vsel %vm8340_vm4, %v15695_v20, %v10082_v47  ;;  %vm8342_vm7 = vcmp.gt.f32.partialorder %v7980_v25, 0.0  ;;  %v8762_v46 = vlaneseq }
 0x7dd   :  { %8663 = vadd.xlane.f32.xlu0 %v8662_v61  ;;  %v8677_v31 = vsel %vm8592_vm3, %v8580_v4, 0.0  ;;  %10470 = vpow2.f32 %v8456_v48  ;;  %v8584_v3 = vmul.f32 %v15398_v38, %v8540_v15  ;;  %v8381_v44 = vmin.f32 %v15689_v2, 0.0 }
 0x7de   :  { %v15772_v53 = vand.u32 127, %v8762_v46  ;;  %vm8767_vm8 = vcmask 130112   ;;  %vm8771_vm9 = vcmask 195712   ;;  %vm8341_vm12 = vcmp.gt.f32.partialorder %v15689_v2, 0.0 }
 0x7df   :  { %v8689_v62 = vsel %vm8592_vm3, %v8584_v3, 0.0  ;;  %v8454_v28 = vmul.f32 1.442695, %v8381_v44  ;;  %vm8775_vm14 = vcmask 261312   ;;  %vm8779_vm0 = vcmask 326912  }
 0x7e0   :  { %v8237_v12 = vpop.f32.mrf.mxu0  ;;  %8684 = vadd.xlane.f32.xlu2 %v8683_v57  ;;  %v10467_v51 = vpop.eup %10466  ;;  %v15776_v30 = vadd.s32 4294967288, %v15772_v53  ;;  %vm8844_vm2 = vcmask 1041409  }
 0x7e1   :  { %v10074_v6 = vadd.f32 -1.0, %v10467_v51  ;;  %v10469_v43 = vpop.eup %10468  ;;  %10472 = vpow2.f32 %v8454_v28 }
 0x7e2   :  { %v10079_v26 = vadd.f32 -1.0, %v10469_v43 }
 0x7e3   :  { %v8248_v50 = vpop.f32.mrf.mxu1  ;;  %v8532_v21 = vsel %vm8332_vm5, %v7330_v29, %v10074_v6  ;;  %v10471_v35 = vpop.eup %10470  ;;  %vm8846_vm5 = vcmask 1042434  }
 0x7e4   :  { %v8576_v13 = vmul.f32 %v15398_v38, %v8532_v21  ;;  %v8537_v20 = vsel %vm8337_vm6, %v15307_v27, %v10079_v26  ;;  %v10084_v49 = vadd.f32 -1.0, %v10471_v35  ;;  %v8249_v45 = vadd.f32 %v8248_v50, %v15607_v39 }
 0x7e5   :  { %8687 = vadd.xlane.f32.xlu0 %v8686_v8  ;;  %v8581_v63 = vmul.f32 %v15398_v38, %v8537_v20  ;;  %vm8852_vm6 = vcmask 1045509  }
 0x7e6   :  { %v8665_v22 = vsel %vm8592_vm3, %v8576_v13, 0.0  ;;  %v8542_v23 = vsel %vm8342_vm7, %v7980_v25, %v10084_v49  ;;  %v15781_v25 = vadd.s32 4294967280, %v15772_v53  ;;  %vm8854_vm7 = vcmask 1046534  }
 0x7e7   :  { %8666 = vadd.xlane.f32.xlu1 %v8665_v22  ;;  %v8680_v34 = vsel %vm8592_vm3, %v8581_v63, 0.0  ;;  %v8586_v7 = vmul.f32 %v15398_v38, %v8542_v23  ;;  %v10473_v58 = vpop.eup %10472 }
 0x7e8   :  { %8678 = vadd.xlane.f32.xlu2 %v8677_v31  ;;  %v10083_v15 = vadd.f32 -1.0, %v10473_v58 }
 0x7e9   :  { %v8695_v0 = vsel %vm8592_vm3, %v8586_v7, 0.0 }
 0x7ea   :  { %v8541_v23 = vsel %vm8341_vm12, %v15689_v2, %v10083_v15  ;;  %vm8858_vm12 = vcmask 326656  }
 0x7eb   :  { %v8250_v17 = vpop.f32.mrf.mxu1  ;;  %v8585_v46 = vmul.f32 %v15398_v38, %v8541_v23 }
 0x7ec   :  { %v8251_v1 = vadd.f32 %v8250_v17, %v15646_v9 }
 0x7ed   :  { %8690 = vadd.xlane.f32.xlu0 %v8689_v62 }
 0x7f3   :  { %v8253_v59 = vpop.f32.mrf.mxu1 }
 0x7f4   :  { %v8254_v61 = vadd.f32 %v8253_v59, %v15685_v14 }
 0x7f5   :  { %8681 = vadd.xlane.f32.xlu0 %v8680_v34 }
 0x7fb   :  { %v8255_v55 = vpop.f32.mrf.mxu1 }
 0x7fc   :  { %v8256_v17 = vadd.f32 %v8255_v55, %v15716_v32  ;;  %v15800_v32 = vadd.s32 4294967272, %v15772_v53 }
 0x7fd   :  { %8696 = vadd.xlane.f32.xlu0 %v8695_v0 }
 0x800   :  { %v8271_v29 = vpop.f32.mrf.mxu2 }
 0x801   :  { %v8272_v27 = vadd.f32 %v8271_v29, %v8249_v45 }
 0x802   :  { %v8294_v11 = vpop.f32.mrf.mxu3 }
 0x803   :  { %v15770_v19 = vpop.f32.mrf.mxu1  ;;  %v8295_v16 = vadd.f32 %v8294_v11, %v8272_v27 }
 0x805   :  { %v8383_v24 = vmin.f32 %v8295_v16, 0.0  ;;  %vm8343_vm10 = vcmp.gt.f32.partialorder %v8295_v16, 0.0 }
 0x807   :  { %v8458_v54 = vmul.f32 1.442695, %v8383_v24 }
 0x808   :  { %v8610_v60 = vpop.xlane.xlu2 %8609  ;;  %v8273_v37 = vpop.f32.mrf.mxu2 }
 0x809   :  { %v8595_v41 = vpop.xlane.xlu0 %8594  ;;  %v8274_v39 = vadd.f32 %v8273_v37, %v8251_v1  ;;  %10474 = vpow2.f32 %v8458_v54  ;;  %v8781_v56 = vperm.slane %v8610_v60, %v15772_v53  ;;  %v10484_v1 = vld [vmem:[%s15904_s3] ss:$0 sm:$0xff]  ;;  %v8259_v60 = vadd.f32 %v15770_v19, %v15737_v10 }
 0x80a   :  { %v8296_v36 = vpop.f32.mrf.mxu3  ;;  %v8764_v52 = vperm.slane %v8595_v41, %v15772_v53  ;;  %v8692_v54 = vsel %vm8592_vm3, %v8585_v46, 0.0 }
 0x80b   :  { %v8260_v33 = vpop.f32.mrf.mxu1  ;;  %v8598_v42 = vpop.xlane.xlu1 %8597  ;;  %v8297_v9 = vadd.f32 %v8296_v36, %v8274_v39 }
 0x80c   :  { %v8766_v40 = vperm.slane %v8598_v42, %v15776_v30 }
 0x80d   :  { %v8384_v12 = vmin.f32 %v8297_v9, 0.0  ;;  %vm8344_vm13 = vcmp.gt.f32.partialorder %v8297_v9, 0.0 }
 0x80e   :  { %v8768_v18 = vsel %vm8767_vm8, %v8766_v40, %v8764_v52 }
 0x80f   :  { %v10475_v50 = vpop.eup %10474  ;;  %v8460_v6 = vmul.f32 1.442695, %v8384_v12 }
 0x810   :  { %v8613_v57 = vpop.xlane.xlu2 %8612  ;;  %v8276_v51 = vpop.f32.mrf.mxu2  ;;  %v10085_v8 = vadd.f32 -1.0, %v10475_v50 }
 0x811   :  { %v8782_v5 = vperm.slane %v8613_v57, %v15776_v30  ;;  %v8601_v47 = vpop.xlane.xlu0 %8600  ;;  %v8277_v48 = vadd.f32 %v8276_v51, %v8254_v61  ;;  %10476 = vpow2.f32 %v8460_v6  ;;  %v15818_v51 = vadd.s32 4294967264, %v15772_v53 }
 0x812   :  { %v8770_v4 = vperm.slane %v8601_v47, %v15781_v25  ;;  %v8299_v13 = vpop.f32.mrf.mxu3  ;;  %v8543_v31 = vsel %vm8343_vm10, %v8295_v16, %v10085_v8  ;;  %vm8856_vm10 = vcmask 1047559  }
 0x813   :  { %v8783_v14 = vsel %vm8767_vm8, %v8782_v5, %v8781_v56  ;;  %v8616_v43 = vpop.xlane.xlu1 %8615  ;;  %v8300_v3 = vadd.f32 %v8299_v13, %v8277_v48  ;;  %v8587_v26 = vmul.f32 %v15398_v38, %v8543_v31 }
 0x814   :  { %v8772_v21 = vsel %vm8771_vm9, %v8770_v4, %v8768_v18  ;;  %v8784_v22 = vperm.slane %v8616_v43, %v15781_v25 }
 0x815   :  { %v8385_v20 = vmin.f32 %v8300_v3, 0.0  ;;  %v8698_v63 = vsel %vm8592_vm3, %v8587_v26, 0.0  ;;  %vm8345_vm15 = vcmp.gt.f32.partialorder %v8300_v3, 0.0 }
 0x816   :  { %v8785_v62 = vsel %vm8771_vm9, %v8784_v22, %v8783_v14  ;;  %8699 = vadd.xlane.f32.xlu1 %v8698_v63 }
 0x817   :  { %v10477_v7 = vpop.eup %10476  ;;  %v8462_v0 = vmul.f32 1.442695, %v8385_v20 }
 0x818   :  { %v8625_v35 = vpop.xlane.xlu2 %8624  ;;  %v8278_v34 = vpop.f32.mrf.mxu2  ;;  %v10086_v55 = vadd.f32 -1.0, %v10477_v7 }
 0x819   :  { %v8790_v49 = vperm.slane %v8625_v35, %v15772_v53  ;;  %v8628_v59 = vpop.xlane.xlu0 %8627  ;;  %v8279_v29 = vadd.f32 %v8278_v34, %v8256_v17  ;;  %10478 = vpow2.f32 %v8462_v0 }
 0x81a   :  { %v8791_v45 = vperm.slane %v8628_v59, %v15776_v30  ;;  %v8301_v11 = vpop.f32.mrf.mxu3  ;;  %v8544_v16 = vsel %vm8344_vm13, %v8297_v9, %v10086_v55 }
 0x81b   :  { %v8604_v44 = vpop.xlane.xlu1 %8603  ;;  %v8302_v28 = vadd.f32 %v8301_v11, %v8279_v29  ;;  %v8588_v24 = vmul.f32 %v10484_v1, %v8544_v16 }
 0x81c   :  { %v8792_v27 = vsel %vm8767_vm8, %v8791_v45, %v8790_v49  ;;  %v8774_v2 = vperm.slane %v8604_v44, %v15800_v32 }
 0x81d   :  { %v8386_v37 = vmin.f32 %v8302_v28, 0.0  ;;  %v8701_v38 = vsel %vm8592_vm3, %v8588_v24, 0.0  ;;  %vm8346_vm1 = vcmp.gt.f32.partialorder %v8302_v28, 0.0 }
 0x81e   :  { %v8776_v41 = vsel %vm8775_vm14, %v8774_v2, %v8772_v21  ;;  %8702 = vadd.xlane.f32.xlu2 %v8701_v38  ;;  %8693 = vadd.xlane.f32.xlu1 %v8692_v54 }
 0x81f   :  { %v10479_v42 = vpop.eup %10478  ;;  %v8464_v36 = vmul.f32 1.442695, %v8386_v37 }
 0x820   :  { %v8281_v33 = vpop.f32.mrf.mxu2  ;;  %v8619_v52 = vpop.xlane.xlu2 %8618  ;;  %v10087_v61 = vadd.f32 -1.0, %v10479_v42 }
 0x821   :  { %v8631_v39 = vpop.xlane.xlu0 %8630  ;;  %v8282_v9 = vadd.f32 %v8281_v33, %v8259_v60  ;;  %v8786_v10 = vperm.slane %v8619_v52, %v15800_v32  ;;  %10480 = vpow2.f32 %v8464_v36  ;;  %v8717_v36 = vld [vmem:[%s15905_s4 + $0x20] sm:$0xff] }
 0x822   :  { %v8793_v40 = vperm.slane %v8631_v39, %v15781_v25  ;;  %v8304_v57 = vpop.f32.mrf.mxu3  ;;  %v8545_v58 = vsel %vm8345_vm15, %v8300_v3, %v10087_v61  ;;  %8872 = vmatpush.msra.mxu0 %v8717_v36  ;;  %v8716_v61 = vld [vmem:[%s15905_s4 + $0x18] sm:$0xff]  ;;  %v10403_v36 = vld [vmem:[%s15906_s5] ss:$0 sm:$0xff] }
 0x823   :  { %v8787_v18 = vsel %vm8775_vm14, %v8786_v10, %v8785_v62  ;;  %v8640_v12 = vpop.xlane.xlu1 %8639  ;;  %v8305_v56 = vadd.f32 %v8304_v57, %v8282_v9  ;;  %v8589_v5 = vmul.f32 %v10484_v1, %v8545_v58  ;;  %v8714_v58 = vld [vmem:[%s15905_s4 + $0x8] sm:$0xff] }
 0x824   :  { %v8794_v19 = vsel %vm8771_vm9, %v8793_v40, %v8792_v27  ;;  %v8799_v15 = vperm.slane %v8640_v12, %v15772_v53  ;;  %8873 = vmatpush.msra.mxu0 %v8716_v61 }
 0x825   :  { %v8387_v47 = vmin.f32 %v8305_v56, 0.0  ;;  %v8704_v50 = vsel %vm8592_vm3, %v8589_v5, 0.0  ;;  %vm8347_vm4 = vcmp.gt.f32.partialorder %v8305_v56, 0.0 }
 0x826   :  { %8705 = vadd.xlane.f32.xlu2 %v8704_v50 }
 0x827   :  { %v10481_v48 = vpop.eup %10480  ;;  %v8466_v8 = vmul.f32 1.442695, %v8387_v47 }
 0x828   :  { %v8283_v4 = vpop.f32.mrf.mxu2  ;;  %v8643_v14 = vpop.xlane.xlu2 %8642  ;;  %v10088_v21 = vadd.f32 -1.0, %v10481_v48 }
 0x829   :  { %v8607_v6 = vpop.xlane.xlu0 %8606  ;;  %v8800_v43 = vperm.slane %v8643_v14, %v15776_v30  ;;  %10482 = vpow2.f32 %v8466_v8 }
 0x82a   :  { %v8778_v13 = vperm.slane %v8607_v6, %v15818_v51  ;;  %v8546_v3 = vsel %vm8346_vm1, %v8302_v28, %v10088_v21  ;;  %v8306_v26 = vpop.f32.mrf.mxu3 }
 0x82b   :  { %v8801_v31 = vsel %vm8767_vm8, %v8800_v43, %v8799_v15  ;;  %v8622_v22 = vpop.xlane.xlu1 %8621  ;;  %v8590_v62 = vmul.f32 %v10484_v1, %v8546_v3 }
 0x82c   :  { %v8788_v17 = vperm.slane %v8622_v22, %v15818_v51  ;;  %v8780_v20 = vsel %vm8779_vm0, %v8778_v13, %v8776_v41 }
 0x82d   :  { %v8707_v63 = vsel %vm8592_vm3, %v8590_v62, 0.0 }
 0x82e   :  { %v8789_v35 = vsel %vm8779_vm0, %v8788_v17, %v8787_v18  ;;  %8708 = vadd.xlane.f32.xlu1 %v8707_v63 }
 0x82f   :  { %v8845_v49 = vsel %vm8844_vm2, %v8789_v35, %v8780_v20  ;;  %v10483_v34 = vpop.eup %10482 }
 0x830   :  { %v8634_v23 = vpop.xlane.xlu2 %8633  ;;  %v10089_v7 = vadd.f32 -1.0, %v10483_v34 }
 0x831   :  { %v8646_v59 = vpop.xlane.xlu0 %8645  ;;  %v8795_v29 = vperm.slane %v8634_v23, %v15800_v32 }
 0x832   :  { %v8547_v0 = vsel %vm8347_vm4, %v8305_v56, %v10089_v7  ;;  %v8713_v56 = vld [vmem:[%s15905_s4] sm:$0xff] }
 0x833   :  { %v8591_v45 = vmul.f32 %v10484_v1, %v8547_v0  ;;  %v8796_v11 = vsel %vm8775_vm14, %v8795_v29, %v8794_v19  ;;  %v8802_v1 = vperm.slane %v8646_v59, %v15781_v25  ;;  %v8715_v19 = vld [vmem:[%s15905_s4 + $0x10] sm:$0xff] }
 0x834   :  { %v8655_v28 = vpop.xlane.xlu1 %8654  ;;  %8874 = vmatpush.msra.mxu0 %v8715_v19 }
 0x835   :  { %v8710_v55 = vsel %vm8592_vm3, %v8591_v45, 0.0  ;;  %v8803_v38 = vsel %vm8771_vm9, %v8802_v1, %v8801_v31  ;;  %vm8848_vm3 = vcmask 1043459   ;;  %v8808_v43 = vperm.slane %v8655_v28, %v15772_v53 }
 0x836   :  { %8711 = vadd.xlane.f32.xlu2 %v8710_v55  ;;  %8875 = vmatpush.msra.mxu0 %v8714_v58 }
 0x838   :  { %v8658_v46 = vpop.xlane.xlu2 %8657  ;;  %8876 = vmatpush.msra.mxu0 %v8713_v56 }
 0x839   :  { %v8637_v27 = vpop.xlane.xlu0 %8636  ;;  %v8809_v8 = vperm.slane %v8658_v46, %v15776_v30 }
 0x83a   :  { %v8797_v44 = vperm.slane %v8637_v27, %v15818_v51 }
 0x83b   :  { %v8810_v63 = vsel %vm8767_vm8, %v8809_v8, %v8808_v43 }
 0x83c   :  { %v8798_v16 = vsel %vm8779_vm0, %v8797_v44, %v8796_v11  ;;  %v8649_v60 = vpop.xlane.xlu1 %8648 }
 0x83d   :  { %v8847_v2 = vsel %vm8846_vm5, %v8798_v16, %v8845_v49  ;;  %v8804_v41 = vperm.slane %v8649_v60, %v15800_v32 }
 0x83f   :  { %v8805_v39 = vsel %vm8775_vm14, %v8804_v41, %v8803_v38 }
 0x840   :  { %v8661_v24 = vpop.xlane.xlu2 %8660 }
 0x841   :  { %v8811_v13 = vperm.slane %v8661_v24, %v15781_v25 }
 0x843   :  { %v8812_v0 = vsel %vm8771_vm9, %v8811_v13, %v8810_v63 }
 0x844   :  { %v8673_v40 = vpop.xlane.xlu1 %8672 }
 0x845   :  { %v8818_v14 = vperm.slane %v8673_v40, %v15776_v30 }
 0x846   :  { %v8670_v52 = vpop.xlane.xlu0 %8669 }
 0x847   :  { %v8817_v26 = vperm.slane %v8670_v52, %v15772_v53 }
 0x849   :  { %v8819_v49 = vsel %vm8767_vm8, %v8818_v14, %v8817_v26 }
 0x84b   :  { %v8652_v37 = vpop.xlane.xlu2 %8651 }
 0x84c   :  { %v8806_v54 = vperm.slane %v8652_v37, %v15818_v51  ;;  %v8676_v10 = vpop.xlane.xlu1 %8675 }
 0x84d   :  { %v8820_v31 = vperm.slane %v8676_v10, %v15781_v25 }
 0x84e   :  { %v8807_v33 = vsel %vm8779_vm0, %v8806_v54, %v8805_v39 }
 0x84f   :  { %v15840_v42 = vsel %vm8848_vm3, %v8807_v33, %v8847_v2  ;;  %v8821_v45 = vsel %vm8771_vm9, %v8820_v31, %v8819_v49 }
 0x850   :  { %v8664_v9 = vpop.xlane.xlu0 %8663 }
 0x851   :  { %v8813_v17 = vperm.slane %v8664_v9, %v15800_v32 }
 0x853   :  { %v8685_v18 = vpop.xlane.xlu2 %8684  ;;  %v8814_v27 = vsel %vm8775_vm14, %v8813_v17, %v8812_v0 }
 0x854   :  { %v8826_v21 = vperm.slane %v8685_v18, %v15772_v53 }
 0x858   :  { %v8688_v12 = vpop.xlane.xlu0 %8687 }
 0x859   :  { %v8827_v15 = vperm.slane %v8688_v12, %v15776_v30 }
 0x85a   :  { %v8667_v57 = vpop.xlane.xlu1 %8666 }
 0x85b   :  { %v8679_v5 = vpop.xlane.xlu2 %8678  ;;  %v8815_v35 = vperm.slane %v8667_v57, %v15818_v51  ;;  %v8828_v59 = vsel %vm8767_vm8, %v8827_v15, %v8826_v21 }
 0x85c   :  { %v8822_v62 = vperm.slane %v8679_v5, %v15800_v32 }
 0x85d   :  { %v8816_v16 = vsel %vm8779_vm0, %v8815_v35, %v8814_v27 }
 0x85e   :  { %v8823_v46 = vsel %vm8775_vm14, %v8822_v62, %v8821_v45 }
 0x860   :  { %v8691_v47 = vpop.xlane.xlu0 %8690 }
 0x861   :  { %v8829_v22 = vperm.slane %v8691_v47, %v15781_v25 }
 0x863   :  { %v8830_v29 = vsel %vm8771_vm9, %v8829_v22, %v8828_v59 }
 0x868   :  { %v8682_v4 = vpop.xlane.xlu0 %8681 }
 0x869   :  { %v8824_v34 = vperm.slane %v8682_v4, %v15818_v51 }
 0x86b   :  { %v8825_v60 = vsel %vm8779_vm0, %v8824_v34, %v8823_v46 }
 0x870   :  { %v8697_v23 = vpop.xlane.xlu0 %8696 }
 0x871   :  { %v8833_v2 = vperm.slane %v8697_v23, %v15818_v51 }
 0x889   :  { %v8700_v50 = vpop.xlane.xlu1 %8699 }
 0x88a   :  { %v8835_v28 = vperm.slane %v8700_v50, %v15772_v53 }
 0x891   :  { %v8703_v6 = vpop.xlane.xlu2 %8702  ;;  %v8694_v48 = vpop.xlane.xlu1 %8693 }
 0x892   :  { %v8831_v20 = vperm.slane %v8694_v48, %v15800_v32  ;;  %v8836_v55 = vperm.slane %v8703_v6, %v15776_v30 }
 0x894   :  { %v8832_v44 = vsel %vm8775_vm14, %v8831_v20, %v8830_v29  ;;  %v8837_v30 = vsel %vm8767_vm8, %v8836_v55, %v8835_v28 }
 0x895   :  { %v8834_v1 = vsel %vm8779_vm0, %v8833_v2, %v8832_v44 }
 0x899   :  { %v8706_v3 = vpop.xlane.xlu2 %8705 }
 0x89a   :  { %v8838_v11 = vperm.slane %v8706_v3, %v15781_v25  ;;  %v8851_v25 = vsel %vm614_vm11, %v8816_v16, %v15840_v42 }
 0x89b   :  { %v8853_v53 = vsel %vm8852_vm6, %v8825_v60, %v8851_v25 }
 0x89c   :  { %v8839_v37 = vsel %vm8771_vm9, %v8838_v11, %v8837_v30  ;;  %v8855_v39 = vsel %vm8854_vm7, %v8834_v1, %v8853_v53 }
 0x8a1   :  { %v8709_v7 = vpop.xlane.xlu1 %8708 }
 0x8a2   :  { %v8840_v24 = vperm.slane %v8709_v7, %v15800_v32 }
 0x8a4   :  { %v8841_v32 = vsel %vm8775_vm14, %v8840_v24, %v8839_v37 }
 0x8a9   :  { %v8712_v41 = vpop.xlane.xlu2 %8711 }
 0x8aa   :  { %v8842_v38 = vperm.slane %v8712_v41, %v15818_v51 }
 0x8ac   :  { %v8843_v54 = vsel %vm8779_vm0, %v8842_v38, %v8841_v32 }
 0x8ad   :  { %v8857_v33 = vsel %vm8856_vm10, %v8843_v54, %v8855_v39 }
 0x8ae   :  { %10090 = vmatmul.msk.f32.vlgmr.msra.gmra.mxu0 %vm8858_vm12, %v8857_v33 }
 0x92b   :  { %v8878_v51 = vpop.f32.mrf.mxu0 }
 0x92c   :  { %v8879_v42 = vadd.f32 %v10403_v36, %v8878_v51 }
 0x92e   :  { %8881 = vst.msk [vmem:[#allocation3] sm:$0xff] %vm8858_vm12, %v8879_v42 }
 0x92f   :  { %8892 = dma.vmem_to_hbm [thread:$0]  %s8888_s10, 128, %s8890_s11, [#allocation4]  }
 0x930   :  { %10509 = dma.done.wait [#allocation4], 128  }
 0x931   :  { %10510 = vsyncadd [#allocation4], 4294967168 }
 0x932   :  { %8897 = vsyncpa [#allocation4], 1 }

</bundles_post_ra>
